<compile_context>
chip_gen: v6e
topology: v6e:2x2x1
jax: 0.10.0
libtpu: 0.0.40
codegen_flags: <defaults>
</compile_context>

<pallas_src>
import functools
import math

import jax
import jax.numpy as jnp
from jax.experimental import pallas as pl
from jax.experimental.pallas import tpu as pltpu

LAYER_NORM_EPS = 1e-12
NEG_MASK = -10000.0
OUT_LANES = 128                  # lane-dense padded width for the scalar score
MATMUL_DTYPE = jnp.bfloat16      # MXU operand dtype (accumulation stays f32)

CONFIG = dict(
    vocab_size=64,
    hidden_size=128,
    num_layers=2,
    num_heads=4,
    intermediate_size=256,
    max_position=32,
    type_vocab=2,
)


# ---------------------------------------------------------------------------
# In-kernel helpers (f32 VPU/EUP math, bf16 MXU operands)
# ---------------------------------------------------------------------------
def _gelu(x):
    # TODO(synk): HF FinBERT uses exact erf GELU; the tanh approximation is
    # used because it lowers cleanly onto the TPU VPU/EUP.
    return 0.5 * x * (1.0 + jnp.tanh(0.7978845608028654 * (x + 0.044715 * x * x * x)))


def _layernorm(x, g, b):
    mean = jnp.mean(x, axis=-1, keepdims=True)
    var = jnp.mean(jnp.square(x - mean), axis=-1, keepdims=True)
    return (x - mean) * jax.lax.rsqrt(var + LAYER_NORM_EPS) * g + b


def _mm(x, w):
    # bf16 operands, f32 accumulation on the MXU.
    return jax.lax.dot_general(
        x.astype(w.dtype), w,
        dimension_numbers=(((1,), (0,)), ((), ())),
        preferred_element_type=jnp.float32)


# ---------------------------------------------------------------------------
# Fused whole-forward kernel: one grid step per BB-sequence batch block
# ---------------------------------------------------------------------------
def _finbert_kernel(ids_ref, mask_ref, word_emb_ref, pos_emb_ref, type_emb_ref,
                    emb_g_ref, emb_b_ref,
                    wqkv_ref, bqkv_ref, wo_ref, bo_ref,
                    ln1_g_ref, ln1_b_ref, w1_ref, b1_ref,
                    w2_ref, b2_ref, ln2_g_ref, ln2_b_ref,
                    pool_w_ref, pool_b_ref, reg_w_ref, reg_b_ref,
                    out_ref, *, num_layers, num_heads, head_dim,
                    batch_block, seq_len):
    BB, S = batch_block, seq_len
    M = BB * S
    V, H = word_emb_ref.shape

    # ---- embeddings fully in-kernel: one-hot MXU gather + pos/type add + LN ----
    ids = ids_ref[...].reshape(M, 1)                                        # [M, 1] i32
    onehot = (ids == jax.lax.broadcasted_iota(jnp.int32, (M, V), 1)
              ).astype(jnp.float32)                                         # [M, V]
    we = jax.lax.dot_general(onehot, word_emb_ref[...],
                             (((1,), (0,)), ((), ())),
                             preferred_element_type=jnp.float32)            # [M, H]
    x3 = (we.reshape(BB, S, H)
          + pos_emb_ref[...][None, :, :]
          + type_emb_ref[...][None, :, :])                                  # [BB, S, H]
    x = _layernorm(x3.reshape(M, H), emb_g_ref[...], emb_b_ref[...])        # [M, H]

    # Additive attention-mask bias (HF convention), shared by all layers/heads.
    bias = (1.0 - mask_ref[...]) * NEG_MASK                                 # [BB, 1, S]

    for l in range(num_layers):
        # --- self-attention: fused QKV projection with M = BB*S rows ---
        qkv = _mm(x, wqkv_ref[l]) + bqkv_ref[l]                             # [M, 3H]
        q3 = qkv[:, 0:H].reshape(BB, S, H)
        k3 = qkv[:, H:2 * H].reshape(BB, S, H)
        v3 = qkv[:, 2 * H:3 * H].reshape(BB, S, H)
        ctx_heads = []
        for h in range(num_heads):
            sl = slice(h * head_dim, (h + 1) * head_dim)
            qh = q3[:, :, sl].astype(MATMUL_DTYPE)
            kh = k3[:, :, sl].astype(MATMUL_DTYPE)
            vh = v3[:, :, sl].astype(MATMUL_DTYPE)
            # 1/sqrt(head_dim) is folded into the Q weights at pack time.
            s = jnp.einsum('bqd,bkd->bqk', qh, kh,
                           preferred_element_type=jnp.float32)              # [BB, S, S]
            s = s + bias
            s = s - jnp.max(s, axis=-1, keepdims=True)
            p = jnp.exp(s)
            p = p * pl.reciprocal(jnp.sum(p, axis=-1, keepdims=True), approx=True)
            ctx_heads.append(
                jnp.einsum('bqk,bkd->bqd', p.astype(MATMUL_DTYPE), vh,
                           preferred_element_type=jnp.float32))             # [BB, S, d]
        ctx = jnp.concatenate(ctx_heads, axis=-1).reshape(M, H)             # [M, H]
        attn_out = _mm(ctx, wo_ref[l]) + bo_ref[l]
        x = _layernorm(x + attn_out, ln1_g_ref[l], ln1_b_ref[l])            # residual + LN
        # --- feed-forward ---
        hmid = _gelu(_mm(x, w1_ref[l]) + b1_ref[l])                         # [M, I]
        ffn_out = _mm(hmid, w2_ref[l]) + b2_ref[l]
        x = _layernorm(x + ffn_out, ln2_g_ref[l], ln2_b_ref[l])             # residual + LN

    # Pooler (tanh on CLS) + regressor, batched over the BB sequences.
    cls = x.reshape(BB, S, H)[:, 0, :]                                      # [BB, H]
    pooled = jnp.tanh(_mm(cls, pool_w_ref[...]) + pool_b_ref[...])          # [BB, H]
    score = jnp.sum(pooled * reg_w_ref[...], axis=-1, keepdims=True)        # [BB, 1]
    score = score + reg_b_ref[...]
    # Lane-dense store of the scalar scores (wrapper slices lane 0).
    out_ref[...] = jnp.broadcast_to(score.reshape(BB, 1, 1),
                                    out_ref.shape).astype(out_ref.dtype)


# ---------------------------------------------------------------------------
# Deterministic synthetic parameters (shapes follow a small BERT config)
# ---------------------------------------------------------------------------
def init_params(key, cfg):
    H = cfg["hidden_size"]
    I = cfg["intermediate_size"]

    def nrm(k, shape):
        return 0.02 * jax.random.normal(k, shape, jnp.float32)

    keys = iter(jax.random.split(key, 16 + 16 * cfg["num_layers"]))
    params = {
        "word_emb": nrm(next(keys), (cfg["vocab_size"], H)),
        "pos_emb": nrm(next(keys), (cfg["max_position"], H)),
        "type_emb": nrm(next(keys), (cfg["type_vocab"], H)),
        "emb_ln_g": jnp.ones((H,), jnp.float32),
        "emb_ln_b": jnp.zeros((H,), jnp.float32),
        "pool_w": nrm(next(keys), (H, H)),
        "pool_b": jnp.zeros((H,), jnp.float32),
        "reg_w": nrm(next(keys), (H, 1)),
        "reg_b": jnp.zeros((1,), jnp.float32),
        "layers": [],
    }
    for _ in range(cfg["num_layers"]):
        layer = {
            "wq": nrm(next(keys), (H, H)), "bq": jnp.zeros((H,), jnp.float32),
            "wk": nrm(next(keys), (H, H)), "bk": jnp.zeros((H,), jnp.float32),
            "wv": nrm(next(keys), (H, H)), "bv": jnp.zeros((H,), jnp.float32),
            "wo": nrm(next(keys), (H, H)), "bo": jnp.zeros((H,), jnp.float32),
            "ln1_g": jnp.ones((H,), jnp.float32), "ln1_b": jnp.zeros((H,), jnp.float32),
            "w1": nrm(next(keys), (H, I)), "b1": jnp.zeros((I,), jnp.float32),
            "w2": nrm(next(keys), (I, H)), "b2": jnp.zeros((H,), jnp.float32),
            "ln2_g": jnp.ones((H,), jnp.float32), "ln2_b": jnp.zeros((H,), jnp.float32),
        }
        params["layers"].append(layer)
    return params


def pack_params(params, cfg):
    """Stack per-layer weights into [L, ...] blocks, merge Q/K/V (with the
    attention scale folded into the Q columns), cast big weight matrices to
    bf16 for the MXU.  All done once, outside the forward."""
    H = cfg["hidden_size"]
    I = cfg["intermediate_size"]
    L = cfg["num_layers"]
    d = H // cfg["num_heads"]
    scale = 1.0 / math.sqrt(d)
    layers = params["layers"]
    wdt = MATMUL_DTYPE

    def stk(name):
        return jnp.stack([lyr[name] for lyr in layers], axis=0)

    wqkv = jnp.stack(
        [jnp.concatenate([l["wq"] * scale, l["wk"], l["wv"]], axis=1) for l in layers],
        axis=0).astype(wdt)                                                # [L, H, 3H]
    bqkv = jnp.stack(
        [jnp.concatenate([l["bq"] * scale, l["bk"], l["bv"]], axis=0) for l in layers],
        axis=0).reshape(L, 1, 3 * H)

    return dict(
        word_emb=params["word_emb"],                 # f32, VMEM-resident gather table
        pos_emb=params["pos_emb"],
        type_emb=params["type_emb"],
        emb_ln_g=params["emb_ln_g"].reshape(1, H),
        emb_ln_b=params["emb_ln_b"].reshape(1, H),
        wqkv=wqkv, bqkv=bqkv,
        wo=stk("wo").astype(wdt), bo=stk("bo").reshape(L, 1, H),
        ln1_g=stk("ln1_g").reshape(L, 1, H), ln1_b=stk("ln1_b").reshape(L, 1, H),
        w1=stk("w1").astype(wdt), b1=stk("b1").reshape(L, 1, I),
        w2=stk("w2").astype(wdt), b2=stk("b2").reshape(L, 1, H),
        ln2_g=stk("ln2_g").reshape(L, 1, H), ln2_b=stk("ln2_b").reshape(L, 1, H),
        pool_w=params["pool_w"].astype(wdt),
        pool_b=params["pool_b"].reshape(1, H),
        reg_w=params["reg_w"].reshape(1, H),          # row vector for VPU reduction
        reg_b=params["reg_b"].reshape(1, 1),
    )


# ---------------------------------------------------------------------------
# Forward pass: one fused, batch-blocked Pallas kernel
# ---------------------------------------------------------------------------
def finbert_regressor_forward(packed, input_ids, attention_mask, cfg, batch_block=None):
    B, S = input_ids.shape
    H = cfg["hidden_size"]
    I = cfg["intermediate_size"]
    L = cfg["num_layers"]
    nH = cfg["num_heads"]
    V = cfg["vocab_size"]
    d = H // nH

    if batch_block is None:
        # Prefer >=2 grid steps (keeps both v7x TensorCores busy) while giving
        # the matmuls M = BB*S rows.
        batch_block = B
        for bb in (16, 8, 4, 2):
            if B % bb == 0 and B // bb >= 2:
                batch_block = bb
                break
    BB = batch_block
    assert B % BB == 0, "batch must be divisible by the batch block"

    # TODO(synk): token_type_ids are hard-coded to type 0 (as in the test input).
    ids = input_ids.astype(jnp.int32).reshape(B, S, 1)
    mask = attention_mask.astype(jnp.float32).reshape(B, 1, S)
    pos_emb = packed["pos_emb"][:S]                   # [S, H]
    type_row = packed["type_emb"][0:1]                # [1, H]

    kernel = functools.partial(_finbert_kernel, num_layers=L, num_heads=nH,
                               head_dim=d, batch_block=BB, seq_len=S)

    batch3 = lambda b: (b, 0, 0)       # one batch block per grid step
    const2 = lambda b: (0, 0)          # weights: constant block -> DMA'd once
    const3 = lambda b: (0, 0, 0)

    in_specs = [
        pl.BlockSpec((BB, S, 1), batch3),           # input_ids
        pl.BlockSpec((BB, 1, S), batch3),           # attention mask row
        pl.BlockSpec((V, H), const2),               # word embedding table (f32)
        pl.BlockSpec((S, H), const2),               # position embeddings [0:S]
        pl.BlockSpec((1, H), const2),               # token-type-0 embedding row
        pl.BlockSpec((1, H), const2),               # emb LN gamma
        pl.BlockSpec((1, H), const2),               # emb LN beta
        pl.BlockSpec((L, H, 3 * H), const3),        # fused QKV weight (bf16, Q pre-scaled)
        pl.BlockSpec((L, 1, 3 * H), const3),        # fused QKV bias (Q pre-scaled)
        pl.BlockSpec((L, H, H), const3),            # attn output weight (bf16)
        pl.BlockSpec((L, 1, H), const3),            # attn output bias
        pl.BlockSpec((L, 1, H), const3),            # LN1 gamma
        pl.BlockSpec((L, 1, H), const3),            # LN1 beta
        pl.BlockSpec((L, H, I), const3),            # FFN w1 (bf16)
        pl.BlockSpec((L, 1, I), const3),            # FFN b1
        pl.BlockSpec((L, I, H), const3),            # FFN w2 (bf16)
        pl.BlockSpec((L, 1, H), const3),            # FFN b2
        pl.BlockSpec((L, 1, H), const3),            # LN2 gamma
        pl.BlockSpec((L, 1, H), const3),            # LN2 beta
        pl.BlockSpec((H, H), const2),               # pooler weight (bf16)
        pl.BlockSpec((1, H), const2),               # pooler bias
        pl.BlockSpec((1, H), const2),               # regressor weight (row)
        pl.BlockSpec((1, 1), const2),               # regressor bias
    ]

    out = pl.pallas_call(
        kernel,
        out_shape=jax.ShapeDtypeStruct((B, 1, OUT_LANES), jnp.float32),
        grid=(B // BB,),
        in_specs=in_specs,
        out_specs=pl.BlockSpec((BB, 1, OUT_LANES), batch3),
        compiler_params=pltpu.CompilerParams(
            dimension_semantics=("parallel",)),      # batch-block axis -> 2 TCs on v7x
    )(ids, mask,
      packed["word_emb"], pos_emb, type_row,
      packed["emb_ln_g"], packed["emb_ln_b"],
      packed["wqkv"], packed["bqkv"], packed["wo"], packed["bo"],
      packed["ln1_g"], packed["ln1_b"], packed["w1"], packed["b1"],
      packed["w2"], packed["b2"], packed["ln2_g"], packed["ln2_b"],
      packed["pool_w"], packed["pool_b"], packed["reg_w"], packed["reg_b"])

    return out[:, 0, 0]                               # [B]


if __name__ == "__main__":
    cfg = CONFIG
    key = jax.random.PRNGKey(0)
    pkey, ikey = jax.random.split(key)
    params = init_params(pkey, cfg)
    packed = pack_params(params, cfg)

    B, S = 16, 8
    input_ids = jax.random.randint(ikey, (B, S), 0, cfg["vocab_size"], dtype=jnp.int32)
    attention_mask = jnp.ones((B, S), dtype=jnp.int32)
    attention_mask = attention_mask.at[1, 6:].set(0).at[5, 4:].set(0)

    # BB=8 -> M = BB*S = 64 matmul rows per step, 2 grid steps (both v7x TCs busy).
    fwd = jax.jit(lambda p, ids, m: finbert_regressor_forward(p, ids, m, cfg,
                                                              batch_block=8))
    score = fwd(packed, input_ids, attention_mask)
    score = jax.block_until_ready(score)
    assert score.shape == (B,) and score.dtype == jnp.float32
    print("KERNEL_OK")
</pallas_src>

<mosaic_0001>
module attributes {stable_mosaic.version = 11 : i64} {
  func.func @_finbert_kernel(%arg0: i32, %arg1: memref<8x8x1xi32, #tpu.memory_space<vmem>>, %arg2: memref<8x1x8xf32, #tpu.memory_space<vmem>>, %arg3: memref<64x128xf32, #tpu.memory_space<vmem>>, %arg4: memref<8x128xf32, #tpu.memory_space<vmem>>, %arg5: memref<1x128xf32, #tpu.memory_space<vmem>>, %arg6: memref<1x128xf32, #tpu.memory_space<vmem>>, %arg7: memref<1x128xf32, #tpu.memory_space<vmem>>, %arg8: memref<2x128x384xbf16, #tpu.memory_space<vmem>>, %arg9: memref<2x1x384xf32, #tpu.memory_space<vmem>>, %arg10: memref<2x128x128xbf16, #tpu.memory_space<vmem>>, %arg11: memref<2x1x128xf32, #tpu.memory_space<vmem>>, %arg12: memref<2x1x128xf32, #tpu.memory_space<vmem>>, %arg13: memref<2x1x128xf32, #tpu.memory_space<vmem>>, %arg14: memref<2x128x256xbf16, #tpu.memory_space<vmem>>, %arg15: memref<2x1x256xf32, #tpu.memory_space<vmem>>, %arg16: memref<2x256x128xbf16, #tpu.memory_space<vmem>>, %arg17: memref<2x1x128xf32, #tpu.memory_space<vmem>>, %arg18: memref<2x1x128xf32, #tpu.memory_space<vmem>>, %arg19: memref<2x1x128xf32, #tpu.memory_space<vmem>>, %arg20: memref<128x128xbf16, #tpu.memory_space<vmem>>, %arg21: memref<1x128xf32, #tpu.memory_space<vmem>>, %arg22: memref<1x128xf32, #tpu.memory_space<vmem>>, %arg23: memref<1x1xf32, #tpu.memory_space<vmem>>, %arg24: memref<8x1x128xf32, #tpu.memory_space<vmem>>) attributes {dimension_semantics = [#tpu.dimension_semantics<parallel>], iteration_bounds = array<i64: 2>, scalar_prefetch = 0 : i64, scratch_operands = 0 : i64, tpu.core_type = #tpu.core_type<tc>, window_params = [{transform_indices = @transform_0, window_bounds = array<i64: 8, 8, 1>}, {transform_indices = @transform_1, window_bounds = array<i64: 8, 1, 8>}, {pipeline_mode = #tpu.pipeline_mode<synchronous>, transform_indices = @transform_2, window_bounds = array<i64: 64, 128>}, {pipeline_mode = #tpu.pipeline_mode<synchronous>, transform_indices = @transform_3, window_bounds = array<i64: 8, 128>}, {pipeline_mode = #tpu.pipeline_mode<synchronous>, transform_indices = @transform_4, window_bounds = array<i64: 1, 128>}, {pipeline_mode = #tpu.pipeline_mode<synchronous>, transform_indices = @transform_5, window_bounds = array<i64: 1, 128>}, {pipeline_mode = #tpu.pipeline_mode<synchronous>, transform_indices = @transform_6, window_bounds = array<i64: 1, 128>}, {pipeline_mode = #tpu.pipeline_mode<synchronous>, transform_indices = @transform_7, window_bounds = array<i64: 2, 128, 384>}, {pipeline_mode = #tpu.pipeline_mode<synchronous>, transform_indices = @transform_8, window_bounds = array<i64: 2, 1, 384>}, {pipeline_mode = #tpu.pipeline_mode<synchronous>, transform_indices = @transform_9, window_bounds = array<i64: 2, 128, 128>}, {pipeline_mode = #tpu.pipeline_mode<synchronous>, transform_indices = @transform_10, window_bounds = array<i64: 2, 1, 128>}, {pipeline_mode = #tpu.pipeline_mode<synchronous>, transform_indices = @transform_11, window_bounds = array<i64: 2, 1, 128>}, {pipeline_mode = #tpu.pipeline_mode<synchronous>, transform_indices = @transform_12, window_bounds = array<i64: 2, 1, 128>}, {pipeline_mode = #tpu.pipeline_mode<synchronous>, transform_indices = @transform_13, window_bounds = array<i64: 2, 128, 256>}, {pipeline_mode = #tpu.pipeline_mode<synchronous>, transform_indices = @transform_14, window_bounds = array<i64: 2, 1, 256>}, {pipeline_mode = #tpu.pipeline_mode<synchronous>, transform_indices = @transform_15, window_bounds = array<i64: 2, 256, 128>}, {pipeline_mode = #tpu.pipeline_mode<synchronous>, transform_indices = @transform_16, window_bounds = array<i64: 2, 1, 128>}, {pipeline_mode = #tpu.pipeline_mode<synchronous>, transform_indices = @transform_17, window_bounds = array<i64: 2, 1, 128>}, {pipeline_mode = #tpu.pipeline_mode<synchronous>, transform_indices = @transform_18, window_bounds = array<i64: 2, 1, 128>}, {pipeline_mode = #tpu.pipeline_mode<synchronous>, transform_indices = @transform_19, window_bounds = array<i64: 128, 128>}, {pipeline_mode = #tpu.pipeline_mode<synchronous>, transform_indices = @transform_20, window_bounds = array<i64: 1, 128>}, {pipeline_mode = #tpu.pipeline_mode<synchronous>, transform_indices = @transform_21, window_bounds = array<i64: 1, 128>}, {pipeline_mode = #tpu.pipeline_mode<synchronous>, transform_indices = @transform_22, window_bounds = array<i64: 1, 1>}, {transform_indices = @transform_23, window_bounds = array<i64: 8, 1, 128>}]} {
    %c0 = arith.constant 0 : index
    %c0_0 = arith.constant 0 : index
    %c0_1 = arith.constant 0 : index
    %0 = vector.load %arg1[%c0, %c0_0, %c0_1] : memref<8x8x1xi32, #tpu.memory_space<vmem>>, vector<8x8x1xi32>
    %1 = vector.shape_cast %0 : vector<8x8x1xi32> to vector<64x1xi32>
    %2 = tpu.iota {dimensions = array<i32: 1>} : vector<64x64xi32>
    %3 = vector.broadcast %1 : vector<64x1xi32> to vector<64x64xi32>
    %4 = arith.cmpi eq, %3, %2 : vector<64x64xi32>
    %5 = arith.extui %4 : vector<64x64xi1> to vector<64x64xi32>
    %6 = arith.sitofp %5 : vector<64x64xi32> to vector<64x64xf32>
    %c0_2 = arith.constant 0 : index
    %c0_3 = arith.constant 0 : index
    %7 = vector.load %arg3[%c0_2, %c0_3] : memref<64x128xf32, #tpu.memory_space<vmem>>, vector<64x128xf32>
    %cst = arith.constant dense<0.000000e+00> : vector<64x128xf32>
    %8 = tpu.matmul %6, %7, %cst {dimension_numbers = #tpu.dot_dimension_numbers<[1], [0], [0], [1], [0, 0, 1, 1], [], []>} : vector<64x64xf32>, vector<64x128xf32>, vector<64x128xf32> -> vector<64x128xf32>
    %9 = vector.shape_cast %8 : vector<64x128xf32> to vector<8x8x128xf32>
    %c0_4 = arith.constant 0 : index
    %c0_5 = arith.constant 0 : index
    %10 = vector.load %arg4[%c0_4, %c0_5] : memref<8x128xf32, #tpu.memory_space<vmem>>, vector<8x128xf32>
    %11 = vector.shape_cast %10 : vector<8x128xf32> to vector<1x8x128xf32>
    %12 = vector.broadcast %11 : vector<1x8x128xf32> to vector<8x8x128xf32>
    %13 = arith.addf %9, %12 : vector<8x8x128xf32>
    %c0_6 = arith.constant 0 : index
    %c0_7 = arith.constant 0 : index
    %14 = vector.load %arg5[%c0_6, %c0_7] : memref<1x128xf32, #tpu.memory_space<vmem>>, vector<1x128xf32>
    %15 = vector.shape_cast %14 : vector<1x128xf32> to vector<1x1x128xf32>
    %16 = vector.broadcast %15 : vector<1x1x128xf32> to vector<8x8x128xf32>
    %17 = arith.addf %13, %16 : vector<8x8x128xf32>
    %18 = vector.shape_cast %17 : vector<8x8x128xf32> to vector<64x128xf32>
    %c0_8 = arith.constant 0 : index
    %c0_9 = arith.constant 0 : index
    %19 = vector.load %arg6[%c0_8, %c0_9] : memref<1x128xf32, #tpu.memory_space<vmem>>, vector<1x128xf32>
    %c0_10 = arith.constant 0 : index
    %c0_11 = arith.constant 0 : index
    %20 = vector.load %arg7[%c0_10, %c0_11] : memref<1x128xf32, #tpu.memory_space<vmem>>, vector<1x128xf32>
    %cst_12 = arith.constant dense<0.000000e+00> : vector<64xf32>
    %21 = vector.multi_reduction <add>, %18, %cst_12 [1] : vector<64x128xf32> to vector<64xf32>
    %22 = vector.shape_cast %21 : vector<64xf32> to vector<64x1xf32>
    %cst_13 = arith.constant 1.280000e+02 : f32
    %23 = vector.broadcast %cst_13 : f32 to vector<64x1xf32>
    %24 = arith.divf %22, %23 : vector<64x1xf32>
    %25 = vector.broadcast %24 : vector<64x1xf32> to vector<64x128xf32>
    %26 = arith.subf %18, %25 : vector<64x128xf32>
    %27 = arith.mulf %26, %26 : vector<64x128xf32>
    %cst_14 = arith.constant dense<0.000000e+00> : vector<64xf32>
    %28 = vector.multi_reduction <add>, %27, %cst_14 [1] : vector<64x128xf32> to vector<64xf32>
    %29 = vector.shape_cast %28 : vector<64xf32> to vector<64x1xf32>
    %cst_15 = arith.constant 1.280000e+02 : f32
    %30 = vector.broadcast %cst_15 : f32 to vector<64x1xf32>
    %31 = arith.divf %29, %30 : vector<64x1xf32>
    %32 = vector.broadcast %24 : vector<64x1xf32> to vector<64x128xf32>
    %33 = arith.subf %18, %32 : vector<64x128xf32>
    %cst_16 = arith.constant 9.99999996E-13 : f32
    %34 = vector.broadcast %cst_16 : f32 to vector<64x1xf32>
    %35 = arith.addf %31, %34 : vector<64x1xf32>
    %36 = math.rsqrt %35 : vector<64x1xf32>
    %37 = vector.broadcast %36 : vector<64x1xf32> to vector<64x128xf32>
    %38 = arith.mulf %33, %37 : vector<64x128xf32>
    %39 = vector.broadcast %19 : vector<1x128xf32> to vector<64x128xf32>
    %40 = arith.mulf %38, %39 : vector<64x128xf32>
    %41 = vector.broadcast %20 : vector<1x128xf32> to vector<64x128xf32>
    %42 = arith.addf %40, %41 : vector<64x128xf32>
    %c0_17 = arith.constant 0 : index
    %c0_18 = arith.constant 0 : index
    %c0_19 = arith.constant 0 : index
    %43 = vector.load %arg2[%c0_17, %c0_18, %c0_19] : memref<8x1x8xf32, #tpu.memory_space<vmem>>, vector<8x1x8xf32>
    %cst_20 = arith.constant 1.000000e+00 : f32
    %44 = vector.broadcast %cst_20 : f32 to vector<8x1x8xf32>
    %45 = arith.subf %44, %43 : vector<8x1x8xf32>
    %cst_21 = arith.constant -1.000000e+04 : f32
    %46 = vector.broadcast %cst_21 : f32 to vector<8x1x8xf32>
    %47 = arith.mulf %45, %46 : vector<8x1x8xf32>
    %c0_22 = arith.constant 0 : index
    %c0_23 = arith.constant 0 : index
    %c0_24 = arith.constant 0 : index
    %48 = vector.load %arg8[%c0_22, %c0_23, %c0_24] : memref<2x128x384xbf16, #tpu.memory_space<vmem>>, vector<1x128x384xbf16>
    %49 = vector.shape_cast %48 : vector<1x128x384xbf16> to vector<128x384xbf16>
    %50 = arith.truncf %42 : vector<64x128xf32> to vector<64x128xbf16>
    %cst_25 = arith.constant dense<0.000000e+00> : vector<64x384xf32>
    %51 = tpu.matmul %50, %49, %cst_25 {dimension_numbers = #tpu.dot_dimension_numbers<[1], [0], [0], [1], [0, 0, 1, 1], [], []>} : vector<64x128xbf16>, vector<128x384xbf16>, vector<64x384xf32> -> vector<64x384xf32>
    %c0_26 = arith.constant 0 : index
    %c0_27 = arith.constant 0 : index
    %c0_28 = arith.constant 0 : index
    %52 = vector.load %arg9[%c0_26, %c0_27, %c0_28] : memref<2x1x384xf32, #tpu.memory_space<vmem>>, vector<1x1x384xf32>
    %53 = vector.shape_cast %52 : vector<1x1x384xf32> to vector<1x384xf32>
    %54 = vector.broadcast %53 : vector<1x384xf32> to vector<64x384xf32>
    %55 = arith.addf %51, %54 : vector<64x384xf32>
    %56 = vector.extract_strided_slice %55 {offsets = [0, 0], sizes = [64, 128], strides = [1, 1]} : vector<64x384xf32> to vector<64x128xf32>
    %57 = vector.shape_cast %56 : vector<64x128xf32> to vector<8x8x128xf32>
    %58 = vector.extract_strided_slice %55 {offsets = [0, 128], sizes = [64, 128], strides = [1, 1]} : vector<64x384xf32> to vector<64x128xf32>
    %59 = vector.shape_cast %58 : vector<64x128xf32> to vector<8x8x128xf32>
    %60 = vector.extract_strided_slice %55 {offsets = [0, 256], sizes = [64, 128], strides = [1, 1]} : vector<64x384xf32> to vector<64x128xf32>
    %61 = vector.shape_cast %60 : vector<64x128xf32> to vector<8x8x128xf32>
    %62 = vector.extract_strided_slice %57 {offsets = [0, 0, 0], sizes = [8, 8, 32], strides = [1, 1, 1]} : vector<8x8x128xf32> to vector<8x8x32xf32>
    %63 = arith.truncf %62 : vector<8x8x32xf32> to vector<8x8x32xbf16>
    %64 = vector.extract_strided_slice %59 {offsets = [0, 0, 0], sizes = [8, 8, 32], strides = [1, 1, 1]} : vector<8x8x128xf32> to vector<8x8x32xf32>
    %65 = arith.truncf %64 : vector<8x8x32xf32> to vector<8x8x32xbf16>
    %66 = vector.extract_strided_slice %61 {offsets = [0, 0, 0], sizes = [8, 8, 32], strides = [1, 1, 1]} : vector<8x8x128xf32> to vector<8x8x32xf32>
    %67 = arith.truncf %66 : vector<8x8x32xf32> to vector<8x8x32xbf16>
    "tpu.trace_start"() <{level = 10 : i32, message = "bqd,bkd->bqk"}> : () -> ()
    %cst_29 = arith.constant dense<0.000000e+00> : vector<8x8x8xf32>
    %68 = tpu.matmul %63, %65, %cst_29 {dimension_numbers = #tpu.dot_dimension_numbers<[2], [2], [1], [1], [0, 0, 0, 1, 1, 1], [0], [0]>} : vector<8x8x32xbf16>, vector<8x8x32xbf16>, vector<8x8x8xf32> -> vector<8x8x8xf32>
    "tpu.trace_stop"() : () -> ()
    %69 = vector.broadcast %47 : vector<8x1x8xf32> to vector<8x8x8xf32>
    %70 = arith.addf %68, %69 : vector<8x8x8xf32>
    %cst_30 = arith.constant dense<0xFF800000> : vector<8x8xf32>
    %71 = vector.multi_reduction <maximumf>, %70, %cst_30 [2] : vector<8x8x8xf32> to vector<8x8xf32>
    %72 = vector.shape_cast %71 : vector<8x8xf32> to vector<8x8x1xf32>
    %73 = vector.broadcast %72 : vector<8x8x1xf32> to vector<8x8x8xf32>
    %74 = arith.subf %70, %73 : vector<8x8x8xf32>
    %75 = math.exp %74 : vector<8x8x8xf32>
    %cst_31 = arith.constant dense<0.000000e+00> : vector<8x8xf32>
    %76 = vector.multi_reduction <add>, %75, %cst_31 [2] : vector<8x8x8xf32> to vector<8x8xf32>
    %77 = vector.shape_cast %76 : vector<8x8xf32> to vector<8x8x1xf32>
    %78 = tpu.reciprocal %77 {approx = true} : vector<8x8x1xf32> -> vector<8x8x1xf32>
    %79 = vector.broadcast %78 : vector<8x8x1xf32> to vector<8x8x8xf32>
    %80 = arith.mulf %75, %79 : vector<8x8x8xf32>
    %81 = arith.truncf %80 : vector<8x8x8xf32> to vector<8x8x8xbf16>
    "tpu.trace_start"() <{level = 10 : i32, message = "bqk,bkd->bqd"}> : () -> ()
    %cst_32 = arith.constant dense<0.000000e+00> : vector<8x8x32xf32>
    %82 = tpu.matmul %81, %67, %cst_32 {dimension_numbers = #tpu.dot_dimension_numbers<[2], [1], [1], [2], [0, 0, 0, 1, 1, 2], [0], [0]>} : vector<8x8x8xbf16>, vector<8x8x32xbf16>, vector<8x8x32xf32> -> vector<8x8x32xf32>
    "tpu.trace_stop"() : () -> ()
    %83 = vector.extract_strided_slice %57 {offsets = [0, 0, 32], sizes = [8, 8, 32], strides = [1, 1, 1]} : vector<8x8x128xf32> to vector<8x8x32xf32>
    %84 = arith.truncf %83 : vector<8x8x32xf32> to vector<8x8x32xbf16>
    %85 = vector.extract_strided_slice %59 {offsets = [0, 0, 32], sizes = [8, 8, 32], strides = [1, 1, 1]} : vector<8x8x128xf32> to vector<8x8x32xf32>
    %86 = arith.truncf %85 : vector<8x8x32xf32> to vector<8x8x32xbf16>
    %87 = vector.extract_strided_slice %61 {offsets = [0, 0, 32], sizes = [8, 8, 32], strides = [1, 1, 1]} : vector<8x8x128xf32> to vector<8x8x32xf32>
    %88 = arith.truncf %87 : vector<8x8x32xf32> to vector<8x8x32xbf16>
    "tpu.trace_start"() <{level = 10 : i32, message = "bqd,bkd->bqk"}> : () -> ()
    %cst_33 = arith.constant dense<0.000000e+00> : vector<8x8x8xf32>
    %89 = tpu.matmul %84, %86, %cst_33 {dimension_numbers = #tpu.dot_dimension_numbers<[2], [2], [1], [1], [0, 0, 0, 1, 1, 1], [0], [0]>} : vector<8x8x32xbf16>, vector<8x8x32xbf16>, vector<8x8x8xf32> -> vector<8x8x8xf32>
    "tpu.trace_stop"() : () -> ()
    %90 = vector.broadcast %47 : vector<8x1x8xf32> to vector<8x8x8xf32>
    %91 = arith.addf %89, %90 : vector<8x8x8xf32>
    %cst_34 = arith.constant dense<0xFF800000> : vector<8x8xf32>
    %92 = vector.multi_reduction <maximumf>, %91, %cst_34 [2] : vector<8x8x8xf32> to vector<8x8xf32>
    %93 = vector.shape_cast %92 : vector<8x8xf32> to vector<8x8x1xf32>
    %94 = vector.broadcast %93 : vector<8x8x1xf32> to vector<8x8x8xf32>
    %95 = arith.subf %91, %94 : vector<8x8x8xf32>
    %96 = math.exp %95 : vector<8x8x8xf32>
    %cst_35 = arith.constant dense<0.000000e+00> : vector<8x8xf32>
    %97 = vector.multi_reduction <add>, %96, %cst_35 [2] : vector<8x8x8xf32> to vector<8x8xf32>
    %98 = vector.shape_cast %97 : vector<8x8xf32> to vector<8x8x1xf32>
    %99 = tpu.reciprocal %98 {approx = true} : vector<8x8x1xf32> -> vector<8x8x1xf32>
    %100 = vector.broadcast %99 : vector<8x8x1xf32> to vector<8x8x8xf32>
    %101 = arith.mulf %96, %100 : vector<8x8x8xf32>
    %102 = arith.truncf %101 : vector<8x8x8xf32> to vector<8x8x8xbf16>
    "tpu.trace_start"() <{level = 10 : i32, message = "bqk,bkd->bqd"}> : () -> ()
    %cst_36 = arith.constant dense<0.000000e+00> : vector<8x8x32xf32>
    %103 = tpu.matmul %102, %88, %cst_36 {dimension_numbers = #tpu.dot_dimension_numbers<[2], [1], [1], [2], [0, 0, 0, 1, 1, 2], [0], [0]>} : vector<8x8x8xbf16>, vector<8x8x32xbf16>, vector<8x8x32xf32> -> vector<8x8x32xf32>
    "tpu.trace_stop"() : () -> ()
    %104 = vector.extract_strided_slice %57 {offsets = [0, 0, 64], sizes = [8, 8, 32], strides = [1, 1, 1]} : vector<8x8x128xf32> to vector<8x8x32xf32>
    %105 = arith.truncf %104 : vector<8x8x32xf32> to vector<8x8x32xbf16>
    %106 = vector.extract_strided_slice %59 {offsets = [0, 0, 64], sizes = [8, 8, 32], strides = [1, 1, 1]} : vector<8x8x128xf32> to vector<8x8x32xf32>
    %107 = arith.truncf %106 : vector<8x8x32xf32> to vector<8x8x32xbf16>
    %108 = vector.extract_strided_slice %61 {offsets = [0, 0, 64], sizes = [8, 8, 32], strides = [1, 1, 1]} : vector<8x8x128xf32> to vector<8x8x32xf32>
    %109 = arith.truncf %108 : vector<8x8x32xf32> to vector<8x8x32xbf16>
    "tpu.trace_start"() <{level = 10 : i32, message = "bqd,bkd->bqk"}> : () -> ()
    %cst_37 = arith.constant dense<0.000000e+00> : vector<8x8x8xf32>
    %110 = tpu.matmul %105, %107, %cst_37 {dimension_numbers = #tpu.dot_dimension_numbers<[2], [2], [1], [1], [0, 0, 0, 1, 1, 1], [0], [0]>} : vector<8x8x32xbf16>, vector<8x8x32xbf16>, vector<8x8x8xf32> -> vector<8x8x8xf32>
    "tpu.trace_stop"() : () -> ()
    %111 = vector.broadcast %47 : vector<8x1x8xf32> to vector<8x8x8xf32>
    %112 = arith.addf %110, %111 : vector<8x8x8xf32>
    %cst_38 = arith.constant dense<0xFF800000> : vector<8x8xf32>
    %113 = vector.multi_reduction <maximumf>, %112, %cst_38 [2] : vector<8x8x8xf32> to vector<8x8xf32>
    %114 = vector.shape_cast %113 : vector<8x8xf32> to vector<8x8x1xf32>
    %115 = vector.broadcast %114 : vector<8x8x1xf32> to vector<8x8x8xf32>
    %116 = arith.subf %112, %115 : vector<8x8x8xf32>
    %117 = math.exp %116 : vector<8x8x8xf32>
    %cst_39 = arith.constant dense<0.000000e+00> : vector<8x8xf32>
    %118 = vector.multi_reduction <add>, %117, %cst_39 [2] : vector<8x8x8xf32> to vector<8x8xf32>
    %119 = vector.shape_cast %118 : vector<8x8xf32> to vector<8x8x1xf32>
    %120 = tpu.reciprocal %119 {approx = true} : vector<8x8x1xf32> -> vector<8x8x1xf32>
    %121 = vector.broadcast %120 : vector<8x8x1xf32> to vector<8x8x8xf32>
    %122 = arith.mulf %117, %121 : vector<8x8x8xf32>
    %123 = arith.truncf %122 : vector<8x8x8xf32> to vector<8x8x8xbf16>
    "tpu.trace_start"() <{level = 10 : i32, message = "bqk,bkd->bqd"}> : () -> ()
    %cst_40 = arith.constant dense<0.000000e+00> : vector<8x8x32xf32>
    %124 = tpu.matmul %123, %109, %cst_40 {dimension_numbers = #tpu.dot_dimension_numbers<[2], [1], [1], [2], [0, 0, 0, 1, 1, 2], [0], [0]>} : vector<8x8x8xbf16>, vector<8x8x32xbf16>, vector<8x8x32xf32> -> vector<8x8x32xf32>
    "tpu.trace_stop"() : () -> ()
    %125 = vector.extract_strided_slice %57 {offsets = [0, 0, 96], sizes = [8, 8, 32], strides = [1, 1, 1]} : vector<8x8x128xf32> to vector<8x8x32xf32>
    %126 = arith.truncf %125 : vector<8x8x32xf32> to vector<8x8x32xbf16>
    %127 = vector.extract_strided_slice %59 {offsets = [0, 0, 96], sizes = [8, 8, 32], strides = [1, 1, 1]} : vector<8x8x128xf32> to vector<8x8x32xf32>
    %128 = arith.truncf %127 : vector<8x8x32xf32> to vector<8x8x32xbf16>
    %129 = vector.extract_strided_slice %61 {offsets = [0, 0, 96], sizes = [8, 8, 32], strides = [1, 1, 1]} : vector<8x8x128xf32> to vector<8x8x32xf32>
    %130 = arith.truncf %129 : vector<8x8x32xf32> to vector<8x8x32xbf16>
    "tpu.trace_start"() <{level = 10 : i32, message = "bqd,bkd->bqk"}> : () -> ()
    %cst_41 = arith.constant dense<0.000000e+00> : vector<8x8x8xf32>
    %131 = tpu.matmul %126, %128, %cst_41 {dimension_numbers = #tpu.dot_dimension_numbers<[2], [2], [1], [1], [0, 0, 0, 1, 1, 1], [0], [0]>} : vector<8x8x32xbf16>, vector<8x8x32xbf16>, vector<8x8x8xf32> -> vector<8x8x8xf32>
    "tpu.trace_stop"() : () -> ()
    %132 = vector.broadcast %47 : vector<8x1x8xf32> to vector<8x8x8xf32>
    %133 = arith.addf %131, %132 : vector<8x8x8xf32>
    %cst_42 = arith.constant dense<0xFF800000> : vector<8x8xf32>
    %134 = vector.multi_reduction <maximumf>, %133, %cst_42 [2] : vector<8x8x8xf32> to vector<8x8xf32>
    %135 = vector.shape_cast %134 : vector<8x8xf32> to vector<8x8x1xf32>
    %136 = vector.broadcast %135 : vector<8x8x1xf32> to vector<8x8x8xf32>
    %137 = arith.subf %133, %136 : vector<8x8x8xf32>
    %138 = math.exp %137 : vector<8x8x8xf32>
    %cst_43 = arith.constant dense<0.000000e+00> : vector<8x8xf32>
    %139 = vector.multi_reduction <add>, %138, %cst_43 [2] : vector<8x8x8xf32> to vector<8x8xf32>
    %140 = vector.shape_cast %139 : vector<8x8xf32> to vector<8x8x1xf32>
    %141 = tpu.reciprocal %140 {approx = true} : vector<8x8x1xf32> -> vector<8x8x1xf32>
    %142 = vector.broadcast %141 : vector<8x8x1xf32> to vector<8x8x8xf32>
    %143 = arith.mulf %138, %142 : vector<8x8x8xf32>
    %144 = arith.truncf %143 : vector<8x8x8xf32> to vector<8x8x8xbf16>
    "tpu.trace_start"() <{level = 10 : i32, message = "bqk,bkd->bqd"}> : () -> ()
    %cst_44 = arith.constant dense<0.000000e+00> : vector<8x8x32xf32>
    %145 = tpu.matmul %144, %130, %cst_44 {dimension_numbers = #tpu.dot_dimension_numbers<[2], [1], [1], [2], [0, 0, 0, 1, 1, 2], [0], [0]>} : vector<8x8x8xbf16>, vector<8x8x32xbf16>, vector<8x8x32xf32> -> vector<8x8x32xf32>
    "tpu.trace_stop"() : () -> ()
    %146 = tpu.concatenate %82, %103, %124, %145 in 2 : vector<8x8x32xf32>, vector<8x8x32xf32>, vector<8x8x32xf32>, vector<8x8x32xf32> -> vector<8x8x128xf32>
    %147 = vector.shape_cast %146 : vector<8x8x128xf32> to vector<64x128xf32>
    %c0_45 = arith.constant 0 : index
    %c0_46 = arith.constant 0 : index
    %c0_47 = arith.constant 0 : index
    %148 = vector.load %arg10[%c0_45, %c0_46, %c0_47] : memref<2x128x128xbf16, #tpu.memory_space<vmem>>, vector<1x128x128xbf16>
    %149 = vector.shape_cast %148 : vector<1x128x128xbf16> to vector<128x128xbf16>
    %150 = arith.truncf %147 : vector<64x128xf32> to vector<64x128xbf16>
    %cst_48 = arith.constant dense<0.000000e+00> : vector<64x128xf32>
    %151 = tpu.matmul %150, %149, %cst_48 {dimension_numbers = #tpu.dot_dimension_numbers<[1], [0], [0], [1], [0, 0, 1, 1], [], []>} : vector<64x128xbf16>, vector<128x128xbf16>, vector<64x128xf32> -> vector<64x128xf32>
    %c0_49 = arith.constant 0 : index
    %c0_50 = arith.constant 0 : index
    %c0_51 = arith.constant 0 : index
    %152 = vector.load %arg11[%c0_49, %c0_50, %c0_51] : memref<2x1x128xf32, #tpu.memory_space<vmem>>, vector<1x1x128xf32>
    %153 = vector.shape_cast %152 : vector<1x1x128xf32> to vector<1x128xf32>
    %154 = vector.broadcast %153 : vector<1x128xf32> to vector<64x128xf32>
    %155 = arith.addf %151, %154 : vector<64x128xf32>
    %156 = arith.addf %42, %155 : vector<64x128xf32>
    %c0_52 = arith.constant 0 : index
    %c0_53 = arith.constant 0 : index
    %c0_54 = arith.constant 0 : index
    %157 = vector.load %arg12[%c0_52, %c0_53, %c0_54] : memref<2x1x128xf32, #tpu.memory_space<vmem>>, vector<1x1x128xf32>
    %158 = vector.shape_cast %157 : vector<1x1x128xf32> to vector<1x128xf32>
    %c0_55 = arith.constant 0 : index
    %c0_56 = arith.constant 0 : index
    %c0_57 = arith.constant 0 : index
    %159 = vector.load %arg13[%c0_55, %c0_56, %c0_57] : memref<2x1x128xf32, #tpu.memory_space<vmem>>, vector<1x1x128xf32>
    %160 = vector.shape_cast %159 : vector<1x1x128xf32> to vector<1x128xf32>
    %cst_58 = arith.constant dense<0.000000e+00> : vector<64xf32>
    %161 = vector.multi_reduction <add>, %156, %cst_58 [1] : vector<64x128xf32> to vector<64xf32>
    %162 = vector.shape_cast %161 : vector<64xf32> to vector<64x1xf32>
    %cst_59 = arith.constant 1.280000e+02 : f32
    %163 = vector.broadcast %cst_59 : f32 to vector<64x1xf32>
    %164 = arith.divf %162, %163 : vector<64x1xf32>
    %165 = vector.broadcast %164 : vector<64x1xf32> to vector<64x128xf32>
    %166 = arith.subf %156, %165 : vector<64x128xf32>
    %167 = arith.mulf %166, %166 : vector<64x128xf32>
    %cst_60 = arith.constant dense<0.000000e+00> : vector<64xf32>
    %168 = vector.multi_reduction <add>, %167, %cst_60 [1] : vector<64x128xf32> to vector<64xf32>
    %169 = vector.shape_cast %168 : vector<64xf32> to vector<64x1xf32>
    %cst_61 = arith.constant 1.280000e+02 : f32
    %170 = vector.broadcast %cst_61 : f32 to vector<64x1xf32>
    %171 = arith.divf %169, %170 : vector<64x1xf32>
    %172 = vector.broadcast %164 : vector<64x1xf32> to vector<64x128xf32>
    %173 = arith.subf %156, %172 : vector<64x128xf32>
    %cst_62 = arith.constant 9.99999996E-13 : f32
    %174 = vector.broadcast %cst_62 : f32 to vector<64x1xf32>
    %175 = arith.addf %171, %174 : vector<64x1xf32>
    %176 = math.rsqrt %175 : vector<64x1xf32>
    %177 = vector.broadcast %176 : vector<64x1xf32> to vector<64x128xf32>
    %178 = arith.mulf %173, %177 : vector<64x128xf32>
    %179 = vector.broadcast %158 : vector<1x128xf32> to vector<64x128xf32>
    %180 = arith.mulf %178, %179 : vector<64x128xf32>
    %181 = vector.broadcast %160 : vector<1x128xf32> to vector<64x128xf32>
    %182 = arith.addf %180, %181 : vector<64x128xf32>
    %c0_63 = arith.constant 0 : index
    %c0_64 = arith.constant 0 : index
    %c0_65 = arith.constant 0 : index
    %183 = vector.load %arg14[%c0_63, %c0_64, %c0_65] : memref<2x128x256xbf16, #tpu.memory_space<vmem>>, vector<1x128x256xbf16>
    %184 = vector.shape_cast %183 : vector<1x128x256xbf16> to vector<128x256xbf16>
    %185 = arith.truncf %182 : vector<64x128xf32> to vector<64x128xbf16>
    %cst_66 = arith.constant dense<0.000000e+00> : vector<64x256xf32>
    %186 = tpu.matmul %185, %184, %cst_66 {dimension_numbers = #tpu.dot_dimension_numbers<[1], [0], [0], [1], [0, 0, 1, 1], [], []>} : vector<64x128xbf16>, vector<128x256xbf16>, vector<64x256xf32> -> vector<64x256xf32>
    %c0_67 = arith.constant 0 : index
    %c0_68 = arith.constant 0 : index
    %c0_69 = arith.constant 0 : index
    %187 = vector.load %arg15[%c0_67, %c0_68, %c0_69] : memref<2x1x256xf32, #tpu.memory_space<vmem>>, vector<1x1x256xf32>
    %188 = vector.shape_cast %187 : vector<1x1x256xf32> to vector<1x256xf32>
    %189 = vector.broadcast %188 : vector<1x256xf32> to vector<64x256xf32>
    %190 = arith.addf %186, %189 : vector<64x256xf32>
    %cst_70 = arith.constant 5.000000e-01 : f32
    %191 = vector.broadcast %cst_70 : f32 to vector<64x256xf32>
    %192 = arith.mulf %191, %190 : vector<64x256xf32>
    %cst_71 = arith.constant 4.471500e-02 : f32
    %193 = vector.broadcast %cst_71 : f32 to vector<64x256xf32>
    %194 = arith.mulf %193, %190 : vector<64x256xf32>
    %195 = arith.mulf %194, %190 : vector<64x256xf32>
    %196 = arith.mulf %195, %190 : vector<64x256xf32>
    %197 = arith.addf %190, %196 : vector<64x256xf32>
    %cst_72 = arith.constant 0.797884583 : f32
    %198 = vector.broadcast %cst_72 : f32 to vector<64x256xf32>
    %199 = arith.mulf %198, %197 : vector<64x256xf32>
    %200 = math.tanh %199 : vector<64x256xf32>
    %cst_73 = arith.constant 1.000000e+00 : f32
    %201 = vector.broadcast %cst_73 : f32 to vector<64x256xf32>
    %202 = arith.addf %201, %200 : vector<64x256xf32>
    %203 = arith.mulf %192, %202 : vector<64x256xf32>
    %c0_74 = arith.constant 0 : index
    %c0_75 = arith.constant 0 : index
    %c0_76 = arith.constant 0 : index
    %204 = vector.load %arg16[%c0_74, %c0_75, %c0_76] : memref<2x256x128xbf16, #tpu.memory_space<vmem>>, vector<1x256x128xbf16>
    %205 = vector.shape_cast %204 : vector<1x256x128xbf16> to vector<256x128xbf16>
    %206 = arith.truncf %203 : vector<64x256xf32> to vector<64x256xbf16>
    %cst_77 = arith.constant dense<0.000000e+00> : vector<64x128xf32>
    %207 = tpu.matmul %206, %205, %cst_77 {dimension_numbers = #tpu.dot_dimension_numbers<[1], [0], [0], [1], [0, 0, 1, 1], [], []>} : vector<64x256xbf16>, vector<256x128xbf16>, vector<64x128xf32> -> vector<64x128xf32>
    %c0_78 = arith.constant 0 : index
    %c0_79 = arith.constant 0 : index
    %c0_80 = arith.constant 0 : index
    %208 = vector.load %arg17[%c0_78, %c0_79, %c0_80] : memref<2x1x128xf32, #tpu.memory_space<vmem>>, vector<1x1x128xf32>
    %209 = vector.shape_cast %208 : vector<1x1x128xf32> to vector<1x128xf32>
    %210 = vector.broadcast %209 : vector<1x128xf32> to vector<64x128xf32>
    %211 = arith.addf %207, %210 : vector<64x128xf32>
    %212 = arith.addf %182, %211 : vector<64x128xf32>
    %c0_81 = arith.constant 0 : index
    %c0_82 = arith.constant 0 : index
    %c0_83 = arith.constant 0 : index
    %213 = vector.load %arg18[%c0_81, %c0_82, %c0_83] : memref<2x1x128xf32, #tpu.memory_space<vmem>>, vector<1x1x128xf32>
    %214 = vector.shape_cast %213 : vector<1x1x128xf32> to vector<1x128xf32>
    %c0_84 = arith.constant 0 : index
    %c0_85 = arith.constant 0 : index
    %c0_86 = arith.constant 0 : index
    %215 = vector.load %arg19[%c0_84, %c0_85, %c0_86] : memref<2x1x128xf32, #tpu.memory_space<vmem>>, vector<1x1x128xf32>
    %216 = vector.shape_cast %215 : vector<1x1x128xf32> to vector<1x128xf32>
    %cst_87 = arith.constant dense<0.000000e+00> : vector<64xf32>
    %217 = vector.multi_reduction <add>, %212, %cst_87 [1] : vector<64x128xf32> to vector<64xf32>
    %218 = vector.shape_cast %217 : vector<64xf32> to vector<64x1xf32>
    %cst_88 = arith.constant 1.280000e+02 : f32
    %219 = vector.broadcast %cst_88 : f32 to vector<64x1xf32>
    %220 = arith.divf %218, %219 : vector<64x1xf32>
    %221 = vector.broadcast %220 : vector<64x1xf32> to vector<64x128xf32>
    %222 = arith.subf %212, %221 : vector<64x128xf32>
    %223 = arith.mulf %222, %222 : vector<64x128xf32>
    %cst_89 = arith.constant dense<0.000000e+00> : vector<64xf32>
    %224 = vector.multi_reduction <add>, %223, %cst_89 [1] : vector<64x128xf32> to vector<64xf32>
    %225 = vector.shape_cast %224 : vector<64xf32> to vector<64x1xf32>
    %cst_90 = arith.constant 1.280000e+02 : f32
    %226 = vector.broadcast %cst_90 : f32 to vector<64x1xf32>
    %227 = arith.divf %225, %226 : vector<64x1xf32>
    %228 = vector.broadcast %220 : vector<64x1xf32> to vector<64x128xf32>
    %229 = arith.subf %212, %228 : vector<64x128xf32>
    %cst_91 = arith.constant 9.99999996E-13 : f32
    %230 = vector.broadcast %cst_91 : f32 to vector<64x1xf32>
    %231 = arith.addf %227, %230 : vector<64x1xf32>
    %232 = math.rsqrt %231 : vector<64x1xf32>
    %233 = vector.broadcast %232 : vector<64x1xf32> to vector<64x128xf32>
    %234 = arith.mulf %229, %233 : vector<64x128xf32>
    %235 = vector.broadcast %214 : vector<1x128xf32> to vector<64x128xf32>
    %236 = arith.mulf %234, %235 : vector<64x128xf32>
    %237 = vector.broadcast %216 : vector<1x128xf32> to vector<64x128xf32>
    %238 = arith.addf %236, %237 : vector<64x128xf32>
    %c1 = arith.constant 1 : index
    %c0_92 = arith.constant 0 : index
    %c0_93 = arith.constant 0 : index
    %239 = vector.load %arg8[%c1, %c0_92, %c0_93] : memref<2x128x384xbf16, #tpu.memory_space<vmem>>, vector<1x128x384xbf16>
    %240 = vector.shape_cast %239 : vector<1x128x384xbf16> to vector<128x384xbf16>
    %241 = arith.truncf %238 : vector<64x128xf32> to vector<64x128xbf16>
    %cst_94 = arith.constant dense<0.000000e+00> : vector<64x384xf32>
    %242 = tpu.matmul %241, %240, %cst_94 {dimension_numbers = #tpu.dot_dimension_numbers<[1], [0], [0], [1], [0, 0, 1, 1], [], []>} : vector<64x128xbf16>, vector<128x384xbf16>, vector<64x384xf32> -> vector<64x384xf32>
    %c1_95 = arith.constant 1 : index
    %c0_96 = arith.constant 0 : index
    %c0_97 = arith.constant 0 : index
    %243 = vector.load %arg9[%c1_95, %c0_96, %c0_97] : memref<2x1x384xf32, #tpu.memory_space<vmem>>, vector<1x1x384xf32>
    %244 = vector.shape_cast %243 : vector<1x1x384xf32> to vector<1x384xf32>
    %245 = vector.broadcast %244 : vector<1x384xf32> to vector<64x384xf32>
    %246 = arith.addf %242, %245 : vector<64x384xf32>
    %247 = vector.extract_strided_slice %246 {offsets = [0, 0], sizes = [64, 128], strides = [1, 1]} : vector<64x384xf32> to vector<64x128xf32>
    %248 = vector.shape_cast %247 : vector<64x128xf32> to vector<8x8x128xf32>
    %249 = vector.extract_strided_slice %246 {offsets = [0, 128], sizes = [64, 128], strides = [1, 1]} : vector<64x384xf32> to vector<64x128xf32>
    %250 = vector.shape_cast %249 : vector<64x128xf32> to vector<8x8x128xf32>
    %251 = vector.extract_strided_slice %246 {offsets = [0, 256], sizes = [64, 128], strides = [1, 1]} : vector<64x384xf32> to vector<64x128xf32>
    %252 = vector.shape_cast %251 : vector<64x128xf32> to vector<8x8x128xf32>
    %253 = vector.extract_strided_slice %248 {offsets = [0, 0, 0], sizes = [8, 8, 32], strides = [1, 1, 1]} : vector<8x8x128xf32> to vector<8x8x32xf32>
    %254 = arith.truncf %253 : vector<8x8x32xf32> to vector<8x8x32xbf16>
    %255 = vector.extract_strided_slice %250 {offsets = [0, 0, 0], sizes = [8, 8, 32], strides = [1, 1, 1]} : vector<8x8x128xf32> to vector<8x8x32xf32>
    %256 = arith.truncf %255 : vector<8x8x32xf32> to vector<8x8x32xbf16>
    %257 = vector.extract_strided_slice %252 {offsets = [0, 0, 0], sizes = [8, 8, 32], strides = [1, 1, 1]} : vector<8x8x128xf32> to vector<8x8x32xf32>
    %258 = arith.truncf %257 : vector<8x8x32xf32> to vector<8x8x32xbf16>
    "tpu.trace_start"() <{level = 10 : i32, message = "bqd,bkd->bqk"}> : () -> ()
    %cst_98 = arith.constant dense<0.000000e+00> : vector<8x8x8xf32>
    %259 = tpu.matmul %254, %256, %cst_98 {dimension_numbers = #tpu.dot_dimension_numbers<[2], [2], [1], [1], [0, 0, 0, 1, 1, 1], [0], [0]>} : vector<8x8x32xbf16>, vector<8x8x32xbf16>, vector<8x8x8xf32> -> vector<8x8x8xf32>
    "tpu.trace_stop"() : () -> ()
    %260 = vector.broadcast %47 : vector<8x1x8xf32> to vector<8x8x8xf32>
    %261 = arith.addf %259, %260 : vector<8x8x8xf32>
    %cst_99 = arith.constant dense<0xFF800000> : vector<8x8xf32>
    %262 = vector.multi_reduction <maximumf>, %261, %cst_99 [2] : vector<8x8x8xf32> to vector<8x8xf32>
    %263 = vector.shape_cast %262 : vector<8x8xf32> to vector<8x8x1xf32>
    %264 = vector.broadcast %263 : vector<8x8x1xf32> to vector<8x8x8xf32>
    %265 = arith.subf %261, %264 : vector<8x8x8xf32>
    %266 = math.exp %265 : vector<8x8x8xf32>
    %cst_100 = arith.constant dense<0.000000e+00> : vector<8x8xf32>
    %267 = vector.multi_reduction <add>, %266, %cst_100 [2] : vector<8x8x8xf32> to vector<8x8xf32>
    %268 = vector.shape_cast %267 : vector<8x8xf32> to vector<8x8x1xf32>
    %269 = tpu.reciprocal %268 {approx = true} : vector<8x8x1xf32> -> vector<8x8x1xf32>
    %270 = vector.broadcast %269 : vector<8x8x1xf32> to vector<8x8x8xf32>
    %271 = arith.mulf %266, %270 : vector<8x8x8xf32>
    %272 = arith.truncf %271 : vector<8x8x8xf32> to vector<8x8x8xbf16>
    "tpu.trace_start"() <{level = 10 : i32, message = "bqk,bkd->bqd"}> : () -> ()
    %cst_101 = arith.constant dense<0.000000e+00> : vector<8x8x32xf32>
    %273 = tpu.matmul %272, %258, %cst_101 {dimension_numbers = #tpu.dot_dimension_numbers<[2], [1], [1], [2], [0, 0, 0, 1, 1, 2], [0], [0]>} : vector<8x8x8xbf16>, vector<8x8x32xbf16>, vector<8x8x32xf32> -> vector<8x8x32xf32>
    "tpu.trace_stop"() : () -> ()
    %274 = vector.extract_strided_slice %248 {offsets = [0, 0, 32], sizes = [8, 8, 32], strides = [1, 1, 1]} : vector<8x8x128xf32> to vector<8x8x32xf32>
    %275 = arith.truncf %274 : vector<8x8x32xf32> to vector<8x8x32xbf16>
    %276 = vector.extract_strided_slice %250 {offsets = [0, 0, 32], sizes = [8, 8, 32], strides = [1, 1, 1]} : vector<8x8x128xf32> to vector<8x8x32xf32>
    %277 = arith.truncf %276 : vector<8x8x32xf32> to vector<8x8x32xbf16>
    %278 = vector.extract_strided_slice %252 {offsets = [0, 0, 32], sizes = [8, 8, 32], strides = [1, 1, 1]} : vector<8x8x128xf32> to vector<8x8x32xf32>
    %279 = arith.truncf %278 : vector<8x8x32xf32> to vector<8x8x32xbf16>
    "tpu.trace_start"() <{level = 10 : i32, message = "bqd,bkd->bqk"}> : () -> ()
    %cst_102 = arith.constant dense<0.000000e+00> : vector<8x8x8xf32>
    %280 = tpu.matmul %275, %277, %cst_102 {dimension_numbers = #tpu.dot_dimension_numbers<[2], [2], [1], [1], [0, 0, 0, 1, 1, 1], [0], [0]>} : vector<8x8x32xbf16>, vector<8x8x32xbf16>, vector<8x8x8xf32> -> vector<8x8x8xf32>
    "tpu.trace_stop"() : () -> ()
    %281 = vector.broadcast %47 : vector<8x1x8xf32> to vector<8x8x8xf32>
    %282 = arith.addf %280, %281 : vector<8x8x8xf32>
    %cst_103 = arith.constant dense<0xFF800000> : vector<8x8xf32>
    %283 = vector.multi_reduction <maximumf>, %282, %cst_103 [2] : vector<8x8x8xf32> to vector<8x8xf32>
    %284 = vector.shape_cast %283 : vector<8x8xf32> to vector<8x8x1xf32>
    %285 = vector.broadcast %284 : vector<8x8x1xf32> to vector<8x8x8xf32>
    %286 = arith.subf %282, %285 : vector<8x8x8xf32>
    %287 = math.exp %286 : vector<8x8x8xf32>
    %cst_104 = arith.constant dense<0.000000e+00> : vector<8x8xf32>
    %288 = vector.multi_reduction <add>, %287, %cst_104 [2] : vector<8x8x8xf32> to vector<8x8xf32>
    %289 = vector.shape_cast %288 : vector<8x8xf32> to vector<8x8x1xf32>
    %290 = tpu.reciprocal %289 {approx = true} : vector<8x8x1xf32> -> vector<8x8x1xf32>
    %291 = vector.broadcast %290 : vector<8x8x1xf32> to vector<8x8x8xf32>
    %292 = arith.mulf %287, %291 : vector<8x8x8xf32>
    %293 = arith.truncf %292 : vector<8x8x8xf32> to vector<8x8x8xbf16>
    "tpu.trace_start"() <{level = 10 : i32, message = "bqk,bkd->bqd"}> : () -> ()
    %cst_105 = arith.constant dense<0.000000e+00> : vector<8x8x32xf32>
    %294 = tpu.matmul %293, %279, %cst_105 {dimension_numbers = #tpu.dot_dimension_numbers<[2], [1], [1], [2], [0, 0, 0, 1, 1, 2], [0], [0]>} : vector<8x8x8xbf16>, vector<8x8x32xbf16>, vector<8x8x32xf32> -> vector<8x8x32xf32>
    "tpu.trace_stop"() : () -> ()
    %295 = vector.extract_strided_slice %248 {offsets = [0, 0, 64], sizes = [8, 8, 32], strides = [1, 1, 1]} : vector<8x8x128xf32> to vector<8x8x32xf32>
    %296 = arith.truncf %295 : vector<8x8x32xf32> to vector<8x8x32xbf16>
    %297 = vector.extract_strided_slice %250 {offsets = [0, 0, 64], sizes = [8, 8, 32], strides = [1, 1, 1]} : vector<8x8x128xf32> to vector<8x8x32xf32>
    %298 = arith.truncf %297 : vector<8x8x32xf32> to vector<8x8x32xbf16>
    %299 = vector.extract_strided_slice %252 {offsets = [0, 0, 64], sizes = [8, 8, 32], strides = [1, 1, 1]} : vector<8x8x128xf32> to vector<8x8x32xf32>
    %300 = arith.truncf %299 : vector<8x8x32xf32> to vector<8x8x32xbf16>
    "tpu.trace_start"() <{level = 10 : i32, message = "bqd,bkd->bqk"}> : () -> ()
    %cst_106 = arith.constant dense<0.000000e+00> : vector<8x8x8xf32>
    %301 = tpu.matmul %296, %298, %cst_106 {dimension_numbers = #tpu.dot_dimension_numbers<[2], [2], [1], [1], [0, 0, 0, 1, 1, 1], [0], [0]>} : vector<8x8x32xbf16>, vector<8x8x32xbf16>, vector<8x8x8xf32> -> vector<8x8x8xf32>
    "tpu.trace_stop"() : () -> ()
    %302 = vector.broadcast %47 : vector<8x1x8xf32> to vector<8x8x8xf32>
    %303 = arith.addf %301, %302 : vector<8x8x8xf32>
    %cst_107 = arith.constant dense<0xFF800000> : vector<8x8xf32>
    %304 = vector.multi_reduction <maximumf>, %303, %cst_107 [2] : vector<8x8x8xf32> to vector<8x8xf32>
    %305 = vector.shape_cast %304 : vector<8x8xf32> to vector<8x8x1xf32>
    %306 = vector.broadcast %305 : vector<8x8x1xf32> to vector<8x8x8xf32>
    %307 = arith.subf %303, %306 : vector<8x8x8xf32>
    %308 = math.exp %307 : vector<8x8x8xf32>
    %cst_108 = arith.constant dense<0.000000e+00> : vector<8x8xf32>
    %309 = vector.multi_reduction <add>, %308, %cst_108 [2] : vector<8x8x8xf32> to vector<8x8xf32>
    %310 = vector.shape_cast %309 : vector<8x8xf32> to vector<8x8x1xf32>
    %311 = tpu.reciprocal %310 {approx = true} : vector<8x8x1xf32> -> vector<8x8x1xf32>
    %312 = vector.broadcast %311 : vector<8x8x1xf32> to vector<8x8x8xf32>
    %313 = arith.mulf %308, %312 : vector<8x8x8xf32>
    %314 = arith.truncf %313 : vector<8x8x8xf32> to vector<8x8x8xbf16>
    "tpu.trace_start"() <{level = 10 : i32, message = "bqk,bkd->bqd"}> : () -> ()
    %cst_109 = arith.constant dense<0.000000e+00> : vector<8x8x32xf32>
    %315 = tpu.matmul %314, %300, %cst_109 {dimension_numbers = #tpu.dot_dimension_numbers<[2], [1], [1], [2], [0, 0, 0, 1, 1, 2], [0], [0]>} : vector<8x8x8xbf16>, vector<8x8x32xbf16>, vector<8x8x32xf32> -> vector<8x8x32xf32>
    "tpu.trace_stop"() : () -> ()
    %316 = vector.extract_strided_slice %248 {offsets = [0, 0, 96], sizes = [8, 8, 32], strides = [1, 1, 1]} : vector<8x8x128xf32> to vector<8x8x32xf32>
    %317 = arith.truncf %316 : vector<8x8x32xf32> to vector<8x8x32xbf16>
    %318 = vector.extract_strided_slice %250 {offsets = [0, 0, 96], sizes = [8, 8, 32], strides = [1, 1, 1]} : vector<8x8x128xf32> to vector<8x8x32xf32>
    %319 = arith.truncf %318 : vector<8x8x32xf32> to vector<8x8x32xbf16>
    %320 = vector.extract_strided_slice %252 {offsets = [0, 0, 96], sizes = [8, 8, 32], strides = [1, 1, 1]} : vector<8x8x128xf32> to vector<8x8x32xf32>
    %321 = arith.truncf %320 : vector<8x8x32xf32> to vector<8x8x32xbf16>
    "tpu.trace_start"() <{level = 10 : i32, message = "bqd,bkd->bqk"}> : () -> ()
    %cst_110 = arith.constant dense<0.000000e+00> : vector<8x8x8xf32>
    %322 = tpu.matmul %317, %319, %cst_110 {dimension_numbers = #tpu.dot_dimension_numbers<[2], [2], [1], [1], [0, 0, 0, 1, 1, 1], [0], [0]>} : vector<8x8x32xbf16>, vector<8x8x32xbf16>, vector<8x8x8xf32> -> vector<8x8x8xf32>
    "tpu.trace_stop"() : () -> ()
    %323 = vector.broadcast %47 : vector<8x1x8xf32> to vector<8x8x8xf32>
    %324 = arith.addf %322, %323 : vector<8x8x8xf32>
    %cst_111 = arith.constant dense<0xFF800000> : vector<8x8xf32>
    %325 = vector.multi_reduction <maximumf>, %324, %cst_111 [2] : vector<8x8x8xf32> to vector<8x8xf32>
    %326 = vector.shape_cast %325 : vector<8x8xf32> to vector<8x8x1xf32>
    %327 = vector.broadcast %326 : vector<8x8x1xf32> to vector<8x8x8xf32>
    %328 = arith.subf %324, %327 : vector<8x8x8xf32>
    %329 = math.exp %328 : vector<8x8x8xf32>
    %cst_112 = arith.constant dense<0.000000e+00> : vector<8x8xf32>
    %330 = vector.multi_reduction <add>, %329, %cst_112 [2] : vector<8x8x8xf32> to vector<8x8xf32>
    %331 = vector.shape_cast %330 : vector<8x8xf32> to vector<8x8x1xf32>
    %332 = tpu.reciprocal %331 {approx = true} : vector<8x8x1xf32> -> vector<8x8x1xf32>
    %333 = vector.broadcast %332 : vector<8x8x1xf32> to vector<8x8x8xf32>
    %334 = arith.mulf %329, %333 : vector<8x8x8xf32>
    %335 = arith.truncf %334 : vector<8x8x8xf32> to vector<8x8x8xbf16>
    "tpu.trace_start"() <{level = 10 : i32, message = "bqk,bkd->bqd"}> : () -> ()
    %cst_113 = arith.constant dense<0.000000e+00> : vector<8x8x32xf32>
    %336 = tpu.matmul %335, %321, %cst_113 {dimension_numbers = #tpu.dot_dimension_numbers<[2], [1], [1], [2], [0, 0, 0, 1, 1, 2], [0], [0]>} : vector<8x8x8xbf16>, vector<8x8x32xbf16>, vector<8x8x32xf32> -> vector<8x8x32xf32>
    "tpu.trace_stop"() : () -> ()
    %337 = tpu.concatenate %273, %294, %315, %336 in 2 : vector<8x8x32xf32>, vector<8x8x32xf32>, vector<8x8x32xf32>, vector<8x8x32xf32> -> vector<8x8x128xf32>
    %338 = vector.shape_cast %337 : vector<8x8x128xf32> to vector<64x128xf32>
    %c1_114 = arith.constant 1 : index
    %c0_115 = arith.constant 0 : index
    %c0_116 = arith.constant 0 : index
    %339 = vector.load %arg10[%c1_114, %c0_115, %c0_116] : memref<2x128x128xbf16, #tpu.memory_space<vmem>>, vector<1x128x128xbf16>
    %340 = vector.shape_cast %339 : vector<1x128x128xbf16> to vector<128x128xbf16>
    %341 = arith.truncf %338 : vector<64x128xf32> to vector<64x128xbf16>
    %cst_117 = arith.constant dense<0.000000e+00> : vector<64x128xf32>
    %342 = tpu.matmul %341, %340, %cst_117 {dimension_numbers = #tpu.dot_dimension_numbers<[1], [0], [0], [1], [0, 0, 1, 1], [], []>} : vector<64x128xbf16>, vector<128x128xbf16>, vector<64x128xf32> -> vector<64x128xf32>
    %c1_118 = arith.constant 1 : index
    %c0_119 = arith.constant 0 : index
    %c0_120 = arith.constant 0 : index
    %343 = vector.load %arg11[%c1_118, %c0_119, %c0_120] : memref<2x1x128xf32, #tpu.memory_space<vmem>>, vector<1x1x128xf32>
    %344 = vector.shape_cast %343 : vector<1x1x128xf32> to vector<1x128xf32>
    %345 = vector.broadcast %344 : vector<1x128xf32> to vector<64x128xf32>
    %346 = arith.addf %342, %345 : vector<64x128xf32>
    %347 = arith.addf %238, %346 : vector<64x128xf32>
    %c1_121 = arith.constant 1 : index
    %c0_122 = arith.constant 0 : index
    %c0_123 = arith.constant 0 : index
    %348 = vector.load %arg12[%c1_121, %c0_122, %c0_123] : memref<2x1x128xf32, #tpu.memory_space<vmem>>, vector<1x1x128xf32>
    %349 = vector.shape_cast %348 : vector<1x1x128xf32> to vector<1x128xf32>
    %c1_124 = arith.constant 1 : index
    %c0_125 = arith.constant 0 : index
    %c0_126 = arith.constant 0 : index
    %350 = vector.load %arg13[%c1_124, %c0_125, %c0_126] : memref<2x1x128xf32, #tpu.memory_space<vmem>>, vector<1x1x128xf32>
    %351 = vector.shape_cast %350 : vector<1x1x128xf32> to vector<1x128xf32>
    %cst_127 = arith.constant dense<0.000000e+00> : vector<64xf32>
    %352 = vector.multi_reduction <add>, %347, %cst_127 [1] : vector<64x128xf32> to vector<64xf32>
    %353 = vector.shape_cast %352 : vector<64xf32> to vector<64x1xf32>
    %cst_128 = arith.constant 1.280000e+02 : f32
    %354 = vector.broadcast %cst_128 : f32 to vector<64x1xf32>
    %355 = arith.divf %353, %354 : vector<64x1xf32>
    %356 = vector.broadcast %355 : vector<64x1xf32> to vector<64x128xf32>
    %357 = arith.subf %347, %356 : vector<64x128xf32>
    %358 = arith.mulf %357, %357 : vector<64x128xf32>
    %cst_129 = arith.constant dense<0.000000e+00> : vector<64xf32>
    %359 = vector.multi_reduction <add>, %358, %cst_129 [1] : vector<64x128xf32> to vector<64xf32>
    %360 = vector.shape_cast %359 : vector<64xf32> to vector<64x1xf32>
    %cst_130 = arith.constant 1.280000e+02 : f32
    %361 = vector.broadcast %cst_130 : f32 to vector<64x1xf32>
    %362 = arith.divf %360, %361 : vector<64x1xf32>
    %363 = vector.broadcast %355 : vector<64x1xf32> to vector<64x128xf32>
    %364 = arith.subf %347, %363 : vector<64x128xf32>
    %cst_131 = arith.constant 9.99999996E-13 : f32
    %365 = vector.broadcast %cst_131 : f32 to vector<64x1xf32>
    %366 = arith.addf %362, %365 : vector<64x1xf32>
    %367 = math.rsqrt %366 : vector<64x1xf32>
    %368 = vector.broadcast %367 : vector<64x1xf32> to vector<64x128xf32>
    %369 = arith.mulf %364, %368 : vector<64x128xf32>
    %370 = vector.broadcast %349 : vector<1x128xf32> to vector<64x128xf32>
    %371 = arith.mulf %369, %370 : vector<64x128xf32>
    %372 = vector.broadcast %351 : vector<1x128xf32> to vector<64x128xf32>
    %373 = arith.addf %371, %372 : vector<64x128xf32>
    %c1_132 = arith.constant 1 : index
    %c0_133 = arith.constant 0 : index
    %c0_134 = arith.constant 0 : index
    %374 = vector.load %arg14[%c1_132, %c0_133, %c0_134] : memref<2x128x256xbf16, #tpu.memory_space<vmem>>, vector<1x128x256xbf16>
    %375 = vector.shape_cast %374 : vector<1x128x256xbf16> to vector<128x256xbf16>
    %376 = arith.truncf %373 : vector<64x128xf32> to vector<64x128xbf16>
    %cst_135 = arith.constant dense<0.000000e+00> : vector<64x256xf32>
    %377 = tpu.matmul %376, %375, %cst_135 {dimension_numbers = #tpu.dot_dimension_numbers<[1], [0], [0], [1], [0, 0, 1, 1], [], []>} : vector<64x128xbf16>, vector<128x256xbf16>, vector<64x256xf32> -> vector<64x256xf32>
    %c1_136 = arith.constant 1 : index
    %c0_137 = arith.constant 0 : index
    %c0_138 = arith.constant 0 : index
    %378 = vector.load %arg15[%c1_136, %c0_137, %c0_138] : memref<2x1x256xf32, #tpu.memory_space<vmem>>, vector<1x1x256xf32>
    %379 = vector.shape_cast %378 : vector<1x1x256xf32> to vector<1x256xf32>
    %380 = vector.broadcast %379 : vector<1x256xf32> to vector<64x256xf32>
    %381 = arith.addf %377, %380 : vector<64x256xf32>
    %cst_139 = arith.constant 5.000000e-01 : f32
    %382 = vector.broadcast %cst_139 : f32 to vector<64x256xf32>
    %383 = arith.mulf %382, %381 : vector<64x256xf32>
    %cst_140 = arith.constant 4.471500e-02 : f32
    %384 = vector.broadcast %cst_140 : f32 to vector<64x256xf32>
    %385 = arith.mulf %384, %381 : vector<64x256xf32>
    %386 = arith.mulf %385, %381 : vector<64x256xf32>
    %387 = arith.mulf %386, %381 : vector<64x256xf32>
    %388 = arith.addf %381, %387 : vector<64x256xf32>
    %cst_141 = arith.constant 0.797884583 : f32
    %389 = vector.broadcast %cst_141 : f32 to vector<64x256xf32>
    %390 = arith.mulf %389, %388 : vector<64x256xf32>
    %391 = math.tanh %390 : vector<64x256xf32>
    %cst_142 = arith.constant 1.000000e+00 : f32
    %392 = vector.broadcast %cst_142 : f32 to vector<64x256xf32>
    %393 = arith.addf %392, %391 : vector<64x256xf32>
    %394 = arith.mulf %383, %393 : vector<64x256xf32>
    %c1_143 = arith.constant 1 : index
    %c0_144 = arith.constant 0 : index
    %c0_145 = arith.constant 0 : index
    %395 = vector.load %arg16[%c1_143, %c0_144, %c0_145] : memref<2x256x128xbf16, #tpu.memory_space<vmem>>, vector<1x256x128xbf16>
    %396 = vector.shape_cast %395 : vector<1x256x128xbf16> to vector<256x128xbf16>
    %397 = arith.truncf %394 : vector<64x256xf32> to vector<64x256xbf16>
    %cst_146 = arith.constant dense<0.000000e+00> : vector<64x128xf32>
    %398 = tpu.matmul %397, %396, %cst_146 {dimension_numbers = #tpu.dot_dimension_numbers<[1], [0], [0], [1], [0, 0, 1, 1], [], []>} : vector<64x256xbf16>, vector<256x128xbf16>, vector<64x128xf32> -> vector<64x128xf32>
    %c1_147 = arith.constant 1 : index
    %c0_148 = arith.constant 0 : index
    %c0_149 = arith.constant 0 : index
    %399 = vector.load %arg17[%c1_147, %c0_148, %c0_149] : memref<2x1x128xf32, #tpu.memory_space<vmem>>, vector<1x1x128xf32>
    %400 = vector.shape_cast %399 : vector<1x1x128xf32> to vector<1x128xf32>
    %401 = vector.broadcast %400 : vector<1x128xf32> to vector<64x128xf32>
    %402 = arith.addf %398, %401 : vector<64x128xf32>
    %403 = arith.addf %373, %402 : vector<64x128xf32>
    %c1_150 = arith.constant 1 : index
    %c0_151 = arith.constant 0 : index
    %c0_152 = arith.constant 0 : index
    %404 = vector.load %arg18[%c1_150, %c0_151, %c0_152] : memref<2x1x128xf32, #tpu.memory_space<vmem>>, vector<1x1x128xf32>
    %405 = vector.shape_cast %404 : vector<1x1x128xf32> to vector<1x128xf32>
    %c1_153 = arith.constant 1 : index
    %c0_154 = arith.constant 0 : index
    %c0_155 = arith.constant 0 : index
    %406 = vector.load %arg19[%c1_153, %c0_154, %c0_155] : memref<2x1x128xf32, #tpu.memory_space<vmem>>, vector<1x1x128xf32>
    %407 = vector.shape_cast %406 : vector<1x1x128xf32> to vector<1x128xf32>
    %cst_156 = arith.constant dense<0.000000e+00> : vector<64xf32>
    %408 = vector.multi_reduction <add>, %403, %cst_156 [1] : vector<64x128xf32> to vector<64xf32>
    %409 = vector.shape_cast %408 : vector<64xf32> to vector<64x1xf32>
    %cst_157 = arith.constant 1.280000e+02 : f32
    %410 = vector.broadcast %cst_157 : f32 to vector<64x1xf32>
    %411 = arith.divf %409, %410 : vector<64x1xf32>
    %412 = vector.broadcast %411 : vector<64x1xf32> to vector<64x128xf32>
    %413 = arith.subf %403, %412 : vector<64x128xf32>
    %414 = arith.mulf %413, %413 : vector<64x128xf32>
    %cst_158 = arith.constant dense<0.000000e+00> : vector<64xf32>
    %415 = vector.multi_reduction <add>, %414, %cst_158 [1] : vector<64x128xf32> to vector<64xf32>
    %416 = vector.shape_cast %415 : vector<64xf32> to vector<64x1xf32>
    %cst_159 = arith.constant 1.280000e+02 : f32
    %417 = vector.broadcast %cst_159 : f32 to vector<64x1xf32>
    %418 = arith.divf %416, %417 : vector<64x1xf32>
    %419 = vector.broadcast %411 : vector<64x1xf32> to vector<64x128xf32>
    %420 = arith.subf %403, %419 : vector<64x128xf32>
    %cst_160 = arith.constant 9.99999996E-13 : f32
    %421 = vector.broadcast %cst_160 : f32 to vector<64x1xf32>
    %422 = arith.addf %418, %421 : vector<64x1xf32>
    %423 = math.rsqrt %422 : vector<64x1xf32>
    %424 = vector.broadcast %423 : vector<64x1xf32> to vector<64x128xf32>
    %425 = arith.mulf %420, %424 : vector<64x128xf32>
    %426 = vector.broadcast %405 : vector<1x128xf32> to vector<64x128xf32>
    %427 = arith.mulf %425, %426 : vector<64x128xf32>
    %428 = vector.broadcast %407 : vector<1x128xf32> to vector<64x128xf32>
    %429 = arith.addf %427, %428 : vector<64x128xf32>
    %430 = vector.shape_cast %429 : vector<64x128xf32> to vector<8x8x128xf32>
    %431 = vector.extract_strided_slice %430 {offsets = [0, 0, 0], sizes = [8, 1, 128], strides = [1, 1, 1]} : vector<8x8x128xf32> to vector<8x1x128xf32>
    %432 = vector.shape_cast %431 : vector<8x1x128xf32> to vector<8x128xf32>
    %c0_161 = arith.constant 0 : index
    %c0_162 = arith.constant 0 : index
    %433 = vector.load %arg20[%c0_161, %c0_162] : memref<128x128xbf16, #tpu.memory_space<vmem>>, vector<128x128xbf16>
    %434 = arith.truncf %432 : vector<8x128xf32> to vector<8x128xbf16>
    %cst_163 = arith.constant dense<0.000000e+00> : vector<8x128xf32>
    %435 = tpu.matmul %434, %433, %cst_163 {dimension_numbers = #tpu.dot_dimension_numbers<[1], [0], [0], [1], [0, 0, 1, 1], [], []>} : vector<8x128xbf16>, vector<128x128xbf16>, vector<8x128xf32> -> vector<8x128xf32>
    %c0_164 = arith.constant 0 : index
    %c0_165 = arith.constant 0 : index
    %436 = vector.load %arg21[%c0_164, %c0_165] : memref<1x128xf32, #tpu.memory_space<vmem>>, vector<1x128xf32>
    %437 = vector.broadcast %436 : vector<1x128xf32> to vector<8x128xf32>
    %438 = arith.addf %435, %437 : vector<8x128xf32>
    %439 = math.tanh %438 : vector<8x128xf32>
    %c0_166 = arith.constant 0 : index
    %c0_167 = arith.constant 0 : index
    %440 = vector.load %arg22[%c0_166, %c0_167] : memref<1x128xf32, #tpu.memory_space<vmem>>, vector<1x128xf32>
    %441 = vector.broadcast %440 : vector<1x128xf32> to vector<8x128xf32>
    %442 = arith.mulf %439, %441 : vector<8x128xf32>
    %cst_168 = arith.constant dense<0.000000e+00> : vector<8xf32>
    %443 = vector.multi_reduction <add>, %442, %cst_168 [1] : vector<8x128xf32> to vector<8xf32>
    %444 = vector.shape_cast %443 : vector<8xf32> to vector<8x1xf32>
    %c0_169 = arith.constant 0 : index
    %c0_170 = arith.constant 0 : index
    %445 = vector.load %arg23[%c0_169, %c0_170] : memref<1x1xf32, #tpu.memory_space<vmem>>, vector<1x1xf32>
    %446 = vector.broadcast %445 : vector<1x1xf32> to vector<8x1xf32>
    %447 = arith.addf %444, %446 : vector<8x1xf32>
    %448 = vector.shape_cast %447 : vector<8x1xf32> to vector<8x1x1xf32>
    %449 = vector.shape_cast %448 : vector<8x1x1xf32> to vector<8x1x1xf32>
    %450 = vector.broadcast %449 : vector<8x1x1xf32> to vector<8x1x128xf32>
    %c0_171 = arith.constant 0 : index
    %c0_172 = arith.constant 0 : index
    %c0_173 = arith.constant 0 : index
    %451 = vector.load %arg24[%c0_171, %c0_172, %c0_173] : memref<8x1x128xf32, #tpu.memory_space<vmem>>, vector<8x1x128xf32>
    tpu.vector_store %arg24[%c0_171, %c0_172, %c0_173], %450 {strides = array<i32>} : memref<8x1x128xf32, #tpu.memory_space<vmem>>, vector<8x1x128xf32>,
    return
  }
  func.func @transform_0(%arg0: i32) -> (i32, i32, i32) {
    %c0_i32 = arith.constant 0 : i32
    %c0_i32_0 = arith.constant 0 : i32
    %c0_i32_1 = arith.constant 0 : i32
    return %arg0, %c0_i32, %c0_i32_0 : i32, i32, i32
  }
  func.func @transform_1(%arg0: i32) -> (i32, i32, i32) {
    %c0_i32 = arith.constant 0 : i32
    %c0_i32_0 = arith.constant 0 : i32
    %c0_i32_1 = arith.constant 0 : i32
    return %arg0, %c0_i32, %c0_i32_0 : i32, i32, i32
  }
  func.func @transform_2(%arg0: i32) -> (i32, i32) {
    %c0_i32 = arith.constant 0 : i32
    %c0_i32_0 = arith.constant 0 : i32
    %c0_i32_1 = arith.constant 0 : i32
    return %c0_i32, %c0_i32_0 : i32, i32
  }
  func.func @transform_3(%arg0: i32) -> (i32, i32) {
    %c0_i32 = arith.constant 0 : i32
    %c0_i32_0 = arith.constant 0 : i32
    %c0_i32_1 = arith.constant 0 : i32
    return %c0_i32, %c0_i32_0 : i32, i32
  }
  func.func @transform_4(%arg0: i32) -> (i32, i32) {
    %c0_i32 = arith.constant 0 : i32
    %c0_i32_0 = arith.constant 0 : i32
    %c0_i32_1 = arith.constant 0 : i32
    return %c0_i32, %c0_i32_0 : i32, i32
  }
  func.func @transform_5(%arg0: i32) -> (i32, i32) {
    %c0_i32 = arith.constant 0 : i32
    %c0_i32_0 = arith.constant 0 : i32
    %c0_i32_1 = arith.constant 0 : i32
    return %c0_i32, %c0_i32_0 : i32, i32
  }
  func.func @transform_6(%arg0: i32) -> (i32, i32) {
    %c0_i32 = arith.constant 0 : i32
    %c0_i32_0 = arith.constant 0 : i32
    %c0_i32_1 = arith.constant 0 : i32
    return %c0_i32, %c0_i32_0 : i32, i32
  }
  func.func @transform_7(%arg0: i32) -> (i32, i32, i32) {
    %c0_i32 = arith.constant 0 : i32
    %c0_i32_0 = arith.constant 0 : i32
    %c0_i32_1 = arith.constant 0 : i32
    %c0_i32_2 = arith.constant 0 : i32
    return %c0_i32, %c0_i32_0, %c0_i32_1 : i32, i32, i32
  }
  func.func @transform_8(%arg0: i32) -> (i32, i32, i32) {
    %c0_i32 = arith.constant 0 : i32
    %c0_i32_0 = arith.constant 0 : i32
    %c0_i32_1 = arith.constant 0 : i32
    %c0_i32_2 = arith.constant 0 : i32
    return %c0_i32, %c0_i32_0, %c0_i32_1 : i32, i32, i32
  }
  func.func @transform_9(%arg0: i32) -> (i32, i32, i32) {
    %c0_i32 = arith.constant 0 : i32
    %c0_i32_0 = arith.constant 0 : i32
    %c0_i32_1 = arith.constant 0 : i32
    %c0_i32_2 = arith.constant 0 : i32
    return %c0_i32, %c0_i32_0, %c0_i32_1 : i32, i32, i32
  }
  func.func @transform_10(%arg0: i32) -> (i32, i32, i32) {
    %c0_i32 = arith.constant 0 : i32
    %c0_i32_0 = arith.constant 0 : i32
    %c0_i32_1 = arith.constant 0 : i32
    %c0_i32_2 = arith.constant 0 : i32
    return %c0_i32, %c0_i32_0, %c0_i32_1 : i32, i32, i32
  }
  func.func @transform_11(%arg0: i32) -> (i32, i32, i32) {
    %c0_i32 = arith.constant 0 : i32
    %c0_i32_0 = arith.constant 0 : i32
    %c0_i32_1 = arith.constant 0 : i32
    %c0_i32_2 = arith.constant 0 : i32
    return %c0_i32, %c0_i32_0, %c0_i32_1 : i32, i32, i32
  }
  func.func @transform_12(%arg0: i32) -> (i32, i32, i32) {
    %c0_i32 = arith.constant 0 : i32
    %c0_i32_0 = arith.constant 0 : i32
    %c0_i32_1 = arith.constant 0 : i32
    %c0_i32_2 = arith.constant 0 : i32
    return %c0_i32, %c0_i32_0, %c0_i32_1 : i32, i32, i32
  }
  func.func @transform_13(%arg0: i32) -> (i32, i32, i32) {
    %c0_i32 = arith.constant 0 : i32
    %c0_i32_0 = arith.constant 0 : i32
    %c0_i32_1 = arith.constant 0 : i32
    %c0_i32_2 = arith.constant 0 : i32
    return %c0_i32, %c0_i32_0, %c0_i32_1 : i32, i32, i32
  }
  func.func @transform_14(%arg0: i32) -> (i32, i32, i32) {
    %c0_i32 = arith.constant 0 : i32
    %c0_i32_0 = arith.constant 0 : i32
    %c0_i32_1 = arith.constant 0 : i32
    %c0_i32_2 = arith.constant 0 : i32
    return %c0_i32, %c0_i32_0, %c0_i32_1 : i32, i32, i32
  }
  func.func @transform_15(%arg0: i32) -> (i32, i32, i32) {
    %c0_i32 = arith.constant 0 : i32
    %c0_i32_0 = arith.constant 0 : i32
    %c0_i32_1 = arith.constant 0 : i32
    %c0_i32_2 = arith.constant 0 : i32
    return %c0_i32, %c0_i32_0, %c0_i32_1 : i32, i32, i32
  }
  func.func @transform_16(%arg0: i32) -> (i32, i32, i32) {
    %c0_i32 = arith.constant 0 : i32
    %c0_i32_0 = arith.constant 0 : i32
    %c0_i32_1 = arith.constant 0 : i32
    %c0_i32_2 = arith.constant 0 : i32
    return %c0_i32, %c0_i32_0, %c0_i32_1 : i32, i32, i32
  }
  func.func @transform_17(%arg0: i32) -> (i32, i32, i32) {
    %c0_i32 = arith.constant 0 : i32
    %c0_i32_0 = arith.constant 0 : i32
    %c0_i32_1 = arith.constant 0 : i32
    %c0_i32_2 = arith.constant 0 : i32
    return %c0_i32, %c0_i32_0, %c0_i32_1 : i32, i32, i32
  }
  func.func @transform_18(%arg0: i32) -> (i32, i32, i32) {
    %c0_i32 = arith.constant 0 : i32
    %c0_i32_0 = arith.constant 0 : i32
    %c0_i32_1 = arith.constant 0 : i32
    %c0_i32_2 = arith.constant 0 : i32
    return %c0_i32, %c0_i32_0, %c0_i32_1 : i32, i32, i32
  }
  func.func @transform_19(%arg0: i32) -> (i32, i32) {
    %c0_i32 = arith.constant 0 : i32
    %c0_i32_0 = arith.constant 0 : i32
    %c0_i32_1 = arith.constant 0 : i32
    return %c0_i32, %c0_i32_0 : i32, i32
  }
  func.func @transform_20(%arg0: i32) -> (i32, i32) {
    %c0_i32 = arith.constant 0 : i32
    %c0_i32_0 = arith.constant 0 : i32
    %c0_i32_1 = arith.constant 0 : i32
    return %c0_i32, %c0_i32_0 : i32, i32
  }
  func.func @transform_21(%arg0: i32) -> (i32, i32) {
    %c0_i32 = arith.constant 0 : i32
    %c0_i32_0 = arith.constant 0 : i32
    %c0_i32_1 = arith.constant 0 : i32
    return %c0_i32, %c0_i32_0 : i32, i32
  }
  func.func @transform_22(%arg0: i32) -> (i32, i32) {
    %c0_i32 = arith.constant 0 : i32
    %c0_i32_0 = arith.constant 0 : i32
    %c0_i32_1 = arith.constant 0 : i32
    return %c0_i32, %c0_i32_0 : i32, i32
  }
  func.func @transform_23(%arg0: i32) -> (i32, i32, i32) {
    %c0_i32 = arith.constant 0 : i32
    %c0_i32_0 = arith.constant 0 : i32
    %c0_i32_1 = arith.constant 0 : i32
    return %arg0, %c0_i32, %c0_i32_0 : i32, i32, i32
  }
}

</mosaic_0001>

<bundles_post_ra>
// kernel: _lambda_.1
= control target key start
LH: loop header
LB: loop body
LE: loop exit
PB: predicated region body
PF: predicated region fallthrough
CT: control target
= control target key end

     0   :  { %s17513_s0 = inlined_call_operand.vmem [shape: s32[16,8,1], index: 0, kind: input, shape index: {}]   ;;  %s17514_s1 = inlined_call_operand.vmem [shape: f32[16,1,8], index: 1, kind: input, shape index: {}]   ;;  %s17515_s2 = inlined_call_operand.vmem [shape: f32[64,128], index: 2, kind: input, shape index: {}]   ;;  %s17516_s3 = inlined_call_operand.vmem [shape: f32[8,128], index: 3, kind: input, shape index: {}]   ;;  %s17517_s4 = inlined_call_operand.vmem [shape: f32[1,128], index: 4, kind: input, shape index: {}]   ;;  %s17518_s5 = inlined_call_operand.vmem [shape: f32[1,128], index: 5, kind: input, shape index: {}]   ;;  %s17519_s6 = inlined_call_operand.hbm [shape: f32[1,128], index: 6, kind: input, shape index: {}]   ;;  %s17520_s7 = inlined_call_operand.hbm [shape: bf16[2,128,384], index: 7, kind: input, shape index: {}]   ;;  %s17521_s8 = inlined_call_operand.vmem [shape: f32[2,1,384], index: 8, kind: input, shape index: {}]   ;;  %s17522_s9 = inlined_call_operand.vmem [shape: bf16[2,128,128], index: 9, kind: input, shape index: {}]   ;;  %s17523_s10 = inlined_call_operand.vmem [shape: f32[2,1,128], index: 10, kind: input, shape index: {}]   ;;  %s17524_s11 = inlined_call_operand.hbm [shape: f32[2,1,128], index: 11, kind: input, shape index: {}]   ;;  %s17525_s12 = inlined_call_operand.hbm [shape: f32[2,1,128], index: 12, kind: input, shape index: {}]   ;;  %s17526_s13 = inlined_call_operand.hbm [shape: bf16[2,128,256], index: 13, kind: input, shape index: {}]   ;;  %s17527_s14 = inlined_call_operand.vmem [shape: f32[2,1,256], index: 14, kind: input, shape index: {}]   ;;  %s17528_s15 = inlined_call_operand.hbm [shape: bf16[2,256,128], index: 15, kind: input, shape index: {}]   ;;  %s17529_s16 = inlined_call_operand.hbm [shape: f32[2,1,128], index: 16, kind: input, shape index: {}]   ;;  %s17530_s17 = inlined_call_operand.hbm [shape: f32[2,1,128], index: 17, kind: input, shape index: {}]   ;;  %s17531_s18 = inlined_call_operand.hbm [shape: f32[2,1,128], index: 18, kind: input, shape index: {}]   ;;  %s17532_s19 = inlined_call_operand.hbm [shape: bf16[128,128], index: 19, kind: input, shape index: {}]   ;;  %s17533_s20 = inlined_call_operand.hbm [shape: f32[1,128], index: 20, kind: input, shape index: {}]   ;;  %s17534_s21 = inlined_call_operand.hbm [shape: f32[1,128], index: 21, kind: input, shape index: {}]   ;;  %s17535_s22 = inlined_call_operand.<no memory space> [shape: f32[1,1], index: 22, kind: input, shape index: {}]   ;;  %s17536_s23 = inlined_call_operand.vmem [shape: f32[16,1,128], index: 23, kind: output, shape index: {}]  }
   0x1   :  { %17582 = sst [smem:[#allocation52_spill]] %s17513_s0  ;;  %v28_v0 = vstv %s17535_s22 }
   0x2   :  { %17583 = sst [smem:[#allocation53_spill]] %s17514_s1  ;;  %29 = vst [vmem:[#allocation2] sm:$0x1] %v28_v0 }
   0x3   :  { %17584 = sst [smem:[#allocation54_spill]] %s17515_s2 }
   0x4   :  { %17585 = sst [smem:[#allocation55_spill]] %s17516_s3 }
   0x5   :  { %17586 = sst [smem:[#allocation56_spill]] %s17517_s4 }
   0x6   :  { %17587 = sst [smem:[#allocation57_spill]] %s17518_s5 }
   0x7   :  { %17588 = sst [smem:[#allocation58_spill]] %s17519_s6 }
   0x8   :  { %17589 = sst [smem:[#allocation59_spill]] %s17520_s7 }
   0x9   :  { %17590 = sst [smem:[#allocation60_spill]] %s17524_s11 }
   0xa   :  { %17591 = sst [smem:[#allocation61_spill]] %s17525_s12 }
   0xb   :  { %30 = vsyncpa [#allocation4], 0 }
   0xc   :  { %31 = vsyncpa [#allocation6], 0 }
   0xd   :  { %32 = vsyncpa [#allocation9], 0 }
   0xe   :  { %33 = vsyncpa [#allocation12], 0 }
   0xf   :  { %34 = vsyncpa [#allocation15], 0 }
  0x10   :  { %35 = vsyncpa [#allocation18], 0 }
  0x11   :  { %36 = vsyncpa [#allocation21], 0  ;;  %s14588_s24 = smov 0  }
  0x12 LB: > { %s14438_s22 = smov [#allocation5]   ;;  %s17538_s5 = sadd.s32 4294967295, %s14436_s24   ;;  %s14436_s24 = sphi %s14588_s24, %s42_s24  }
  0x13   : > { %s601_s25 = sshll.u32 %s14438_s22, 4  ;;  %p11583_p0 = scmp.ge.s32.totalorder %s14436_s24, 1  ;;  %s602_s25 = int_to_ptr.vmem [resolvable:$true] %s601_s25 }
  0x14   : > { %p566_p1 = scmp.lt.s32.totalorder %s14436_s24, 3  ;;  %p14598_p2 = scmp.eq.s32.totalorder %s17538_s5, 0 }
  0x15   : > { %s14439_s6 = smov [#allocation8]   ;;  %s14440_s7 = smov [#allocation11]  }
  0x16   : > { %s17592_s1 = scalar_select %p14598_p2, 1, 0 }
  0x17   : > { %p14602_p3 = pnand %p11583_p0, %p566_p1  ;;  %s636_s27 = sshll.u32 %s14439_s6, 4  ;;  %s14614_s27 = int_to_ptr.vmem [resolvable:$true] %s636_s27 }
  0x18   : > { %s665_s28 = sshll.u32 %s14440_s7, 4  ;;  %s14101_s3 = scalar_lea.vmem %s602_s25, 6144  ;;  %s14616_s28 = int_to_ptr.vmem [resolvable:$true] %s665_s28 }
  0x19   : > { %s17593_s26 = scalar_select %p14602_p3, 1, 0 }
  0x1a   : > { %p13302_p4 = pneg %p14602_p3  ;;  %p14102_p7 = scmp.ne.s32.totalorder %s602_s25, %s14101_s3 }
  0x1b   : > { %p14109_p10 = scmp.lt.s32.totalorder %s602_s25, %s602_s25  ;;  %p14110_p11 = scmp.lt.s32.totalorder %s14101_s3, %s14101_s3 }
  0x1c   : > { %p14610_p5 = pnand %p14598_p2, %p13302_p4 }
  0x1d   : > { %p14111_p12 = por %p14110_p11, %p14109_p10 }
  0x1e   : > { %p14620_p6 = pneg %p14610_p5 }
  0x20   : > { %p14104_p8 = pnand %p14102_p7, %p14620_p6 }
  0x22   : > { %p14105_p9 = pneg %p14104_p8 }
  0x24   : > { %p14112_p13 = pnand %p14111_p12, %p14105_p9 }
  0x26   : > { %14115 = shalt.err (!%p14112_p13)
}
  0x27   : > { %s14441_s0 = smov 192   ;;  %s14442_s4 = smov 12  }
  0x28   : > { %s17596_s6 = sld [smem:[#allocation59_spill]]  ;;  %s14127_s7 = scalar_lea.vmem %s14614_s27, 32 }
  0x29   : > { %p14128_p0 = scmp.ne.s32.totalorder %s14614_s27, %s14127_s7  ;;  %p14135_p7 = scmp.lt.s32.totalorder %s14614_s27, %s14614_s27 }
  0x2a   : > { %p14136_p8 = scmp.lt.s32.totalorder %s14127_s7, %s14127_s7 }
  0x2b   : > { %p14130_p1 = pnand %p14128_p0, %p14620_p6 }
  0x2c   : > { %p14137_p9 = por %p14136_p8, %p14135_p7 }
  0x2d   : > { %p14131_p4 = pneg %p14130_p1 }
  0x2e   : > { %13308 = dma.hbm_to_vmem [thread:$0]  (!%p14610_p5), %s17596_s6, 6144, %s602_s25, [#allocation6], %s14441_s0, %s14441_s0, %s14442_s4  }
  0x2f   : > { %p14138_p10 = pnand %p14137_p9, %p14131_p4 }
  0x31   : > { %14141 = shalt.err (!%p14138_p10)
}
  0x32   : > { %s17539_s3 = smov 16   ;;  %s17541_s30 = smov 1  }
  0x33   : > { %s17597_s12 = sld [smem:[#allocation61_spill]]  ;;  %s14153_s4 = scalar_lea.vmem %s14616_s28, 4096 }
  0x34   : > { %p14154_p11 = scmp.ne.s32.totalorder %s14616_s28, %s14153_s4  ;;  %p14161_p0 = scmp.lt.s32.totalorder %s14616_s28, %s14616_s28 }
  0x35   : > { %p14162_p1 = scmp.lt.s32.totalorder %s14153_s4, %s14153_s4 }
  0x36   : > { %p14156_p12 = pnand %p14154_p11, %p14620_p6 }
  0x37   : > { %p14163_p4 = por %p14162_p1, %p14161_p0 }
  0x38   : > { %p14157_p13 = pneg %p14156_p12 }
  0x39   : > { %13314 = dma.hbm_to_vmem [thread:$0]  (!%p14610_p5), %s17597_s12, 32, %s14614_s27, [#allocation9], %s17539_s3, %s17539_s3, %s17541_s30  }
  0x3a   : > { %p14164_p7 = pnand %p14163_p4, %p14157_p13 }
  0x3c   : > { %14167 = shalt.err (!%p14164_p7)
}
  0x3d   : > { %s14445_s22 = smov 64   ;;  %s14446_s6 = smov 4  }
  0x3e   : > { %13320 = dma.hbm_to_vmem [thread:$0]  (!%p14610_p5), %s17528_s15, 4096, %s14616_s28, [#allocation12], %s14445_s22, %s14445_s22, %s14446_s6  }
  0x3f   : > { %s14447_s25 = smov [#allocation14]   ;;  %s14448_s5 = smov [#allocation17]  }
  0x40   : > { %s691_s0 = sshll.u32 %s14447_s25, 4  ;;  %s717_s4 = sshll.u32 %s14448_s5, 4  ;;  %s692_s0 = int_to_ptr.vmem [resolvable:$true] %s691_s0  ;;  %s718_s4 = int_to_ptr.vmem [resolvable:$true] %s717_s4 }
  0x41   : > { %s14179_s3 = scalar_lea.vmem %s692_s0, 32  ;;  %p14187_p11 = scmp.lt.s32.totalorder %s692_s0, %s692_s0 }
  0x42   : > { %p14180_p8 = scmp.ne.s32.totalorder %s692_s0, %s14179_s3  ;;  %p14188_p12 = scmp.lt.s32.totalorder %s14179_s3, %s14179_s3 }
  0x44   : > { %p14182_p9 = pnand %p14180_p8, %p14620_p6  ;;  %p14189_p13 = por %p14188_p12, %p14187_p11 }
  0x46   : > { %p14183_p10 = pneg %p14182_p9 }
  0x48   : > { %p14190_p0 = pnand %p14189_p13, %p14183_p10 }
  0x4a   : > { %14193 = shalt.err (!%p14190_p0)
}
  0x4b   : > { %s17598_s28 = smov 16   ;;  %s14205_s5 = scalar_lea.vmem %s718_s4, 1024 }
  0x4c   : > { %13326 = dma.hbm_to_vmem [thread:$0]  (!%p14610_p5), %s17530_s17, 32, %s692_s0, [#allocation15], %s17598_s28, %s17598_s28, %s17541_s30  }
  0x4d   : > { %p14206_p1 = scmp.ne.s32.totalorder %s718_s4, %s14205_s5  ;;  %p14213_p8 = scmp.lt.s32.totalorder %s718_s4, %s718_s4 }
  0x4e   : > { %p14214_p9 = scmp.lt.s32.totalorder %s14205_s5, %s14205_s5 }
  0x4f   : > { %p14208_p4 = pnand %p14206_p1, %p14620_p6 }
  0x50   : > { %p14215_p11 = por %p14214_p9, %p14213_p8 }
  0x51   : > { %p14209_p7 = pneg %p14208_p4 }
  0x53   : > { %p14216_p10 = pnand %p14215_p11, %p14209_p7 }
  0x55   : > { %14219 = shalt.err (!%p14216_p10)
}
  0x56   : > { %13332 = dma.hbm_to_vmem [thread:$0]  (!%p14610_p5), %s17532_s19, 1024, %s718_s4, [#allocation18], %s14445_s22, %s14445_s22, %s14446_s6  }
  0x57   : > { %s14449_s0 = smov [#allocation3]   ;;  %s14450_s7 = smov [#allocation7]  }
  0x58   : > { %s591_s27 = sshll.u32 %s14449_s0, 4  ;;  %s623_s30 = sshll.u32 %s14450_s7, 4  ;;  %s592_s27 = int_to_ptr.vmem [resolvable:$true] %s591_s27  ;;  %s624_s30 = int_to_ptr.vmem [resolvable:$true] %s623_s30 }
  0x59   : > { %s14231_s5 = scalar_lea.vmem %s592_s27, 16  ;;  %s14238_s12 = scalar_lea.vmem %s592_s27, 32 }
  0x5a   : > { %p14232_p12 = scmp.ne.s32.totalorder %s592_s27, %s14231_s5  ;;  %p14239_p1 = scmp.lt.s32.totalorder %s592_s27, %s592_s27 }
  0x5b   : > { %p14240_p4 = scmp.lt.s32.totalorder %s14238_s12, %s14231_s5 }
  0x5c   : > { %p14234_p13 = pnand %p14232_p12, %p14620_p6 }
  0x5d   : > { %p14241_p7 = por %p14240_p4, %p14239_p1 }
  0x5e   : > { %p14235_p0 = pneg %p14234_p13 }
  0x60   : > { %p14242_p8 = pnand %p14241_p7, %p14235_p0 }
  0x62   : > { %14245 = shalt.err (!%p14242_p8)
}
  0x63   : > { %s17599_s4 = sld [smem:[#allocation58_spill]]  ;;  %s14257_s3 = scalar_lea.vmem %s624_s30, 32 }
  0x64   : > { %p14258_p9 = scmp.ne.s32.totalorder %s624_s30, %s14257_s3  ;;  %p14265_p12 = scmp.lt.s32.totalorder %s624_s30, %s624_s30 }
  0x65   : > { %p14266_p13 = scmp.lt.s32.totalorder %s14257_s3, %s14257_s3 }
  0x66   : > { %p14260_p11 = pnand %p14258_p9, %p14620_p6 }
  0x67   : > { %p14267_p2 = por %p14266_p13, %p14265_p12 }
  0x68   : > { %p14261_p10 = pneg %p14260_p11 }
  0x69   : > { %13305 = dma.hbm_to_vmem [thread:$0]  (!%p14610_p5), %s17599_s4, 16, %s592_s27, [#allocation4]  }
  0x6a   : > { %p14268_p3 = pnand %p14267_p2, %p14261_p10 }
  0x6c   : > { %14271 = shalt.err (!%p14268_p3)
}
  0x6d   : > { %s17600_s12 = smov 1   ;;  %s17601_s11 = sld [smem:[#allocation60_spill]] }
  0x6e   : > { %s14451_s27 = smov [#allocation10]  }
  0x6f   : > { %s649_s7 = sshll.u32 %s14451_s27, 4  ;;  %s650_s7 = int_to_ptr.vmem [resolvable:$true] %s649_s7 }
  0x70   : > { %s14283_s5 = scalar_lea.vmem %s650_s7, 4096  ;;  %p14291_p2 = scmp.lt.s32.totalorder %s650_s7, %s650_s7 }
  0x71   : > { %p14284_p0 = scmp.ne.s32.totalorder %s650_s7, %s14283_s5  ;;  %p14292_p3 = scmp.lt.s32.totalorder %s14283_s5, %s14283_s5 }
  0x73   : > { %13311 = dma.hbm_to_vmem [thread:$0]  (!%p14610_p5), %s17601_s11, 32, %s624_s30, [#allocation6], %s17598_s28, %s17598_s28, %s17600_s12  }
  0x74   : > { %p14286_p1 = pnand %p14284_p0, %p14620_p6  ;;  %p14293_p7 = por %p14292_p3, %p14291_p2 }
  0x76   : > { %p14287_p4 = pneg %p14286_p1 }
  0x78   : > { %p14294_p8 = pnand %p14293_p7, %p14287_p4 }
  0x7a   : > { %14297 = shalt.err (!%p14294_p8)
}
  0x7b   : > { %s14452_s22 = smov 128   ;;  %s14453_s6 = smov 8  }
  0x7c   : > { %13317 = dma.hbm_to_vmem [thread:$0]  (!%p14610_p5), %s17526_s13, 4096, %s650_s7, [#allocation9], %s14452_s22, %s14452_s22, %s14453_s6  }
  0x7d   : > { %s14454_s3 = smov [#allocation13]   ;;  %s14455_s0 = smov [#allocation16]  }
  0x7e   : > { %s678_s25 = sshll.u32 %s14454_s3, 4  ;;  %s704_s27 = sshll.u32 %s14455_s0, 4  ;;  %s679_s25 = int_to_ptr.vmem [resolvable:$true] %s678_s25  ;;  %s705_s27 = int_to_ptr.vmem [resolvable:$true] %s704_s27 }
  0x7f   : > { %s14309_s11 = scalar_lea.vmem %s679_s25, 32  ;;  %p14317_p12 = scmp.lt.s32.totalorder %s679_s25, %s679_s25 }
  0x80   : > { %p14310_p9 = scmp.ne.s32.totalorder %s679_s25, %s14309_s11  ;;  %p14318_p13 = scmp.lt.s32.totalorder %s14309_s11, %s14309_s11 }
  0x82   : > { %p14312_p11 = pnand %p14310_p9, %p14620_p6  ;;  %p14319_p0 = por %p14318_p13, %p14317_p12 }
  0x84   : > { %p14313_p10 = pneg %p14312_p11 }
  0x86   : > { %p14320_p1 = pnand %p14319_p0, %p14313_p10 }
  0x88   : > { %14323 = shalt.err (!%p14320_p1)
}
  0x89   : > { %13323 = dma.hbm_to_vmem [thread:$0]  (!%p14610_p5), %s17529_s16, 32, %s679_s25, [#allocation12], %s17598_s28, %s17598_s28, %s17600_s12  }
  0x8a   : > { %s14335_s22 = scalar_lea.vmem %s705_s27, 32  ;;  %p14343_p7 = scmp.lt.s32.totalorder %s705_s27, %s705_s27 }
  0x8b   : > { %p14336_p4 = scmp.ne.s32.totalorder %s705_s27, %s14335_s22  ;;  %p14344_p8 = scmp.lt.s32.totalorder %s14335_s22, %s14335_s22 }
  0x8d   : > { %p14338_p2 = pnand %p14336_p4, %p14620_p6  ;;  %p14345_p9 = por %p14344_p8, %p14343_p7 }
  0x8f   : > { %p14339_p3 = pneg %p14338_p2 }
  0x91   : > { %p14346_p11 = pnand %p14345_p9, %p14339_p3 }
  0x93   : > { %14349 = shalt.err (!%p14346_p11)
}
  0x94   : > { %13329 = dma.hbm_to_vmem [thread:$0]  (!%p14610_p5), %s17531_s18, 32, %s705_s27, [#allocation15], %s17598_s28, %s17598_s28, %s17600_s12  }
  0x95   : > { %s14456_s4 = smov [#allocation19]   ;;  %s14457_s3 = smov [#allocation20]  }
  0x96   : > { %s731_s30 = sshll.u32 %s14456_s4, 4  ;;  %s742_s25 = sshll.u32 %s14457_s3, 4  ;;  %s732_s30 = int_to_ptr.vmem [resolvable:$true] %s731_s30  ;;  %s743_s25 = int_to_ptr.vmem [resolvable:$true] %s742_s25 }
  0x97   : > { %s14361_s0 = scalar_lea.vmem %s732_s30, 16  ;;  %s14368_s7 = scalar_lea.vmem %s732_s30, 32 }
  0x98   : > { %p14362_p10 = scmp.ne.s32.totalorder %s732_s30, %s14361_s0  ;;  %p14369_p0 = scmp.lt.s32.totalorder %s732_s30, %s732_s30 }
  0x99   : > { %p14370_p1 = scmp.lt.s32.totalorder %s14368_s7, %s14361_s0 }
  0x9a   : > { %p14364_p12 = pnand %p14362_p10, %p14620_p6 }
  0x9b   : > { %p14371_p4 = por %p14370_p1, %p14369_p0 }
  0x9c   : > { %p14365_p13 = pneg %p14364_p12 }
  0x9e   : > { %p14372_p2 = pnand %p14371_p4, %p14365_p13 }
  0xa0   : > { %14375 = shalt.err (!%p14372_p2)
}
  0xa1   : > { %13335 = dma.hbm_to_vmem [thread:$0]  (!%p14610_p5), %s17533_s20, 16, %s732_s30, [#allocation18]  }
  0xa2   : > { %s14387_s12 = scalar_lea.vmem %s743_s25, 16  ;;  %s14394_s27 = scalar_lea.vmem %s743_s25, 32 }
  0xa3   : > { %p14388_p3 = scmp.ne.s32.totalorder %s743_s25, %s14387_s12  ;;  %p14395_p9 = scmp.lt.s32.totalorder %s743_s25, %s743_s25 }
  0xa4   : > { %p14396_p11 = scmp.lt.s32.totalorder %s14394_s27, %s14387_s12 }
  0xa5   : > { %p14390_p7 = pnand %p14388_p3, %p14620_p6 }
  0xa6   : > { %p14397_p10 = por %p14396_p11, %p14395_p9 }
  0xa7   : > { %p14391_p8 = pneg %p14390_p7 }
  0xa9   : > { %p14398_p12 = pnand %p14397_p10, %p14391_p8 }
  0xab   : > { %14401 = shalt.err (!%p14398_p12)
}
  0xac   : > { %13338 = dma.hbm_to_vmem [thread:$0]  (!%p14610_p5), %s17534_s21, 16, %s743_s25, [#allocation21]  }
  0xad   : > { %p17602_p13 = scmp.ne.s32.totalorder %s17593_s26, 0 }
  0xaf   : > { %775 = sbr.rel (%p17602_p13) target bundleno = 9577 (0x2569), region = 112 }
  0xb4   : > { %p17603_p0 = scmp.ne.s32.totalorder %s17592_s1, 0 }
  0xb6   : > { %14407 = dma.done.wait (%p17603_p0), [#allocation4], 16  }
  0xb7   : > { %14409 = vsyncadd (%p17603_p0), [#allocation4], 4294967280 }
  0xb8   : > { %14411 = dma.done.wait (%p17603_p0), [#allocation6], 6176  }
  0xb9   : > { %14413 = vsyncadd (%p17603_p0), [#allocation6], 4294961120 }
  0xba   : > { %14415 = dma.done.wait (%p17603_p0), [#allocation9], 4128  }
  0xbb   : > { %14417 = vsyncadd (%p17603_p0), [#allocation9], 4294963168 }
  0xbc   : > { %14419 = dma.done.wait (%p17603_p0), [#allocation12], 4128  }
  0xbd   : > { %14421 = vsyncadd (%p17603_p0), [#allocation12], 4294963168 }
  0xbe   : > { %14423 = dma.done.wait (%p17603_p0), [#allocation15], 64  }
  0xbf   : > { %14425 = vsyncadd (%p17603_p0), [#allocation15], 4294967232 }
  0xc0   : > { %14427 = dma.done.wait (%p17603_p0), [#allocation18], 1040  }
  0xc1   : > { %14429 = vsyncadd (%p17603_p0), [#allocation18], 4294966256 }
  0xc2   : > { %14431 = dma.done.wait (%p17603_p0), [#allocation21], 16  }
  0xc3   : > { %14433 = vsyncadd (%p17603_p0), [#allocation21], 4294967280  ;;  %s17604_s26 = sadd.s32 4294967295, %s14436_s24   ;;  %v17547_v1 = vmov 0   ;;  %s17605_s30 = sld [smem:[#allocation52_spill]]  ;;  %v911_v18 = vlaneseq  ;;  %vm969_vm0 = vcmask 523264  }
  0xc4   : > { %s11610_s2 = sshll.u32 %s17604_s26, 3  ;;  %13399 = vset.pattern.permute.xlu1 %v17547_v1  ;;  %13398 = vset.pattern.permute.xlu0 %v17547_v1  ;;  %s17606_s0 = sld [smem:[#allocation54_spill]]  ;;  %v17549_v22 = vmov 0.0   ;;  %v13520_v63 = vld [vmem:[#allocation5 + $0xa8] ss:$12 sps:$4 sm:$0xff]   ;;  %vm14460_vm9 = vmmov 0  }
  0xc5   : > { %p887_p5 = scmp.lt.s32.totalorder %s11610_s2, 15  ;;  %v912_v19 = vand.u32 127, %v911_v18  ;;  %s17607_s5 = sld [smem:[#allocation55_spill]]  ;;  %v13522_v0 = vld [vmem:[#allocation5 + $0xac] ss:$12 sps:$4 sm:$0xff]   ;;  %vm1657_vm10 = vcmask 261120  }
  0xc6   : > { %s17608_s27 = sld [smem:[#allocation56_spill]]  ;;  %vm2126_vm11 = vcmask 1043456   ;;  %vm2026_vm12 = vcmask 64512   ;;  %s14461_s25 = smov 96   ;;  %vm5268_vm13 = vcmask 785408   ;;  %vm11154_vm14 = vcmask 1041409  }
  0xc7   : > { %s17710_s2 = smov (!%p887_p5, %s11610_s2), 15  ;;  %s17609_s26 = sld [smem:[#allocation57_spill]]  ;;  %vm11157_vm15 = vcmask 1042434  }
  0xc8   : > { %s11611_s29 = sshll.u32 %s17710_s2, 3  ;;  %s14462_s7 = smov 64  }
  0xc9   : > { %s890_s3 = scalar_lea.vmem %s17605_s30, %s11611_s29 }
  0xca   : > { %v905_v2 = vld [vmem:[%s890_s3 + $0x10] sm:$0xff]  ;;  %v903_v3 = vld [vmem:[%s890_s3] sm:$0xff]  ;;  %v906_v4 = vld [vmem:[%s890_s3 + $0x18] sm:$0xff] }
  0xcb   : > { %920 = vperm.xlu1 %13399, %v905_v2   ;;  %914 = vperm.xlu0 %13398, %v903_v3   ;;  %v904_v5 = vld [vmem:[%s890_s3 + $0x8] sm:$0xff]  ;;  %v968_v6 = vld [vmem:[%s17606_s0 + $0x38] sm:$0xff]  ;;  %v967_v7 = vld [vmem:[%s17606_s0 + $0x30] sm:$0xff] }
  0xcc   : > { %12342 = vmatprep.subr.mxu1 %v968_v6  ;;  %v908_v8 = vld [vmem:[%s890_s3 + $0x28] sm:$0xff]  ;;  %v907_v9 = vld [vmem:[%s890_s3 + $0x20] sm:$0xff]  ;;  %v910_v12 = vld [vmem:[%s890_s3 + $0x38] sm:$0xff] }
  0xcd   : > { %12343 = vmatpush3.msra.mxu1 %v968_v6  ;;  %v966_v10 = vld [vmem:[%s17606_s0 + $0x28] sm:$0xff]  ;;  %v965_v11 = vld [vmem:[%s17606_s0 + $0x20] sm:$0xff]  ;;  %v909_v13 = vld [vmem:[%s890_s3 + $0x30] sm:$0xff]  ;;  %s17621_s3 = sld [smem:[#allocation53_spill]] }
  0xce   : > { %12344 = vmatprep.subr.mxu1 %v967_v7  ;;  %v964_v14 = vld [vmem:[%s17606_s0 + $0x18] sm:$0xff]  ;;  %v963_v15 = vld [vmem:[%s17606_s0 + $0x10] sm:$0xff]  ;;  %v962_v16 = vld [vmem:[%s17606_s0 + $0x8] sm:$0xff] }
  0xcf   : > { %923 = vperm.xlu1 %13399, %v906_v4   ;;  %917 = vperm.xlu0 %13398, %v904_v5   ;;  %v961_v17 = vld [vmem:[%s17606_s0] sm:$0xff] }
  0xd0   : > { %12345 = vmatpush3.msra.mxu1 %v967_v7  ;;  %v1099_v37 = vld [vmem:[%s17607_s5] sm:$0xff]  ;;  %s14463_s5 = smov 32  }
  0xd1   : > { %12346 = vmatprep.subr.mxu1 %v966_v10  ;;  %v11630_v39 = vld [vmem:[%s17608_s27] ss:$0 sm:$0xff] }
  0xd2   : > { %12347 = vmatpush3.msra.mxu1 %v966_v10 }
  0xd3   : > { %929 = vperm.xlu1 %13399, %v908_v8   ;;  %926 = vperm.xlu0 %13398, %v907_v9   ;;  %s15067_s1 = scalar_lea.vmem %s17621_s3, %s17710_s2 }
  0xd4   : > { %12348 = vmatprep.subr.mxu1 %v965_v11 }
  0xd5   : > { %12349 = vmatpush3.msra.mxu1 %v965_v11 }
  0xd6   : > { %12350 = vmatprep.subr.mxu1 %v964_v14 }
  0xd7   : > { %935 = vperm.xlu1 %13399, %v910_v12   ;;  %932 = vperm.xlu0 %13398, %v909_v13  }
  0xd8   : > { %12351 = vmatpush3.msra.mxu1 %v964_v14 }
  0xd9   : > { %12352 = vmatprep.subr.mxu1 %v963_v15 }
  0xda   : > { %12353 = vmatpush3.msra.mxu1 %v963_v15 }
  0xdb   : > { %12354 = vmatprep.subr.mxu1 %v962_v16 }
  0xdc   : > { %12355 = vmatpush3.msra.mxu1 %v962_v16 }
  0xdd   : > { %12356 = vmatprep.subr.mxu1 %v961_v17 }
  0xde   : > { %12357 = vmatpush3.msra.mxu1 %v961_v17 }
  0xdf   : > { %1447 = vmatprep.subr.bf16.mxu1 %v13522_v0 }
 0x146   : > { %v921_v20 = vpop.permute.xlu1 %920  ;;  %v915_v21 = vpop.permute.xlu0 %914 }
 0x147   : > { %vm937_vm1 = vcmp.eq.s32.totalorder %v915_v21, %v912_v19  ;;  %vm939_vm2 = vcmp.eq.s32.totalorder %v921_v20, %v912_v19 }
 0x148   : > { %v11614_v23 = vsel %vm937_vm1, 1.0, %v17549_v22  ;;  %v11616_v26 = vsel %vm939_vm2, 1.0, %v17549_v22  ;;  %vm11163_vm1 = vcmask 1044484   ;;  %vm11166_vm2 = vcmask 1045509  }
 0x149   : > { %12358 = vmatprep.mubr.msk.f32.mxu1 %vm969_vm0, %v11614_v23 }
 0x14a   : > { %v924_v24 = vpop.permute.xlu1 %923  ;;  %v918_v25 = vpop.permute.xlu0 %917 }
 0x14b   : > { %vm938_vm3 = vcmp.eq.s32.totalorder %v918_v25, %v912_v19  ;;  %vm940_vm4 = vcmp.eq.s32.totalorder %v924_v24, %v912_v19 }
 0x14c   : > { %v11615_v27 = vsel %vm938_vm3, 1.0, %v17549_v22  ;;  %v11617_v30 = vsel %vm940_vm4, 1.0, %v17549_v22  ;;  %vm11169_vm3 = vcmask 1046534   ;;  %vm11172_vm4 = vcmask 1047559  }
 0x14d   : > { %12359 = vmatmul.mubr.msk.f32.vlgmr.msra.gmra.mxu1 %vm969_vm0, %v11615_v27 }
 0x14e   : > { %v930_v28 = vpop.permute.xlu1 %929  ;;  %v927_v29 = vpop.permute.xlu0 %926  ;;  %12361 = vmatprep.mubr.msk.f32.mxu1 %vm969_vm0, %v11616_v26  ;;  %1448 = vmatpush1.bf16.msra.mxu1 %v13520_v63 }
 0x14f   : > { %vm941_vm5 = vcmp.eq.s32.totalorder %v927_v29, %v912_v19  ;;  %vm942_vm6 = vcmp.eq.s32.totalorder %v930_v28, %v912_v19  ;;  %v13525_v28 = vld [vmem:[#allocation5 + $0x94] ss:$12 sps:$4 sm:$0xff]   ;;  %v13523_v29 = vld [vmem:[#allocation5 + $0x90] ss:$12 sps:$4 sm:$0xff]  }
 0x150   : > { %v11618_v31 = vsel %vm941_vm5, 1.0, %v17549_v22  ;;  %v11619_v34 = vsel %vm942_vm6, 1.0, %v17549_v22  ;;  %1449 = vmatprep.subr.bf16.mxu1 %v13525_v28 }
 0x151   : > { %12362 = vmatmul.mubr.msk.f32.gmra.mxu1 %vm969_vm0, %v11617_v30 }
 0x152   : > { %v936_v32 = vpop.permute.xlu1 %935  ;;  %12364 = vmatprep.mubr.msk.f32.mxu1 %vm969_vm0, %v11618_v31  ;;  %v933_v33 = vpop.permute.xlu0 %932  ;;  %1450 = vmatpush1.bf16.msra.mxu1 %v13523_v29 }
 0x153   : > { %vm943_vm7 = vcmp.eq.s32.totalorder %v933_v33, %v912_v19  ;;  %vm944_vm8 = vcmp.eq.s32.totalorder %v936_v32, %v912_v19 }
 0x154   : > { %v11620_v35 = vsel %vm943_vm7, 1.0, %v17549_v22  ;;  %v11621_v36 = vsel %vm944_vm8, 1.0, %v17549_v22 }
 0x155   : > { %12365 = vmatmul.mubr.msk.f32.gmra.mxu1 %vm969_vm0, %v11619_v34 }
 0x156   : > { %12367 = vmatprep.mubr.msk.f32.mxu1 %vm969_vm0, %v11620_v35 }
 0x159   : > { %12368 = vmatmul.mubr.msk.f32.gmra.mxu1 %vm969_vm0, %v11621_v36  ;;  %v13528_v36 = vld [vmem:[#allocation5 + $0x7c] ss:$12 sps:$4 sm:$0xff]  }
 0x15a   : > { %1479 = vmatprep.mubr.bf16.mxu1 %v17547_v1  ;;  %1451 = vmatprep.subr.bf16.mxu1 %v13528_v36 }
 0x20d   : > { %v12360_v38 = vpop.f32.mrf.mxu1 }
 0x20e   : > { %v1101_v40 = vadd.f32 %v12360_v38, %v1099_v37  ;;  %v13526_v38 = vld [vmem:[#allocation5 + $0x78] ss:$12 sps:$4 sm:$0xff]  }
 0x20f   : > { %v1060_v41 = vpop.f32.mrf.mxu1  ;;  %1452 = vmatpush1.bf16.msra.mxu1 %v13526_v38 }
 0x210   : > { %v1100_v42 = vadd.f32 %v1099_v37, %v1060_v41  ;;  %v1116_v43 = vadd.f32 %v11630_v39, %v1101_v40  ;;  %v13532_v41 = vld [vmem:[#allocation5 + $0x64] ss:$12 sps:$4 sm:$0xff]  }
 0x211   : > { %v12363_v44 = vpop.f32.mrf.mxu1  ;;  %1453 = vmatprep.subr.bf16.mxu1 %v13532_v41 }
 0x212   : > { %1127 = vadd.xlane.f32.xlu1 %v1116_v43  ;;  %v1115_v45 = vadd.f32 %v11630_v39, %v1100_v42  ;;  %v1103_v49 = vadd.f32 %v12363_v44, %v1099_v37  ;;  %v13533_v42 = vld [vmem:[#allocation5 + $0x98] ss:$12 sps:$4 sm:$0xff]  }
 0x213   : > { %v1070_v46 = vpop.f32.mrf.mxu1  ;;  %v13536_v44 = vld [vmem:[#allocation5 + $0x4c] ss:$12 sps:$4 sm:$0xff]  }
 0x214   : > { %v1102_v47 = vadd.f32 %v1099_v37, %v1070_v46  ;;  %1125 = vadd.xlane.f32.xlu0 %v1115_v45  ;;  %v1118_v55 = vadd.f32 %v11630_v39, %v1103_v49  ;;  %v13534_v46 = vld [vmem:[#allocation5 + $0x48] ss:$12 sps:$4 sm:$0xff]   ;;  %v13538_v49 = vld [vmem:[#allocation5 + $0x30] ss:$12 sps:$4 sm:$0xff]  }
 0x215   : > { %v12366_v48 = vpop.f32.mrf.mxu1 }
 0x216   : > { %v1117_v50 = vadd.f32 %v11630_v39, %v1102_v47  ;;  %v1105_v54 = vadd.f32 %v12366_v48, %v1099_v37  ;;  %v13540_v47 = vld [vmem:[#allocation5 + $0x34] ss:$12 sps:$4 sm:$0xff]  }
 0x217   : > { %v1080_v51 = vpop.f32.mrf.mxu1  ;;  %v13541_v48 = vld [vmem:[#allocation5 + $0x68] ss:$12 sps:$4 sm:$0xff]  }
 0x218   : > { %v1104_v52 = vadd.f32 %v1099_v37, %v1080_v51  ;;  %1129 = vadd.xlane.f32.xlu0 %v1117_v50  ;;  %v1120_v60 = vadd.f32 %v11630_v39, %v1105_v54  ;;  %v13545_v51 = vld [vmem:[#allocation5 + $0x50] ss:$12 sps:$4 sm:$0xff]  }
 0x219   : > { %v12369_v53 = vpop.f32.mrf.mxu1  ;;  %v13548_v54 = vld [vmem:[#allocation5 + $0x4] ss:$12 sps:$4 sm:$0xff]  }
 0x21a   : > { %v1119_v56 = vadd.f32 %v11630_v39, %v1104_v52  ;;  %v1107_v59 = vadd.f32 %v12369_v53, %v1099_v37  ;;  %v13542_v52 = vld [vmem:[#allocation5 + $0x18] ss:$12 sps:$4 sm:$0xff]   ;;  %v13546_v53 = vld [vmem:[#allocation5] ss:$12 sps:$4 sm:$0xff]  }
 0x21b   : > { %v1090_v57 = vpop.f32.mrf.mxu1 }
 0x21c   : > { %v1106_v58 = vadd.f32 %v1099_v37, %v1090_v57  ;;  %1131 = vadd.xlane.f32.xlu0 %v1118_v55  ;;  %1133 = vadd.xlane.f32.xlu1 %v1119_v56  ;;  %v1122_v62 = vadd.f32 %v11630_v39, %v1107_v59  ;;  %v13529_v37 = vld [vmem:[#allocation5 + $0xb0] ss:$12 sps:$4 sm:$0xff]   ;;  %v13551_v57 = vld [vmem:[#allocation5 + $0x8] ss:$12 sps:$4 sm:$0xff]  }
 0x21d   : > { %12370 = vmatprep.subr.bf16.mxu0 %v13529_v37 }
 0x21e   : > { %v1121_v61 = vadd.f32 %v11630_v39, %v1106_v58  ;;  %12371 = vmatpush3.bf16.msra.mxu0 %v13529_v37 }
 0x21f   : > { %12372 = vmatprep.subr.bf16.mxu0 %v13533_v42 }
 0x220   : > { %1135 = vadd.xlane.f32.xlu0 %v1120_v60  ;;  %1137 = vadd.xlane.f32.xlu1 %v1121_v61 }
 0x222   : > { %12373 = vmatpush3.bf16.msra.mxu0 %v13533_v42 }
 0x224   : > { %1139 = vadd.xlane.f32.xlu0 %v1122_v62 }
 0x29b   : > { %v1128_v2 = vpop.xlane.xlu1 %1127 }
 0x29c   : > { %v1143_v3 = vmul.f32 0.0078125, %v1128_v2 }
 0x29d   : > { %v1126_v4 = vpop.xlane.xlu0 %1125 }
 0x29e   : > { %v1142_v5 = vmul.f32 0.0078125, %v1126_v4  ;;  %v14827_v6 = vsub.f32 %v1116_v43, %v1143_v3  ;;  %v13530_v43 = vld [vmem:[#allocation5 + $0x60] ss:$12 sps:$4 sm:$0xff]  }
 0x29f   : > { %1454 = vmatpush1.bf16.msra.mxu1 %v13530_v43 }
 0x2a0   : > { %v1159_v7 = vmul.f32 %v14827_v6, %v14827_v6  ;;  %v14831_v8 = vsub.f32 %v1115_v45, %v1142_v5  ;;  %v13537_v45 = vld [vmem:[#allocation5 + $0x80] ss:$12 sps:$4 sm:$0xff]   ;;  %1455 = vmatprep.subr.bf16.mxu1 %v13536_v44 }
 0x2a1   : > { %v1130_v9 = vpop.xlane.xlu0 %1129  ;;  %12374 = vmatprep.subr.bf16.mxu0 %v13537_v45 }
 0x2a2   : > { %v1144_v10 = vmul.f32 0.0078125, %v1130_v9  ;;  %1168 = vadd.xlane.f32.xlu0 %v1159_v7  ;;  %v1158_v11 = vmul.f32 %v14831_v8, %v14831_v8  ;;  %12375 = vmatpush3.bf16.msra.mxu0 %v13537_v45 }
 0x2a3   : > { %1456 = vmatpush1.bf16.msra.mxu1 %v13534_v46  ;;  %12376 = vmatprep.subr.bf16.mxu0 %v13541_v48 }
 0x2a4   : > { %1166 = vadd.xlane.f32.xlu1 %v1158_v11  ;;  %v14835_v12 = vsub.f32 %v1117_v50, %v1144_v10  ;;  %1457 = vmatprep.subr.bf16.mxu1 %v13540_v47  ;;  %v13544_v50 = vld [vmem:[#allocation5 + $0x1c] ss:$12 sps:$4 sm:$0xff]  }
 0x2a5   : > { %v1134_v13 = vpop.xlane.xlu1 %1133  ;;  %v1132_v14 = vpop.xlane.xlu0 %1131 }
 0x2a6   : > { %v1146_v15 = vmul.f32 0.0078125, %v1134_v13  ;;  %v1145_v16 = vmul.f32 0.0078125, %v1132_v14  ;;  %v1160_v17 = vmul.f32 %v14835_v12, %v14835_v12  ;;  %12377 = vmatpush3.bf16.msra.mxu0 %v13541_v48 }
 0x2a7   : > { %1458 = vmatpush1.bf16.msra.mxu1 %v13538_v49  ;;  %12378 = vmatprep.subr.bf16.mxu0 %v13545_v51 }
 0x2a8   : > { %1170 = vadd.xlane.f32.xlu1 %v1160_v17  ;;  %v14839_v19 = vsub.f32 %v1119_v56, %v1146_v15  ;;  %v14841_v20 = vsub.f32 %v1118_v55, %v1145_v16  ;;  %1459 = vmatprep.subr.bf16.mxu1 %v13544_v50  ;;  %v13549_v55 = vld [vmem:[#allocation5 + $0x38] ss:$12 sps:$4 sm:$0xff]   ;;  %v13550_v56 = vld [vmem:[#allocation5 + $0x20] ss:$12 sps:$4 sm:$0xff]  }
 0x2a9   : > { %v1138_v21 = vpop.xlane.xlu1 %1137  ;;  %v1136_v23 = vpop.xlane.xlu0 %1135 }
 0x2aa   : > { %v1148_v24 = vmul.f32 0.0078125, %v1138_v21  ;;  %v1147_v25 = vmul.f32 0.0078125, %v1136_v23  ;;  %v1162_v26 = vmul.f32 %v14839_v19, %v14839_v19  ;;  %v1161_v27 = vmul.f32 %v14841_v20, %v14841_v20  ;;  %12379 = vmatpush3.bf16.msra.mxu0 %v13545_v51 }
 0x2ab   : > { %1460 = vmatpush1.bf16.msra.mxu1 %v13542_v52  ;;  %12380 = vmatprep.subr.bf16.mxu0 %v13549_v55 }
 0x2ac   : > { %1174 = vadd.xlane.f32.xlu1 %v1162_v26  ;;  %1172 = vadd.xlane.f32.xlu0 %v1161_v27  ;;  %v14847_v30 = vsub.f32 %v1121_v61, %v1148_v24  ;;  %v14849_v31 = vsub.f32 %v1120_v60, %v1147_v25  ;;  %v11631_v25 = vld [vmem:[%s17609_s26] ss:$0 sm:$0xff]  ;;  %s900_s26 = scalar_lea.vmem %s17536_s23, %s17710_s2 }
 0x2ad   : > { %v1140_v32 = vpop.xlane.xlu0 %1139  ;;  %1461 = vmatprep.subr.bf16.mxu1 %v13548_v54 }
 0x2ae   : > { %v1149_v33 = vmul.f32 0.0078125, %v1140_v32  ;;  %v1164_v34 = vmul.f32 %v14847_v30, %v14847_v30  ;;  %v1163_v35 = vmul.f32 %v14849_v31, %v14849_v31  ;;  %12381 = vmatpush3.bf16.msra.mxu0 %v13549_v55 }
 0x2af   : > { %1462 = vmatpush1.bf16.msra.mxu1 %v13546_v53  ;;  %12382 = vmatprep.subr.bf16.mxu0 %v13550_v56 }
 0x2b0   : > { %1178 = vadd.xlane.f32.xlu1 %v1164_v34  ;;  %1176 = vadd.xlane.f32.xlu0 %v1163_v35  ;;  %v14855_v39 = vsub.f32 %v1122_v62, %v1149_v33  ;;  %v11632_v34 = vld [vmem:[#allocation3] ss:$0 sm:$0xff] }
 0x2b1   : > { %12400 = vmatprep.subr.bf16.mxu1 %v17549_v22 }
 0x2b2   : > { %v1165_v40 = vmul.f32 %v14855_v39, %v14855_v39  ;;  %12383 = vmatpush3.bf16.msra.mxu0 %v13550_v56 }
 0x2b3   : > { %12384 = vmatprep.subr.bf16.mxu0 %v13551_v57 }
 0x2b4   : > { %1180 = vadd.xlane.f32.xlu0 %v1165_v40 }
 0x2b6   : > { %12385 = vmatpush3.bf16.msra.mxu0 %v13551_v57 }
 0x2b7   : > { %12394 = vmatprep.subr.bf16.mxu0 %v17549_v22 }
 0x32b   : > { %v1169_v58 = vpop.xlane.xlu0 %1168 }
 0x32c   : > { %v1183_v59 = vmul.f32 0.0078125, %v1169_v58 }
 0x32d   : > { %v1167_v60 = vpop.xlane.xlu1 %1166 }
 0x32e   : > { %v1191_v61 = vadd.f32 1e-12, %v1183_v59  ;;  %v1182_v62 = vmul.f32 0.0078125, %v1167_v60  ;;  %v14904_v59 = vshrl.u32 %v911_v18, 7 }
 0x330   : > { %13688 = vrsqrt.f32 %v1191_v61  ;;  %v1190_v63 = vadd.f32 1e-12, %v1182_v62  ;;  %17618 = vst [vmem:[#allocation37_spill] sm:$0xff] %v14904_v59  ;;  %v14907_v60 = vsub.s32 1, %v14904_v59  ;;  %v1302_v61 = vld [vmem:[%s17521_s8] sm:$0x7] }
 0x331   : > { %v1171_v0 = vpop.xlane.xlu1 %1170 }
 0x332   : > { %13690 = vrsqrt.f32 %v1190_v63  ;;  %v1184_v2 = vmul.f32 0.0078125, %v1171_v0  ;;  %17619 = vst [vmem:[#allocation38_spill] sm:$0xff] %v14907_v60  ;;  %v14913_v62 = vrot.slane %v1302_v61, %v14907_v60  ;;  %v14916_v0 = vsub.s32 0, %v14904_v59 }
 0x334   : > { %v1192_v3 = vadd.f32 1e-12, %v1184_v2  ;;  %17620 = vst [vmem:[#allocation39_spill] sm:$0xff] %v14916_v0 }
 0x335   : > { %v1175_v4 = vpop.xlane.xlu1 %1174  ;;  %v1173_v5 = vpop.xlane.xlu0 %1172 }
 0x336   : > { %13692 = vrsqrt.f32 %v1192_v3  ;;  %v1186_v7 = vmul.f32 0.0078125, %v1175_v4  ;;  %v1185_v9 = vmul.f32 0.0078125, %v1173_v5  ;;  %v17546_v3 = vsub.s32 2, %v14904_v59 }
 0x337   : > { %v14921_v5 = vrot.slane %v1302_v61, %v14916_v0 }
 0x338   : > { %v1194_v10 = vadd.f32 1e-12, %v1186_v7  ;;  %v1193_v11 = vadd.f32 1e-12, %v1185_v9 }
 0x339   : > { %v1179_v13 = vpop.xlane.xlu1 %1178  ;;  %v1177_v14 = vpop.xlane.xlu0 %1176 }
 0x33a   : > { %13694 = vrsqrt.f32 %v1194_v10  ;;  %v1188_v15 = vmul.f32 0.0078125, %v1179_v13  ;;  %v1187_v16 = vmul.f32 0.0078125, %v1177_v14  ;;  %v14927_v10 = vrot.slane %v1302_v61, %v17546_v3 }
 0x33b   : > { %13696 = vrsqrt.f32 %v1193_v11 }
 0x33c   : > { %v1196_v17 = vadd.f32 1e-12, %v1188_v15  ;;  %v1195_v21 = vadd.f32 1e-12, %v1187_v16 }
 0x33d   : > { %v13689_v23 = vpop.eup %13688  ;;  %v1181_v24 = vpop.xlane.xlu0 %1180 }
 0x33e   : > { %v1207_v26 = vmul.f32 %v13689_v23, %v14827_v6  ;;  %13698 = vrsqrt.f32 %v1196_v17  ;;  %v1189_v27 = vmul.f32 0.0078125, %v1181_v24 }
 0x33f   : > { %v13691_v28 = vpop.eup %13690  ;;  %13700 = vrsqrt.f32 %v1195_v21 }
 0x340   : > { %v1206_v29 = vmul.f32 %v13691_v28, %v14831_v8  ;;  %v1197_v32 = vadd.f32 1e-12, %v1189_v27  ;;  %v1221_v33 = vmul.f32 %v11631_v25, %v1207_v26 }
 0x342   : > { %13702 = vrsqrt.f32 %v1197_v32  ;;  %v1220_v35 = vmul.f32 %v11631_v25, %v1206_v29  ;;  %v14868_v38 = vadd.f32 %v11632_v34, %v1221_v33 }
 0x343   : > { %v13693_v36 = vpop.eup %13692 }
 0x344   : > { %v14866_v37 = vadd.f32 %v11632_v34, %v1220_v35  ;;  %17611 = vst [vmem:[#allocation30_spill] sm:$0xff] %v14868_v38  ;;  %v1208_v40 = vmul.f32 %v13693_v36, %v14835_v12 }
 0x346   : > { %17610 = vst [vmem:[#allocation29_spill] sm:$0xff] %v14866_v37  ;;  %v1298_v6 = vpack.c.bf16 %v14868_v38, %v14866_v37  ;;  %v1222_v43 = vmul.f32 %v11631_v25, %v1208_v40 }
 0x347   : > { %v13695_v41 = vpop.eup %13694 }
 0x348   : > { %v13697_v42 = vpop.eup %13696  ;;  %1480 = vmatmul.mubr.bf16.vlgmr.msra.gmra.mxu1 %v1298_v6  ;;  %12386 = vmatprep.mubr.bf16.mxu0 %v1298_v6  ;;  %v1210_v44 = vmul.f32 %v13695_v41, %v14839_v19  ;;  %v14877_v12 = vadd.f32 %v11632_v34, %v1222_v43 }
 0x349   : > { %1489 = vmatprep.mubr.bf16.mxu1 %v17547_v1  ;;  %v1209_v8 = vmul.f32 %v13697_v42, %v14841_v20 }
 0x34a   : > { %17612 = vst [vmem:[#allocation31_spill] sm:$0xff] %v14877_v12  ;;  %v1224_v51 = vmul.f32 %v11631_v25, %v1210_v44 }
 0x34b   : > { %v13699_v45 = vpop.eup %13698  ;;  %v1223_v46 = vmul.f32 %v11631_v25, %v1209_v8 }
 0x34c   : > { %v13701_v47 = vpop.eup %13700  ;;  %v1212_v48 = vmul.f32 %v13699_v45, %v14847_v30  ;;  %v14885_v55 = vadd.f32 %v11632_v34, %v1224_v51 }
 0x34d   : > { %v14879_v49 = vadd.f32 %v11632_v34, %v1223_v46  ;;  %v1211_v50 = vmul.f32 %v13701_v47, %v14849_v31 }
 0x34e   : > { %v1226_v19 = vmul.f32 %v11631_v25, %v1212_v48  ;;  %17614 = vst [vmem:[#allocation33_spill] sm:$0xff] %v14885_v55 }
 0x34f   : > { %17613 = vst [vmem:[#allocation32_spill] sm:$0xff] %v14879_v49  ;;  %v13703_v52 = vpop.eup %13702  ;;  %v1299_v53 = vpack.c.bf16 %v14879_v49, %v14877_v12  ;;  %v1225_v20 = vmul.f32 %v11631_v25, %v1211_v50 }
 0x350   : > { %v1213_v54 = vmul.f32 %v13703_v52, %v14855_v39  ;;  %v14892_v57 = vadd.f32 %v11632_v34, %v1226_v19 }
 0x351   : > { %1490 = vmatmul.mubr.bf16.gmra.mxu1 %v1299_v53  ;;  %12387 = vmatmul.mubr.bf16.vlgmr.msra.gmra.mxu0 %v1299_v53  ;;  %v14887_v30 = vadd.f32 %v11632_v34, %v1225_v20 }
 0x352   : > { %1499 = vmatprep.mubr.bf16.mxu1 %v17547_v1  ;;  %v1227_v56 = vmul.f32 %v11631_v25, %v1213_v54  ;;  %17616 = vst [vmem:[#allocation35_spill] sm:$0xff] %v14892_v57 }
 0x353   : > { %17615 = vst [vmem:[#allocation34_spill] sm:$0xff] %v14887_v30  ;;  %v1300_v31 = vpack.c.bf16 %v14887_v30, %v14885_v55 }
 0x354   : > { %v14894_v58 = vadd.f32 %v11632_v34, %v1227_v56 }
 0x355   : > { %12390 = vmatprep.mubr.bf16.mxu0 %v1300_v31 }
 0x356   : > { %17617 = vst [vmem:[#allocation36_spill] sm:$0xff] %v14894_v58  ;;  %v1301_v39 = vpack.c.bf16 %v14894_v58, %v14892_v57 }
 0x359   : > { %1500 = vmatmul.mubr.bf16.gmra.mxu1 %v1300_v31  ;;  %12391 = vmatmul.mubr.bf16.gmra.mxu0 %v1301_v39 }
 0x35a   : > { %1509 = vmatprep.mubr.bf16.mxu1 %v17547_v1  ;;  %12396 = vmatprep.mubr.msk.bf16.mxu0 %vm14460_vm9, %v17549_v22 }
 0x361   : > { %1510 = vmatmul.mubr.bf16.gmra.mxu1 %v1301_v39 }
 0x362   : > { %12402 = vmatprep.mubr.msk.bf16.mxu1 %vm14460_vm9, %v17549_v22 }
 0x408   : > { %v1481_v63 = vpop.f32.mrf.mxu1 }
 0x409   : > { %v1482_v14 = vadd.f32 %v1481_v63, %v14921_v5 }
 0x40a   : > { %v1483_v2 = vpop.f32.mrf.mxu1 }
 0x40b   : > { %v1484_v18 = vadd.f32 %v1483_v2, %v14913_v62  ;;  %v14944_v27 = vpack.c.bf16 %v1482_v14, %v1482_v14 }
 0x40c   : > { %v1485_v4 = vpop.f32.mrf.mxu1 }
 0x40d   : > { %v14923_v7 = vpack.c.bf16 %v1484_v18, %v1484_v18  ;;  %v1486_v28 = vadd.f32 %v1485_v4, %v14921_v5 }
 0x40e   : > { %v1487_v9 = vpop.f32.mrf.mxu1 }
 0x40f   : > { %v1488_v11 = vadd.f32 %v1487_v9, %v14913_v62  ;;  %v1662_v13 = vsel %vm1657_vm10, %v14923_v7, 0  ;;  %v14960_v6 = vpack.c.bf16 %v1486_v28, %v1486_v28 }
 0x410   : > { %12395 = vmatpush3.bf16.xpose.msra.mxu0 %v1662_v13 }
 0x411   : > { %v14933_v15 = vpack.c.bf16 %v1488_v11, %v1488_v11  ;;  %v1491_v16 = vpop.f32.mrf.mxu1  ;;  %v12388_v17 = vpop.f32.mrf.mxu0  ;;  %12406 = vmatprep.subr.bf16.mxu0 %v17549_v22 }
 0x412   : > { %v14937_v21 = vadd.f32 %v12388_v17, %v14927_v10  ;;  %v1492_v45 = vadd.f32 %v1491_v16, %v14921_v5 }
 0x413   : > { %v1493_v23 = vpop.f32.mrf.mxu1  ;;  %v14939_v24 = vpop.f32.mrf.mxu0  ;;  %v1708_v25 = vsel %vm1657_vm10, %v14933_v15, 0 }
 0x414   : > { %v1494_v26 = vadd.f32 %v1493_v23, %v14913_v62  ;;  %12401 = vmatpush3.bf16.xpose.msra.mxu1 %v1708_v25  ;;  %v14986_v19 = vpack.c.bf16 %v1492_v45, %v1492_v45 }
 0x415   : > { %v1495_v29 = vpop.f32.mrf.mxu1  ;;  %v12389_v32 = vpop.f32.mrf.mxu0  ;;  %12412 = vmatprep.subr.bf16.mxu1 %v17549_v22 }
 0x416   : > { %v14948_v33 = vpack.c.bf16 %v1494_v26, %v1494_v26  ;;  %v14951_v34 = vadd.f32 %v12389_v32, %v14927_v10  ;;  %v1496_v56 = vadd.f32 %v1495_v29, %v14921_v5  ;;  %v1555_v29 = vadd.f32 %v14939_v24, %v14927_v10 }
 0x417   : > { %v1497_v35 = vpop.f32.mrf.mxu1  ;;  %v14953_v36 = vpop.f32.mrf.mxu0  ;;  %12397 = vmatmul.mubr.msk.bf16.vlgmr.msra.gmra.mxu0 %vm1657_vm10, %v14944_v27 }
 0x418   : > { %v1498_v40 = vadd.f32 %v1497_v35, %v14913_v62  ;;  %12408 = vmatprep.mubr.msk.bf16.mxu0 %vm14460_vm9, %v17549_v22  ;;  %v1754_v8 = vsel %vm1657_vm10, %v14948_v33, 0  ;;  %v14999_v18 = vpack.c.bf16 %v1496_v56, %v1496_v56  ;;  %v1558_v24 = vadd.f32 %v14953_v36, %v14927_v10  ;;  %v1244_v56 = vld [vmem:[%s15067_s1 + $0x2] sm:$0x1] }
 0x419   : > { %v1501_v41 = vpop.f32.mrf.mxu1  ;;  %v12392_v42 = vpop.f32.mrf.mxu0  ;;  %12407 = vmatpush3.bf16.xpose.msra.mxu0 %v1754_v8 }
 0x41a   : > { %v14964_v43 = vpack.c.bf16 %v1498_v40, %v1498_v40  ;;  %v14967_v44 = vadd.f32 %v12392_v42, %v14927_v10  ;;  %12418 = vmatprep.subr.bf16.mxu0 %v17549_v22  ;;  %v1502_v4 = vadd.f32 %v1501_v41, %v14921_v5  ;;  %v15033_v41 = vpack.c.bf16 %v1555_v29, %v1555_v29 }
 0x41b   : > { %v1503_v46 = vpop.f32.mrf.mxu1  ;;  %v1570_v47 = vpop.f32.mrf.mxu0  ;;  %12403 = vmatmul.mubr.msk.bf16.vlgmr.msra.gmra.mxu1 %vm1657_vm10, %v14960_v6  ;;  %v15045_v45 = vpack.c.bf16 %v1558_v24, %v1558_v24 }
 0x41c   : > { %v1504_v48 = vadd.f32 %v1503_v46, %v14913_v62  ;;  %v14975_v50 = vadd.f32 %v1570_v47, %v14927_v10  ;;  %12414 = vmatprep.mubr.msk.bf16.mxu1 %vm14460_vm9, %v17549_v22  ;;  %v1800_v53 = vsel %vm1657_vm10, %v14964_v43, 0  ;;  %v15012_v17 = vpack.c.bf16 %v1502_v4, %v1502_v4  ;;  %v1242_v47 = vld [vmem:[%s15067_s1] sm:$0x1] }
 0x41d   : > { %v1505_v51 = vpop.f32.mrf.mxu1  ;;  %v12393_v52 = vpop.f32.mrf.mxu0  ;;  %12413 = vmatpush3.bf16.xpose.msra.mxu1 %v1800_v53  ;;  %v2128_v36 = vsel %vm2126_vm11, %v15033_v41, 0 }
 0x41e   : > { %v14981_v20 = vpack.c.bf16 %v1504_v48, %v1504_v48  ;;  %v14984_v54 = vadd.f32 %v12393_v52, %v14927_v10  ;;  %12424 = vmatprep.subr.bf16.mxu1 %v17549_v22  ;;  %v1506_v23 = vadd.f32 %v1505_v51, %v14921_v5  ;;  %v1250_v48 = vsub.f32 1.0, %v1242_v47  ;;  %v1243_v51 = vld [vmem:[%s15067_s1 + $0x1] sm:$0x1] }
 0x41f   : > { %v1507_v31 = vpop.f32.mrf.mxu1  ;;  %v1251_v53 = vsub.f32 1.0, %v1243_v51 }
 0x420   : > { %v1508_v39 = vadd.f32 %v1507_v31, %v14913_v62  ;;  %12409 = vmatmul.mubr.msk.bf16.vlgmr.msra.gmra.mxu0 %vm1657_vm10, %v14986_v19  ;;  %v1846_v63 = vsel %vm1657_vm10, %v14981_v20, 0  ;;  %v15027_v35 = vpack.c.bf16 %v1506_v23, %v1506_v23  ;;  %v1258_v52 = vmul.f32 -10000.0, %v1250_v48 }
 0x421   : > { %v1511_v61 = vpop.f32.mrf.mxu1  ;;  %12419 = vmatpush3.bf16.xpose.msra.mxu0 %v1846_v63  ;;  %12420 = vmatprep.mubr.msk.bf16.mxu0 %vm14460_vm9, %v17549_v22  ;;  %v1252_v63 = vsub.f32 1.0, %v1244_v56 }
 0x422   : > { %v14995_v2 = vpack.c.bf16 %v1508_v39, %v1508_v39  ;;  %12430 = vmatprep.subr.bf16.mxu0 %v17549_v22  ;;  %v1512_v40 = vadd.f32 %v1511_v61, %v14921_v5  ;;  %v15073_v31 = vrot.slane %v1258_v52, %v14916_v0  ;;  %v1259_v39 = vmul.f32 -10000.0, %v1251_v53  ;;  %v15075_v61 = vpop.f32.mrf.mxu0  ;;  %v1247_v52 = vld [vmem:[%s15067_s1 + $0x5] sm:$0x1] }
 0x423   : > { %v1513_v9 = vpop.f32.mrf.mxu1 }
 0x424   : > { %v1514_v11 = vadd.f32 %v1513_v9, %v14913_v62  ;;  %v1892_v13 = vsel %vm1657_vm10, %v14995_v2, 0  ;;  %12415 = vmatmul.mubr.msk.bf16.vlgmr.msra.gmra.mxu1 %vm1657_vm10, %v14999_v18  ;;  %v15041_v42 = vpack.c.bf16 %v1512_v40, %v1512_v40  ;;  %v1245_v9 = vld [vmem:[%s15067_s1 + $0x3] sm:$0x1]  ;;  %v1246_v40 = vld [vmem:[%s15067_s1 + $0x4] sm:$0x1] }
 0x425   : > { %v1515_v14 = vpop.f32.mrf.mxu1  ;;  %12425 = vmatpush3.bf16.xpose.msra.mxu1 %v1892_v13  ;;  %12426 = vmatprep.mubr.msk.bf16.mxu1 %vm14460_vm9, %v17549_v22  ;;  %v15082_v13 = vrot.slane %v1259_v39, %v14916_v0  ;;  %v1254_v48 = vsub.f32 1.0, %v1246_v40 }
 0x426   : > { %v15008_v16 = vpack.c.bf16 %v1514_v11, %v1514_v11  ;;  %12436 = vmatprep.subr.bf16.mxu1 %v17549_v22  ;;  %v1516_v8 = vadd.f32 %v1515_v14, %v14921_v5  ;;  %v2174_v5 = vsel %vm2126_vm11, %v15045_v45, 0 }
 0x427   : > { %v1517_v25 = vpop.f32.mrf.mxu1 }
 0x428   : > { %v1518_v26 = vadd.f32 %v1517_v25, %v14913_v62  ;;  %v1938_v28 = vsel %vm1657_vm10, %v15008_v16, 0  ;;  %12421 = vmatmul.mubr.msk.bf16.vlgmr.msra.gmra.mxu0 %vm1657_vm10, %v15012_v17  ;;  %v15053_v46 = vpack.c.bf16 %v1516_v8, %v1516_v8  ;;  %v1260_v25 = vmul.f32 -10000.0, %v1252_v63 }
 0x429   : > { %12431 = vmatpush3.bf16.xpose.msra.mxu0 %v1938_v28  ;;  %12432 = vmatprep.mubr.msk.bf16.mxu0 %vm14460_vm9, %v17549_v22 }
 0x42a   : > { %v15023_v32 = vpack.c.bf16 %v1518_v26, %v1518_v26  ;;  %12442 = vmatprep.subr.bf16.mxu0 %v17549_v22  ;;  %v1253_v26 = vsub.f32 1.0, %v1245_v9  ;;  %v1255_v9 = vsub.f32 1.0, %v1247_v52 }
 0x42c   : > { %v1984_v62 = vsel %vm1657_vm10, %v15023_v32, 0  ;;  %12427 = vmatmul.mubr.msk.bf16.vlgmr.msra.gmra.mxu1 %vm1657_vm10, %v15027_v35  ;;  %v1261_v47 = vmul.f32 -10000.0, %v1253_v26 }
 0x42d   : > { %12437 = vmatpush3.bf16.xpose.msra.mxu1 %v1984_v62  ;;  %12438 = vmatprep.mubr.msk.bf16.mxu1 %vm14460_vm9, %v17549_v22 }
 0x42e   : > { %12448 = vmatprep.subr.bf16.mxu1 %v17549_v22  ;;  %v15100_v63 = vrot.slane %v1261_v47, %v14916_v0 }
 0x430   : > { %12433 = vmatmul.mubr.msk.bf16.vlgmr.msra.gmra.mxu0 %vm1657_vm10, %v15041_v42 }
 0x431   : > { %12443 = vmatpush3.bf16.msra.mxu0 %v2128_v36  ;;  %12444 = vmatprep.mubr.msk.bf16.mxu0 %vm14460_vm9, %v17549_v22  ;;  %v15091_v36 = vrot.slane %v1260_v25, %v14916_v0 }
 0x432   : > { %12454 = vmatprep.subr.bf16.mxu0 %v17549_v22 }
 0x434   : > { %12439 = vmatmul.mubr.msk.bf16.vlgmr.msra.gmra.mxu1 %vm1657_vm10, %v15053_v46 }
 0x435   : > { %12449 = vmatpush3.bf16.msra.mxu1 %v2174_v5  ;;  %12450 = vmatprep.mubr.msk.bf16.mxu1 %vm14460_vm9, %v17549_v22 }
 0x436   : > { %12460 = vmatprep.subr.bf16.mxu1 %v17549_v22 }
 0x4d7   : > { %v1698_v4 = vpop.f32.mrf.mxu0 }
 0x4d8   : > { %v15079_v11 = vadd.f32 %v1698_v4, %v15073_v31  ;;  %v1262_v4 = vmul.f32 -10000.0, %v1254_v48 }
 0x4d9   : > { %v12398_v14 = vpop.f32.mrf.mxu0 }
 0x4da   : > { %v2027_v23 = vsel %vm2026_vm12, %v15079_v11, -inf  ;;  %v15107_v40 = vrot.slane %v1262_v4, %v14916_v0 }
 0x4db   : > { %2028 = vmax.xlane.f32.xlu1 %v2027_v23  ;;  %v1701_v28 = vpop.f32.mrf.mxu0  ;;  %v1744_v29 = vpop.f32.mrf.mxu1  ;;  %v1248_v23 = vld [vmem:[%s15067_s1 + $0x6] sm:$0x1] }
 0x4dc   : > { %v15088_v62 = vadd.f32 %v1744_v29, %v15082_v13 }
 0x4dd   : > { %v12399_v24 = vpop.f32.mrf.mxu0  ;;  %v12404_v8 = vpop.f32.mrf.mxu1 }
 0x4de   : > { %v2030_v5 = vsel %vm2026_vm12, %v15088_v62, -inf  ;;  %v1263_v24 = vmul.f32 -10000.0, %v1255_v9  ;;  %v1256_v8 = vsub.f32 1.0, %v1248_v23 }
 0x4df   : > { %2031 = vmax.xlane.f32.xlu0 %v2030_v5  ;;  %v1747_v51 = vpop.f32.mrf.mxu1 }
 0x4e0   : > { %v1790_v53 = vpop.f32.mrf.mxu0  ;;  %v1249_v51 = vld [vmem:[%s15067_s1 + $0x7] sm:$0x1] }
 0x4e1   : > { %v12405_v56 = vpop.f32.mrf.mxu1  ;;  %v15097_v39 = vadd.f32 %v1790_v53, %v15091_v36 }
 0x4e2   : > { %v12410_v14 = vpop.f32.mrf.mxu0 }
 0x4e3   : > { %v2033_v25 = vsel %vm2026_vm12, %v15097_v39, -inf  ;;  %v15113_v14 = vrot.slane %v1263_v24, %v14916_v0 }
 0x4e4   : > { %2034 = vmax.xlane.f32.xlu1 %v2033_v25  ;;  %v1793_v26 = vpop.f32.mrf.mxu0  ;;  %v1836_v28 = vpop.f32.mrf.mxu1  ;;  %v1264_v25 = vmul.f32 -10000.0, %v1256_v8 }
 0x4e5   : > { %v1837_v29 = vadd.f32 %v1836_v28, %v15100_v63  ;;  %v1257_v26 = vsub.f32 1.0, %v1249_v51 }
 0x4e6   : > { %v12411_v5 = vpop.f32.mrf.mxu0  ;;  %v12416_v47 = vpop.f32.mrf.mxu1  ;;  %v15118_v3 = vrot.slane %v1264_v25, %v14916_v0 }
 0x4e7   : > { %v2036_v48 = vsel %vm2026_vm12, %v1837_v29, -inf }
 0x4e8   : > { %v1882_v52 = vpop.f32.mrf.mxu0  ;;  %2037 = vmax.xlane.f32.xlu0 %v2036_v48  ;;  %v1839_v53 = vpop.f32.mrf.mxu1  ;;  %v1265_v48 = vmul.f32 -10000.0, %v1257_v26 }
 0x4e9   : > { %v1883_v56 = vadd.f32 %v1882_v52, %v15107_v40 }
 0x4ea   : > { %v12417_v28 = vpop.f32.mrf.mxu1  ;;  %v12422_v4 = vpop.f32.mrf.mxu0 }
 0x4eb   : > { %v2039_v9 = vsel %vm2026_vm12, %v1883_v56, -inf  ;;  %v15125_v4 = vrot.slane %v1265_v48, %v14916_v0 }
 0x4ec   : > { %2040 = vmax.xlane.f32.xlu1 %v2039_v9  ;;  %v1885_v23 = vpop.f32.mrf.mxu0  ;;  %v1928_v5 = vpop.f32.mrf.mxu1 }
 0x4ed   : > { %v1929_v47 = vadd.f32 %v1928_v5, %v15113_v14 }
 0x4ee   : > { %v12423_v53 = vpop.f32.mrf.mxu0  ;;  %v12428_v52 = vpop.f32.mrf.mxu1 }
 0x4ef   : > { %v2042_v24 = vsel %vm2026_vm12, %v1929_v47, -inf }
 0x4f0   : > { %2043 = vmax.xlane.f32.xlu0 %v2042_v24  ;;  %v1931_v8 = vpop.f32.mrf.mxu1  ;;  %v1974_v51 = vpop.f32.mrf.mxu0 }
 0x4f1   : > { %v15122_v28 = vadd.f32 %v1974_v51, %v15118_v3 }
 0x4f2   : > { %v12429_v9 = vpop.f32.mrf.mxu1  ;;  %v12434_v23 = vpop.f32.mrf.mxu0 }
 0x4f3   : > { %v2045_v25 = vsel %vm2026_vm12, %v15122_v28, -inf }
 0x4f4   : > { %v2020_v5 = vpop.f32.mrf.mxu1  ;;  %2046 = vmax.xlane.f32.xlu1 %v2045_v25  ;;  %v1977_v26 = vpop.f32.mrf.mxu0 }
 0x4f5   : > { %v2021_v53 = vadd.f32 %v2020_v5, %v15125_v4 }
 0x4f6   : > { %v12435_v52 = vpop.f32.mrf.mxu0  ;;  %v12440_v24 = vpop.f32.mrf.mxu1 }
 0x4f7   : > { %v2048_v8 = vsel %vm2026_vm12, %v2021_v53, -inf }
 0x4f8   : > { %2049 = vmax.xlane.f32.xlu0 %v2048_v8  ;;  %v2023_v51 = vpop.f32.mrf.mxu1 }
 0x4fa   : > { %v12441_v1 = vpop.f32.mrf.mxu1 }
 0x564   : > { %v2029_v22 = vpop.xlane.xlu1 %2028 }
 0x565   : > { %v2051_v48 = vsub.f32 %v15079_v11, %v2029_v22 }
 0x567   : > { %v2059_v9 = vmul.f32 1.442695, %v2051_v48 }
 0x568   : > { %v2032_v23 = vpop.xlane.xlu0 %2031 }
 0x569   : > { %13704 = vpow2.f32 %v2059_v9  ;;  %v2052_v59 = vsub.f32 %v15088_v62, %v2032_v23 }
 0x56b   : > { %v2061_v60 = vmul.f32 1.442695, %v2052_v59 }
 0x56d   : > { %13706 = vpow2.f32 %v2061_v60  ;;  %v2035_v25 = vpop.xlane.xlu1 %2034 }
 0x56e   : > { %v2053_v5 = vsub.f32 %v15097_v39, %v2035_v25 }
 0x570   : > { %v2063_v26 = vmul.f32 1.442695, %v2053_v5 }
 0x571   : > { %v2038_v52 = vpop.xlane.xlu0 %2037 }
 0x572   : > { %13708 = vpow2.f32 %v2063_v26  ;;  %v2054_v24 = vsub.f32 %v1837_v29, %v2038_v52 }
 0x574   : > { %v2065_v8 = vmul.f32 1.442695, %v2054_v24 }
 0x575   : > { %v2041_v1 = vpop.xlane.xlu1 %2040 }
 0x576   : > { %v15134_v51 = vpop.eup %13704  ;;  %13710 = vpow2.f32 %v2065_v8  ;;  %v2055_v22 = vsub.f32 %v1883_v56, %v2041_v1 }
 0x577   : > { %v2075_v11 = vsel %vm2026_vm12, %v15134_v51, 0.0 }
 0x578   : > { %2076 = vadd.xlane.f32.xlu1 %v2075_v11  ;;  %v2067_v62 = vmul.f32 1.442695, %v2055_v22 }
 0x579   : > { %v2044_v60 = vpop.xlane.xlu0 %2043 }
 0x57a   : > { %v15138_v59 = vpop.eup %13706  ;;  %13712 = vpow2.f32 %v2067_v62  ;;  %v2056_v39 = vsub.f32 %v1929_v47, %v2044_v60 }
 0x57b   : > { %v2078_v48 = vsel %vm2026_vm12, %v15138_v59, 0.0 }
 0x57c   : > { %2079 = vadd.xlane.f32.xlu0 %v2078_v48  ;;  %v2069_v29 = vmul.f32 1.442695, %v2056_v39  ;;  %v15205_v48 = vpack.c.bf16 %v14937_v21, %v14937_v21 }
 0x57d   : > { %v2047_v11 = vpop.xlane.xlu1 %2046 }
 0x57e   : > { %13714 = vpow2.f32 %v2069_v29  ;;  %v2057_v62 = vsub.f32 %v15122_v28, %v2047_v11  ;;  %v15211_v29 = vpack.c.bf16 %v14951_v34, %v14951_v34  ;;  %v2220_v34 = vsel %vm2126_vm11, %v15205_v48, 0 }
 0x57f   : > { %v15142_v9 = vpop.eup %13708 }
 0x580   : > { %v2081_v56 = vsel %vm2026_vm12, %v15142_v9, 0.0  ;;  %v2071_v60 = vmul.f32 1.442695, %v2057_v62  ;;  %v17622_v62 = vmov 0.0  }
 0x581   : > { %v2050_v23 = vpop.xlane.xlu0 %2049  ;;  %2082 = vadd.xlane.f32.xlu1 %v2081_v56 }
 0x582   : > { %v2058_v25 = vsub.f32 %v2021_v53, %v2050_v23 }
 0x583   : > { %v15146_v5 = vpop.eup %13710 }
 0x584   : > { %v2073_v26 = vmul.f32 1.442695, %v2058_v25  ;;  %v2084_v47 = vsel %vm2026_vm12, %v15146_v5, 0.0 }
 0x585   : > { %2085 = vadd.xlane.f32.xlu0 %v2084_v47 }
 0x586   : > { %13716 = vpow2.f32 %v2073_v26 }
 0x587   : > { %v15150_v52 = vpop.eup %13712  ;;  %13718 = vpow2.f32 %v2071_v60 }
 0x588   : > { %v2087_v24 = vsel %vm2026_vm12, %v15150_v52, 0.0 }
 0x589   : > { %2088 = vadd.xlane.f32.xlu1 %v2087_v24 }
 0x58b   : > { %v15154_v8 = vpop.eup %13714 }
 0x58c   : > { %v2090_v1 = vsel %vm2026_vm12, %v15154_v8, 0.0 }
 0x58d   : > { %2091 = vadd.xlane.f32.xlu0 %v2090_v1 }
 0x593   : > { %v15158_v53 = vpop.eup %13716 }
 0x594   : > { %v2096_v22 = vsel %vm2026_vm12, %v15158_v53, 0.0  ;;  %v15173_v39 = vpop.eup %13718 }
 0x595   : > { %2097 = vadd.xlane.f32.xlu0 %v2096_v22  ;;  %v2093_v28 = vsel %vm2026_vm12, %v15173_v39, 0.0 }
 0x59a   : > { %2496 = vrot.lane.b32.xlu1 %v14923_v7, %s14461_s25 }
 0x5ab   : > { %2548 = vrot.lane.b32.xlu0 %v14933_v15, %s14461_s25 }
 0x5af   : > { %2600 = vrot.lane.b32.xlu0 %v14948_v33, %s14461_s25 }
 0x5b3   : > { %2597 = vrot.lane.b32.xlu0 %v14986_v19, %s14461_s25 }
 0x5b7   : > { %2704 = vrot.lane.b32.xlu0 %v14981_v20, %s14461_s25 }
 0x5bb   : > { %2701 = vrot.lane.b32.xlu0 %v15012_v17, %s14461_s25 }
 0x5be   : > { %2094 = vadd.xlane.f32.xlu1 %v2093_v28 }
 0x5bf   : > { %2808 = vrot.lane.b32.xlu0 %v15008_v16, %s14461_s25 }
 0x5c3   : > { %2805 = vrot.lane.b32.xlu0 %v15041_v42, %s14461_s25 }
 0x5c7   : > { %3054 = vrot.lane.b32.xlu0 %v15045_v45, %s14461_s25 }
 0x5cf   : > { %2493 = vrot.lane.b32.xlu1 %v14944_v27, %s14461_s25 }
 0x5d3   : > { %2545 = vrot.lane.b32.xlu1 %v14960_v6, %s14461_s25 }
 0x5d7   : > { %2652 = vrot.lane.b32.xlu1 %v14964_v43, %s14461_s25 }
 0x5db   : > { %2649 = vrot.lane.b32.xlu1 %v14999_v18, %s14461_s25 }
 0x5df   : > { %2756 = vrot.lane.b32.xlu1 %v14995_v2, %s14461_s25 }
 0x5e3   : > { %2753 = vrot.lane.b32.xlu1 %v15027_v35, %s14461_s25 }
 0x5e7   : > { %2860 = vrot.lane.b32.xlu1 %v15023_v32, %s14461_s25 }
 0x5eb   : > { %2857 = vrot.lane.b32.xlu1 %v15053_v46, %s14461_s25 }
 0x5ef   : > { %3005 = vrot.lane.b32.xlu1 %v15033_v41, %s14461_s25 }
 0x5f3   : > { %3103 = vrot.lane.b32.xlu1 %v15205_v48, %s14461_s25 }
 0x5f7   : > { %3152 = vrot.lane.b32.xlu1 %v15211_v29, %s14461_s25 }
 0x601   : > { %v2077_v56 = vpop.xlane.xlu1 %2076 }
 0x602   : > { %13720 = vrcp.f32 %v2077_v56 }
 0x605   : > { %v2080_v23 = vpop.xlane.xlu0 %2079 }
 0x606   : > { %13722 = vrcp.f32 %v2080_v23  ;;  %v1574_v23 = vadd.f32 %v15075_v61, %v14927_v10 }
 0x60a   : > { %v2083_v25 = vpop.xlane.xlu1 %2082 }
 0x60b   : > { %13724 = vrcp.f32 %v2083_v25 }
 0x60e   : > { %v2086_v47 = vpop.xlane.xlu0 %2085 }
 0x60f   : > { %v13721_v26 = vpop.eup %13720  ;;  %13726 = vrcp.f32 %v2086_v47 }
 0x610   : > { %v2107_v21 = vmul.f32 %v13721_v26, %v15134_v51  ;;  %v2266_v51 = vsel %vm2126_vm11, %v15211_v29, 0 }
 0x612   : > { %v2115_v24 = vpack.c.bf16 %v2107_v21, %v2107_v21  ;;  %v2089_v22 = vpop.xlane.xlu1 %2088  ;;  %v15236_v21 = vpack.c.bf16 %v1574_v23, %v1574_v23 }
 0x613   : > { %v13723_v1 = vpop.eup %13722  ;;  %13728 = vrcp.f32 %v2089_v22 }
 0x614   : > { %12445 = vmatmul.mubr.msk.bf16.vlgmr.msra.gmra.mxu0 %vm2026_vm12, %v2115_v24  ;;  %v2108_v11 = vmul.f32 %v13723_v1, %v15138_v59  ;;  %v15230_v59 = vpack.c.bf16 %v14975_v50, %v14975_v50  ;;  %v2358_v22 = vsel %vm2126_vm11, %v15236_v21, 0 }
 0x615   : > { %12455 = vmatpush3.bf16.msra.mxu0 %v2220_v34  ;;  %12456 = vmatprep.mubr.msk.bf16.mxu0 %vm14460_vm9, %v17622_v62 }
 0x616   : > { %v2116_v60 = vpack.c.bf16 %v2108_v11, %v2108_v11  ;;  %12466 = vmatprep.subr.bf16.mxu0 %v17622_v62  ;;  %v2092_v28 = vpop.xlane.xlu0 %2091  ;;  %v2312_v24 = vsel %vm2126_vm11, %v15230_v59, 0 }
 0x617   : > { %13730 = vrcp.f32 %v2092_v28 }
 0x618   : > { %12451 = vmatmul.mubr.msk.bf16.vlgmr.msra.gmra.mxu1 %vm2026_vm12, %v2116_v60  ;;  %v13725_v56 = vpop.eup %13724  ;;  %v15258_v60 = vpack.c.bf16 %v14984_v54, %v14984_v54 }
 0x619   : > { %12461 = vmatpush3.bf16.msra.mxu1 %v2266_v51  ;;  %12462 = vmatprep.mubr.msk.bf16.mxu1 %vm14460_vm9, %v17622_v62  ;;  %v2109_v25 = vmul.f32 %v13725_v56, %v15142_v9  ;;  %v15247_v9 = vpack.c.bf16 %v14967_v44, %v14967_v44 }
 0x61a   : > { %12472 = vmatprep.subr.bf16.mxu1 %v17622_v62  ;;  %v2450_v54 = vsel %vm2126_vm11, %v15258_v60, 0 }
 0x61b   : > { %v2117_v26 = vpack.c.bf16 %v2109_v25, %v2109_v25  ;;  %v2404_v44 = vsel %vm2126_vm11, %v15247_v9, 0 }
 0x61c   : > { %v13727_v47 = vpop.eup %13726 }
 0x61d   : > { %12457 = vmatmul.mubr.msk.bf16.vlgmr.msra.gmra.mxu0 %vm2026_vm12, %v2117_v26  ;;  %v2110_v1 = vmul.f32 %v13727_v47, %v15146_v5  ;;  %v2497_v26 = vpop.permute.xlu1 %2496 }
 0x61e   : > { %12467 = vmatpush3.bf16.msra.mxu0 %v2312_v24  ;;  %v2098_v50 = vpop.xlane.xlu0 %2097  ;;  %12468 = vmatprep.mubr.msk.bf16.mxu0 %vm14460_vm9, %v17622_v62 }
 0x61f   : > { %13732 = vrcp.f32 %v2098_v50  ;;  %v2118_v10 = vpack.c.bf16 %v2110_v1, %v2110_v1  ;;  %12478 = vmatprep.subr.bf16.mxu0 %v17622_v62 }
 0x620   : > { %v13729_v61 = vpop.eup %13728 }
 0x621   : > { %12463 = vmatmul.mubr.msk.bf16.vlgmr.msra.gmra.mxu1 %vm2026_vm12, %v2118_v10  ;;  %v2111_v5 = vmul.f32 %v13729_v61, %v15150_v52 }
 0x622   : > { %12473 = vmatpush3.bf16.msra.mxu1 %v2358_v22  ;;  %12474 = vmatprep.mubr.msk.bf16.mxu1 %vm14460_vm9, %v17622_v62  ;;  %v2549_v56 = vpop.permute.xlu0 %2548 }
 0x623   : > { %v2119_v34 = vpack.c.bf16 %v2111_v5, %v2111_v5  ;;  %12484 = vmatprep.subr.bf16.mxu1 %v17622_v62  ;;  %v2554_v25 = vsel %vm1657_vm10, %v2549_v56, 0 }
 0x624   : > { %v13731_v11 = vpop.eup %13730 }
 0x625   : > { %12469 = vmatmul.mubr.msk.bf16.vlgmr.msra.gmra.mxu0 %vm2026_vm12, %v2119_v34  ;;  %v2112_v28 = vmul.f32 %v13731_v11, %v15154_v8 }
 0x626   : > { %12479 = vmatpush3.bf16.msra.mxu0 %v2404_v44  ;;  %12480 = vmatprep.mubr.msk.bf16.mxu0 %vm14460_vm9, %v17622_v62  ;;  %v2601_v47 = vpop.permute.xlu0 %2600 }
 0x627   : > { %v2120_v52 = vpack.c.bf16 %v2112_v28, %v2112_v28  ;;  %12490 = vmatprep.subr.bf16.mxu0 %v17622_v62  ;;  %v2606_v56 = vsel %vm1657_vm10, %v2601_v47, 0 }
 0x629   : > { %12475 = vmatmul.mubr.msk.bf16.vlgmr.msra.gmra.mxu1 %vm2026_vm12, %v2120_v52  ;;  %v2502_v52 = vsel %vm1657_vm10, %v2497_v26, 0 }
 0x62a   : > { %12485 = vmatpush3.bf16.msra.mxu1 %v2450_v54  ;;  %12486 = vmatprep.mubr.msk.bf16.mxu1 %vm14460_vm9, %v17622_v62  ;;  %v2598_v1 = vpop.permute.xlu0 %2597 }
 0x62b   : > { %12496 = vmatprep.subr.bf16.mxu1 %v17622_v62 }
 0x62c   : > { %v13733_v51 = vpop.eup %13732 }
 0x62d   : > { %v2114_v8 = vmul.f32 %v13733_v51, %v15158_v53 }
 0x62e   : > { %v2705_v53 = vpop.permute.xlu0 %2704 }
 0x62f   : > { %v2122_v23 = vpack.c.bf16 %v2114_v8, %v2114_v8 }
 0x631   : > { %12487 = vmatmul.mubr.msk.bf16.vlgmr.msra.gmra.mxu1 %vm2026_vm12, %v2122_v23 }
 0x632   : > { %12497 = vmatpush3.bf16.xpose.msra.mxu1 %v2554_v25  ;;  %12498 = vmatprep.mubr.msk.bf16.mxu1 %vm14460_vm9, %v17622_v62  ;;  %v2702_v11 = vpop.permute.xlu0 %2701 }
 0x633   : > { %12508 = vmatprep.subr.bf16.mxu1 %v17622_v62 }
 0x647   : > { %v2095_v24 = vpop.xlane.xlu1 %2094 }
 0x648   : > { %13734 = vrcp.f32 %v2095_v24  ;;  %v2710_v24 = vsel %vm1657_vm10, %v2705_v53, 0 }
 0x64b   : > { %v2494_v50 = vpop.permute.xlu1 %2493 }
 0x64f   : > { %v2546_v10 = vpop.permute.xlu1 %2545 }
 0x650   : > { %12499 = vmatmul.mubr.msk.bf16.vlgmr.msra.gmra.mxu1 %vm1657_vm10, %v2546_v10 }
 0x651   : > { %12510 = vmatprep.mubr.msk.bf16.mxu1 %vm14460_vm9, %v17622_v62 }
 0x653   : > { %v2653_v61 = vpop.permute.xlu1 %2652 }
 0x654   : > { %v2658_v22 = vsel %vm1657_vm10, %v2653_v61, 0 }
 0x655   : > { %v13735_v5 = vpop.eup %13734  ;;  %12509 = vmatpush3.bf16.xpose.msra.mxu1 %v2658_v22 }
 0x656   : > { %v2113_v34 = vmul.f32 %v13735_v5, %v15173_v39  ;;  %12520 = vmatprep.subr.bf16.mxu1 %v17622_v62  ;;  %v2809_v39 = vpop.permute.xlu0 %2808 }
 0x657   : > { %v2650_v44 = vpop.permute.xlu1 %2649  ;;  %v2814_v53 = vsel %vm1657_vm10, %v2809_v39, 0 }
 0x658   : > { %v2121_v28 = vpack.c.bf16 %v2113_v34, %v2113_v34 }
 0x65a   : > { %12481 = vmatmul.mubr.msk.bf16.vlgmr.msra.gmra.mxu0 %vm2026_vm12, %v2121_v28  ;;  %v2806_v23 = vpop.permute.xlu0 %2805 }
 0x65b   : > { %12491 = vmatpush3.bf16.xpose.msra.mxu0 %v2502_v52  ;;  %v2757_v54 = vpop.permute.xlu1 %2756  ;;  %12492 = vmatprep.mubr.msk.bf16.mxu0 %vm14460_vm9, %v17622_v62 }
 0x65c   : > { %v2762_v51 = vsel %vm1657_vm10, %v2757_v54, 0  ;;  %12511 = vmatmul.mubr.msk.bf16.vlgmr.msra.gmra.mxu1 %vm1657_vm10, %v2650_v44  ;;  %12502 = vmatprep.subr.bf16.mxu0 %v17622_v62 }
 0x65d   : > { %12521 = vmatpush3.bf16.xpose.msra.mxu1 %v2762_v51  ;;  %12522 = vmatprep.mubr.msk.bf16.mxu1 %vm14460_vm9, %v17622_v62 }
 0x65e   : > { %12532 = vmatprep.subr.bf16.mxu1 %v17622_v62  ;;  %v3055_v47 = vpop.permute.xlu0 %3054 }
 0x65f   : > { %v2754_v8 = vpop.permute.xlu1 %2753  ;;  %v3060_v10 = vsel %vm2126_vm11, %v3055_v47, 0 }
 0x662   : > { %12493 = vmatmul.mubr.msk.bf16.vlgmr.msra.gmra.mxu0 %vm1657_vm10, %v2494_v50 }
 0x663   : > { %12503 = vmatpush3.bf16.xpose.msra.mxu0 %v2606_v56  ;;  %v2861_v25 = vpop.permute.xlu1 %2860  ;;  %12504 = vmatprep.mubr.msk.bf16.mxu0 %vm14460_vm9, %v17622_v62 }
 0x664   : > { %v2866_v26 = vsel %vm1657_vm10, %v2861_v25, 0  ;;  %12523 = vmatmul.mubr.msk.bf16.vlgmr.msra.gmra.mxu1 %vm1657_vm10, %v2754_v8  ;;  %12514 = vmatprep.subr.bf16.mxu0 %v17622_v62 }
 0x665   : > { %12533 = vmatpush3.bf16.xpose.msra.mxu1 %v2866_v26  ;;  %12534 = vmatprep.mubr.msk.bf16.mxu1 %vm14460_vm9, %v17622_v62 }
 0x666   : > { %12544 = vmatprep.subr.bf16.mxu1 %v17622_v62 }
 0x667   : > { %v2858_v50 = vpop.permute.xlu1 %2857 }
 0x66a   : > { %12505 = vmatmul.mubr.msk.bf16.vlgmr.msra.gmra.mxu0 %vm1657_vm10, %v2598_v1 }
 0x66b   : > { %12515 = vmatpush3.bf16.xpose.msra.mxu0 %v2710_v24  ;;  %12516 = vmatprep.mubr.msk.bf16.mxu0 %vm14460_vm9, %v17622_v62  ;;  %v3006_v1 = vpop.permute.xlu1 %3005 }
 0x66c   : > { %12535 = vmatmul.mubr.msk.bf16.vlgmr.msra.gmra.mxu1 %vm1657_vm10, %v2858_v50  ;;  %12526 = vmatprep.subr.bf16.mxu0 %v17622_v62  ;;  %v3011_v61 = vsel %vm2126_vm11, %v3006_v1, 0 }
 0x66d   : > { %12545 = vmatpush3.bf16.msra.mxu1 %v3060_v10  ;;  %12546 = vmatprep.mubr.msk.bf16.mxu1 %vm14460_vm9, %v17622_v62 }
 0x66e   : > { %12556 = vmatprep.subr.bf16.mxu1 %v17622_v62 }
 0x672   : > { %12517 = vmatmul.mubr.msk.bf16.vlgmr.msra.gmra.mxu0 %vm1657_vm10, %v2702_v11 }
 0x673   : > { %12527 = vmatpush3.bf16.xpose.msra.mxu0 %v2814_v53  ;;  %12528 = vmatprep.mubr.msk.bf16.mxu0 %vm14460_vm9, %v17622_v62 }
 0x674   : > { %12538 = vmatprep.subr.bf16.mxu0 %v17622_v62 }
 0x67a   : > { %12529 = vmatmul.mubr.msk.bf16.vlgmr.msra.gmra.mxu0 %vm1657_vm10, %v2806_v23 }
 0x67b   : > { %12539 = vmatpush3.bf16.msra.mxu0 %v3011_v61  ;;  %12540 = vmatprep.mubr.msk.bf16.mxu0 %vm14460_vm9, %v17622_v62 }
 0x67c   : > { %12550 = vmatprep.subr.bf16.mxu0 %v17622_v62 }
 0x6d4   : > { %v15325_v22 = vpop.f32.mrf.mxu0 }
 0x6d5   : > { %17623 = vst [vmem:[#allocation40_spill] sm:$0xff] %v15325_v22 }
 0x6d6   : > { %v12446_v5 = vpop.f32.mrf.mxu0 }
 0x6d8   : > { %v2167_v34 = vpop.f32.mrf.mxu0  ;;  %v15327_v11 = vpop.f32.mrf.mxu1 }
 0x6d9   : > { %17624 = vst [vmem:[#allocation41_spill] sm:$0xff] %v15327_v11 }
 0x6da   : > { %v12447_v44 = vpop.f32.mrf.mxu0  ;;  %v12452_v28 = vpop.f32.mrf.mxu1 }
 0x6dc   : > { %v2213_v52 = vpop.f32.mrf.mxu1 }
 0x6dd   : > { %v15329_v54 = vpop.f32.mrf.mxu0 }
 0x6de   : > { %17625 = vst [vmem:[#allocation42_spill] sm:$0xff] %v15329_v54  ;;  %v12453_v51 = vpop.f32.mrf.mxu1 }
 0x6df   : > { %v12458_v39 = vpop.f32.mrf.mxu0 }
 0x6e1   : > { %v2259_v8 = vpop.f32.mrf.mxu0  ;;  %v15331_v56 = vpop.f32.mrf.mxu1 }
 0x6e2   : > { %17626 = vst [vmem:[#allocation43_spill] sm:$0xff] %v15331_v56 }
 0x6e3   : > { %v12459_v23 = vpop.f32.mrf.mxu0  ;;  %v12464_v25 = vpop.f32.mrf.mxu1 }
 0x6e5   : > { %v2305_v26 = vpop.f32.mrf.mxu1  ;;  %v15333_v47 = vpop.f32.mrf.mxu0 }
 0x6e6   : > { %17627 = vst [vmem:[#allocation44_spill] sm:$0xff] %v15333_v47 }
 0x6e7   : > { %v12465_v24 = vpop.f32.mrf.mxu1  ;;  %v12470_v50 = vpop.f32.mrf.mxu0 }
 0x6e9   : > { %v2351_v10 = vpop.f32.mrf.mxu0  ;;  %v15335_v53 = vpop.f32.mrf.mxu1 }
 0x6ea   : > { %17628 = vst [vmem:[#allocation45_spill] sm:$0xff] %v15335_v53 }
 0x6eb   : > { %v12471_v1 = vpop.f32.mrf.mxu0  ;;  %v12476_v61 = vpop.f32.mrf.mxu1 }
 0x6ed   : > { %v2397_v5 = vpop.f32.mrf.mxu1 }
 0x6ef   : > { %v12477_v34 = vpop.f32.mrf.mxu1 }
 0x6f1   : > { %v15337_v44 = vpop.f32.mrf.mxu1 }
 0x6f2   : > { %17629 = vst [vmem:[#allocation46_spill] sm:$0xff] %v15337_v44 }
 0x6f3   : > { %v12488_v28 = vpop.f32.mrf.mxu1 }
 0x6f5   : > { %v2489_v52 = vpop.f32.mrf.mxu1 }
 0x6f7   : > { %v12489_v51 = vpop.f32.mrf.mxu1 }
 0x710   : > { %v2590_v39 = vpop.f32.mrf.mxu1 }
 0x711   : > { %v15340_v8 = vadd.f32 %v2590_v39, %v15082_v13 }
 0x712   : > { %v12500_v23 = vpop.f32.mrf.mxu1 }
 0x713   : > { %v2911_v25 = vsel %vm2026_vm12, %v15340_v8, -inf }
 0x714   : > { %2912 = vmax.xlane.f32.xlu1 %v2911_v25  ;;  %v2593_v26 = vpop.f32.mrf.mxu1 }
 0x716   : > { %v12501_v24 = vpop.f32.mrf.mxu1 }
 0x71a   : > { %v15344_v50 = vpop.f32.mrf.mxu0 }
 0x71b   : > { %17630 = vst [vmem:[#allocation47_spill] sm:$0xff] %v15344_v50 }
 0x71c   : > { %v12482_v10 = vpop.f32.mrf.mxu0  ;;  %v2694_v1 = vpop.f32.mrf.mxu1 }
 0x71e   : > { %v2443_v61 = vpop.f32.mrf.mxu0  ;;  %v12512_v5 = vpop.f32.mrf.mxu1 }
 0x720   : > { %v12483_v34 = vpop.f32.mrf.mxu0  ;;  %v2697_v28 = vpop.f32.mrf.mxu1 }
 0x721   : > { %v2695_v28 = vadd.f32 %v2694_v1, %v15100_v63 }
 0x722   : > { %v2538_v52 = vpop.f32.mrf.mxu0  ;;  %v12513_v51 = vpop.f32.mrf.mxu1 }
 0x723   : > { %v2539_v39 = vadd.f32 %v2538_v52, %v15073_v31 }
 0x724   : > { %v12494_v0 = vpop.f32.mrf.mxu0  ;;  %v2798_v23 = vpop.f32.mrf.mxu1 }
 0x725   : > { %v2908_v58 = vsel %vm2026_vm12, %v2539_v39, -inf }
 0x726   : > { %v12524_v30 = vpop.f32.mrf.mxu1  ;;  %2909 = vmax.xlane.f32.xlu0 %v2908_v58  ;;  %v2541_v25 = vpop.f32.mrf.mxu0  ;;  %v2917_v58 = vsel %vm2026_vm12, %v2695_v28, -inf }
 0x727   : > { %v2799_v30 = vadd.f32 %v2798_v23, %v15113_v14 }
 0x728   : > { %v12495_v26 = vpop.f32.mrf.mxu0  ;;  %v2801_v24 = vpop.f32.mrf.mxu1 }
 0x729   : > { %v2923_v1 = vsel %vm2026_vm12, %v2799_v30, -inf }
 0x72a   : > { %v2642_v57 = vpop.f32.mrf.mxu0  ;;  %v12525_v10 = vpop.f32.mrf.mxu1 }
 0x72b   : > { %v2643_v61 = vadd.f32 %v2642_v57, %v15091_v36 }
 0x72c   : > { %v12506_v5 = vpop.f32.mrf.mxu0  ;;  %v2902_v34 = vpop.f32.mrf.mxu1 }
 0x72d   : > { %v2914_v51 = vsel %vm2026_vm12, %v2643_v61, -inf  ;;  %v15355_v10 = vadd.f32 %v2902_v34, %v15125_v4 }
 0x72e   : > { %v12536_v52 = vpop.f32.mrf.mxu1  ;;  %2915 = vmax.xlane.f32.xlu0 %v2914_v51  ;;  %v2645_v0 = vpop.f32.mrf.mxu0 }
 0x72f   : > { %v2929_v23 = vsel %vm2026_vm12, %v15355_v10, -inf }
 0x730   : > { %v12507_v55 = vpop.f32.mrf.mxu0  ;;  %v2905_v49 = vpop.f32.mrf.mxu1 }
 0x732   : > { %v12537_v25 = vpop.f32.mrf.mxu1  ;;  %2918 = vmax.xlane.f32.xlu0 %v2917_v58  ;;  %v2746_v26 = vpop.f32.mrf.mxu0 }
 0x733   : > { %v2747_v57 = vadd.f32 %v2746_v26, %v15107_v40  ;;  %v15367_v26 = vpop.permute.xlu1 %3103 }
 0x734   : > { %v12518_v24 = vpop.f32.mrf.mxu0 }
 0x735   : > { %v2920_v5 = vsel %vm2026_vm12, %v2747_v57, -inf }
 0x736   : > { %2924 = vmax.xlane.f32.xlu0 %v2923_v1  ;;  %2921 = vmax.xlane.f32.xlu1 %v2920_v5  ;;  %v2749_v49 = vpop.f32.mrf.mxu0 }
 0x737   : > { %v15369_v24 = vpop.permute.xlu1 %3152 }
 0x738   : > { %v12519_v55 = vpop.f32.mrf.mxu0 }
 0x73a   : > { %2930 = vmax.xlane.f32.xlu0 %v2929_v23  ;;  %v2850_v51 = vpop.f32.mrf.mxu0 }
 0x73b   : > { %v2851_v52 = vadd.f32 %v2850_v51, %v15118_v3 }
 0x73c   : > { %v12530_v0 = vpop.f32.mrf.mxu0 }
 0x73d   : > { %v2926_v58 = vsel %vm2026_vm12, %v2851_v52, -inf }
 0x73e   : > { %2927 = vmax.xlane.f32.xlu1 %v2926_v58  ;;  %v2853_v34 = vpop.f32.mrf.mxu0 }
 0x740   : > { %v12531_v25 = vpop.f32.mrf.mxu0 }
 0x74f   : > { %3250 = vrot.lane.b32.xlu1 %v15236_v21, %s14461_s25 }
 0x750   : > { %3201 = vrot.lane.b32.xlu0 %v15230_v59, %s14461_s25 }
 0x79d   : > { %v2913_v1 = vpop.xlane.xlu1 %2912 }
 0x79e   : > { %v2933_v5 = vsub.f32 %v15340_v8, %v2913_v1 }
 0x7a0   : > { %v2942_v49 = vmul.f32 1.442695, %v2933_v5 }
 0x7a2   : > { %13736 = vpow2.f32 %v2942_v49 }
 0x7af   : > { %v15372_v55 = vpop.eup %13736  ;;  %v2910_v23 = vpop.xlane.xlu0 %2909 }
 0x7b0   : > { %v2932_v51 = vsub.f32 %v2539_v39, %v2910_v23  ;;  %v2959_v0 = vsel %vm2026_vm12, %v15372_v55, 0.0 }
 0x7b1   : > { %2960 = vadd.xlane.f32.xlu0 %v2959_v0 }
 0x7b2   : > { %v2940_v58 = vmul.f32 1.442695, %v2932_v51 }
 0x7b4   : > { %13738 = vpow2.f32 %v2940_v58 }
 0x7b7   : > { %v2916_v34 = vpop.xlane.xlu0 %2915 }
 0x7b8   : > { %v2934_v25 = vsub.f32 %v2643_v61, %v2916_v34 }
 0x7ba   : > { %v2944_v38 = vmul.f32 1.442695, %v2934_v25 }
 0x7bb   : > { %v2919_v12 = vpop.xlane.xlu0 %2918 }
 0x7bc   : > { %13740 = vpow2.f32 %v2944_v38  ;;  %v2935_v37 = vsub.f32 %v2695_v28, %v2919_v12 }
 0x7be   : > { %v2946_v50 = vmul.f32 1.442695, %v2935_v37 }
 0x7bf   : > { %v2925_v8 = vpop.xlane.xlu0 %2924  ;;  %v2922_v1 = vpop.xlane.xlu1 %2921 }
 0x7c0   : > { %13742 = vpow2.f32 %v2946_v50  ;;  %v2937_v5 = vsub.f32 %v2799_v30, %v2925_v8  ;;  %v2936_v49 = vsub.f32 %v2747_v57, %v2922_v1 }
 0x7c1   : > { %v15376_v44 = vpop.eup %13738 }
 0x7c2   : > { %v2950_v39 = vmul.f32 1.442695, %v2937_v5  ;;  %v2948_v23 = vmul.f32 1.442695, %v2936_v49  ;;  %v2956_v51 = vsel %vm2026_vm12, %v15376_v44, 0.0 }
 0x7c3   : > { %2957 = vadd.xlane.f32.xlu1 %v2956_v51  ;;  %v2931_v0 = vpop.xlane.xlu0 %2930 }
 0x7c4   : > { %13744 = vpow2.f32 %v2950_v39  ;;  %v2939_v34 = vsub.f32 %v15355_v10, %v2931_v0  ;;  %v3158_v0 = vsel %vm2126_vm11, %v15369_v24, 0 }
 0x7c5   : > { %13746 = vpow2.f32 %v2948_v23 }
 0x7c6   : > { %v2954_v8 = vmul.f32 1.442695, %v2939_v34 }
 0x7c7   : > { %v2928_v58 = vpop.xlane.xlu1 %2927  ;;  %v3202_v10 = vpop.permute.xlu0 %3201 }
 0x7c8   : > { %v2938_v25 = vsub.f32 %v2851_v52, %v2928_v58  ;;  %13748 = vpow2.f32 %v2954_v8 }
 0x7c9   : > { %v15380_v61 = vpop.eup %13740 }
 0x7ca   : > { %v2962_v37 = vsel %vm2026_vm12, %v15380_v61, 0.0  ;;  %v2952_v1 = vmul.f32 1.442695, %v2938_v25 }
 0x7cb   : > { %2963 = vadd.xlane.f32.xlu1 %v2962_v37  ;;  %v3251_v37 = vpop.permute.xlu1 %3250 }
 0x7cc   : > { %13750 = vpow2.f32 %v2952_v1 }
 0x7cd   : > { %v15384_v38 = vpop.eup %13742 }
 0x7ce   : > { %v2965_v12 = vsel %vm2026_vm12, %v15384_v38, 0.0 }
 0x7cf   : > { %2966 = vadd.xlane.f32.xlu0 %v2965_v12 }
 0x7d1   : > { %v15388_v50 = vpop.eup %13744 }
 0x7d2   : > { %v15390_v28 = vpop.eup %13746  ;;  %v2971_v30 = vsel %vm2026_vm12, %v15388_v50, 0.0 }
 0x7d3   : > { %2972 = vadd.xlane.f32.xlu0 %v2971_v30  ;;  %v2968_v57 = vsel %vm2026_vm12, %v15390_v28, 0.0 }
 0x7d4   : > { %2969 = vadd.xlane.f32.xlu1 %v2968_v57 }
 0x7d5   : > { %v15401_v5 = vpop.eup %13748 }
 0x7d6   : > { %v2977_v39 = vsel %vm2026_vm12, %v15401_v5, 0.0 }
 0x7d9   : > { %v15403_v49 = vpop.eup %13750 }
 0x7da   : > { %v2974_v23 = vsel %vm2026_vm12, %v15403_v49, 0.0 }
 0x7e5   : > { %3348 = vrot.lane.b32.xlu1 %v15258_v60, %s14461_s25 }
 0x7e9   : > { %3299 = vrot.lane.b32.xlu0 %v15247_v9, %s14461_s25 }
 0x808   : > { %2978 = vadd.xlane.f32.xlu0 %v2977_v39  ;;  %v3109_v39 = vsel %vm2126_vm11, %v15367_v26, 0 }
 0x809   : > { %2975 = vadd.xlane.f32.xlu1 %v2974_v23 }
 0x81a   : > { %3448 = vrot.lane.b32.xlu1 %v14933_v15, %s14462_s7 }
 0x81e   : > { %3446 = vrot.lane.b32.xlu1 %v14960_v6, %s14462_s7  ;;  %3398 = vrot.lane.b32.xlu0 %v14923_v7, %s14462_s7 }
 0x822   : > { %3548 = vrot.lane.b32.xlu1 %v14964_v43, %s14462_s7  ;;  %3396 = vrot.lane.b32.xlu0 %v14944_v27, %s14462_s7 }
 0x826   : > { %3546 = vrot.lane.b32.xlu1 %v14999_v18, %s14462_s7  ;;  %3498 = vrot.lane.b32.xlu0 %v14948_v33, %s14462_s7 }
 0x82a   : > { %3648 = vrot.lane.b32.xlu1 %v14995_v2, %s14462_s7  ;;  %3496 = vrot.lane.b32.xlu0 %v14986_v19, %s14462_s7 }
 0x82e   : > { %3646 = vrot.lane.b32.xlu1 %v15027_v35, %s14462_s7  ;;  %3598 = vrot.lane.b32.xlu0 %v14981_v20, %s14462_s7 }
 0x832   : > { %3748 = vrot.lane.b32.xlu1 %v15023_v32, %s14462_s7  ;;  %3596 = vrot.lane.b32.xlu0 %v15012_v17, %s14462_s7 }
 0x836   : > { %3746 = vrot.lane.b32.xlu1 %v15053_v46, %s14462_s7  ;;  %3698 = vrot.lane.b32.xlu0 %v15008_v16, %s14462_s7 }
 0x83a   : > { %3892 = vrot.lane.b32.xlu1 %v15033_v41, %s14462_s7  ;;  %3696 = vrot.lane.b32.xlu0 %v15041_v42, %s14462_s7  ;;  %v2961_v52 = vpop.xlane.xlu0 %2960 }
 0x83b   : > { %13752 = vrcp.f32 %v2961_v52 }
 0x83e   : > { %3988 = vrot.lane.b32.xlu1 %v15205_v48, %s14462_s7  ;;  %3940 = vrot.lane.b32.xlu0 %v15045_v45, %s14462_s7 }
 0x842   : > { %4036 = vrot.lane.b32.xlu1 %v15211_v29, %s14462_s7 }
 0x848   : > { %v13753_v51 = vpop.eup %13752 }
 0x849   : > { %v2989_v12 = vmul.f32 %v13753_v51, %v15372_v55 }
 0x84b   : > { %v2997_v30 = vpack.c.bf16 %v2989_v12, %v2989_v12  ;;  %v3207_v12 = vsel %vm2126_vm11, %v3202_v10, 0 }
 0x84c   : > { %v2958_v57 = vpop.xlane.xlu1 %2957 }
 0x84d   : > { %13754 = vrcp.f32 %v2958_v57  ;;  %12547 = vmatmul.mubr.msk.bf16.vlgmr.msra.gmra.mxu1 %vm2026_vm12, %v2997_v30 }
 0x84e   : > { %12557 = vmatpush3.bf16.msra.mxu1 %v3158_v0  ;;  %12558 = vmatprep.mubr.msk.bf16.mxu1 %vm14460_vm9, %v17622_v62 }
 0x84f   : > { %12568 = vmatprep.subr.bf16.mxu1 %v17622_v62 }
 0x854   : > { %v2964_v58 = vpop.xlane.xlu1 %2963 }
 0x855   : > { %13756 = vrcp.f32 %v2964_v58  ;;  %v3256_v58 = vsel %vm2126_vm11, %v3251_v37, 0 }
 0x858   : > { %v2967_v34 = vpop.xlane.xlu0 %2966 }
 0x859   : > { %13758 = vrcp.f32 %v2967_v34 }
 0x85a   : > { %v13755_v25 = vpop.eup %13754 }
 0x85b   : > { %v2988_v55 = vmul.f32 %v13755_v25, %v15376_v44 }
 0x85c   : > { %v2973_v8 = vpop.xlane.xlu0 %2972 }
 0x85d   : > { %13760 = vrcp.f32 %v2973_v8  ;;  %v2970_v1 = vpop.xlane.xlu1 %2969  ;;  %v2996_v24 = vpack.c.bf16 %v2988_v55, %v2988_v55 }
 0x85e   : > { %13762 = vrcp.f32 %v2970_v1 }
 0x85f   : > { %12541 = vmatmul.mubr.msk.bf16.vlgmr.msra.gmra.mxu0 %vm2026_vm12, %v2996_v24 }
 0x860   : > { %12551 = vmatpush3.bf16.msra.mxu0 %v3109_v39  ;;  %12552 = vmatprep.mubr.msk.bf16.mxu0 %vm14460_vm9, %v17622_v62 }
 0x861   : > { %12562 = vmatprep.subr.bf16.mxu0 %v17622_v62  ;;  %v3349_v55 = vpop.permute.xlu1 %3348 }
 0x862   : > { %v13757_v23 = vpop.eup %13756 }
 0x863   : > { %v2990_v52 = vmul.f32 %v13757_v23, %v15380_v61 }
 0x865   : > { %v2998_v44 = vpack.c.bf16 %v2990_v52, %v2990_v52 }
 0x866   : > { %v13759_v51 = vpop.eup %13758 }
 0x867   : > { %12553 = vmatmul.mubr.msk.bf16.vlgmr.msra.gmra.mxu0 %vm2026_vm12, %v2998_v44  ;;  %v2991_v30 = vmul.f32 %v13759_v51, %v15384_v38  ;;  %v3300_v38 = vpop.permute.xlu0 %3299 }
 0x868   : > { %12563 = vmatpush3.bf16.msra.mxu0 %v3207_v12  ;;  %12564 = vmatprep.mubr.msk.bf16.mxu0 %vm14460_vm9, %v17622_v62  ;;  %v3305_v25 = vsel %vm2126_vm11, %v3300_v38, 0 }
 0x869   : > { %v2999_v26 = vpack.c.bf16 %v2991_v30, %v2991_v30  ;;  %12574 = vmatprep.subr.bf16.mxu0 %v17622_v62 }
 0x86a   : > { %v13761_v57 = vpop.eup %13760 }
 0x86b   : > { %v13763_v0 = vpop.eup %13762  ;;  %12559 = vmatmul.mubr.msk.bf16.vlgmr.msra.gmra.mxu1 %vm2026_vm12, %v2999_v26  ;;  %v2993_v10 = vmul.f32 %v13761_v57, %v15388_v50 }
 0x86c   : > { %12569 = vmatpush3.bf16.msra.mxu1 %v3256_v58  ;;  %v2992_v61 = vmul.f32 %v13763_v0, %v15390_v28  ;;  %12570 = vmatprep.mubr.msk.bf16.mxu1 %vm14460_vm9, %v17622_v62  ;;  %v3354_v28 = vsel %vm2126_vm11, %v3349_v55, 0 }
 0x86d   : > { %12580 = vmatprep.subr.bf16.mxu1 %v17622_v62  ;;  %v3001_v37 = vpack.c.bf16 %v2993_v10, %v2993_v10 }
 0x86e   : > { %v3000_v34 = vpack.c.bf16 %v2992_v61, %v2992_v61 }
 0x870   : > { %12565 = vmatmul.mubr.msk.bf16.vlgmr.msra.gmra.mxu0 %vm2026_vm12, %v3000_v34 }
 0x871   : > { %12575 = vmatpush3.bf16.msra.mxu0 %v3305_v25  ;;  %12576 = vmatprep.mubr.msk.bf16.mxu0 %vm14460_vm9, %v17622_v62 }
 0x872   : > { %12586 = vmatprep.subr.bf16.mxu0 %v17622_v62 }
 0x873   : > { %12571 = vmatmul.mubr.msk.bf16.vlgmr.msra.gmra.mxu1 %vm2026_vm12, %v3001_v37 }
 0x874   : > { %12581 = vmatpush3.bf16.msra.mxu1 %v3354_v28  ;;  %12582 = vmatprep.mubr.msk.bf16.mxu1 %vm14460_vm9, %v17622_v62 }
 0x875   : > { %12592 = vmatprep.subr.bf16.mxu1 %v17622_v62 }
 0x891   : > { %v2979_v50 = vpop.xlane.xlu0 %2978 }
 0x892   : > { %13764 = vrcp.f32 %v2979_v50  ;;  %v2976_v8 = vpop.xlane.xlu1 %2975 }
 0x893   : > { %13766 = vrcp.f32 %v2976_v8 }
 0x895   : > { %v3399_v1 = vpop.permute.xlu0 %3398 }
 0x896   : > { %v3449_v24 = vpop.permute.xlu1 %3448  ;;  %v3404_v10 = vsel %vm1657_vm10, %v3399_v1, 0 }
 0x897   : > { %v3454_v61 = vsel %vm1657_vm10, %v3449_v24, 0 }
 0x899   : > { %v3397_v39 = vpop.permute.xlu0 %3396 }
 0x89a   : > { %v3447_v23 = vpop.permute.xlu1 %3446 }
 0x89d   : > { %v3499_v52 = vpop.permute.xlu0 %3498 }
 0x89e   : > { %v3549_v44 = vpop.permute.xlu1 %3548  ;;  %v3504_v25 = vsel %vm1657_vm10, %v3499_v52, 0 }
 0x89f   : > { %v13765_v51 = vpop.eup %13764  ;;  %v3554_v34 = vsel %vm1657_vm10, %v3549_v44, 0 }
 0x8a0   : > { %v13767_v12 = vpop.eup %13766  ;;  %v2995_v30 = vmul.f32 %v13765_v51, %v15401_v5 }
 0x8a1   : > { %v2994_v26 = vmul.f32 %v13767_v12, %v15403_v49  ;;  %v3497_v0 = vpop.permute.xlu0 %3496 }
 0x8a2   : > { %v3003_v57 = vpack.c.bf16 %v2995_v30, %v2995_v30  ;;  %v3547_v38 = vpop.permute.xlu1 %3546 }
 0x8a3   : > { %v3002_v58 = vpack.c.bf16 %v2994_v26, %v2994_v26 }
 0x8a4   : > { %12583 = vmatmul.mubr.msk.bf16.vlgmr.msra.gmra.mxu1 %vm2026_vm12, %v3003_v57 }
 0x8a5   : > { %12577 = vmatmul.mubr.msk.bf16.vlgmr.msra.gmra.mxu0 %vm2026_vm12, %v3002_v58  ;;  %12593 = vmatpush3.bf16.xpose.msra.mxu1 %v3454_v61  ;;  %v3599_v5 = vpop.permute.xlu0 %3598 }
 0x8a6   : > { %12587 = vmatpush3.bf16.xpose.msra.mxu0 %v3404_v10  ;;  %12588 = vmatprep.mubr.msk.bf16.mxu0 %vm14460_vm9, %v17622_v62  ;;  %v3649_v49 = vpop.permute.xlu1 %3648  ;;  %v3604_v50 = vsel %vm1657_vm10, %v3599_v5, 0 }
 0x8a7   : > { %12594 = vmatprep.mubr.msk.bf16.mxu1 %vm14460_vm9, %v17622_v62  ;;  %12598 = vmatprep.subr.bf16.mxu0 %v17622_v62  ;;  %v3654_v28 = vsel %vm1657_vm10, %v3649_v49, 0 }
 0x8a8   : > { %12604 = vmatprep.subr.bf16.mxu1 %v17622_v62 }
 0x8a9   : > { %v3597_v55 = vpop.permute.xlu0 %3596 }
 0x8aa   : > { %v3647_v37 = vpop.permute.xlu1 %3646 }
 0x8ac   : > { %12595 = vmatmul.mubr.msk.bf16.vlgmr.msra.gmra.mxu1 %vm1657_vm10, %v3447_v23 }
 0x8ad   : > { %12589 = vmatmul.mubr.msk.bf16.vlgmr.msra.gmra.mxu0 %vm1657_vm10, %v3397_v39  ;;  %12605 = vmatpush3.bf16.xpose.msra.mxu1 %v3554_v34  ;;  %v3699_v8 = vpop.permute.xlu0 %3698 }
 0x8ae   : > { %12599 = vmatpush3.bf16.xpose.msra.mxu0 %v3504_v25  ;;  %12600 = vmatprep.mubr.msk.bf16.mxu0 %vm14460_vm9, %v17622_v62  ;;  %v3749_v1 = vpop.permute.xlu1 %3748  ;;  %v3704_v52 = vsel %vm1657_vm10, %v3699_v8, 0 }
 0x8af   : > { %12606 = vmatprep.mubr.msk.bf16.mxu1 %vm14460_vm9, %v17622_v62  ;;  %12610 = vmatprep.subr.bf16.mxu0 %v17622_v62  ;;  %v3754_v39 = vsel %vm1657_vm10, %v3749_v1, 0 }
 0x8b0   : > { %12616 = vmatprep.subr.bf16.mxu1 %v17622_v62 }
 0x8b1   : > { %v3697_v24 = vpop.permute.xlu0 %3696 }
 0x8b2   : > { %v3747_v23 = vpop.permute.xlu1 %3746 }
 0x8b4   : > { %12607 = vmatmul.mubr.msk.bf16.vlgmr.msra.gmra.mxu1 %vm1657_vm10, %v3547_v38 }
 0x8b5   : > { %12601 = vmatmul.mubr.msk.bf16.vlgmr.msra.gmra.mxu0 %vm1657_vm10, %v3497_v0  ;;  %12617 = vmatpush3.bf16.xpose.msra.mxu1 %v3654_v28  ;;  %v3941_v44 = vpop.permute.xlu0 %3940 }
 0x8b6   : > { %12611 = vmatpush3.bf16.xpose.msra.mxu0 %v3604_v50  ;;  %12612 = vmatprep.mubr.msk.bf16.mxu0 %vm14460_vm9, %v17622_v62  ;;  %v3893_v51 = vpop.permute.xlu1 %3892  ;;  %v3946_v12 = vsel %vm2126_vm11, %v3941_v44, 0 }
 0x8b7   : > { %12618 = vmatprep.mubr.msk.bf16.mxu1 %vm14460_vm9, %v17622_v62  ;;  %12622 = vmatprep.subr.bf16.mxu0 %v17622_v62  ;;  %v3898_v30 = vsel %vm2126_vm11, %v3893_v51, 0 }
 0x8b8   : > { %12628 = vmatprep.subr.bf16.mxu1 %v17622_v62 }
 0x8bc   : > { %12619 = vmatmul.mubr.msk.bf16.vlgmr.msra.gmra.mxu1 %vm1657_vm10, %v3647_v37 }
 0x8bd   : > { %12613 = vmatmul.mubr.msk.bf16.vlgmr.msra.gmra.mxu0 %vm1657_vm10, %v3597_v55  ;;  %12629 = vmatpush3.bf16.xpose.msra.mxu1 %v3754_v39 }
 0x8be   : > { %12623 = vmatpush3.bf16.xpose.msra.mxu0 %v3704_v52  ;;  %12624 = vmatprep.mubr.msk.bf16.mxu0 %vm14460_vm9, %v17622_v62 }
 0x8bf   : > { %12630 = vmatprep.mubr.msk.bf16.mxu1 %vm14460_vm9, %v17622_v62  ;;  %12634 = vmatprep.subr.bf16.mxu0 %v17622_v62 }
 0x8c0   : > { %12640 = vmatprep.subr.bf16.mxu1 %v17622_v62 }
 0x8c4   : > { %12631 = vmatmul.mubr.msk.bf16.vlgmr.msra.gmra.mxu1 %vm1657_vm10, %v3747_v23 }
 0x8c5   : > { %12625 = vmatmul.mubr.msk.bf16.vlgmr.msra.gmra.mxu0 %vm1657_vm10, %v3697_v24  ;;  %12641 = vmatpush3.bf16.msra.mxu1 %v3946_v12 }
 0x8c6   : > { %12635 = vmatpush3.bf16.msra.mxu0 %v3898_v30  ;;  %12636 = vmatprep.mubr.msk.bf16.mxu0 %vm14460_vm9, %v17622_v62 }
 0x8c7   : > { %12642 = vmatprep.mubr.msk.bf16.mxu1 %vm14460_vm9, %v17622_v62  ;;  %12646 = vmatprep.subr.bf16.mxu0 %v17622_v62 }
 0x8c8   : > { %12652 = vmatprep.subr.bf16.mxu1 %v17622_v62 }
 0x90d   : > { %v15539_v26 = vpop.f32.mrf.mxu1 }
 0x90f   : > { %v12548_v57 = vpop.f32.mrf.mxu1 }
 0x911   : > { %v3099_v0 = vpop.f32.mrf.mxu1 }
 0x913   : > { %v12549_v58 = vpop.f32.mrf.mxu1 }
 0x91f   : > { %v15541_v61 = vpop.f32.mrf.mxu0 }
 0x921   : > { %v12542_v10 = vpop.f32.mrf.mxu0 }
 0x923   : > { %v3050_v5 = vpop.f32.mrf.mxu0 }
 0x925   : > { %v12543_v49 = vpop.f32.mrf.mxu0 }
 0x927   : > { %v15545_v34 = vpop.f32.mrf.mxu0 }
 0x929   : > { %v12554_v25 = vpop.f32.mrf.mxu0 }
 0x92b   : > { %v3148_v55 = vpop.f32.mrf.mxu0  ;;  %v15547_v37 = vpop.f32.mrf.mxu1 }
 0x92d   : > { %v12555_v50 = vpop.f32.mrf.mxu0  ;;  %v12560_v8 = vpop.f32.mrf.mxu1 }
 0x92f   : > { %v3197_v1 = vpop.f32.mrf.mxu1 }
 0x930   : > { %v15551_v24 = vpop.f32.mrf.mxu0 }
 0x931   : > { %17631 = vst [vmem:[#allocation48_spill] sm:$0xff] %v15551_v24  ;;  %v12561_v39 = vpop.f32.mrf.mxu1 }
 0x932   : > { %v12566_v23 = vpop.f32.mrf.mxu0 }
 0x933   : > { %v15553_v52 = vpop.f32.mrf.mxu1 }
 0x934   : > { %v3246_v44 = vpop.f32.mrf.mxu0 }
 0x935   : > { %v12572_v12 = vpop.f32.mrf.mxu1 }
 0x936   : > { %v12567_v30 = vpop.f32.mrf.mxu0 }
 0x937   : > { %v3295_v57 = vpop.f32.mrf.mxu1 }
 0x939   : > { %v12573_v0 = vpop.f32.mrf.mxu1 }
 0x964   : > { %v15557_v58 = vpop.f32.mrf.mxu1 }
 0x965   : > { %17632 = vst [vmem:[#allocation49_spill] sm:$0xff] %v15557_v58  ;;  %v15559_v10 = vpop.f32.mrf.mxu0 }
 0x966   : > { %17633 = vst [vmem:[#allocation50_spill] sm:$0xff] %v15559_v10  ;;  %v12584_v49 = vpop.f32.mrf.mxu1 }
 0x967   : > { %v12578_v25 = vpop.f32.mrf.mxu0 }
 0x968   : > { %v3393_v55 = vpop.f32.mrf.mxu1 }
 0x969   : > { %v3344_v50 = vpop.f32.mrf.mxu0 }
 0x96a   : > { %v12585_v8 = vpop.f32.mrf.mxu1 }
 0x96b   : > { %v12579_v1 = vpop.f32.mrf.mxu0 }
 0x96c   : > { %v3490_v39 = vpop.f32.mrf.mxu1 }
 0x96d   : > { %v3440_v23 = vpop.f32.mrf.mxu0  ;;  %v3491_v44 = vadd.f32 %v3490_v39, %v15082_v13 }
 0x96e   : > { %v3441_v12 = vadd.f32 %v3440_v23, %v15073_v31  ;;  %v12596_v30 = vpop.f32.mrf.mxu1 }
 0x96f   : > { %v12590_v57 = vpop.f32.mrf.mxu0  ;;  %v3799_v0 = vsel %vm2026_vm12, %v3491_v44, -inf }
 0x970   : > { %3800 = vmax.xlane.f32.xlu1 %v3799_v0  ;;  %v3493_v51 = vpop.f32.mrf.mxu1  ;;  %v3796_v5 = vsel %vm2026_vm12, %v3441_v12, -inf }
 0x971   : > { %3797 = vmax.xlane.f32.xlu0 %v3796_v5  ;;  %v3443_v49 = vpop.f32.mrf.mxu0 }
 0x972   : > { %v12597_v25 = vpop.f32.mrf.mxu1 }
 0x973   : > { %v12591_v55 = vpop.f32.mrf.mxu0 }
 0x974   : > { %v3590_v50 = vpop.f32.mrf.mxu1 }
 0x975   : > { %v3540_v8 = vpop.f32.mrf.mxu0  ;;  %v3591_v23 = vadd.f32 %v3590_v50, %v15100_v63 }
 0x976   : > { %v3541_v1 = vadd.f32 %v3540_v8, %v15091_v36  ;;  %v12608_v38 = vpop.f32.mrf.mxu1 }
 0x977   : > { %v12602_v39 = vpop.f32.mrf.mxu0  ;;  %v3805_v5 = vsel %vm2026_vm12, %v3591_v23, -inf }
 0x978   : > { %v3593_v30 = vpop.f32.mrf.mxu1  ;;  %v3802_v57 = vsel %vm2026_vm12, %v3541_v1, -inf }
 0x979   : > { %3803 = vmax.xlane.f32.xlu0 %v3802_v57  ;;  %v3543_v0 = vpop.f32.mrf.mxu0 }
 0x97a   : > { %v12609_v51 = vpop.f32.mrf.mxu1 }
 0x97b   : > { %v12603_v28 = vpop.f32.mrf.mxu0 }
 0x97c   : > { %v3690_v47 = vpop.f32.mrf.mxu1 }
 0x97d   : > { %v3691_v49 = vadd.f32 %v3690_v47, %v15113_v14  ;;  %3806 = vmax.xlane.f32.xlu0 %v3805_v5  ;;  %v3640_v25 = vpop.f32.mrf.mxu0 }
 0x97e   : > { %v3641_v55 = vadd.f32 %v3640_v25, %v15107_v40  ;;  %v12620_v38 = vpop.f32.mrf.mxu1 }
 0x97f   : > { %v12614_v8 = vpop.f32.mrf.mxu0  ;;  %v3811_v50 = vsel %vm2026_vm12, %v3691_v49, -inf }
 0x980   : > { %v3693_v39 = vpop.f32.mrf.mxu1  ;;  %v3808_v30 = vsel %vm2026_vm12, %v3641_v55, -inf }
 0x981   : > { %3812 = vmax.xlane.f32.xlu0 %v3811_v50  ;;  %3809 = vmax.xlane.f32.xlu1 %v3808_v30  ;;  %v3643_v57 = vpop.f32.mrf.mxu0 }
 0x982   : > { %v12621_v28 = vpop.f32.mrf.mxu1 }
 0x983   : > { %v12615_v0 = vpop.f32.mrf.mxu0 }
 0x984   : > { %v3790_v51 = vpop.f32.mrf.mxu1 }
 0x985   : > { %v3740_v53 = vpop.f32.mrf.mxu0  ;;  %v15576_v47 = vadd.f32 %v3790_v51, %v15125_v4 }
 0x986   : > { %v15579_v5 = vadd.f32 %v3740_v53, %v15118_v3  ;;  %v12632_v25 = vpop.f32.mrf.mxu1  ;;  %v15589_v53 = vpop.permute.xlu1 %3988 }
 0x987   : > { %v12626_v38 = vpop.f32.mrf.mxu0  ;;  %v3817_v8 = vsel %vm2026_vm12, %v15576_v47, -inf }
 0x988   : > { %v3793_v39 = vpop.f32.mrf.mxu1  ;;  %3818 = vmax.xlane.f32.xlu0 %v3817_v8  ;;  %v3814_v50 = vsel %vm2026_vm12, %v15579_v5, -inf }
 0x989   : > { %3815 = vmax.xlane.f32.xlu1 %v3814_v50  ;;  %v3743_v30 = vpop.f32.mrf.mxu0 }
 0x98a   : > { %v12633_v57 = vpop.f32.mrf.mxu1  ;;  %v15591_v0 = vpop.permute.xlu1 %4036 }
 0x98b   : > { %v12627_v28 = vpop.f32.mrf.mxu0 }
 0x99a   : > { %4132 = vrot.lane.b32.xlu1 %v15236_v21, %s14462_s7 }
 0x99e   : > { %4084 = vrot.lane.b32.xlu0 %v15230_v59, %s14462_s7 }
 0x9f9   : > { %v3801_v51 = vpop.xlane.xlu1 %3800 }
 0x9fa   : > { %v3821_v25 = vsub.f32 %v3491_v44, %v3801_v51  ;;  %v3798_v38 = vpop.xlane.xlu0 %3797 }
 0x9fb   : > { %v3820_v8 = vsub.f32 %v3441_v12, %v3798_v38 }
 0x9fc   : > { %v3830_v39 = vmul.f32 1.442695, %v3821_v25 }
 0x9fd   : > { %v3828_v54 = vmul.f32 1.442695, %v3820_v8 }
 0x9fe   : > { %13768 = vpow2.f32 %v3830_v39 }
 0x9ff   : > { %13770 = vpow2.f32 %v3828_v54 }
 0xa02   : > { %v3804_v50 = vpop.xlane.xlu0 %3803 }
 0xa03   : > { %v3822_v30 = vsub.f32 %v3541_v1, %v3804_v50 }
 0xa05   : > { %v3832_v57 = vmul.f32 1.442695, %v3822_v30 }
 0xa06   : > { %v3807_v28 = vpop.xlane.xlu0 %3806 }
 0xa07   : > { %13772 = vpow2.f32 %v3832_v57  ;;  %v3823_v56 = vsub.f32 %v3591_v23, %v3807_v28 }
 0xa09   : > { %v3834_v22 = vmul.f32 1.442695, %v3823_v56 }
 0xa0a   : > { %v3813_v11 = vpop.xlane.xlu0 %3812  ;;  %v3810_v10 = vpop.xlane.xlu1 %3809 }
 0xa0b   : > { %v15593_v58 = vpop.eup %13768  ;;  %13774 = vpow2.f32 %v3834_v22  ;;  %v3825_v24 = vsub.f32 %v3691_v49, %v3813_v11  ;;  %v3824_v44 = vsub.f32 %v3641_v55, %v3810_v10 }
 0xa0c   : > { %v15595_v51 = vpop.eup %13770  ;;  %v3847_v12 = vsel %vm2026_vm12, %v15593_v58, 0.0 }
 0xa0d   : > { %v3838_v54 = vmul.f32 1.442695, %v3825_v24  ;;  %v3836_v25 = vmul.f32 1.442695, %v3824_v44  ;;  %3848 = vadd.xlane.f32.xlu0 %v3847_v12  ;;  %v3844_v1 = vsel %vm2026_vm12, %v15595_v51, 0.0 }
 0xa0e   : > { %3845 = vadd.xlane.f32.xlu1 %v3844_v1 }
 0xa0f   : > { %13776 = vpow2.f32 %v3838_v54 }
 0xa10   : > { %13778 = vpow2.f32 %v3836_v25 }
 0xa11   : > { %v3819_v38 = vpop.xlane.xlu0 %3818 }
 0xa12   : > { %v3816_v8 = vpop.xlane.xlu1 %3815  ;;  %v3827_v39 = vsub.f32 %v15576_v47, %v3819_v38 }
 0xa13   : > { %v3826_v50 = vsub.f32 %v15579_v5, %v3816_v8 }
 0xa14   : > { %v15601_v56 = vpop.eup %13772  ;;  %v3842_v30 = vmul.f32 1.442695, %v3827_v39 }
 0xa15   : > { %v3850_v22 = vsel %vm2026_vm12, %v15601_v56, 0.0  ;;  %v3840_v57 = vmul.f32 1.442695, %v3826_v50 }
 0xa16   : > { %3851 = vadd.xlane.f32.xlu1 %v3850_v22  ;;  %13780 = vpow2.f32 %v3842_v30 }
 0xa17   : > { %13782 = vpow2.f32 %v3840_v57 }
 0xa18   : > { %v15605_v11 = vpop.eup %13774 }
 0xa19   : > { %v3853_v10 = vsel %vm2026_vm12, %v15605_v11, 0.0 }
 0xa1a   : > { %3854 = vadd.xlane.f32.xlu0 %v3853_v10 }
 0xa1c   : > { %v15609_v24 = vpop.eup %13776 }
 0xa1d   : > { %v15611_v23 = vpop.eup %13778  ;;  %v3859_v49 = vsel %vm2026_vm12, %v15609_v24, 0.0 }
 0xa1e   : > { %3860 = vadd.xlane.f32.xlu0 %v3859_v49  ;;  %v3856_v55 = vsel %vm2026_vm12, %v15611_v23, 0.0 }
 0xa1f   : > { %3857 = vadd.xlane.f32.xlu1 %v3856_v55 }
 0xa23   : > { %v15623_v28 = vpop.eup %13780 }
 0xa24   : > { %v15625_v44 = vpop.eup %13782  ;;  %v3865_v12 = vsel %vm2026_vm12, %v15623_v28, 0.0 }
 0xa25   : > { %v3862_v54 = vsel %vm2026_vm12, %v15625_v44, 0.0 }
 0xa30   : > { %4228 = vrot.lane.b32.xlu1 %v15258_v60, %s14462_s7 }
 0xa34   : > { %4180 = vrot.lane.b32.xlu0 %v15247_v9, %s14462_s7 }
 0xa53   : > { %3866 = vadd.xlane.f32.xlu0 %v3865_v12 }
 0xa54   : > { %3863 = vadd.xlane.f32.xlu1 %v3862_v54 }
 0xa65   : > { %4328 = vrot.lane.b32.xlu1 %v14933_v15, %s14463_s5  ;;  %v4133_v15 = vpop.permute.xlu1 %4132 }
 0xa66   : > { %v4138_v22 = vsel %vm2126_vm11, %v4133_v15, 0 }
 0xa69   : > { %4326 = vrot.lane.b32.xlu1 %v14960_v6, %s14463_s5  ;;  %4278 = vrot.lane.b32.xlu0 %v14923_v7, %s14463_s5  ;;  %v4085_v7 = vpop.permute.xlu0 %4084 }
 0xa6d   : > { %4428 = vrot.lane.b32.xlu1 %v14964_v43, %s14463_s5  ;;  %4276 = vrot.lane.b32.xlu0 %v14944_v27, %s14463_s5 }
 0xa71   : > { %4426 = vrot.lane.b32.xlu1 %v14999_v18, %s14463_s5  ;;  %4378 = vrot.lane.b32.xlu0 %v14948_v33, %s14463_s5 }
 0xa75   : > { %4528 = vrot.lane.b32.xlu1 %v14995_v2, %s14463_s5  ;;  %4376 = vrot.lane.b32.xlu0 %v14986_v19, %s14463_s5 }
 0xa79   : > { %4526 = vrot.lane.b32.xlu1 %v15027_v35, %s14463_s5  ;;  %4478 = vrot.lane.b32.xlu0 %v14981_v20, %s14463_s5 }
 0xa7d   : > { %4628 = vrot.lane.b32.xlu1 %v15023_v32, %s14463_s5  ;;  %4476 = vrot.lane.b32.xlu0 %v15012_v17, %s14463_s5 }
 0xa81   : > { %4626 = vrot.lane.b32.xlu1 %v15053_v46, %s14463_s5  ;;  %4578 = vrot.lane.b32.xlu0 %v15008_v16, %s14463_s5 }
 0xa85   : > { %4772 = vrot.lane.b32.xlu1 %v15033_v41, %s14463_s5  ;;  %4576 = vrot.lane.b32.xlu0 %v15041_v42, %s14463_s5  ;;  %v4042_v41 = vsel %vm2126_vm11, %v15591_v0, 0  ;;  %v3994_v42 = vsel %vm2126_vm11, %v15589_v53, 0  ;;  %v4090_v53 = vsel %vm2126_vm11, %v4085_v7, 0 }
 0xa96   : > { %v3849_v27 = vpop.xlane.xlu0 %3848 }
 0xa97   : > { %13784 = vrcp.f32 %v3849_v27  ;;  %v3846_v33 = vpop.xlane.xlu1 %3845 }
 0xa98   : > { %13786 = vrcp.f32 %v3846_v33 }
 0xa9f   : > { %v3852_v6 = vpop.xlane.xlu1 %3851 }
 0xaa0   : > { %13788 = vrcp.f32 %v3852_v6 }
 0xaa3   : > { %v3855_v43 = vpop.xlane.xlu0 %3854 }
 0xaa4   : > { %v13785_v20 = vpop.eup %13784  ;;  %13790 = vrcp.f32 %v3855_v43 }
 0xaa5   : > { %v13787_v19 = vpop.eup %13786  ;;  %v3877_v2 = vmul.f32 %v13785_v20, %v15593_v58 }
 0xaa6   : > { %v3876_v18 = vmul.f32 %v13787_v19, %v15595_v51 }
 0xaa7   : > { %v3861_v16 = vpop.xlane.xlu0 %3860  ;;  %v3885_v17 = vpack.c.bf16 %v3877_v2, %v3877_v2 }
 0xaa8   : > { %13792 = vrcp.f32 %v3861_v16  ;;  %v3858_v32 = vpop.xlane.xlu1 %3857  ;;  %v3884_v35 = vpack.c.bf16 %v3876_v18, %v3876_v18 }
 0xaa9   : > { %13794 = vrcp.f32 %v3858_v32  ;;  %12643 = vmatmul.mubr.msk.bf16.vlgmr.msra.gmra.mxu1 %vm2026_vm12, %v3885_v17 }
 0xaaa   : > { %12637 = vmatmul.mubr.msk.bf16.vlgmr.msra.gmra.mxu0 %vm2026_vm12, %v3884_v35  ;;  %12653 = vmatpush3.bf16.msra.mxu1 %v4042_v41 }
 0xaab   : > { %12647 = vmatpush3.bf16.msra.mxu0 %v3994_v42  ;;  %12648 = vmatprep.mubr.msk.bf16.mxu0 %vm14460_vm9, %v17622_v62  ;;  %v4181_v10 = vpop.permute.xlu0 %4180 }
 0xaac   : > { %12658 = vmatprep.subr.bf16.mxu0 %v17622_v62  ;;  %12654 = vmatprep.mubr.msk.bf16.mxu1 %vm14460_vm9, %v17622_v62  ;;  %v4186_v55 = vsel %vm2126_vm11, %v4181_v10, 0  ;;  %v4229_v38 = vpop.permute.xlu1 %4228 }
 0xaad   : > { %v13789_v46 = vpop.eup %13788  ;;  %12664 = vmatprep.subr.bf16.mxu1 %v17622_v62 }
 0xaae   : > { %v3878_v58 = vmul.f32 %v13789_v46, %v15601_v56 }
 0xab0   : > { %v3886_v47 = vpack.c.bf16 %v3878_v58, %v3878_v58 }
 0xab1   : > { %v13791_v5 = vpop.eup %13790 }
 0xab2   : > { %12649 = vmatmul.mubr.msk.bf16.vlgmr.msra.gmra.mxu0 %vm2026_vm12, %v3886_v47  ;;  %v3879_v0 = vmul.f32 %v13791_v5, %v15605_v11 }
 0xab3   : > { %12659 = vmatpush3.bf16.msra.mxu0 %v4090_v53  ;;  %12660 = vmatprep.mubr.msk.bf16.mxu0 %vm14460_vm9, %v17622_v62 }
 0xab4   : > { %v3887_v51 = vpack.c.bf16 %v3879_v0, %v3879_v0  ;;  %12670 = vmatprep.subr.bf16.mxu0 %v17622_v62 }
 0xab5   : > { %v13793_v25 = vpop.eup %13792 }
 0xab6   : > { %v13795_v1 = vpop.eup %13794  ;;  %12655 = vmatmul.mubr.msk.bf16.vlgmr.msra.gmra.mxu1 %vm2026_vm12, %v3887_v51  ;;  %v3881_v11 = vmul.f32 %v13793_v25, %v15609_v24 }
 0xab7   : > { %12665 = vmatpush3.bf16.msra.mxu1 %v4138_v22  ;;  %v3880_v56 = vmul.f32 %v13795_v1, %v15611_v23  ;;  %12666 = vmatprep.mubr.msk.bf16.mxu1 %vm14460_vm9, %v17622_v62  ;;  %v4234_v23 = vsel %vm2126_vm11, %v4229_v38, 0 }
 0xab8   : > { %12676 = vmatprep.subr.bf16.mxu1 %v17622_v62  ;;  %v3889_v8 = vpack.c.bf16 %v3881_v11, %v3881_v11 }
 0xab9   : > { %v3888_v49 = vpack.c.bf16 %v3880_v56, %v3880_v56 }
 0xabb   : > { %12661 = vmatmul.mubr.msk.bf16.vlgmr.msra.gmra.mxu0 %vm2026_vm12, %v3888_v49 }
 0xabc   : > { %12671 = vmatpush3.bf16.msra.mxu0 %v4186_v55  ;;  %12672 = vmatprep.mubr.msk.bf16.mxu0 %vm14460_vm9, %v17622_v62 }
 0xabd   : > { %12682 = vmatprep.subr.bf16.mxu0 %v17622_v62 }
 0xabe   : > { %12667 = vmatmul.mubr.msk.bf16.vlgmr.msra.gmra.mxu1 %vm2026_vm12, %v3889_v8 }
 0xabf   : > { %12677 = vmatpush3.bf16.msra.mxu1 %v4234_v23  ;;  %12678 = vmatprep.mubr.msk.bf16.mxu1 %vm14460_vm9, %v17622_v62 }
 0xac0   : > { %12688 = vmatprep.subr.bf16.mxu1 %v17622_v62 }
 0xadc   : > { %v3867_v24 = vpop.xlane.xlu0 %3866 }
 0xadd   : > { %13796 = vrcp.f32 %v3867_v24  ;;  %v3864_v39 = vpop.xlane.xlu1 %3863 }
 0xade   : > { %13798 = vrcp.f32 %v3864_v39 }
 0xae0   : > { %v4279_v50 = vpop.permute.xlu0 %4278 }
 0xae1   : > { %v4329_v30 = vpop.permute.xlu1 %4328  ;;  %v4284_v18 = vsel %vm1657_vm10, %v4279_v50, 0 }
 0xae2   : > { %v4334_v19 = vsel %vm1657_vm10, %v4329_v30, 0 }
 0xae4   : > { %v4277_v12 = vpop.permute.xlu0 %4276 }
 0xae5   : > { %v4327_v57 = vpop.permute.xlu1 %4326 }
 0xae8   : > { %v4379_v43 = vpop.permute.xlu0 %4378 }
 0xae9   : > { %v4429_v54 = vpop.permute.xlu1 %4428  ;;  %v4384_v17 = vsel %vm1657_vm10, %v4379_v43, 0 }
 0xaea   : > { %v13797_v7 = vpop.eup %13796  ;;  %v4434_v16 = vsel %vm1657_vm10, %v4429_v54, 0 }
 0xaeb   : > { %v13799_v15 = vpop.eup %13798  ;;  %v3883_v27 = vmul.f32 %v13797_v7, %v15623_v28 }
 0xaec   : > { %v3882_v33 = vmul.f32 %v13799_v15, %v15625_v44  ;;  %v4377_v28 = vpop.permute.xlu0 %4376 }
 0xaed   : > { %v3891_v6 = vpack.c.bf16 %v3883_v27, %v3883_v27  ;;  %v4427_v2 = vpop.permute.xlu1 %4426 }
 0xaee   : > { %v3890_v20 = vpack.c.bf16 %v3882_v33, %v3882_v33 }
 0xaef   : > { %12679 = vmatmul.mubr.msk.bf16.vlgmr.msra.gmra.mxu1 %vm2026_vm12, %v3891_v6 }
 0xaf0   : > { %12673 = vmatmul.mubr.msk.bf16.vlgmr.msra.gmra.mxu0 %vm2026_vm12, %v3890_v20  ;;  %12689 = vmatpush3.bf16.xpose.msra.mxu1 %v4334_v19  ;;  %v4479_v32 = vpop.permute.xlu0 %4478 }
 0xaf1   : > { %12683 = vmatpush3.bf16.xpose.msra.mxu0 %v4284_v18  ;;  %12684 = vmatprep.mubr.msk.bf16.mxu0 %vm14460_vm9, %v17622_v62  ;;  %v4529_v44 = vpop.permute.xlu1 %4528  ;;  %v4484_v46 = vsel %vm1657_vm10, %v4479_v32, 0 }
 0xaf2   : > { %12690 = vmatprep.mubr.msk.bf16.mxu1 %vm14460_vm9, %v17622_v62  ;;  %12694 = vmatprep.subr.bf16.mxu0 %v17622_v62  ;;  %v4534_v41 = vsel %vm1657_vm10, %v4529_v44, 0 }
 0xaf3   : > { %12700 = vmatprep.subr.bf16.mxu1 %v17622_v62 }
 0xaf4   : > { %v4477_v42 = vpop.permute.xlu0 %4476 }
 0xaf5   : > { %v4527_v35 = vpop.permute.xlu1 %4526 }
 0xaf7   : > { %12691 = vmatmul.mubr.msk.bf16.vlgmr.msra.gmra.mxu1 %vm1657_vm10, %v4327_v57 }
 0xaf8   : > { %12685 = vmatmul.mubr.msk.bf16.vlgmr.msra.gmra.mxu0 %vm1657_vm10, %v4277_v12  ;;  %12701 = vmatpush3.bf16.xpose.msra.mxu1 %v4434_v16  ;;  %v4579_v47 = vpop.permute.xlu0 %4578 }
 0xaf9   : > { %12695 = vmatpush3.bf16.xpose.msra.mxu0 %v4384_v17  ;;  %12696 = vmatprep.mubr.msk.bf16.mxu0 %vm14460_vm9, %v17622_v62  ;;  %v4629_v58 = vpop.permute.xlu1 %4628  ;;  %v4584_v0 = vsel %vm1657_vm10, %v4579_v47, 0 }
 0xafa   : > { %12702 = vmatprep.mubr.msk.bf16.mxu1 %vm14460_vm9, %v17622_v62  ;;  %12706 = vmatprep.subr.bf16.mxu0 %v17622_v62  ;;  %v4634_v5 = vsel %vm1657_vm10, %v4629_v58, 0 }
 0xafb   : > { %12712 = vmatprep.subr.bf16.mxu1 %v17622_v62 }
 0xafc   : > { %v4577_v25 = vpop.permute.xlu0 %4576 }
 0xafd   : > { %v4627_v53 = vpop.permute.xlu1 %4626 }
 0xaff   : > { %12703 = vmatmul.mubr.msk.bf16.vlgmr.msra.gmra.mxu1 %vm1657_vm10, %v4427_v2 }
 0xb00   : > { %12697 = vmatmul.mubr.msk.bf16.vlgmr.msra.gmra.mxu0 %vm1657_vm10, %v4377_v28  ;;  %12713 = vmatpush3.bf16.xpose.msra.mxu1 %v4534_v41 }
 0xb01   : > { %12707 = vmatpush3.bf16.xpose.msra.mxu0 %v4484_v46  ;;  %12708 = vmatprep.mubr.msk.bf16.mxu0 %vm14460_vm9, %v17622_v62  ;;  %v4773_v51 = vpop.permute.xlu1 %4772 }
 0xb02   : > { %12714 = vmatprep.mubr.msk.bf16.mxu1 %vm14460_vm9, %v17622_v62  ;;  %12718 = vmatprep.subr.bf16.mxu0 %v17622_v62  ;;  %v4778_v1 = vsel %vm2126_vm11, %v4773_v51, 0 }
 0xb03   : > { %12724 = vmatprep.subr.bf16.mxu1 %v17622_v62 }
 0xb07   : > { %12715 = vmatmul.mubr.msk.bf16.vlgmr.msra.gmra.mxu1 %vm1657_vm10, %v4527_v35 }
 0xb08   : > { %12709 = vmatmul.mubr.msk.bf16.vlgmr.msra.gmra.mxu0 %vm1657_vm10, %v4477_v42  ;;  %12725 = vmatpush3.bf16.xpose.msra.mxu1 %v4634_v5 }
 0xb09   : > { %12719 = vmatpush3.bf16.xpose.msra.mxu0 %v4584_v0  ;;  %12720 = vmatprep.mubr.msk.bf16.mxu0 %vm14460_vm9, %v17622_v62 }
 0xb0a   : > { %12726 = vmatprep.mubr.msk.bf16.mxu1 %vm14460_vm9, %v17622_v62  ;;  %12730 = vmatprep.subr.bf16.mxu0 %v17622_v62 }
 0xb0b   : > { %12736 = vmatprep.subr.bf16.mxu1 %v17622_v62 }
 0xb0f   : > { %12727 = vmatmul.mubr.msk.bf16.vlgmr.msra.gmra.mxu1 %vm1657_vm10, %v4627_v53 }
 0xb10   : > { %12721 = vmatmul.mubr.msk.bf16.vlgmr.msra.gmra.mxu0 %vm1657_vm10, %v4577_v25  ;;  %12738 = vmatprep.mubr.msk.bf16.mxu1 %vm14460_vm9, %v17622_v62 }
 0xb11   : > { %12731 = vmatpush3.bf16.msra.mxu0 %v4778_v1  ;;  %12732 = vmatprep.mubr.msk.bf16.mxu0 %vm14460_vm9, %v17622_v62 }
 0xb12   : > { %12742 = vmatprep.subr.bf16.mxu0 %v17622_v62 }
 0xb69   : > { %v15753_v22 = vpop.f32.mrf.mxu1 }
 0xb6a   : > { %v15755_v56 = vpop.f32.mrf.mxu0 }
 0xb6b   : > { %v13410_v11 = vpack.i.bf16 %v15753_v22, %v15755_v56  ;;  %v12644_v10 = vpop.f32.mrf.mxu1 }
 0xb6c   : > { %v12638_v49 = vpop.f32.mrf.mxu0 }
 0xb6d   : > { %v3985_v55 = vpop.f32.mrf.mxu1 }
 0xb6e   : > { %v3937_v38 = vpop.f32.mrf.mxu0 }
 0xb6f   : > { %v12645_v8 = vpop.f32.mrf.mxu1 }
 0xb70   : > { %v12639_v23 = vpop.f32.mrf.mxu0 }
 0xb72   : > { %v15759_v24 = vpop.f32.mrf.mxu0 }
 0xb74   : > { %v12650_v39 = vpop.f32.mrf.mxu0 }
 0xb76   : > { %v4033_v50 = vpop.f32.mrf.mxu0  ;;  %v15761_v30 = vpop.f32.mrf.mxu1 }
 0xb77   : > { %v13415_v57 = vpack.i.bf16 %v15761_v30, %v15759_v24 }
 0xb78   : > { %v12651_v12 = vpop.f32.mrf.mxu0  ;;  %v12656_v54 = vpop.f32.mrf.mxu1 }
 0xb7a   : > { %v4081_v7 = vpop.f32.mrf.mxu1 }
 0xb7b   : > { %v15765_v15 = vpop.f32.mrf.mxu0 }
 0xb7c   : > { %v12657_v27 = vpop.f32.mrf.mxu1 }
 0xb7d   : > { %v12662_v33 = vpop.f32.mrf.mxu0 }
 0xb7e   : > { %v15767_v6 = vpop.f32.mrf.mxu1 }
 0xb7f   : > { %v4129_v43 = vpop.f32.mrf.mxu0  ;;  %v13440_v20 = vpack.i.bf16 %v15767_v6, %v15765_v15 }
 0xb80   : > { %v12668_v19 = vpop.f32.mrf.mxu1 }
 0xb81   : > { %v12663_v2 = vpop.f32.mrf.mxu0 }
 0xb82   : > { %v4177_v18 = vpop.f32.mrf.mxu1 }
 0xb84   : > { %v12669_v28 = vpop.f32.mrf.mxu1 }
 0xbaf   : > { %v15771_v44 = vpop.f32.mrf.mxu1 }
 0xbb0   : > { %v15773_v16 = vpop.f32.mrf.mxu0 }
 0xbb1   : > { %v13445_v17 = vpack.i.bf16 %v15771_v44, %v15773_v16  ;;  %v12680_v32 = vpop.f32.mrf.mxu1 }
 0xbb2   : > { %v12674_v35 = vpop.f32.mrf.mxu0 }
 0xbb3   : > { %v4273_v41 = vpop.f32.mrf.mxu1 }
 0xbb4   : > { %v4225_v42 = vpop.f32.mrf.mxu0 }
 0xbb5   : > { %v12681_v46 = vpop.f32.mrf.mxu1 }
 0xbb6   : > { %v12675_v58 = vpop.f32.mrf.mxu0 }
 0xbb7   : > { %v4370_v47 = vpop.f32.mrf.mxu1 }
 0xbb8   : > { %v4320_v5 = vpop.f32.mrf.mxu0  ;;  %v4371_v53 = vadd.f32 %v4370_v47, %v15082_v13 }
 0xbb9   : > { %v4321_v0 = vadd.f32 %v4320_v5, %v15073_v31  ;;  %v12692_v51 = vpop.f32.mrf.mxu1 }
 0xbba   : > { %v12686_v25 = vpop.f32.mrf.mxu0  ;;  %v4679_v1 = vsel %vm2026_vm12, %v4371_v53, -inf }
 0xbbb   : > { %4680 = vmax.xlane.f32.xlu1 %v4679_v1  ;;  %v4373_v10 = vpop.f32.mrf.mxu1  ;;  %v4676_v49 = vsel %vm2026_vm12, %v4321_v0, -inf }
 0xbbc   : > { %4677 = vmax.xlane.f32.xlu0 %v4676_v49  ;;  %v4323_v55 = vpop.f32.mrf.mxu0 }
 0xbbd   : > { %v12693_v38 = vpop.f32.mrf.mxu1 }
 0xbbe   : > { %v12687_v8 = vpop.f32.mrf.mxu0 }
 0xbbf   : > { %v4470_v23 = vpop.f32.mrf.mxu1 }
 0xbc0   : > { %v4420_v39 = vpop.f32.mrf.mxu0  ;;  %v4471_v7 = vadd.f32 %v4470_v23, %v15100_v63 }
 0xbc1   : > { %v4421_v50 = vadd.f32 %v4420_v39, %v15091_v36  ;;  %v12704_v12 = vpop.f32.mrf.mxu1 }
 0xbc2   : > { %v12698_v54 = vpop.f32.mrf.mxu0  ;;  %v4685_v28 = vsel %vm2026_vm12, %v4471_v7, -inf }
 0xbc3   : > { %v4473_v27 = vpop.f32.mrf.mxu1  ;;  %v4682_v33 = vsel %vm2026_vm12, %v4421_v50, -inf }
 0xbc4   : > { %4683 = vmax.xlane.f32.xlu0 %v4682_v33  ;;  %v4423_v43 = vpop.f32.mrf.mxu0 }
 0xbc5   : > { %v12705_v19 = vpop.f32.mrf.mxu1 }
 0xbc6   : > { %v12699_v2 = vpop.f32.mrf.mxu0 }
 0xbc7   : > { %v4570_v18 = vpop.f32.mrf.mxu1 }
 0xbc8   : > { %v15786_v32 = vadd.f32 %v4570_v18, %v15113_v14  ;;  %4686 = vmax.xlane.f32.xlu0 %v4685_v28  ;;  %v4520_v35 = vpop.f32.mrf.mxu0 }
 0xbc9   : > { %v15789_v41 = vadd.f32 %v4520_v35, %v15107_v40  ;;  %v12716_v42 = vpop.f32.mrf.mxu1 }
 0xbca   : > { %v12710_v46 = vpop.f32.mrf.mxu0  ;;  %v4691_v58 = vsel %vm2026_vm12, %v15786_v32, -inf }
 0xbcb   : > { %v4573_v47 = vpop.f32.mrf.mxu1  ;;  %v4688_v5 = vsel %vm2026_vm12, %v15789_v41, -inf }
 0xbcc   : > { %4692 = vmax.xlane.f32.xlu0 %v4691_v58  ;;  %4689 = vmax.xlane.f32.xlu1 %v4688_v5  ;;  %v4523_v51 = vpop.f32.mrf.mxu0 }
 0xbcd   : > { %v12717_v25 = vpop.f32.mrf.mxu1 }
 0xbce   : > { %v12711_v1 = vpop.f32.mrf.mxu0 }
 0xbcf   : > { %v4670_v10 = vpop.f32.mrf.mxu1 }
 0xbd0   : > { %v4620_v49 = vpop.f32.mrf.mxu0  ;;  %v4671_v55 = vadd.f32 %v4670_v10, %v15125_v4 }
 0xbd1   : > { %v4621_v38 = vadd.f32 %v4620_v49, %v15118_v3  ;;  %v12728_v8 = vpop.f32.mrf.mxu1 }
 0xbd2   : > { %v12722_v23 = vpop.f32.mrf.mxu0  ;;  %v4697_v39 = vsel %vm2026_vm12, %v4671_v55, -inf }
 0xbd3   : > { %v4673_v12 = vpop.f32.mrf.mxu1  ;;  %4698 = vmax.xlane.f32.xlu0 %v4697_v39  ;;  %v4694_v54 = vsel %vm2026_vm12, %v4621_v38, -inf }
 0xbd4   : > { %4695 = vmax.xlane.f32.xlu1 %v4694_v54  ;;  %v4623_v27 = vpop.f32.mrf.mxu0 }
 0xbd5   : > { %v12729_v33 = vpop.f32.mrf.mxu1 }
 0xbd6   : > { %v12723_v43 = vpop.f32.mrf.mxu0 }
 0xbe5   : > { %4868 = vrot.lane.b32.xlu1 %v15205_v48, %s14463_s5 }
 0xbe9   : > { %4820 = vrot.lane.b32.xlu0 %v15045_v45, %s14463_s5 }
 0xc44   : > { %v4681_v19 = vpop.xlane.xlu1 %4680 }
 0xc45   : > { %v4701_v2 = vsub.f32 %v4371_v53, %v4681_v19  ;;  %v4678_v18 = vpop.xlane.xlu0 %4677 }
 0xc46   : > { %v4700_v28 = vsub.f32 %v4321_v0, %v4678_v18 }
 0xc47   : > { %v4710_v35 = vmul.f32 1.442695, %v4701_v2 }
 0xc48   : > { %v4708_v42 = vmul.f32 1.442695, %v4700_v28 }
 0xc49   : > { %13800 = vpow2.f32 %v4710_v35 }
 0xc4a   : > { %13802 = vpow2.f32 %v4708_v42 }
 0xc4d   : > { %v4684_v46 = vpop.xlane.xlu0 %4683 }
 0xc4e   : > { %v4702_v58 = vsub.f32 %v4421_v50, %v4684_v46  ;;  %v17634_v46 = vpack.i.bf16 %v15547_v37, %v15545_v34 }
 0xc50   : > { %v4712_v47 = vmul.f32 1.442695, %v4702_v58  ;;  %v17635_v58 = vpack.i.bf16 %v15539_v26, %v15541_v61 }
 0xc51   : > { %v4687_v5 = vpop.xlane.xlu0 %4686 }
 0xc52   : > { %13804 = vpow2.f32 %v4712_v47  ;;  %v4703_v51 = vsub.f32 %v4471_v7, %v4687_v5 }
 0xc54   : > { %v4714_v25 = vmul.f32 1.442695, %v4703_v51 }
 0xc55   : > { %v4693_v53 = vpop.xlane.xlu0 %4692  ;;  %v4690_v12 = vpop.xlane.xlu1 %4689 }
 0xc56   : > { %v15803_v1 = vpop.eup %13800  ;;  %13806 = vpow2.f32 %v4714_v25  ;;  %v4705_v54 = vsub.f32 %v15786_v32, %v4693_v53  ;;  %v4704_v27 = vsub.f32 %v15789_v41, %v4690_v12 }
 0xc57   : > { %v15805_v48 = vpop.eup %13802  ;;  %v4727_v45 = vsel %vm2026_vm12, %v15803_v1, 0.0 }
 0xc58   : > { %4728 = vadd.xlane.f32.xlu0 %v4727_v45  ;;  %v4724_v0 = vsel %vm2026_vm12, %v15805_v48, 0.0  ;;  %v4718_v43 = vmul.f32 1.442695, %v4705_v54  ;;  %v4716_v2 = vmul.f32 1.442695, %v4704_v27 }
 0xc59   : > { %4725 = vadd.xlane.f32.xlu1 %v4724_v0 }
 0xc5a   : > { %13808 = vpow2.f32 %v4718_v43 }
 0xc5b   : > { %13810 = vpow2.f32 %v4716_v2 }
 0xc5c   : > { %v4699_v50 = vpop.xlane.xlu0 %4698 }
 0xc5d   : > { %v4696_v33 = vpop.xlane.xlu1 %4695  ;;  %v4707_v19 = vsub.f32 %v4671_v55, %v4699_v50 }
 0xc5e   : > { %v4706_v18 = vsub.f32 %v4621_v38, %v4696_v33 }
 0xc5f   : > { %v15811_v10 = vpop.eup %13804  ;;  %v4722_v28 = vmul.f32 1.442695, %v4707_v19 }
 0xc60   : > { %v4821_v49 = vpop.permute.xlu0 %4820  ;;  %v4730_v7 = vsel %vm2026_vm12, %v15811_v10, 0.0 }
 0xc61   : > { %v4826_v8 = vsel %vm2126_vm11, %v4821_v49, 0  ;;  %4731 = vadd.xlane.f32.xlu1 %v4730_v7  ;;  %13812 = vpow2.f32 %v4722_v28 }
 0xc62   : > { %12737 = vmatpush3.bf16.msra.mxu1 %v4826_v8 }
 0xc63   : > { %v15816_v23 = vpop.eup %13806  ;;  %12748 = vmatprep.subr.bf16.mxu1 %v17622_v62 }
 0xc64   : > { %v4733_v39 = vsel %vm2026_vm12, %v15816_v23, 0.0 }
 0xc65   : > { %4734 = vadd.xlane.f32.xlu0 %v4733_v39 }
 0xc72   : > { %4964 = vrot.lane.b32.xlu1 %v15230_v59, %s14463_s5  ;;  %v4720_v59 = vmul.f32 1.442695, %v4706_v18 }
 0xc74   : > { %13814 = vpow2.f32 %v4720_v59 }
 0xc76   : > { %5012 = vrot.lane.b32.xlu1 %v15236_v21, %s14463_s5  ;;  %v15829_v21 = vpop.eup %13808 }
 0xc77   : > { %v15831_v35 = vpop.eup %13810  ;;  %v4739_v32 = vsel %vm2026_vm12, %v15829_v21, 0.0 }
 0xc78   : > { %v4736_v41 = vsel %vm2026_vm12, %v15831_v35, 0.0 }
 0xc7b   : > { %4916 = vrot.lane.b32.xlu0 %v15211_v29, %s14463_s5  ;;  %v15833_v29 = vpop.eup %13812 }
 0xc7c   : > { %v4745_v38 = vsel %vm2026_vm12, %v15833_v29, 0.0 }
 0xc81   : > { %v15839_v55 = vpop.eup %13814 }
 0xc82   : > { %v4742_v42 = vsel %vm2026_vm12, %v15839_v55, 0.0 }
 0xc9a   : > { %4740 = vadd.xlane.f32.xlu0 %v4739_v32  ;;  %4737 = vadd.xlane.f32.xlu1 %v4736_v41 }
 0xc9e   : > { %4746 = vadd.xlane.f32.xlu0 %v4745_v38  ;;  %4743 = vadd.xlane.f32.xlu1 %v4742_v42 }
 0xcaf   : > { %5108 = vrot.lane.b32.xlu1 %v15258_v60, %s14463_s5  ;;  %v4869_v60 = vpop.permute.xlu1 %4868 }
 0xcb0   : > { %v4874_v56 = vsel %vm2126_vm11, %v4869_v60, 0  ;;  %v13555_v60 = vld [vmem:[%s17522_s9 + $0x20] sm:$0xff]  }
 0xcb3   : > { %13406 = vrot.lane.b32.xlu1 %v17634_v46, %s14463_s5  ;;  %v17636_v46 = vmov 0  }
 0xcb4   : > { %5060 = vrot.lane.b32.xlu0 %v15247_v9, %s14463_s5 }
 0xcb7   : > { %13416 = vrot.lane.b32.xlu1 %v13415_v57, %s14462_s7 }
 0xcb8   : > { %13401 = vrot.lane.b32.xlu0 %v17635_v58, %s14463_s5  ;;  %v13553_v58 = vld [vmem:[%s17522_s9 + $0x30] sm:$0xff]  }
 0xcbc   : > { %13411 = vrot.lane.b32.xlu0 %v13410_v11, %s14462_s7 }
 0xce1   : > { %v4729_v34 = vpop.xlane.xlu0 %4728 }
 0xce2   : > { %13816 = vrcp.f32 %v4729_v34  ;;  %v4726_v37 = vpop.xlane.xlu1 %4725  ;;  %v13556_v34 = vld [vmem:[%s17522_s9 + $0x18] sm:$0xff]  }
 0xce3   : > { %13818 = vrcp.f32 %v4726_v37  ;;  %v13557_v37 = vld [vmem:[%s17522_s9 + $0x10] sm:$0xff]  }
 0xcea   : > { %v4732_v9 = vpop.xlane.xlu1 %4731 }
 0xceb   : > { %13820 = vrcp.f32 %v4732_v9  ;;  %v13558_v9 = vld [vmem:[%s17522_s9 + $0x8] sm:$0xff]  }
 0xcee   : > { %v4735_v47 = vpop.xlane.xlu0 %4734  ;;  %v4965_v25 = vpop.permute.xlu1 %4964 }
 0xcef   : > { %v13817_v24 = vpop.eup %13816  ;;  %13822 = vrcp.f32 %v4735_v47  ;;  %v4970_v0 = vsel %vm2126_vm11, %v4965_v25, 0 }
 0xcf0   : > { %v13819_v30 = vpop.eup %13818  ;;  %v4757_v57 = vmul.f32 %v13817_v24, %v15803_v1 }
 0xcf1   : > { %v4756_v26 = vmul.f32 %v13819_v30, %v15805_v48 }
 0xcf2   : > { %v4765_v61 = vpack.c.bf16 %v4757_v57, %v4757_v57  ;;  %v4917_v5 = vpop.permute.xlu0 %4916  ;;  %v5013_v50 = vpop.permute.xlu1 %5012 }
 0xcf3   : > { %v4764_v51 = vpack.c.bf16 %v4756_v26, %v4756_v26  ;;  %v4922_v22 = vsel %vm2126_vm11, %v4917_v5, 0  ;;  %v5018_v7 = vsel %vm2126_vm11, %v5013_v50, 0  ;;  %v13559_v5 = vld [vmem:[%s17522_s9] sm:$0xff]  }
 0xcf4   : > { %12739 = vmatmul.mubr.msk.bf16.vlgmr.msra.gmra.mxu1 %vm2026_vm12, %v4765_v61 }
 0xcf5   : > { %12733 = vmatmul.mubr.msk.bf16.vlgmr.msra.gmra.mxu0 %vm2026_vm12, %v4764_v51  ;;  %12749 = vmatpush3.bf16.msra.mxu1 %v4922_v22 }
 0xcf6   : > { %12743 = vmatpush3.bf16.msra.mxu0 %v4874_v56  ;;  %12744 = vmatprep.mubr.msk.bf16.mxu0 %vm14460_vm9, %v17622_v62 }
 0xcf7   : > { %12754 = vmatprep.subr.bf16.mxu0 %v17622_v62  ;;  %12750 = vmatprep.mubr.msk.bf16.mxu1 %vm14460_vm9, %v17622_v62 }
 0xcf8   : > { %v13821_v11 = vpop.eup %13820  ;;  %12760 = vmatprep.subr.bf16.mxu1 %v17622_v62 }
 0xcf9   : > { %v4758_v1 = vmul.f32 %v13821_v11, %v15811_v10  ;;  %v17637_v11 = vld [vmem:[#allocation48_spill] sm:$0xff] }
 0xcfa   : > { %v17638_v25 = vpack.i.bf16 %v15553_v52, %v17637_v11  ;;  %v17640_v52 = vld [vmem:[#allocation50_spill] sm:$0xff] }
 0xcfb   : > { %v4766_v48 = vpack.c.bf16 %v4758_v1, %v4758_v1 }
 0xcfc   : > { %v13823_v45 = vpop.eup %13822 }
 0xcfd   : > { %v4759_v53 = vmul.f32 %v13823_v45, %v15816_v23  ;;  %12745 = vmatmul.mubr.msk.bf16.vlgmr.msra.gmra.mxu0 %vm2026_vm12, %v4766_v48 }
 0xcfe   : > { %12755 = vmatpush3.bf16.msra.mxu0 %v4970_v0  ;;  %12756 = vmatprep.mubr.msk.bf16.mxu0 %vm14460_vm9, %v17622_v62 }
 0xcff   : > { %v4767_v49 = vpack.c.bf16 %v4759_v53, %v4759_v53  ;;  %12766 = vmatprep.subr.bf16.mxu0 %v17622_v62 }
 0xd01   : > { %12751 = vmatmul.mubr.msk.bf16.vlgmr.msra.gmra.mxu1 %vm2026_vm12, %v4767_v49 }
 0xd02   : > { %12761 = vmatpush3.bf16.msra.mxu1 %v5018_v7  ;;  %12762 = vmatprep.mubr.msk.bf16.mxu1 %vm14460_vm9, %v17622_v62 }
 0xd03   : > { %12772 = vmatprep.subr.bf16.mxu1 %v17622_v62 }
 0xd23   : > { %v4741_v10 = vpop.xlane.xlu0 %4740  ;;  %v4738_v8 = vpop.xlane.xlu1 %4737 }
 0xd24   : > { %13824 = vrcp.f32 %v4741_v10 }
 0xd25   : > { %13826 = vrcp.f32 %v4738_v8  ;;  %v17639_v8 = vld [vmem:[#allocation49_spill] sm:$0xff] }
 0xd27   : > { %v4747_v23 = vpop.xlane.xlu0 %4746  ;;  %v4744_v39 = vpop.xlane.xlu1 %4743 }
 0xd28   : > { %13828 = vrcp.f32 %v4747_v23  ;;  %v17641_v23 = vpack.i.bf16 %v17639_v8, %v17640_v52 }
 0xd29   : > { %13830 = vrcp.f32 %v4744_v39 }
 0xd2b   : > { %v5109_v43 = vpop.permute.xlu1 %5108  ;;  %v5061_v2 = vpop.permute.xlu0 %5060 }
 0xd2c   : > { %v5114_v32 = vsel %vm2126_vm11, %v5109_v43, 0  ;;  %v5066_v41 = vsel %vm2126_vm11, %v5061_v2, 0 }
 0xd31   : > { %v13825_v12 = vpop.eup %13824 }
 0xd32   : > { %v13827_v54 = vpop.eup %13826  ;;  %v4761_v27 = vmul.f32 %v13825_v12, %v15829_v21 }
 0xd33   : > { %v4760_v33 = vmul.f32 %v13827_v54, %v15831_v35 }
 0xd34   : > { %v4769_v19 = vpack.c.bf16 %v4761_v27, %v4761_v27 }
 0xd35   : > { %v13829_v18 = vpop.eup %13828  ;;  %v4768_v28 = vpack.c.bf16 %v4760_v33, %v4760_v33 }
 0xd36   : > { %v13831_v59 = vpop.eup %13830  ;;  %12763 = vmatmul.mubr.msk.bf16.vlgmr.msra.gmra.mxu1 %vm2026_vm12, %v4769_v19  ;;  %v4763_v38 = vmul.f32 %v13829_v18, %v15833_v29  ;;  %v13552_v29 = vld [vmem:[%s17522_s9 + $0x38] sm:$0xff]  }
 0xd37   : > { %12757 = vmatmul.mubr.msk.bf16.vlgmr.msra.gmra.mxu0 %vm2026_vm12, %v4768_v28  ;;  %12773 = vmatpush3.bf16.msra.mxu1 %v5114_v32  ;;  %v4762_v21 = vmul.f32 %v13831_v59, %v15839_v55  ;;  %v13554_v55 = vld [vmem:[%s17522_s9 + $0x28] sm:$0xff]  }
 0xd38   : > { %12767 = vmatpush3.bf16.msra.mxu0 %v5066_v41  ;;  %12768 = vmatprep.mubr.msk.bf16.mxu0 %vm14460_vm9, %v17622_v62  ;;  %v4771_v35 = vpack.c.bf16 %v4763_v38, %v4763_v38  ;;  %v13402_v41 = vpop.permute.xlu0 %13401 }
 0xd39   : > { %12774 = vmatprep.mubr.msk.bf16.mxu1 %vm14460_vm9, %v17622_v62  ;;  %v4770_v42 = vpack.c.bf16 %v4762_v21, %v4762_v21  ;;  %12778 = vmatprep.subr.bf16.mxu0 %v13552_v29  ;;  %v13404_v21 = vunpack.i.h.bf16 %v13402_v41 }
 0xd3c   : > { %v13412_v38 = vpop.permute.xlu0 %13411 }
 0xd3e   : > { %12775 = vmatmul.mubr.msk.bf16.vlgmr.msra.gmra.mxu1 %vm2026_vm12, %v4771_v35  ;;  %v13403_v35 = vunpack.i.l.bf16 %v13402_v41 }
 0xd3f   : > { %12769 = vmatmul.mubr.msk.bf16.vlgmr.msra.gmra.mxu0 %vm2026_vm12, %v4770_v42  ;;  %5687 = vmatprep.mubr.bf16.mxu1 %v17636_v46  ;;  %v13414_v42 = vunpack.i.h.bf16 %v13412_v38 }
 0xd40   : > { %12779 = vmatpush3.bf16.msra.mxu0 %v13552_v29  ;;  %v13413_v29 = vunpack.i.l.bf16 %v13412_v38 }
 0xd41   : > { %12780 = vmatprep.subr.bf16.mxu0 %v13553_v58 }
 0xd44   : > { %12781 = vmatpush3.bf16.msra.mxu0 %v13553_v58 }
 0xd45   : > { %12782 = vmatprep.subr.bf16.mxu0 %v13554_v55 }
 0xd48   : > { %12783 = vmatpush3.bf16.msra.mxu0 %v13554_v55  ;;  %v17642_v55 = vld [vmem:[#allocation41_spill] sm:$0xff] }
 0xd49   : > { %12784 = vmatprep.subr.bf16.mxu0 %v13555_v60 }
 0xd4c   : > { %12785 = vmatpush3.bf16.msra.mxu0 %v13555_v60  ;;  %v5253_v60 = vsel %vm1657_vm10, %v17642_v55, %v13404_v21  ;;  %v17648_v55 = vld [vmem:[#allocation46_spill] sm:$0xff] }
 0xd4d   : > { %12786 = vmatprep.subr.bf16.mxu0 %v13556_v34 }
 0xd50   : > { %12787 = vmatpush3.bf16.msra.mxu0 %v13556_v34  ;;  %v17643_v34 = vld [vmem:[#allocation40_spill] sm:$0xff] }
 0xd51   : > { %12788 = vmatprep.subr.bf16.mxu0 %v13557_v37 }
 0xd54   : > { %12789 = vmatpush3.bf16.msra.mxu0 %v13557_v37  ;;  %v5252_v37 = vsel %vm1657_vm10, %v17643_v34, %v13403_v35  ;;  %v17649_v34 = vld [vmem:[#allocation47_spill] sm:$0xff] }
 0xd55   : > { %12790 = vmatprep.subr.bf16.mxu0 %v13558_v9 }
 0xd58   : > { %12791 = vmatpush3.bf16.msra.mxu0 %v13558_v9  ;;  %v13407_v9 = vpop.permute.xlu1 %13406 }
 0xd59   : > { %12792 = vmatprep.subr.bf16.mxu0 %v13559_v5 }
 0xd5c   : > { %12793 = vmatpush3.bf16.msra.mxu0 %v13559_v5 }
 0xdb4   : > { %v4862_v47 = vpop.f32.mrf.mxu1 }
 0xdb5   : > { %v4814_v24 = vpop.f32.mrf.mxu0 }
 0xdb6   : > { %v13420_v30 = vpack.i.bf16 %v4862_v47, %v4814_v24  ;;  %v12740_v57 = vpop.f32.mrf.mxu1 }
 0xdb7   : > { %v12734_v26 = vpop.f32.mrf.mxu0  ;;  %v5261_v57 = vsel %vm969_vm0, %v5253_v60, %v13414_v42 }
 0xdb8   : > { %13421 = vrot.lane.b32.xlu0 %v13420_v30, %s14461_s25  ;;  %v4865_v61 = vpop.f32.mrf.mxu1  ;;  %v5260_v30 = vsel %vm969_vm0, %v5252_v37, %v13413_v29 }
 0xdb9   : > { %v4817_v51 = vpop.f32.mrf.mxu0 }
 0xdba   : > { %v12741_v22 = vpop.f32.mrf.mxu1  ;;  %v13417_v51 = vpop.permute.xlu1 %13416 }
 0xdbb   : > { %v12735_v56 = vpop.f32.mrf.mxu0  ;;  %v13409_v22 = vunpack.i.h.bf16 %v13407_v9  ;;  %v13419_v11 = vunpack.i.h.bf16 %v13417_v51 }
 0xdbc   : > { %13431 = vrot.lane.b32.xlu0 %v17638_v25, %s14463_s5  ;;  %v13408_v56 = vunpack.i.l.bf16 %v13407_v9  ;;  %v13418_v25 = vunpack.i.l.bf16 %v13417_v51  ;;  %v11721_v51 = vld [vmem:[%s17523_s10] ss:$0 sm:$0xff] }
 0xdbd   : > { %v4910_v1 = vpop.f32.mrf.mxu0 }
 0xdbf   : > { %v12746_v48 = vpop.f32.mrf.mxu0 }
 0xdc0   : > { %13441 = vrot.lane.b32.xlu0 %v13440_v20, %s14462_s7  ;;  %v17644_v48 = vld [vmem:[#allocation43_spill] sm:$0xff] }
 0xdc1   : > { %v4913_v45 = vpop.f32.mrf.mxu0  ;;  %v4958_v53 = vpop.f32.mrf.mxu1 }
 0xdc2   : > { %v13425_v0 = vpack.i.bf16 %v4958_v53, %v4910_v1  ;;  %v5255_v45 = vsel %vm1657_vm10, %v17644_v48, %v13409_v22  ;;  %v17645_v53 = vld [vmem:[#allocation42_spill] sm:$0xff] }
 0xdc3   : > { %v12747_v50 = vpop.f32.mrf.mxu0  ;;  %v12752_v49 = vpop.f32.mrf.mxu1 }
 0xdc4   : > { %13426 = vrot.lane.b32.xlu1 %v13425_v0, %s14461_s25  ;;  %v5254_v0 = vsel %vm1657_vm10, %v17645_v53, %v13408_v56 }
 0xdc5   : > { %v4961_v7 = vpop.f32.mrf.mxu1 }
 0xdc6   : > { %v5262_v7 = vsel %vm969_vm0, %v5254_v0, %v13418_v25  ;;  %v17651_v0 = vld [vmem:[#allocation31_spill] sm:$0xff] }
 0xdc7   : > { %v12753_v10 = vpop.f32.mrf.mxu1 }
 0xdc8   : > { %13436 = vrot.lane.b32.xlu1 %v17641_v23, %s14463_s5  ;;  %v5263_v10 = vsel %vm969_vm0, %v5255_v45, %v13419_v11 }
 0xdcc   : > { %13446 = vrot.lane.b32.xlu1 %v13445_v17, %s14462_s7 }
 0xdf6   : > { %v5054_v15 = vpop.f32.mrf.mxu1 }
 0xdf7   : > { %v5006_v6 = vpop.f32.mrf.mxu0 }
 0xdf8   : > { %v13450_v20 = vpack.i.bf16 %v5054_v15, %v5006_v6  ;;  %v12764_v39 = vpop.f32.mrf.mxu1 }
 0xdf9   : > { %v12758_v12 = vpop.f32.mrf.mxu0 }
 0xdfa   : > { %13451 = vrot.lane.b32.xlu0 %v13450_v20, %s14461_s25  ;;  %v5057_v54 = vpop.f32.mrf.mxu1 }
 0xdfb   : > { %v5009_v27 = vpop.f32.mrf.mxu0 }
 0xdfc   : > { %v12765_v33 = vpop.f32.mrf.mxu1 }
 0xdfd   : > { %v12759_v43 = vpop.f32.mrf.mxu0 }
 0xdfe   : > { %v5150_v19 = vpop.f32.mrf.mxu1  ;;  %v17646_v43 = vld [vmem:[#allocation45_spill] sm:$0xff] }
 0xdff   : > { %v5102_v2 = vpop.f32.mrf.mxu0 }
 0xe00   : > { %v13455_v18 = vpack.i.bf16 %v5150_v19, %v5102_v2  ;;  %v12776_v28 = vpop.f32.mrf.mxu1  ;;  %v17647_v2 = vld [vmem:[#allocation44_spill] sm:$0xff] }
 0xe01   : > { %v12770_v59 = vpop.f32.mrf.mxu0 }
 0xe02   : > { %13456 = vrot.lane.b32.xlu1 %v13455_v18, %s14461_s25  ;;  %v5153_v44 = vpop.f32.mrf.mxu1 }
 0xe03   : > { %v5105_v16 = vpop.f32.mrf.mxu0 }
 0xe04   : > { %v12777_v17 = vpop.f32.mrf.mxu1 }
 0xe05   : > { %v12771_v32 = vpop.f32.mrf.mxu0 }
 0xe2a   : > { %v13422_v58 = vpop.permute.xlu0 %13421 }
 0xe2b   : > { %v13424_v47 = vunpack.i.h.bf16 %v13422_v58  ;;  %v13423_v24 = vunpack.i.l.bf16 %v13422_v58 }
 0xe2d   : > { %v5269_v26 = vsel %vm5268_vm13, %v5260_v30, %v13423_v24  ;;  %v5270_v61 = vsel %vm5268_vm13, %v5261_v57, %v13424_v47 }
 0xe2e   : > { %v5293_v5 = vpack.c.bf16 %v5270_v61, %v5269_v26  ;;  %v13432_v15 = vpop.permute.xlu0 %13431 }
 0xe2f   : > { %v13434_v20 = vunpack.i.h.bf16 %v13432_v15  ;;  %v13433_v39 = vunpack.i.l.bf16 %v13432_v15 }
 0xe30   : > { %12794 = vmatprep.mubr.bf16.mxu0 %v5293_v5 }
 0xe31   : > { %v5257_v19 = vsel %vm1657_vm10, %v17646_v43, %v13434_v20  ;;  %v5256_v18 = vsel %vm1657_vm10, %v17647_v2, %v13433_v39  ;;  %v17655_v43 = vld [vmem:[#allocation35_spill] sm:$0xff] }
 0xe32   : > { %v13442_v6 = vpop.permute.xlu0 %13441 }
 0xe33   : > { %v13444_v54 = vunpack.i.h.bf16 %v13442_v6  ;;  %v13443_v27 = vunpack.i.l.bf16 %v13442_v6 }
 0xe35   : > { %v5264_v44 = vsel %vm969_vm0, %v5256_v18, %v13443_v27  ;;  %v5265_v16 = vsel %vm969_vm0, %v5257_v19, %v13444_v54  ;;  %v17656_v18 = vld [vmem:[#allocation34_spill] sm:$0xff] }
 0xe36   : > { %v13427_v1 = vpop.permute.xlu1 %13426 }
 0xe37   : > { %v13429_v50 = vunpack.i.h.bf16 %v13427_v1  ;;  %v13428_v49 = vunpack.i.l.bf16 %v13427_v1  ;;  %v17650_v1 = vld [vmem:[#allocation29_spill] sm:$0xff] }
 0xe39   : > { %v5272_v8 = vsel %vm5268_vm13, %v5263_v10, %v13429_v50  ;;  %v5271_v52 = vsel %vm5268_vm13, %v5262_v7, %v13428_v49  ;;  %v17652_v7 = vld [vmem:[#allocation30_spill] sm:$0xff] }
 0xe3a   : > { %v5294_v23 = vpack.c.bf16 %v5272_v8, %v5271_v52  ;;  %v13437_v12 = vpop.permute.xlu1 %13436  ;;  %v17653_v8 = vld [vmem:[#allocation32_spill] sm:$0xff] }
 0xe3b   : > { %v13439_v21 = vunpack.i.h.bf16 %v13437_v12  ;;  %v13438_v35 = vunpack.i.l.bf16 %v13437_v12  ;;  %v17654_v12 = vld [vmem:[#allocation33_spill] sm:$0xff] }
 0xe3c   : > { %12795 = vmatmul.mubr.bf16.vlgmr.msra.gmra.mxu0 %v5294_v23 }
 0xe3d   : > { %v5259_v60 = vsel %vm1657_vm10, %v17648_v55, %v13439_v21  ;;  %v5258_v37 = vsel %vm1657_vm10, %v17649_v34, %v13438_v35 }
 0xe3e   : > { %v13447_v17 = vpop.permute.xlu1 %13446 }
 0xe3f   : > { %v13449_v42 = vunpack.i.h.bf16 %v13447_v17  ;;  %v13448_v29 = vunpack.i.l.bf16 %v13447_v17  ;;  %v13562_v17 = vld [vmem:[#allocation10 + $0x74] ss:$8 sps:$4 sm:$0xff]  }
 0xe40   : > { %5655 = vmatprep.subr.bf16.mxu1 %v13562_v17 }
 0xe41   : > { %v5266_v24 = vsel %vm969_vm0, %v5258_v37, %v13448_v29  ;;  %v5267_v30 = vsel %vm969_vm0, %v5259_v60, %v13449_v42 }
 0xe6c   : > { %v13452_v33 = vpop.permute.xlu0 %13451 }
 0xe6d   : > { %v13454_v28 = vunpack.i.h.bf16 %v13452_v33  ;;  %v13453_v59 = vunpack.i.l.bf16 %v13452_v33 }
 0xe6f   : > { %v5273_v32 = vsel %vm5268_vm13, %v5264_v44, %v13453_v59  ;;  %v5274_v41 = vsel %vm5268_vm13, %v5265_v16, %v13454_v28  ;;  %v17657_v59 = vld [vmem:[#allocation36_spill] sm:$0xff]  ;;  %v13560_v16 = vld [vmem:[#allocation10 + $0x70] ss:$8 sps:$4 sm:$0xff]  }
 0xe70   : > { %v5295_v38 = vpack.c.bf16 %v5274_v41, %v5273_v32  ;;  %5656 = vmatpush1.bf16.msra.mxu1 %v13560_v16 }
 0xe72   : > { %12798 = vmatprep.mubr.bf16.mxu0 %v5295_v38 }
 0xe74   : > { %v13457_v58 = vpop.permute.xlu1 %13456 }
 0xe75   : > { %v13459_v9 = vunpack.i.h.bf16 %v13457_v58  ;;  %v13458_v47 = vunpack.i.l.bf16 %v13457_v58 }
 0xe77   : > { %v5276_v57 = vsel %vm5268_vm13, %v5267_v30, %v13459_v9  ;;  %v5275_v26 = vsel %vm5268_vm13, %v5266_v24, %v13458_v47 }
 0xe78   : > { %v5296_v61 = vpack.c.bf16 %v5276_v57, %v5275_v26  ;;  %v13565_v57 = vld [vmem:[#allocation10 + $0x64] ss:$8 sps:$4 sm:$0xff]   ;;  %v13563_v26 = vld [vmem:[#allocation10 + $0x60] ss:$8 sps:$4 sm:$0xff]  }
 0xe79   : > { %5657 = vmatprep.subr.bf16.mxu1 %v13565_v57 }
 0xe7a   : > { %12799 = vmatmul.mubr.bf16.gmra.mxu0 %v5296_v61  ;;  %5658 = vmatpush1.bf16.msra.mxu1 %v13563_v26  ;;  %v13568_v61 = vld [vmem:[#allocation10 + $0x54] ss:$8 sps:$4 sm:$0xff]  }
 0xe7b   : > { %5659 = vmatprep.subr.bf16.mxu1 %v13568_v61 }
 0xefc   : > { %v12796_v5 = vpop.f32.mrf.mxu0 }
 0xefd   : > { %v5395_v25 = vadd.f32 %v12796_v5, %v11721_v51  ;;  %v13566_v5 = vld [vmem:[#allocation10 + $0x50] ss:$8 sps:$4 sm:$0xff]  }
 0xefe   : > { %v5386_v22 = vpop.f32.mrf.mxu0  ;;  %5660 = vmatpush1.bf16.msra.mxu1 %v13566_v5 }
 0xeff   : > { %v5387_v56 = vadd.f32 %v11721_v51, %v5386_v22  ;;  %v5419_v50 = vadd.f32 %v5395_v25, %v17651_v0  ;;  %v13569_v22 = vld [vmem:[#allocation10 + $0x40] ss:$8 sps:$4 sm:$0xff]   ;;  %v13577_v25 = vld [vmem:[#allocation10 + $0x24] ss:$8 sps:$4 sm:$0xff]  }
 0xf00   : > { %v12797_v11 = vpop.f32.mrf.mxu0  ;;  %v13581_v0 = vld [vmem:[#allocation10] ss:$8 sps:$4 sm:$0xff]  }
 0xf01   : > { %v5417_v48 = vadd.f32 %v5387_v56, %v17650_v1  ;;  %v5398_v49 = vadd.f32 %v12797_v11, %v11721_v51  ;;  %v13574_v56 = vld [vmem:[#allocation10 + $0x34] ss:$8 sps:$4 sm:$0xff]   ;;  %v13572_v11 = vld [vmem:[#allocation10 + $0x30] ss:$8 sps:$4 sm:$0xff]   ;;  %v13575_v1 = vld [vmem:[#allocation10 + $0x20] ss:$8 sps:$4 sm:$0xff]  }
 0xf02   : > { %v5389_v45 = vpop.f32.mrf.mxu0 }
 0xf03   : > { %v5390_v53 = vadd.f32 %v11721_v51, %v5389_v45  ;;  %5427 = vadd.xlane.f32.xlu0 %v5417_v48  ;;  %v5420_v52 = vadd.f32 %v5398_v49, %v17653_v8  ;;  %v13578_v45 = vld [vmem:[#allocation10 + $0x10] ss:$8 sps:$4 sm:$0xff]  }
 0xf05   : > { %v5418_v10 = vadd.f32 %v5390_v53, %v17652_v7  ;;  %v13583_v53 = vld [vmem:[#allocation10 + $0x4] ss:$8 sps:$4 sm:$0xff]  }
 0xf07   : > { %5429 = vadd.xlane.f32.xlu1 %v5418_v10  ;;  %5431 = vadd.xlane.f32.xlu0 %v5419_v50 }
 0xf0b   : > { %5433 = vadd.xlane.f32.xlu0 %v5420_v52 }
 0xf3a   : > { %v12800_v23 = vpop.f32.mrf.mxu0 }
 0xf3b   : > { %v5411_v39 = vadd.f32 %v12800_v23, %v11721_v51 }
 0xf3c   : > { %v5402_v15 = vpop.f32.mrf.mxu0 }
 0xf3d   : > { %v5403_v6 = vadd.f32 %v11721_v51, %v5402_v15  ;;  %v15992_v19 = vadd.f32 %v5411_v39, %v17655_v43 }
 0xf3e   : > { %v12801_v20 = vpop.f32.mrf.mxu0 }
 0xf3f   : > { %v15988_v54 = vadd.f32 %v5403_v6, %v17654_v12  ;;  %v5414_v2 = vadd.f32 %v12801_v20, %v11721_v51 }
 0xf40   : > { %v5405_v27 = vpop.f32.mrf.mxu0 }
 0xf41   : > { %v5406_v33 = vadd.f32 %v11721_v51, %v5405_v27  ;;  %5435 = vadd.xlane.f32.xlu1 %v15988_v54  ;;  %v16000_v44 = vadd.f32 %v5414_v2, %v17657_v59  ;;  %v13571_v51 = vld [vmem:[#allocation10 + $0x44] ss:$8 sps:$4 sm:$0xff]  }
 0xf42   : > { %5661 = vmatprep.subr.bf16.mxu1 %v13571_v51 }
 0xf43   : > { %v15995_v28 = vadd.f32 %v5406_v33, %v17656_v18  ;;  %5662 = vmatpush1.bf16.msra.mxu1 %v13569_v22 }
 0xf44   : > { %5663 = vmatprep.subr.bf16.mxu1 %v13574_v56 }
 0xf45   : > { %5439 = vadd.xlane.f32.xlu1 %v15992_v19  ;;  %5437 = vadd.xlane.f32.xlu0 %v15995_v28 }
 0xf47   : > { %5664 = vmatpush1.bf16.msra.mxu1 %v13572_v11 }
 0xf48   : > { %5665 = vmatprep.subr.bf16.mxu1 %v13577_v25 }
 0xf49   : > { %5441 = vadd.xlane.f32.xlu0 %v16000_v44 }
 0xf4b   : > { %5666 = vmatpush1.bf16.msra.mxu1 %v13575_v1 }
 0xf8c   : > { %v5428_v32 = vpop.xlane.xlu0 %5427 }
 0xf8d   : > { %v5443_v41 = vmul.f32 0.0078125, %v5428_v32 }
 0xf8f   : > { %v16003_v38 = vsub.f32 %v5417_v48, %v5443_v41  ;;  %v13580_v48 = vld [vmem:[#allocation10 + $0x14] ss:$8 sps:$4 sm:$0xff]  }
 0xf90   : > { %v5430_v21 = vpop.xlane.xlu1 %5429  ;;  %v5432_v35 = vpop.xlane.xlu0 %5431  ;;  %5667 = vmatprep.subr.bf16.mxu1 %v13580_v48 }
 0xf91   : > { %v5444_v42 = vmul.f32 0.0078125, %v5430_v21  ;;  %v5445_v29 = vmul.f32 0.0078125, %v5432_v35  ;;  %v5459_v58 = vmul.f32 %v16003_v38, %v16003_v38  ;;  %5668 = vmatpush1.bf16.msra.mxu1 %v13578_v45 }
 0xf92   : > { %5669 = vmatprep.subr.bf16.mxu1 %v13583_v53 }
 0xf93   : > { %v16007_v55 = vsub.f32 %v5418_v10, %v5444_v42  ;;  %v16009_v60 = vsub.f32 %v5419_v50, %v5445_v29  ;;  %5467 = vadd.xlane.f32.xlu1 %v5459_v58  ;;  %v11730_v58 = vld [vmem:[#allocation7] ss:$0 sm:$0xff] }
 0xf94   : > { %v5434_v34 = vpop.xlane.xlu0 %5433 }
 0xf95   : > { %v5446_v37 = vmul.f32 0.0078125, %v5434_v34  ;;  %v5460_v9 = vmul.f32 %v16007_v55, %v16007_v55  ;;  %v5461_v47 = vmul.f32 %v16009_v60, %v16009_v60  ;;  %5670 = vmatpush1.bf16.msra.mxu1 %v13581_v0 }
 0xf97   : > { %v16015_v24 = vsub.f32 %v5420_v52, %v5446_v37  ;;  %5469 = vadd.xlane.f32.xlu0 %v5460_v9  ;;  %5471 = vadd.xlane.f32.xlu1 %v5461_v47 }
 0xf99   : > { %v5462_v30 = vmul.f32 %v16015_v24, %v16015_v24 }
 0xf9b   : > { %5473 = vadd.xlane.f32.xlu0 %v5462_v30  ;;  %v11731_v30 = vld [vmem:[#allocation8] ss:$0 sm:$0xff] }
 0xfca   : > { %v5436_v50 = vpop.xlane.xlu1 %5435 }
 0xfcb   : > { %v5447_v49 = vmul.f32 0.0078125, %v5436_v50 }
 0xfcd   : > { %v16020_v7 = vsub.f32 %v15988_v54, %v5447_v49 }
 0xfce   : > { %v5440_v10 = vpop.xlane.xlu1 %5439  ;;  %v5438_v8 = vpop.xlane.xlu0 %5437 }
 0xfcf   : > { %v5449_v52 = vmul.f32 0.0078125, %v5440_v10  ;;  %v5448_v23 = vmul.f32 0.0078125, %v5438_v8  ;;  %v5463_v15 = vmul.f32 %v16020_v7, %v16020_v7 }
 0xfd1   : > { %v16025_v6 = vsub.f32 %v15992_v19, %v5449_v52  ;;  %v16028_v20 = vsub.f32 %v15995_v28, %v5448_v23  ;;  %5475 = vadd.xlane.f32.xlu1 %v5463_v15 }
 0xfd2   : > { %v5442_v39 = vpop.xlane.xlu0 %5441 }
 0xfd3   : > { %v5450_v12 = vmul.f32 0.0078125, %v5442_v39  ;;  %v5465_v54 = vmul.f32 %v16025_v6, %v16025_v6  ;;  %v5464_v27 = vmul.f32 %v16028_v20, %v16028_v20 }
 0xfd5   : > { %v16035_v33 = vsub.f32 %v16000_v44, %v5450_v12  ;;  %5479 = vadd.xlane.f32.xlu1 %v5465_v54  ;;  %5477 = vadd.xlane.f32.xlu0 %v5464_v27 }
 0xfd7   : > { %v5466_v43 = vmul.f32 %v16035_v33, %v16035_v33 }
 0xfd9   : > { %5481 = vadd.xlane.f32.xlu0 %v5466_v43 }
0x101c   : > { %v5468_v19 = vpop.xlane.xlu1 %5467 }
0x101d   : > { %v5483_v2 = vmul.f32 0.0078125, %v5468_v19 }
0x101f   : > { %v5491_v18 = vadd.f32 1e-12, %v5483_v2 }
0x1020   : > { %v5472_v28 = vpop.xlane.xlu1 %5471  ;;  %v5470_v59 = vpop.xlane.xlu0 %5469 }
0x1021   : > { %13832 = vrsqrt.f32 %v5491_v18  ;;  %v5485_v16 = vmul.f32 0.0078125, %v5472_v28  ;;  %v5484_v17 = vmul.f32 0.0078125, %v5470_v59 }
0x1023   : > { %v5492_v32 = vadd.f32 1e-12, %v5484_v17  ;;  %v5493_v41 = vadd.f32 1e-12, %v5485_v16 }
0x1024   : > { %v5474_v21 = vpop.xlane.xlu0 %5473 }
0x1025   : > { %v5486_v35 = vmul.f32 0.0078125, %v5474_v21  ;;  %13834 = vrsqrt.f32 %v5492_v32  ;;  %v13584_v21 = vld [vmem:[#allocation11 + $0x78] sm:$0xff]  }
0x1026   : > { %13836 = vrsqrt.f32 %v5493_v41  ;;  %12101 = vmatprep.subr.bf16.mxu0 %v13584_v21 }
0x1027   : > { %v5494_v44 = vadd.f32 1e-12, %v5486_v35  ;;  %v13586_v35 = vld [vmem:[#allocation11 + $0x70] sm:$0xff]  }
0x1029   : > { %13838 = vrsqrt.f32 %v5494_v44  ;;  %v13587_v44 = vld [vmem:[#allocation11 + $0x30] sm:$0xff]  }
0x102e   : > { %v13833_v42 = vpop.eup %13832 }
0x102f   : > { %v5507_v29 = vmul.f32 %v13833_v42, %v16003_v38  ;;  %v13588_v42 = vld [vmem:[#allocation11 + $0x68] sm:$0xff]  }
0x1031   : > { %v5521_v9 = vmul.f32 %v11730_v58, %v5507_v29  ;;  %v13589_v29 = vld [vmem:[#allocation11 + $0x28] sm:$0xff]  }
0x1032   : > { %v13835_v34 = vpop.eup %13834 }
0x1033   : > { %v5508_v37 = vmul.f32 %v13835_v34, %v16007_v55  ;;  %v13837_v47 = vpop.eup %13836  ;;  %v16042_v5 = vadd.f32 %v11731_v30, %v5521_v9  ;;  %v13591_v34 = vld [vmem:[#allocation11 + $0x20] sm:$0xff]   ;;  %v13593_v9 = vld [vmem:[#allocation11 + $0x18] sm:$0xff]  }
0x1034   : > { %v5509_v22 = vmul.f32 %v13837_v47, %v16009_v60  ;;  %v13594_v47 = vld [vmem:[#allocation11 + $0x50] sm:$0xff]  }
0x1035   : > { %v5522_v26 = vmul.f32 %v11730_v58, %v5508_v37  ;;  %v13592_v37 = vld [vmem:[#allocation11 + $0x58] sm:$0xff]  }
0x1036   : > { %v13839_v57 = vpop.eup %13838  ;;  %v5523_v11 = vmul.f32 %v11730_v58, %v5509_v22  ;;  %v13599_v22 = vld [vmem:[#allocation11] sm:$0xff]  }
0x1037   : > { %v5510_v61 = vmul.f32 %v13839_v57, %v16015_v24  ;;  %v16044_v51 = vadd.f32 %v11731_v30, %v5522_v26  ;;  %v13596_v57 = vld [vmem:[#allocation11 + $0x48] sm:$0xff]  }
0x1038   : > { %v16052_v25 = vadd.f32 %v11731_v30, %v5523_v11  ;;  %v13597_v26 = vld [vmem:[#allocation11 + $0x8] sm:$0xff]  }
0x1039   : > { %v5559_v38 = vpack.c.bf16 %v16044_v51, %v16042_v5  ;;  %v5524_v56 = vmul.f32 %v11730_v58, %v5510_v61  ;;  %v13598_v61 = vld [vmem:[#allocation11 + $0x40] sm:$0xff]  }
0x103b   : > { %5688 = vmatmul.mubr.bf16.vlgmr.msra.gmra.mxu1 %v5559_v38  ;;  %v16050_v55 = vadd.f32 %v11731_v30, %v5524_v56  ;;  %v5563_v38 = vld [vmem:[%s17527_s14] sm:$0x3] }
0x103c   : > { %5697 = vmatprep.mubr.bf16.mxu1 %v17636_v46  ;;  %v17658_v56 = vld [vmem:[#allocation39_spill] sm:$0xff] }
0x103d   : > { %v5560_v24 = vpack.c.bf16 %v16050_v55, %v16052_v25  ;;  %v16079_v11 = vrot.slane %v5563_v38, %v17658_v56 }
0x1043   : > { %5698 = vmatmul.mubr.bf16.gmra.mxu1 %v5560_v24  ;;  %v17659_v24 = vld [vmem:[#allocation38_spill] sm:$0xff] }
0x1044   : > { %5707 = vmatprep.mubr.bf16.mxu1 %v17636_v46 }
0x105a   : > { %v5476_v1 = vpop.xlane.xlu1 %5475 }
0x105b   : > { %v5487_v60 = vmul.f32 0.0078125, %v5476_v1  ;;  %v16082_v1 = vrot.slane %v5563_v38, %v17659_v24 }
0x105d   : > { %v5495_v48 = vadd.f32 1e-12, %v5487_v60 }
0x105e   : > { %v5480_v45 = vpop.xlane.xlu1 %5479  ;;  %v5478_v53 = vpop.xlane.xlu0 %5477 }
0x105f   : > { %13840 = vrsqrt.f32 %v5495_v48  ;;  %v5489_v0 = vmul.f32 0.0078125, %v5480_v45  ;;  %v5488_v50 = vmul.f32 0.0078125, %v5478_v53 }
0x1061   : > { %v5496_v49 = vadd.f32 1e-12, %v5488_v50  ;;  %v5497_v10 = vadd.f32 1e-12, %v5489_v0 }
0x1062   : > { %v5482_v8 = vpop.xlane.xlu0 %5481 }
0x1063   : > { %v5490_v52 = vmul.f32 0.0078125, %v5482_v8  ;;  %13842 = vrsqrt.f32 %v5496_v49 }
0x1064   : > { %13844 = vrsqrt.f32 %v5497_v10 }
0x1065   : > { %v5498_v23 = vadd.f32 1e-12, %v5490_v52 }
0x1067   : > { %13846 = vrsqrt.f32 %v5498_v23 }
0x106c   : > { %v13841_v15 = vpop.eup %13840 }
0x106d   : > { %v5511_v39 = vmul.f32 %v13841_v15, %v16020_v7 }
0x106f   : > { %v5525_v27 = vmul.f32 %v11730_v58, %v5511_v39 }
0x1070   : > { %v13843_v12 = vpop.eup %13842 }
0x1071   : > { %v5512_v54 = vmul.f32 %v13843_v12, %v16028_v20  ;;  %v13845_v43 = vpop.eup %13844  ;;  %v16060_v28 = vadd.f32 %v11731_v30, %v5525_v27 }
0x1072   : > { %v5513_v16 = vmul.f32 %v13845_v43, %v16025_v6  ;;  %v13585_v6 = vld [vmem:[#allocation11 + $0x38] sm:$0xff]  }
0x1073   : > { %v5526_v2 = vmul.f32 %v11730_v58, %v5512_v54  ;;  %12102 = vmatpush3.bf16.msra.mxu0 %v13585_v6 }
0x1074   : > { %v13847_v19 = vpop.eup %13846  ;;  %v5527_v7 = vmul.f32 %v11730_v58, %v5513_v16  ;;  %12103 = vmatprep.subr.bf16.mxu0 %v13586_v35 }
0x1075   : > { %v5514_v18 = vmul.f32 %v13847_v19, %v16035_v33  ;;  %v16062_v59 = vadd.f32 %v11731_v30, %v5526_v2 }
0x1076   : > { %v16070_v41 = vadd.f32 %v11731_v30, %v5527_v7 }
0x1077   : > { %v5561_v17 = vpack.c.bf16 %v16062_v59, %v16060_v28  ;;  %v5528_v32 = vmul.f32 %v11730_v58, %v5514_v18  ;;  %12104 = vmatpush3.bf16.msra.mxu0 %v13587_v44  ;;  %v13590_v58 = vld [vmem:[#allocation11 + $0x60] sm:$0xff]  }
0x1078   : > { %12105 = vmatprep.subr.bf16.mxu0 %v13588_v42 }
0x1079   : > { %5708 = vmatmul.mubr.bf16.gmra.mxu1 %v5561_v17  ;;  %v16068_v20 = vadd.f32 %v11731_v30, %v5528_v32  ;;  %v13595_v30 = vld [vmem:[#allocation11 + $0x10] sm:$0xff]  }
0x107a   : > { %5717 = vmatprep.mubr.bf16.mxu1 %v17636_v46 }
0x107b   : > { %v5562_v33 = vpack.c.bf16 %v16068_v20, %v16070_v41  ;;  %12106 = vmatpush3.bf16.msra.mxu0 %v13589_v29 }
0x107c   : > { %12107 = vmatprep.subr.bf16.mxu0 %v13590_v58 }
0x107f   : > { %12108 = vmatpush3.bf16.msra.mxu0 %v13591_v34 }
0x1080   : > { %12109 = vmatprep.subr.bf16.mxu0 %v13592_v37 }
0x1081   : > { %5718 = vmatmul.mubr.bf16.gmra.mxu1 %v5562_v33 }
0x1082   : > { %6421 = vmatprep.mubr.bf16.mxu1 %v17636_v46 }
0x1083   : > { %12110 = vmatpush3.bf16.msra.mxu0 %v13593_v9 }
0x1084   : > { %12111 = vmatprep.subr.bf16.mxu0 %v13594_v47 }
0x1087   : > { %12112 = vmatpush3.bf16.msra.mxu0 %v13595_v30 }
0x1088   : > { %12113 = vmatprep.subr.bf16.mxu0 %v13596_v57 }
0x108b   : > { %12114 = vmatpush3.bf16.msra.mxu0 %v13597_v26 }
0x108c   : > { %12115 = vmatprep.subr.bf16.mxu0 %v13598_v61 }
0x108f   : > { %12116 = vmatpush3.bf16.msra.mxu0 %v13599_v22 }
0x10fb   : > { %v5689_v60 = vpop.f32.mrf.mxu1 }
0x10fc   : > { %v16085_v48 = vadd.f32 %v5689_v60, %v16079_v11 }
0x10fd   : > { %v5691_v45 = vpop.f32.mrf.mxu1 }
0x10fe   : > { %v5744_v53 = vmul.f32 0.044715, %v16085_v48  ;;  %v16089_v0 = vadd.f32 %v5691_v45, %v16082_v1 }
0x10ff   : > { %v5693_v50 = vpop.f32.mrf.mxu1 }
0x1100   : > { %v5760_v49 = vmul.f32 %v5744_v53, %v16085_v48  ;;  %v5745_v10 = vmul.f32 0.044715, %v16089_v0  ;;  %v5694_v8 = vadd.f32 %v5693_v50, %v16079_v11 }
0x1101   : > { %v5695_v52 = vpop.f32.mrf.mxu1 }
0x1102   : > { %v5776_v23 = vmul.f32 %v5760_v49, %v16085_v48  ;;  %v5761_v15 = vmul.f32 %v5745_v10, %v16089_v0  ;;  %v5746_v39 = vmul.f32 0.044715, %v5694_v8  ;;  %v5696_v12 = vadd.f32 %v5695_v52, %v16082_v1 }
0x1103   : > { %v5699_v54 = vpop.f32.mrf.mxu1 }
0x1104   : > { %v5792_v27 = vadd.f32 %v5776_v23, %v16085_v48  ;;  %v5777_v43 = vmul.f32 %v5761_v15, %v16089_v0  ;;  %v5762_v19 = vmul.f32 %v5746_v39, %v5694_v8  ;;  %v16100_v2 = vadd.f32 %v5699_v54, %v16079_v11 }
0x1105   : > { %v5747_v18 = vmul.f32 0.044715, %v5696_v12  ;;  %v5701_v16 = vpop.f32.mrf.mxu1 }
0x1106   : > { %v5808_v17 = vmul.f32 0.7978846, %v5792_v27  ;;  %v5778_v32 = vmul.f32 %v5762_v19, %v5694_v8  ;;  %v5748_v7 = vmul.f32 0.044715, %v16100_v2  ;;  %v16104_v33 = vadd.f32 %v5701_v16, %v16082_v1 }
0x1107   : > { %v5763_v21 = vmul.f32 %v5747_v18, %v5696_v12  ;;  %v5703_v6 = vpop.f32.mrf.mxu1  ;;  %v5793_v35 = vadd.f32 %v5777_v43, %v16089_v0 }
0x1108   : > { %v5794_v44 = vadd.f32 %v5778_v32, %v5694_v8  ;;  %v5764_v42 = vmul.f32 %v5748_v7, %v16100_v2  ;;  %v5749_v29 = vmul.f32 0.044715, %v16104_v33  ;;  %13848 = vtanh.f32 %v5808_v17 }
0x1109   : > { %v5779_v58 = vmul.f32 %v5763_v21, %v5696_v12  ;;  %v5704_v34 = vadd.f32 %v5703_v6, %v16079_v11  ;;  %v5705_v37 = vpop.f32.mrf.mxu1  ;;  %v5809_v9 = vmul.f32 0.7978846, %v5793_v35  ;;  %v5730_v35 = vmul.f32 0.5, %v5694_v8 }
0x110a   : > { %v5810_v47 = vmul.f32 0.7978846, %v5794_v44  ;;  %v5780_v30 = vmul.f32 %v5764_v42, %v16100_v2  ;;  %v5765_v57 = vmul.f32 %v5749_v29, %v16104_v33  ;;  %v5706_v26 = vadd.f32 %v5705_v37, %v16082_v1 }
0x110b   : > { %v5750_v61 = vmul.f32 0.044715, %v5704_v34  ;;  %v5795_v22 = vadd.f32 %v5779_v58, %v5696_v12  ;;  %13850 = vtanh.f32 %v5809_v9  ;;  %v5729_v44 = vmul.f32 0.5, %v16089_v0 }
0x110c   : > { %13852 = vtanh.f32 %v5810_v47  ;;  %v5796_v38 = vadd.f32 %v5780_v30, %v16100_v2  ;;  %v5781_v60 = vmul.f32 %v5765_v57, %v16104_v33  ;;  %v5751_v45 = vmul.f32 0.044715, %v5706_v26 }
0x110d   : > { %v5766_v53 = vmul.f32 %v5750_v61, %v5704_v34  ;;  %v5811_v50 = vmul.f32 0.7978846, %v5795_v22  ;;  %v5731_v42 = vmul.f32 0.5, %v5696_v12  ;;  %v5728_v58 = vmul.f32 0.5, %v16085_v48 }
0x110e   : > { %v5767_v49 = vmul.f32 %v5751_v45, %v5706_v26  ;;  %v5797_v10 = vadd.f32 %v5781_v60, %v16104_v33  ;;  %v5812_v23 = vmul.f32 0.7978846, %v5796_v38  ;;  %v5733_v8 = vmul.f32 0.5, %v16104_v33 }
0x110f   : > { %v5782_v52 = vmul.f32 %v5766_v53, %v5704_v34  ;;  %13854 = vtanh.f32 %v5811_v50  ;;  %v5735_v0 = vmul.f32 0.5, %v5706_v26 }
0x1110   : > { %v5783_v15 = vmul.f32 %v5767_v49, %v5706_v26  ;;  %v5813_v39 = vmul.f32 0.7978846, %v5797_v10  ;;  %v5734_v49 = vmul.f32 0.5, %v5704_v34 }
0x1111   : > { %v5798_v54 = vadd.f32 %v5782_v52, %v5704_v34 }
0x1112   : > { %v5799_v27 = vadd.f32 %v5783_v15, %v5706_v26  ;;  %13856 = vtanh.f32 %v5813_v39 }
0x1113   : > { %v5814_v43 = vmul.f32 0.7978846, %v5798_v54  ;;  %13858 = vtanh.f32 %v5812_v23  ;;  %v5732_v23 = vmul.f32 0.5, %v16100_v2 }
0x1114   : > { %v5815_v19 = vmul.f32 0.7978846, %v5799_v27 }
0x1115   : > { %13860 = vtanh.f32 %v5814_v43  ;;  %v13849_v18 = vpop.eup %13848 }
0x1116   : > { %13862 = vtanh.f32 %v5815_v19  ;;  %v5840_v6 = vadd.f32 1.0, %v13849_v18 }
0x1118   : > { %v13851_v16 = vpop.eup %13850  ;;  %v5856_v57 = vmul.f32 %v5840_v6, %v5728_v58 }
0x1119   : > { %v13853_v17 = vpop.eup %13852  ;;  %v5841_v7 = vadd.f32 1.0, %v13851_v16 }
0x111a   : > { %v5842_v32 = vadd.f32 1.0, %v13853_v17 }
0x111b   : > { %v5857_v47 = vmul.f32 %v5841_v7, %v5729_v44 }
0x111c   : > { %v13855_v21 = vpop.eup %13854  ;;  %v5858_v37 = vmul.f32 %v5842_v32, %v5730_v35 }
0x111d   : > { %v5843_v29 = vadd.f32 1.0, %v13855_v21 }
0x111e   : > { %v5904_v60 = vpack.c.bf16 %v5858_v37, %v5856_v57 }
0x111f   : > { %v13857_v9 = vpop.eup %13856  ;;  %v5859_v30 = vmul.f32 %v5843_v29, %v5731_v42 }
0x1120   : > { %v13859_v61 = vpop.eup %13858  ;;  %v5845_v45 = vadd.f32 1.0, %v13857_v9 }
0x1121   : > { %v5905_v22 = vpack.c.bf16 %v5859_v30, %v5857_v47  ;;  %v5844_v48 = vadd.f32 1.0, %v13859_v61 }
0x1122   : > { %v13861_v38 = vpop.eup %13860  ;;  %v5861_v10 = vmul.f32 %v5845_v45, %v5733_v8 }
0x1123   : > { %v13863_v53 = vpop.eup %13862  ;;  %6047 = vmatprep.mubr.bf16.mxu0 %v5905_v22  ;;  %v5846_v50 = vadd.f32 1.0, %v13861_v38  ;;  %v5860_v54 = vmul.f32 %v5844_v48, %v5732_v23 }
0x1124   : > { %6048 = vmatmul.mubr.bf16.vlgmr.msra.gmra.mxu0 %v5904_v60  ;;  %v5847_v12 = vadd.f32 1.0, %v13863_v53 }
0x1125   : > { %v5862_v15 = vmul.f32 %v5846_v50, %v5734_v49 }
0x1126   : > { %v5863_v52 = vmul.f32 %v5847_v12, %v5735_v0 }
0x1127   : > { %v5906_v27 = vpack.c.bf16 %v5862_v15, %v5860_v54 }
0x1128   : > { %v5907_v39 = vpack.c.bf16 %v5863_v52, %v5861_v10 }
0x112a   : > { %6055 = vmatprep.mubr.bf16.mxu0 %v5907_v39 }
0x112c   : > { %6056 = vmatmul.mubr.bf16.gmra.mxu0 %v5906_v27 }
0x1139   : > { %v5709_v43 = vpop.f32.mrf.mxu1 }
0x113a   : > { %v16121_v19 = vadd.f32 %v5709_v43, %v16079_v11 }
0x113b   : > { %v5711_v33 = vpop.f32.mrf.mxu1 }
0x113c   : > { %v5752_v26 = vmul.f32 0.044715, %v16121_v19  ;;  %v16125_v34 = vadd.f32 %v5711_v33, %v16082_v1 }
0x113d   : > { %v5713_v18 = vpop.f32.mrf.mxu1 }
0x113e   : > { %v5768_v16 = vmul.f32 %v5752_v26, %v16121_v19  ;;  %v5753_v2 = vmul.f32 0.044715, %v16125_v34  ;;  %v5714_v17 = vadd.f32 %v5713_v18, %v16079_v11 }
0x113f   : > { %v5715_v32 = vpop.f32.mrf.mxu1 }
0x1140   : > { %v5784_v7 = vmul.f32 %v5768_v16, %v16121_v19  ;;  %v5769_v21 = vmul.f32 %v5753_v2, %v16125_v34  ;;  %v5754_v6 = vmul.f32 0.044715, %v5714_v17  ;;  %v5716_v35 = vadd.f32 %v5715_v32, %v16082_v1 }
0x1141   : > { %v5719_v44 = vpop.f32.mrf.mxu1 }
0x1142   : > { %v5800_v42 = vadd.f32 %v5784_v7, %v16121_v19  ;;  %v5785_v29 = vmul.f32 %v5769_v21, %v16125_v34  ;;  %v5770_v58 = vmul.f32 %v5754_v6, %v5714_v17  ;;  %v5755_v37 = vmul.f32 0.044715, %v5716_v35 }
0x1143   : > { %v16136_v9 = vadd.f32 %v5719_v44, %v16079_v11  ;;  %v5721_v47 = vpop.f32.mrf.mxu1 }
0x1144   : > { %v5816_v30 = vmul.f32 0.7978846, %v5800_v42  ;;  %v5786_v57 = vmul.f32 %v5770_v58, %v5714_v17  ;;  %v5771_v61 = vmul.f32 %v5755_v37, %v5716_v35  ;;  %v16139_v22 = vadd.f32 %v5721_v47, %v16082_v1 }
0x1145   : > { %v5756_v38 = vmul.f32 0.044715, %v16136_v9  ;;  %v5723_v60 = vpop.f32.mrf.mxu1  ;;  %v5801_v45 = vadd.f32 %v5785_v29, %v16125_v34 }
0x1146   : > { %v5802_v53 = vadd.f32 %v5786_v57, %v5714_v17  ;;  %v5787_v8 = vmul.f32 %v5771_v61, %v5716_v35  ;;  %v5757_v50 = vmul.f32 0.044715, %v16139_v22  ;;  %13864 = vtanh.f32 %v5816_v30 }
0x1147   : > { %v5772_v0 = vmul.f32 %v5756_v38, %v16136_v9  ;;  %v5724_v12 = vadd.f32 %v5723_v60, %v16079_v11  ;;  %v5725_v49 = vpop.f32.mrf.mxu1  ;;  %v5817_v48 = vmul.f32 0.7978846, %v5801_v45  ;;  %v5738_v61 = vmul.f32 0.5, %v5714_v17 }
0x1148   : > { %v5818_v10 = vmul.f32 0.7978846, %v5802_v53  ;;  %v5773_v52 = vmul.f32 %v5757_v50, %v16139_v22  ;;  %v5726_v23 = vadd.f32 %v5725_v49, %v16082_v1  ;;  %v5803_v15 = vadd.f32 %v5787_v8, %v5716_v35 }
0x1149   : > { %v5788_v39 = vmul.f32 %v5772_v0, %v16136_v9  ;;  %v5758_v54 = vmul.f32 0.044715, %v5724_v12  ;;  %13866 = vtanh.f32 %v5817_v48  ;;  %v5737_v60 = vmul.f32 0.5, %v16125_v34 }
0x114a   : > { %13868 = vtanh.f32 %v5818_v10  ;;  %v5789_v27 = vmul.f32 %v5773_v52, %v16139_v22  ;;  %v5759_v43 = vmul.f32 0.044715, %v5726_v23  ;;  %v5819_v33 = vmul.f32 0.7978846, %v5803_v15 }
0x114b   : > { %v5804_v26 = vadd.f32 %v5788_v39, %v16136_v9  ;;  %v5774_v11 = vmul.f32 %v5758_v54, %v5724_v12  ;;  %v5739_v45 = vmul.f32 0.5, %v5716_v35  ;;  %v5736_v8 = vmul.f32 0.5, %v16121_v19 }
0x114c   : > { %v5775_v18 = vmul.f32 %v5759_v43, %v5726_v23  ;;  %13870 = vtanh.f32 %v5819_v33  ;;  %v5805_v16 = vadd.f32 %v5789_v27, %v16139_v22  ;;  %v5742_v17 = vmul.f32 0.5, %v5724_v12 }
0x114d   : > { %v5820_v2 = vmul.f32 0.7978846, %v5804_v26  ;;  %v5790_v32 = vmul.f32 %v5774_v11, %v5724_v12  ;;  %v5741_v35 = vmul.f32 0.5, %v16139_v22  ;;  %v5743_v26 = vmul.f32 0.5, %v5726_v23 }
0x114e   : > { %v5791_v1 = vmul.f32 %v5775_v18, %v5726_v23  ;;  %v5821_v7 = vmul.f32 0.7978846, %v5805_v16  ;;  %v5740_v11 = vmul.f32 0.5, %v16136_v9 }
0x114f   : > { %v5806_v21 = vadd.f32 %v5790_v32, %v5724_v12 }
0x1150   : > { %v5807_v6 = vadd.f32 %v5791_v1, %v5726_v23  ;;  %13872 = vtanh.f32 %v5821_v7 }
0x1151   : > { %13874 = vtanh.f32 %v5820_v2  ;;  %v5822_v44 = vmul.f32 0.7978846, %v5806_v21 }
0x1152   : > { %v5823_v42 = vmul.f32 0.7978846, %v5807_v6  ;;  %v11748_v6 = vld [vmem:[#allocation13] ss:$0 sm:$0xff] }
0x1153   : > { %13876 = vtanh.f32 %v5822_v44  ;;  %v13865_v29 = vpop.eup %13864 }
0x1154   : > { %13878 = vtanh.f32 %v5823_v42  ;;  %v5848_v38 = vadd.f32 1.0, %v13865_v29 }
0x1156   : > { %v13867_v58 = vpop.eup %13866  ;;  %v5864_v10 = vmul.f32 %v5848_v38, %v5736_v8 }
0x1157   : > { %v13869_v37 = vpop.eup %13868  ;;  %v5849_v47 = vadd.f32 1.0, %v13867_v58 }
0x1158   : > { %v5850_v30 = vadd.f32 1.0, %v13869_v37 }
0x1159   : > { %v13871_v57 = vpop.eup %13870  ;;  %v5865_v0 = vmul.f32 %v5849_v47, %v5737_v60 }
0x115a   : > { %v5851_v53 = vadd.f32 1.0, %v13871_v57  ;;  %v5866_v50 = vmul.f32 %v5850_v30, %v5738_v61 }
0x115c   : > { %v5867_v49 = vmul.f32 %v5851_v53, %v5739_v45  ;;  %v5908_v39 = vpack.c.bf16 %v5866_v50, %v5864_v10 }
0x115d   : > { %v13873_v48 = vpop.eup %13872 }
0x115e   : > { %v13875_v52 = vpop.eup %13874  ;;  %v5909_v15 = vpack.c.bf16 %v5867_v49, %v5865_v0  ;;  %v5853_v27 = vadd.f32 1.0, %v13873_v48 }
0x115f   : > { %v5852_v33 = vadd.f32 1.0, %v13875_v52 }
0x1160   : > { %v13877_v54 = vpop.eup %13876  ;;  %6063 = vmatprep.mubr.bf16.mxu0 %v5909_v15  ;;  %v5869_v16 = vmul.f32 %v5853_v27, %v5741_v35 }
0x1161   : > { %v13879_v43 = vpop.eup %13878  ;;  %6064 = vmatmul.mubr.bf16.gmra.mxu0 %v5908_v39  ;;  %v5854_v34 = vadd.f32 1.0, %v13877_v54  ;;  %v5868_v32 = vmul.f32 %v5852_v33, %v5740_v11 }
0x1162   : > { %v5855_v19 = vadd.f32 1.0, %v13879_v43 }
0x1163   : > { %v5870_v18 = vmul.f32 %v5854_v34, %v5742_v17 }
0x1164   : > { %v5871_v2 = vmul.f32 %v5855_v19, %v5743_v26  ;;  %v13600_v19 = vld [vmem:[#allocation5 + $0x168] ss:$12 sps:$4 sm:$0xff]  }
0x1165   : > { %v5910_v7 = vpack.c.bf16 %v5870_v18, %v5868_v32 }
0x1166   : > { %v5911_v1 = vpack.c.bf16 %v5871_v2, %v5869_v16 }
0x1168   : > { %6071 = vmatprep.mubr.bf16.mxu0 %v5911_v1 }
0x1169   : > { %6072 = vmatmul.mubr.bf16.gmra.mxu0 %v5910_v7 }
0x11e4   : > { %v12117_v21 = vpop.f32.mrf.mxu0 }
0x11e6   : > { %v12118_v44 = vpop.f32.mrf.mxu0 }
0x11e7   : > { %v12119_v12 = vadd.f32 %v12118_v44, %v12117_v21 }
0x11e8   : > { %v12120_v42 = vpop.f32.mrf.mxu0 }
0x11e9   : > { %v6050_v29 = vadd.f32 %v12119_v12, %v11748_v6 }
0x11ea   : > { %v12121_v58 = vpop.f32.mrf.mxu0 }
0x11eb   : > { %v12122_v22 = vadd.f32 %v12121_v58, %v12120_v42  ;;  %v6080_v23 = vadd.f32 %v6050_v29, %v16042_v5 }
0x11ec   : > { %v12123_v37 = vpop.f32.mrf.mxu0 }
0x11ed   : > { %v6053_v9 = vadd.f32 %v12122_v22, %v11748_v6  ;;  %6090 = vadd.xlane.f32.xlu1 %v6080_v23  ;;  %v13605_v22 = vld [vmem:[#allocation5 + $0x154] ss:$12 sps:$4 sm:$0xff]  }
0x11ee   : > { %v12124_v47 = vpop.f32.mrf.mxu0 }
0x11ef   : > { %v12125_v30 = vadd.f32 %v12124_v47, %v12123_v37  ;;  %v6081_v57 = vadd.f32 %v6053_v9, %v16044_v51  ;;  %v13608_v37 = vld [vmem:[#allocation5 + $0x13c] ss:$12 sps:$4 sm:$0xff]   ;;  %v13606_v47 = vld [vmem:[#allocation5 + $0x138] ss:$12 sps:$4 sm:$0xff]  }
0x11f0   : > { %v12126_v61 = vpop.f32.mrf.mxu0  ;;  %v13609_v9 = vld [vmem:[#allocation5 + $0x170] ss:$12 sps:$4 sm:$0xff]  }
0x11f1   : > { %v6058_v38 = vadd.f32 %v12125_v30, %v11748_v6  ;;  %6092 = vadd.xlane.f32.xlu0 %v6081_v57  ;;  %12802 = vmatprep.subr.bf16.mxu0 %v13609_v9  ;;  %v13612_v30 = vld [vmem:[#allocation5 + $0x124] ss:$12 sps:$4 sm:$0xff]  }
0x11f2   : > { %v12127_v60 = vpop.f32.mrf.mxu0  ;;  %12803 = vmatpush3.bf16.msra.mxu0 %v13609_v9 }
0x11f3   : > { %v12128_v45 = vadd.f32 %v12127_v60, %v12126_v61  ;;  %v6082_v53 = vadd.f32 %v6058_v38, %v16052_v25  ;;  %v13610_v61 = vld [vmem:[#allocation5 + $0x120] ss:$12 sps:$4 sm:$0xff]  }
0x11f4   : > { %v13616_v38 = vld [vmem:[#allocation5 + $0x10c] ss:$12 sps:$4 sm:$0xff]  }
0x11f5   : > { %v6061_v8 = vadd.f32 %v12128_v45, %v11748_v6  ;;  %6094 = vadd.xlane.f32.xlu1 %v6082_v53  ;;  %v13617_v60 = vld [vmem:[#allocation5 + $0x140] ss:$12 sps:$4 sm:$0xff]   ;;  %v13614_v45 = vld [vmem:[#allocation5 + $0x108] ss:$12 sps:$4 sm:$0xff]  }
0x11f7   : > { %v6083_v50 = vadd.f32 %v6061_v8, %v16050_v55  ;;  %v13621_v8 = vld [vmem:[#allocation5 + $0x128] ss:$12 sps:$4 sm:$0xff]  }
0x11f9   : > { %6096 = vadd.xlane.f32.xlu0 %v6083_v50 }
0x1221   : > { %v12129_v5 = vpop.f32.mrf.mxu0 }
0x1223   : > { %v12130_v0 = vpop.f32.mrf.mxu0 }
0x1224   : > { %v12131_v49 = vadd.f32 %v12130_v0, %v12129_v5  ;;  %v13624_v5 = vld [vmem:[#allocation5 + $0xdc] ss:$12 sps:$4 sm:$0xff]  }
0x1225   : > { %v12132_v48 = vpop.f32.mrf.mxu0  ;;  %v13625_v0 = vld [vmem:[#allocation5 + $0x110] ss:$12 sps:$4 sm:$0xff]  }
0x1226   : > { %v6066_v10 = vadd.f32 %v12131_v49, %v11748_v6  ;;  %v13622_v49 = vld [vmem:[#allocation5 + $0xd8] ss:$12 sps:$4 sm:$0xff]  }
0x1227   : > { %v12133_v52 = vpop.f32.mrf.mxu0 }
0x1228   : > { %v12134_v15 = vadd.f32 %v12133_v52, %v12132_v48  ;;  %v16161_v51 = vadd.f32 %v6066_v10, %v16060_v28  ;;  %v13626_v48 = vld [vmem:[#allocation5 + $0xc0] ss:$12 sps:$4 sm:$0xff]   ;;  %v13628_v10 = vld [vmem:[#allocation5 + $0xc4] ss:$12 sps:$4 sm:$0xff]  }
0x1229   : > { %v12135_v39 = vpop.f32.mrf.mxu0  ;;  %v13629_v52 = vld [vmem:[#allocation5 + $0xf8] ss:$12 sps:$4 sm:$0xff]  }
0x122a   : > { %v6069_v54 = vadd.f32 %v12134_v15, %v11748_v6  ;;  %6098 = vadd.xlane.f32.xlu1 %v16161_v51  ;;  %v13630_v15 = vld [vmem:[#allocation5 + $0xe0] ss:$12 sps:$4 sm:$0xff]  }
0x122b   : > { %v12136_v25 = vpop.f32.mrf.mxu0 }
0x122c   : > { %v12137_v27 = vadd.f32 %v12136_v25, %v12135_v39  ;;  %v16165_v43 = vadd.f32 %v6069_v54, %v16062_v59  ;;  %v13602_v59 = vld [vmem:[#allocation5 + $0x16c] ss:$12 sps:$4 sm:$0xff]   ;;  %v13631_v39 = vld [vmem:[#allocation5 + $0xc8] ss:$12 sps:$4 sm:$0xff]  }
0x122d   : > { %v12138_v55 = vpop.f32.mrf.mxu0  ;;  %6389 = vmatprep.subr.bf16.mxu1 %v13602_v59 }
0x122e   : > { %v6074_v17 = vadd.f32 %v12137_v27, %v11748_v6  ;;  %6100 = vadd.xlane.f32.xlu0 %v16165_v43  ;;  %6390 = vmatpush1.bf16.msra.mxu1 %v13600_v19 }
0x122f   : > { %v12139_v33 = vpop.f32.mrf.mxu0  ;;  %6391 = vmatprep.subr.bf16.mxu1 %v13605_v22 }
0x1230   : > { %v12140_v34 = vadd.f32 %v12139_v33, %v12138_v55  ;;  %v16169_v35 = vadd.f32 %v6074_v17, %v16070_v41 }
0x1232   : > { %v6077_v28 = vadd.f32 %v12140_v34, %v11748_v6  ;;  %6102 = vadd.xlane.f32.xlu1 %v16169_v35 }
0x1234   : > { %v16173_v26 = vadd.f32 %v6077_v28, %v16068_v20 }
0x1236   : > { %6104 = vadd.xlane.f32.xlu0 %v16173_v26 }
0x1276   : > { %v6091_v11 = vpop.xlane.xlu1 %6090 }
0x1277   : > { %v6106_v18 = vmul.f32 0.0078125, %v6091_v11 }
0x1279   : > { %v16176_v16 = vsub.f32 %v6080_v23, %v6106_v18  ;;  %v13603_v23 = vld [vmem:[#allocation5 + $0x150] ss:$12 sps:$4 sm:$0xff]  }
0x127a   : > { %v6093_v2 = vpop.xlane.xlu0 %6092  ;;  %6392 = vmatpush1.bf16.msra.mxu1 %v13603_v23 }
0x127b   : > { %v6107_v32 = vmul.f32 0.0078125, %v6093_v2  ;;  %v6122_v41 = vmul.f32 %v16176_v16, %v16176_v16  ;;  %6393 = vmatprep.subr.bf16.mxu1 %v13608_v37 }
0x127d   : > { %v16180_v1 = vsub.f32 %v6081_v57, %v6107_v32  ;;  %6130 = vadd.xlane.f32.xlu1 %v6122_v41  ;;  %v13613_v57 = vld [vmem:[#allocation5 + $0x158] ss:$12 sps:$4 sm:$0xff]  }
0x127e   : > { %v6095_v20 = vpop.xlane.xlu1 %6094  ;;  %6394 = vmatpush1.bf16.msra.mxu1 %v13606_v47  ;;  %12804 = vmatprep.subr.bf16.mxu0 %v13613_v57  ;;  %v11765_v47 = vld [vmem:[#allocation14] ss:$0 sm:$0xff] }
0x127f   : > { %v6108_v7 = vmul.f32 0.0078125, %v6095_v20  ;;  %v6123_v21 = vmul.f32 %v16180_v1, %v16180_v1  ;;  %6395 = vmatprep.subr.bf16.mxu1 %v13612_v30  ;;  %12805 = vmatpush3.bf16.msra.mxu0 %v13613_v57 }
0x1280   : > { %12806 = vmatprep.subr.bf16.mxu0 %v13617_v60 }
0x1281   : > { %v16184_v6 = vsub.f32 %v6082_v53, %v6108_v7  ;;  %6132 = vadd.xlane.f32.xlu0 %v6123_v21  ;;  %v13620_v53 = vld [vmem:[#allocation5 + $0xf4] ss:$12 sps:$4 sm:$0xff]  }
0x1282   : > { %v6097_v44 = vpop.xlane.xlu0 %6096  ;;  %6396 = vmatpush1.bf16.msra.mxu1 %v13610_v61 }
0x1283   : > { %v6109_v12 = vmul.f32 0.0078125, %v6097_v44  ;;  %v6124_v42 = vmul.f32 %v16184_v6, %v16184_v6  ;;  %6397 = vmatprep.subr.bf16.mxu1 %v13616_v38  ;;  %12807 = vmatpush3.bf16.msra.mxu0 %v13617_v60  ;;  %v11766_v38 = vld [vmem:[#allocation16] ss:$0 sm:$0xff] }
0x1284   : > { %12808 = vmatprep.subr.bf16.mxu0 %v13621_v8 }
0x1285   : > { %v16188_v29 = vsub.f32 %v6083_v50, %v6109_v12  ;;  %6134 = vadd.xlane.f32.xlu1 %v6124_v42  ;;  %v13618_v50 = vld [vmem:[#allocation5 + $0xf0] ss:$12 sps:$4 sm:$0xff]  }
0x1286   : > { %6398 = vmatpush1.bf16.msra.mxu1 %v13614_v45 }
0x1287   : > { %v6125_v58 = vmul.f32 %v16188_v29, %v16188_v29  ;;  %6399 = vmatprep.subr.bf16.mxu1 %v13620_v53  ;;  %12809 = vmatpush3.bf16.msra.mxu0 %v13621_v8 }
0x1288   : > { %12810 = vmatprep.subr.bf16.mxu0 %v13625_v0 }
0x1289   : > { %6136 = vadd.xlane.f32.xlu0 %v6125_v58 }
0x128a   : > { %6400 = vmatpush1.bf16.msra.mxu1 %v13618_v50 }
0x128b   : > { %6401 = vmatprep.subr.bf16.mxu1 %v13624_v5  ;;  %12811 = vmatpush3.bf16.msra.mxu0 %v13625_v0 }
0x128c   : > { %12812 = vmatprep.subr.bf16.mxu0 %v13629_v52 }
0x128e   : > { %6402 = vmatpush1.bf16.msra.mxu1 %v13622_v49 }
0x128f   : > { %6403 = vmatprep.subr.bf16.mxu1 %v13628_v10  ;;  %12813 = vmatpush3.bf16.msra.mxu0 %v13629_v52 }
0x1290   : > { %12814 = vmatprep.subr.bf16.mxu0 %v13630_v15 }
0x1292   : > { %6404 = vmatpush1.bf16.msra.mxu1 %v13626_v48 }
0x1293   : > { %12826 = vmatprep.subr.bf16.mxu1 %v17622_v62  ;;  %12815 = vmatpush3.bf16.msra.mxu0 %v13630_v15 }
0x1294   : > { %12816 = vmatprep.subr.bf16.mxu0 %v13631_v39 }
0x1297   : > { %12817 = vmatpush3.bf16.msra.mxu0 %v13631_v39 }
0x1298   : > { %12838 = vmatprep.subr.bf16.mxu0 %v17622_v62 }
0x12b3   : > { %v6099_v54 = vpop.xlane.xlu1 %6098 }
0x12b4   : > { %v6110_v25 = vmul.f32 0.0078125, %v6099_v54 }
0x12b6   : > { %v16195_v27 = vsub.f32 %v16161_v51, %v6110_v25 }
0x12b7   : > { %v6101_v55 = vpop.xlane.xlu0 %6100 }
0x12b8   : > { %v6111_v17 = vmul.f32 0.0078125, %v6101_v55  ;;  %v6126_v33 = vmul.f32 %v16195_v27, %v16195_v27 }
0x12ba   : > { %v16200_v34 = vsub.f32 %v16165_v43, %v6111_v17  ;;  %6138 = vadd.xlane.f32.xlu1 %v6126_v33 }
0x12bb   : > { %v6103_v28 = vpop.xlane.xlu1 %6102 }
0x12bc   : > { %v6112_v19 = vmul.f32 0.0078125, %v6103_v28  ;;  %v6127_v59 = vmul.f32 %v16200_v34, %v16200_v34 }
0x12be   : > { %v16205_v11 = vsub.f32 %v16169_v35, %v6112_v19  ;;  %6140 = vadd.xlane.f32.xlu0 %v6127_v59 }
0x12bf   : > { %v6105_v51 = vpop.xlane.xlu0 %6104 }
0x12c0   : > { %v6113_v18 = vmul.f32 0.0078125, %v6105_v51  ;;  %v6128_v2 = vmul.f32 %v16205_v11, %v16205_v11 }
0x12c2   : > { %v16210_v32 = vsub.f32 %v16173_v26, %v6113_v18  ;;  %6142 = vadd.xlane.f32.xlu1 %v6128_v2 }
0x12c4   : > { %v6129_v43 = vmul.f32 %v16210_v32, %v16210_v32 }
0x12c6   : > { %6144 = vadd.xlane.f32.xlu0 %v6129_v43 }
0x1306   : > { %v6131_v41 = vpop.xlane.xlu1 %6130 }
0x1307   : > { %v6146_v20 = vmul.f32 0.0078125, %v6131_v41 }
0x1309   : > { %v6154_v7 = vadd.f32 1e-12, %v6146_v20 }
0x130a   : > { %v6133_v21 = vpop.xlane.xlu0 %6132 }
0x130b   : > { %13880 = vrsqrt.f32 %v6154_v7  ;;  %v6147_v35 = vmul.f32 0.0078125, %v6133_v21 }
0x130d   : > { %v6155_v44 = vadd.f32 1e-12, %v6147_v35 }
0x130e   : > { %v6135_v12 = vpop.xlane.xlu1 %6134 }
0x130f   : > { %13882 = vrsqrt.f32 %v6155_v44  ;;  %v6148_v42 = vmul.f32 0.0078125, %v6135_v12 }
0x1311   : > { %v6156_v58 = vadd.f32 1e-12, %v6148_v42 }
0x1312   : > { %v6137_v22 = vpop.xlane.xlu0 %6136 }
0x1313   : > { %13884 = vrsqrt.f32 %v6156_v58  ;;  %v6149_v26 = vmul.f32 0.0078125, %v6137_v22 }
0x1315   : > { %v6157_v23 = vadd.f32 1e-12, %v6149_v26 }
0x1317   : > { %13886 = vrsqrt.f32 %v6157_v23 }
0x1318   : > { %v13881_v37 = vpop.eup %13880 }
0x1319   : > { %v6170_v9 = vmul.f32 %v13881_v37, %v16176_v16 }
0x131b   : > { %v6184_v57 = vmul.f32 %v11765_v47, %v6170_v9 }
0x131c   : > { %v13883_v30 = vpop.eup %13882 }
0x131d   : > { %v6171_v61 = vmul.f32 %v13883_v30, %v16180_v1  ;;  %v16216_v53 = vadd.f32 %v11766_v38, %v6184_v57 }
0x131f   : > { %v6185_v60 = vmul.f32 %v11765_v47, %v6171_v61  ;;  %17660 = vst [vmem:[#allocation48_spill] sm:$0xff] %v16216_v53 }
0x1320   : > { %v13885_v45 = vpop.eup %13884 }
0x1321   : > { %v16218_v8 = vadd.f32 %v11766_v38, %v6185_v60  ;;  %v6172_v50 = vmul.f32 %v13885_v45, %v16184_v6 }
0x1323   : > { %17661 = vst [vmem:[#allocation49_spill] sm:$0xff] %v16218_v8  ;;  %v6239_v5 = vpack.c.bf16 %v16218_v8, %v16216_v53  ;;  %v6186_v49 = vmul.f32 %v11765_v47, %v6172_v50 }
0x1324   : > { %v13887_v0 = vpop.eup %13886 }
0x1325   : > { %6422 = vmatmul.mubr.bf16.vlgmr.msra.gmra.mxu1 %v6239_v5  ;;  %12818 = vmatprep.mubr.bf16.mxu0 %v6239_v5  ;;  %v6173_v16 = vmul.f32 %v13887_v0, %v16188_v29  ;;  %v16225_v48 = vadd.f32 %v11766_v38, %v6186_v49 }
0x1326   : > { %6431 = vmatprep.mubr.bf16.mxu1 %v17636_v46 }
0x1327   : > { %v6187_v1 = vmul.f32 %v11765_v47, %v6173_v16  ;;  %17662 = vst [vmem:[#allocation50_spill] sm:$0xff] %v16225_v48 }
0x1329   : > { %v16227_v10 = vadd.f32 %v11766_v38, %v6187_v1 }
0x132b   : > { %17663 = vst [vmem:[#allocation41_spill] sm:$0xff] %v16227_v10  ;;  %v6240_v52 = vpack.c.bf16 %v16227_v10, %v16225_v48 }
0x132d   : > { %6432 = vmatmul.mubr.bf16.gmra.mxu1 %v6240_v52  ;;  %12819 = vmatmul.mubr.bf16.vlgmr.msra.gmra.mxu0 %v6240_v52 }
0x132e   : > { %6441 = vmatprep.mubr.bf16.mxu1 %v17636_v46 }
0x1343   : > { %v6139_v6 = vpop.xlane.xlu1 %6138 }
0x1344   : > { %v6150_v15 = vmul.f32 0.0078125, %v6139_v6 }
0x1346   : > { %v6158_v39 = vadd.f32 1e-12, %v6150_v15 }
0x1347   : > { %v6141_v54 = vpop.xlane.xlu0 %6140 }
0x1348   : > { %13888 = vrsqrt.f32 %v6158_v39  ;;  %v6151_v29 = vmul.f32 0.0078125, %v6141_v54 }
0x134a   : > { %v6159_v25 = vadd.f32 1e-12, %v6151_v29 }
0x134b   : > { %v6143_v55 = vpop.xlane.xlu1 %6142 }
0x134c   : > { %13890 = vrsqrt.f32 %v6159_v25  ;;  %v6152_v17 = vmul.f32 0.0078125, %v6143_v55 }
0x134e   : > { %v6160_v33 = vadd.f32 1e-12, %v6152_v17 }
0x134f   : > { %v6145_v28 = vpop.xlane.xlu0 %6144 }
0x1350   : > { %13892 = vrsqrt.f32 %v6160_v33  ;;  %v6153_v19 = vmul.f32 0.0078125, %v6145_v28 }
0x1352   : > { %v6161_v59 = vadd.f32 1e-12, %v6153_v19 }
0x1354   : > { %13894 = vrsqrt.f32 %v6161_v59 }
0x1355   : > { %v13889_v51 = vpop.eup %13888 }
0x1356   : > { %v6174_v18 = vmul.f32 %v13889_v51, %v16195_v27 }
0x1358   : > { %v6188_v41 = vmul.f32 %v11765_v47, %v6174_v18 }
0x1359   : > { %v13891_v2 = vpop.eup %13890 }
0x135a   : > { %v6175_v43 = vmul.f32 %v13891_v2, %v16200_v34  ;;  %v16234_v21 = vadd.f32 %v11766_v38, %v6188_v41 }
0x135c   : > { %v6189_v20 = vmul.f32 %v11765_v47, %v6175_v43  ;;  %17664 = vst [vmem:[#allocation40_spill] sm:$0xff] %v16234_v21 }
0x135d   : > { %v13893_v7 = vpop.eup %13892 }
0x135e   : > { %v16236_v35 = vadd.f32 %v11766_v38, %v6189_v20  ;;  %v6176_v44 = vmul.f32 %v13893_v7, %v16205_v11  ;;  %v16256_v11 = vld [vmem:[%s17521_s8 + $0x3] sm:$0x7] }
0x135f   : > { %v16265_v57 = vrot.slane %v16256_v11, %v17658_v56 }
0x1360   : > { %17665 = vst [vmem:[#allocation43_spill] sm:$0xff] %v16236_v35  ;;  %v6241_v12 = vpack.c.bf16 %v16236_v35, %v16234_v21  ;;  %v6190_v58 = vmul.f32 %v11765_v47, %v6176_v44 }
0x1361   : > { %v13895_v42 = vpop.eup %13894 }
0x1362   : > { %6442 = vmatmul.mubr.bf16.gmra.mxu1 %v6241_v12  ;;  %12822 = vmatprep.mubr.bf16.mxu0 %v6241_v12  ;;  %v6177_v27 = vmul.f32 %v13895_v42, %v16210_v32  ;;  %v16243_v22 = vadd.f32 %v11766_v38, %v6190_v58  ;;  %v16260_v32 = vrot.slane %v16256_v11, %v17659_v24 }
0x1363   : > { %6451 = vmatprep.mubr.bf16.mxu1 %v17636_v46 }
0x1364   : > { %v6191_v34 = vmul.f32 %v11765_v47, %v6177_v27  ;;  %17666 = vst [vmem:[#allocation42_spill] sm:$0xff] %v16243_v22 }
0x1366   : > { %v16245_v26 = vadd.f32 %v11766_v38, %v6191_v34 }
0x1368   : > { %17667 = vst [vmem:[#allocation45_spill] sm:$0xff] %v16245_v26  ;;  %v6242_v23 = vpack.c.bf16 %v16245_v26, %v16243_v22 }
0x136a   : > { %6452 = vmatmul.mubr.bf16.gmra.mxu1 %v6242_v23  ;;  %12823 = vmatmul.mubr.bf16.gmra.mxu0 %v6242_v23 }
0x136b   : > { %12828 = vmatprep.mubr.msk.bf16.mxu1 %vm14460_vm9, %v17622_v62  ;;  %12840 = vmatprep.mubr.msk.bf16.mxu0 %vm14460_vm9, %v17622_v62 }
0x13e5   : > { %v6423_v37 = vpop.f32.mrf.mxu1 }
0x13e6   : > { %v6424_v5 = vadd.f32 %v6423_v37, %v16265_v57 }
0x13e7   : > { %v6425_v9 = vpop.f32.mrf.mxu1 }
0x13e8   : > { %v6426_v47 = vadd.f32 %v6425_v9, %v16260_v32  ;;  %v16277_v52 = vpack.c.bf16 %v6424_v5, %v6424_v5 }
0x13e9   : > { %v6427_v30 = vpop.f32.mrf.mxu1 }
0x13ea   : > { %v16267_v61 = vpack.c.bf16 %v6426_v47, %v6426_v47  ;;  %v6428_v25 = vadd.f32 %v6427_v30, %v16265_v57 }
0x13eb   : > { %v6429_v38 = vpop.f32.mrf.mxu1 }
0x13ec   : > { %v6430_v60 = vadd.f32 %v6429_v38, %v16260_v32  ;;  %v6555_v45 = vsel %vm1657_vm10, %v16267_v61, 0  ;;  %v16296_v33 = vpack.c.bf16 %v6428_v25, %v6428_v25 }
0x13ed   : > { %v6433_v50 = vpop.f32.mrf.mxu1  ;;  %12827 = vmatpush3.bf16.xpose.msra.mxu1 %v6555_v45  ;;  %v16319_v20 = vpop.f32.mrf.mxu0 }
0x13ee   : > { %12832 = vmatprep.subr.bf16.mxu1 %v17622_v62  ;;  %v16274_v16 = vpack.c.bf16 %v6430_v60, %v6430_v60  ;;  %v6434_v55 = vadd.f32 %v6433_v50, %v16265_v57  ;;  %v17668_v50 = vld [vmem:[#allocation37_spill] sm:$0xff] }
0x13ef   : > { %v6435_v0 = vpop.f32.mrf.mxu1  ;;  %v6496_v58 = vpop.f32.mrf.mxu0  ;;  %v17669_v5 = vsub.s32 2, %v17668_v50 }
0x13f0   : > { %v6436_v49 = vadd.f32 %v6435_v0, %v16260_v32  ;;  %v6601_v54 = vsel %vm1657_vm10, %v16274_v16, 0  ;;  %v16298_v28 = vpack.c.bf16 %v6434_v55, %v6434_v55 }
0x13f1   : > { %v6437_v1 = vpop.f32.mrf.mxu1  ;;  %v16333_v38 = vpop.f32.mrf.mxu0  ;;  %v16342_v0 = vrot.slane %v16256_v11, %v17669_v5 }
0x13f2   : > { %v16279_v6 = vpack.c.bf16 %v6436_v49, %v6436_v49  ;;  %v6438_v59 = vadd.f32 %v6437_v1, %v16265_v57 }
0x13f3   : > { %v6439_v15 = vpop.f32.mrf.mxu1  ;;  %v6499_v11 = vpop.f32.mrf.mxu0 }
0x13f4   : > { %v6440_v39 = vadd.f32 %v6439_v15, %v16260_v32  ;;  %12829 = vmatmul.mubr.msk.bf16.vlgmr.msra.gmra.mxu1 %vm1657_vm10, %v16277_v52  ;;  %v6647_v29 = vsel %vm1657_vm10, %v16279_v6, 0  ;;  %v16312_v51 = vpack.c.bf16 %v6438_v59, %v6438_v59  ;;  %v6500_v59 = vadd.f32 %v6499_v11, %v16342_v0 }
0x13f5   : > { %12833 = vmatpush3.bf16.xpose.msra.mxu1 %v6601_v54  ;;  %12834 = vmatprep.mubr.msk.bf16.mxu1 %vm14460_vm9, %v17622_v62 }
0x13f6   : > { %12839 = vmatpush3.bf16.xpose.msra.mxu0 %v6647_v29  ;;  %12844 = vmatprep.subr.bf16.mxu1 %v17622_v62  ;;  %v16294_v17 = vpack.c.bf16 %v6440_v39, %v6440_v39  ;;  %v6497_v39 = vadd.f32 %v6496_v58, %v16342_v0 }
0x13f7   : > { %12850 = vmatprep.subr.bf16.mxu0 %v17622_v62 }
0x13f8   : > { %v6693_v19 = vsel %vm1657_vm10, %v16294_v17, 0 }
0x13fc   : > { %12835 = vmatmul.mubr.msk.bf16.vlgmr.msra.gmra.mxu1 %vm1657_vm10, %v16296_v33 }
0x13fd   : > { %12841 = vmatmul.mubr.msk.bf16.vlgmr.msra.gmra.mxu0 %vm1657_vm10, %v16298_v28  ;;  %12845 = vmatpush3.bf16.xpose.msra.mxu1 %v6693_v19  ;;  %v16362_v19 = vpack.c.bf16 %v6497_v39, %v6497_v39 }
0x13fe   : > { %12846 = vmatprep.mubr.msk.bf16.mxu1 %vm14460_vm9, %v17622_v62  ;;  %12856 = vmatprep.subr.bf16.mxu1 %v17622_v62 }
0x13ff   : > { %12852 = vmatprep.mubr.msk.bf16.mxu0 %vm14460_vm9, %v17622_v62 }
0x1404   : > { %12847 = vmatmul.mubr.msk.bf16.vlgmr.msra.gmra.mxu1 %vm1657_vm10, %v16312_v51 }
0x1405   : > { %12858 = vmatprep.mubr.msk.bf16.mxu1 %vm14460_vm9, %v17622_v62 }
0x1422   : > { %v6443_v18 = vpop.f32.mrf.mxu1 }
0x1423   : > { %v6444_v34 = vadd.f32 %v6443_v18, %v16265_v57 }
0x1424   : > { %v6445_v2 = vpop.f32.mrf.mxu1 }
0x1425   : > { %v6446_v43 = vadd.f32 %v6445_v2, %v16260_v32  ;;  %v16335_v60 = vpack.c.bf16 %v6444_v34, %v6444_v34 }
0x1426   : > { %v6447_v41 = vpop.f32.mrf.mxu1 }
0x1427   : > { %v16321_v7 = vpack.c.bf16 %v6446_v43, %v6446_v43  ;;  %v6448_v49 = vadd.f32 %v6447_v41, %v16265_v57  ;;  %v16373_v43 = vpack.c.bf16 %v6500_v59, %v6500_v59  ;;  %v7019_v41 = vsel %vm2126_vm11, %v16362_v19, 0 }
0x1428   : > { %v6449_v44 = vpop.f32.mrf.mxu1 }
0x1429   : > { %v6450_v12 = vadd.f32 %v6449_v44, %v16260_v32  ;;  %v6739_v42 = vsel %vm1657_vm10, %v16321_v7, 0  ;;  %v16356_v25 = vpack.c.bf16 %v6448_v49, %v6448_v49 }
0x142a   : > { %v6453_v27 = vpop.f32.mrf.mxu1  ;;  %12851 = vmatpush3.bf16.xpose.msra.mxu0 %v6739_v42 }
0x142b   : > { %v16327_v23 = vpack.c.bf16 %v6450_v12, %v6450_v12  ;;  %12862 = vmatprep.subr.bf16.mxu0 %v17622_v62  ;;  %v6454_v55 = vadd.f32 %v6453_v27, %v16265_v57  ;;  %v16391_v12 = vpop.f32.mrf.mxu0 }
0x142c   : > { %v6455_v37 = vpop.f32.mrf.mxu1 }
0x142d   : > { %v6456_v9 = vadd.f32 %v6455_v37, %v16260_v32  ;;  %v6785_v30 = vsel %vm1657_vm10, %v16327_v23, 0  ;;  %v16369_v18 = vpack.c.bf16 %v6454_v55, %v6454_v55  ;;  %v16393_v42 = vpop.f32.mrf.mxu0 }
0x142e   : > { %v6457_v47 = vpop.f32.mrf.mxu1  ;;  %12857 = vmatpush3.bf16.xpose.msra.mxu1 %v6785_v30 }
0x142f   : > { %v16337_v45 = vpack.c.bf16 %v6456_v9, %v6456_v9  ;;  %12868 = vmatprep.subr.bf16.mxu1 %v17622_v62  ;;  %v6458_v2 = vadd.f32 %v6457_v47, %v16265_v57  ;;  %v7065_v57 = vsel %vm2126_vm11, %v16373_v43, 0  ;;  %v16396_v37 = vpop.f32.mrf.mxu0 }
0x1430   : > { %v6459_v1 = vpop.f32.mrf.mxu1 }
0x1431   : > { %v6460_v15 = vadd.f32 %v6459_v1, %v16260_v32  ;;  %12853 = vmatmul.mubr.msk.bf16.vlgmr.msra.gmra.mxu0 %vm1657_vm10, %v16335_v60  ;;  %v6831_v54 = vsel %vm1657_vm10, %v16337_v45, 0  ;;  %v16381_v44 = vpack.c.bf16 %v6458_v2, %v6458_v2  ;;  %v16399_v5 = vpop.f32.mrf.mxu0 }
0x1432   : > { %12864 = vmatprep.mubr.msk.bf16.mxu0 %vm14460_vm9, %v17622_v62  ;;  %12863 = vmatpush3.bf16.xpose.msra.mxu0 %v6831_v54 }
0x1433   : > { %v16354_v29 = vpack.c.bf16 %v6460_v15, %v6460_v15  ;;  %12874 = vmatprep.subr.bf16.mxu0 %v17622_v62 }
0x1435   : > { %v6877_v32 = vsel %vm1657_vm10, %v16354_v29, 0  ;;  %12859 = vmatmul.mubr.msk.bf16.vlgmr.msra.gmra.mxu1 %vm1657_vm10, %v16356_v25 }
0x1436   : > { %12869 = vmatpush3.bf16.xpose.msra.mxu1 %v6877_v32  ;;  %12870 = vmatprep.mubr.msk.bf16.mxu1 %vm14460_vm9, %v17622_v62 }
0x1437   : > { %12880 = vmatprep.subr.bf16.mxu1 %v17622_v62 }
0x1439   : > { %12865 = vmatmul.mubr.msk.bf16.vlgmr.msra.gmra.mxu0 %vm1657_vm10, %v16369_v18 }
0x143a   : > { %12875 = vmatpush3.bf16.msra.mxu0 %v7019_v41  ;;  %12876 = vmatprep.mubr.msk.bf16.mxu0 %vm14460_vm9, %v17622_v62 }
0x143b   : > { %12886 = vmatprep.subr.bf16.mxu0 %v17622_v62 }
0x143d   : > { %12871 = vmatmul.mubr.msk.bf16.vlgmr.msra.gmra.mxu1 %vm1657_vm10, %v16381_v44 }
0x143e   : > { %12881 = vmatpush3.bf16.msra.mxu1 %v7065_v57  ;;  %12882 = vmatprep.mubr.msk.bf16.mxu1 %vm14460_vm9, %v17622_v62 }
0x143f   : > { %12892 = vmatprep.subr.bf16.mxu1 %v17622_v62 }
0x14b4   : > { %v6591_v27 = vpop.f32.mrf.mxu1 }
0x14b5   : > { %v6592_v58 = vadd.f32 %v6591_v27, %v15073_v31 }
0x14b6   : > { %v12830_v34 = vpop.f32.mrf.mxu1 }
0x14b7   : > { %v6919_v9 = vsel %vm2026_vm12, %v6592_v58, -inf }
0x14b8   : > { %6920 = vmax.xlane.f32.xlu1 %v6919_v9  ;;  %v6594_v47 = vpop.f32.mrf.mxu1 }
0x14ba   : > { %v12831_v30 = vpop.f32.mrf.mxu1 }
0x14bc   : > { %v6637_v49 = vpop.f32.mrf.mxu1 }
0x14bd   : > { %v6638_v1 = vadd.f32 %v6637_v49, %v15082_v13  ;;  %v6683_v15 = vpop.f32.mrf.mxu0 }
0x14be   : > { %v6684_v39 = vadd.f32 %v6683_v15, %v15091_v36  ;;  %v12836_v54 = vpop.f32.mrf.mxu1 }
0x14bf   : > { %v12842_v11 = vpop.f32.mrf.mxu0  ;;  %v6922_v55 = vsel %vm2026_vm12, %v6638_v1, -inf }
0x14c0   : > { %v6925_v32 = vsel %vm2026_vm12, %v6684_v39, -inf  ;;  %6923 = vmax.xlane.f32.xlu0 %v6922_v55  ;;  %v6640_v59 = vpop.f32.mrf.mxu1 }
0x14c1   : > { %v6686_v2 = vpop.f32.mrf.mxu0  ;;  %6926 = vmax.xlane.f32.xlu1 %v6925_v32 }
0x14c2   : > { %v12837_v41 = vpop.f32.mrf.mxu1 }
0x14c3   : > { %v12843_v57 = vpop.f32.mrf.mxu0 }
0x14c4   : > { %v6729_v27 = vpop.f32.mrf.mxu1 }
0x14c5   : > { %v6730_v34 = vadd.f32 %v6729_v27, %v15100_v63 }
0x14c6   : > { %v12848_v9 = vpop.f32.mrf.mxu1 }
0x14c7   : > { %v6928_v47 = vsel %vm2026_vm12, %v6730_v34, -inf }
0x14c8   : > { %6929 = vmax.xlane.f32.xlu0 %v6928_v47  ;;  %v6732_v30 = vpop.f32.mrf.mxu1 }
0x14ca   : > { %v12849_v49 = vpop.f32.mrf.mxu1 }
0x14f1   : > { %v6775_v15 = vpop.f32.mrf.mxu0 }
0x14f2   : > { %v6776_v54 = vadd.f32 %v6775_v15, %v15107_v40 }
0x14f3   : > { %v12854_v11 = vpop.f32.mrf.mxu0 }
0x14f4   : > { %v6931_v55 = vsel %vm2026_vm12, %v6776_v54, -inf }
0x14f5   : > { %v6778_v59 = vpop.f32.mrf.mxu0  ;;  %6932 = vmax.xlane.f32.xlu1 %v6931_v55  ;;  %v6821_v32 = vpop.f32.mrf.mxu1 }
0x14f6   : > { %v6822_v2 = vadd.f32 %v6821_v32, %v15113_v14 }
0x14f7   : > { %v12855_v41 = vpop.f32.mrf.mxu0  ;;  %v12860_v57 = vpop.f32.mrf.mxu1 }
0x14f8   : > { %v6934_v27 = vsel %vm2026_vm12, %v6822_v2, -inf }
0x14f9   : > { %6935 = vmax.xlane.f32.xlu0 %v6934_v27  ;;  %v6824_v9 = vpop.f32.mrf.mxu1  ;;  %v6867_v47 = vpop.f32.mrf.mxu0 }
0x14fa   : > { %v16412_v30 = vadd.f32 %v6867_v47, %v15118_v3 }
0x14fb   : > { %v12861_v49 = vpop.f32.mrf.mxu1  ;;  %v12866_v15 = vpop.f32.mrf.mxu0 }
0x14fc   : > { %v6937_v11 = vsel %vm2026_vm12, %v16412_v30, -inf }
0x14fd   : > { %v6913_v59 = vpop.f32.mrf.mxu1  ;;  %6938 = vmax.xlane.f32.xlu1 %v6937_v11  ;;  %v6870_v55 = vpop.f32.mrf.mxu0 }
0x14fe   : > { %v6914_v32 = vadd.f32 %v6913_v59, %v15125_v4 }
0x14ff   : > { %v12867_v41 = vpop.f32.mrf.mxu0  ;;  %v12872_v57 = vpop.f32.mrf.mxu1 }
0x1500   : > { %v6940_v50 = vsel %vm2026_vm12, %v6914_v32, -inf }
0x1501   : > { %6941 = vmax.xlane.f32.xlu0 %v6940_v50  ;;  %v6916_v27 = vpop.f32.mrf.mxu1 }
0x1503   : > { %v12873_v9 = vpop.f32.mrf.mxu1 }
0x1541   : > { %v6921_v24 = vpop.xlane.xlu1 %6920 }
0x1542   : > { %v6943_v47 = vsub.f32 %v6592_v58, %v6921_v24 }
0x1544   : > { %v6951_v56 = vmul.f32 1.442695, %v6943_v47 }
0x1546   : > { %13896 = vpow2.f32 %v6951_v56 }
0x1549   : > { %v6924_v49 = vpop.xlane.xlu0 %6923 }
0x154a   : > { %v6927_v15 = vpop.xlane.xlu1 %6926  ;;  %v6944_v26 = vsub.f32 %v6638_v1, %v6924_v49 }
0x154b   : > { %v6945_v35 = vsub.f32 %v6684_v39, %v6927_v15 }
0x154c   : > { %v6953_v22 = vmul.f32 1.442695, %v6944_v26 }
0x154d   : > { %v6955_v11 = vmul.f32 1.442695, %v6945_v35 }
0x154e   : > { %13898 = vpow2.f32 %v6953_v22 }
0x154f   : > { %13900 = vpow2.f32 %v6955_v11 }
0x1551   : > { %v6930_v59 = vpop.xlane.xlu0 %6929 }
0x1552   : > { %v6946_v55 = vsub.f32 %v6730_v34, %v6930_v59 }
0x1553   : > { %v16418_v41 = vpop.eup %13896 }
0x1554   : > { %v6957_v57 = vmul.f32 1.442695, %v6946_v55  ;;  %v6967_v50 = vsel %vm2026_vm12, %v16418_v41, 0.0 }
0x1555   : > { %6968 = vadd.xlane.f32.xlu1 %v6967_v50 }
0x1556   : > { %13902 = vpow2.f32 %v6957_v57 }
0x155b   : > { %v16422_v24 = vpop.eup %13898 }
0x155c   : > { %v16424_v56 = vpop.eup %13900  ;;  %v6970_v26 = vsel %vm2026_vm12, %v16422_v24, 0.0 }
0x155d   : > { %6971 = vadd.xlane.f32.xlu0 %v6970_v26  ;;  %v6973_v35 = vsel %vm2026_vm12, %v16424_v56, 0.0 }
0x155e   : > { %6974 = vadd.xlane.f32.xlu1 %v6973_v35 }
0x1563   : > { %v16430_v22 = vpop.eup %13902 }
0x1564   : > { %v6976_v58 = vsel %vm2026_vm12, %v16430_v22, 0.0 }
0x1565   : > { %6977 = vadd.xlane.f32.xlu0 %v6976_v58 }
0x157e   : > { %v6933_v1 = vpop.xlane.xlu1 %6932 }
0x157f   : > { %v6947_v39 = vsub.f32 %v6776_v54, %v6933_v1 }
0x1581   : > { %v6959_v34 = vmul.f32 1.442695, %v6947_v39 }
0x1582   : > { %v6936_v27 = vpop.xlane.xlu0 %6935 }
0x1583   : > { %13904 = vpow2.f32 %v6959_v34  ;;  %v6948_v9 = vsub.f32 %v6822_v2, %v6936_v27  ;;  %v6505_v27 = vadd.f32 %v16319_v20, %v16342_v0 }
0x1585   : > { %v6961_v47 = vmul.f32 1.442695, %v6948_v9 }
0x1587   : > { %13906 = vpow2.f32 %v6961_v47  ;;  %v16483_v47 = vpack.c.bf16 %v6505_v27, %v6505_v27 }
0x1589   : > { %v7111_v20 = vsel %vm2126_vm11, %v16483_v47, 0 }
0x158a   : > { %v6942_v49 = vpop.xlane.xlu0 %6941 }
0x158b   : > { %v6950_v15 = vsub.f32 %v6914_v32, %v6942_v49  ;;  %v6939_v32 = vpop.xlane.xlu1 %6938 }
0x158c   : > { %v6949_v26 = vsub.f32 %v16412_v30, %v6939_v32 }
0x158d   : > { %v6965_v11 = vmul.f32 1.442695, %v6950_v15 }
0x158e   : > { %v6963_v35 = vmul.f32 1.442695, %v6949_v26 }
0x158f   : > { %13908 = vpow2.f32 %v6965_v11 }
0x1590   : > { %v16434_v59 = vpop.eup %13904  ;;  %13910 = vpow2.f32 %v6963_v35 }
0x1591   : > { %v6979_v55 = vsel %vm2026_vm12, %v16434_v59, 0.0 }
0x1592   : > { %6980 = vadd.xlane.f32.xlu1 %v6979_v55  ;;  %v6508_v55 = vadd.f32 %v16333_v38, %v16342_v0 }
0x1594   : > { %v16438_v57 = vpop.eup %13906  ;;  %v16500_v38 = vpack.c.bf16 %v6508_v55, %v6508_v55 }
0x1595   : > { %v6982_v54 = vsel %vm2026_vm12, %v16438_v57, 0.0 }
0x1596   : > { %6983 = vadd.xlane.f32.xlu0 %v6982_v54  ;;  %v6513_v54 = vadd.f32 %v16393_v42, %v16342_v0 }
0x1598   : > { %v16503_v26 = vpack.c.bf16 %v6513_v54, %v6513_v54 }
0x159c   : > { %v16442_v50 = vpop.eup %13908 }
0x159d   : > { %v6988_v2 = vsel %vm2026_vm12, %v16442_v50, 0.0  ;;  %v16457_v58 = vpop.eup %13910 }
0x159e   : > { %6989 = vadd.xlane.f32.xlu0 %v6988_v2  ;;  %v6985_v30 = vsel %vm2026_vm12, %v16457_v58, 0.0 }
0x15a3   : > { %7387 = vrot.lane.b32.xlu1 %v16267_v61, %s14461_s25 }
0x15b4   : > { %7439 = vrot.lane.b32.xlu0 %v16274_v16, %s14461_s25 }
0x15b8   : > { %7491 = vrot.lane.b32.xlu0 %v16279_v6, %s14461_s25 }
0x15bc   : > { %7488 = vrot.lane.b32.xlu0 %v16298_v28, %s14461_s25 }
0x15c0   : > { %7595 = vrot.lane.b32.xlu0 %v16321_v7, %s14461_s25 }
0x15c4   : > { %7592 = vrot.lane.b32.xlu0 %v16335_v60, %s14461_s25 }
0x15c7   : > { %6986 = vadd.xlane.f32.xlu1 %v6985_v30 }
0x15c8   : > { %7699 = vrot.lane.b32.xlu0 %v16337_v45, %s14461_s25 }
0x15cc   : > { %7696 = vrot.lane.b32.xlu0 %v16369_v18, %s14461_s25 }
0x15d0   : > { %7945 = vrot.lane.b32.xlu0 %v16373_v43, %s14461_s25 }
0x15d8   : > { %7384 = vrot.lane.b32.xlu1 %v16277_v52, %s14461_s25 }
0x15dc   : > { %7436 = vrot.lane.b32.xlu1 %v16296_v33, %s14461_s25 }
0x15de   : > { %v6969_v1 = vpop.xlane.xlu1 %6968 }
0x15df   : > { %13912 = vrcp.f32 %v6969_v1  ;;  %v6516_v1 = vadd.f32 %v16399_v5, %v16342_v0 }
0x15e0   : > { %7543 = vrot.lane.b32.xlu1 %v16294_v17, %s14461_s25 }
0x15e1   : > { %v16521_v5 = vpack.c.bf16 %v6516_v1, %v6516_v1 }
0x15e4   : > { %7540 = vrot.lane.b32.xlu1 %v16312_v51, %s14461_s25 }
0x15e6   : > { %v6972_v39 = vpop.xlane.xlu0 %6971 }
0x15e7   : > { %13914 = vrcp.f32 %v6972_v39  ;;  %v6975_v34 = vpop.xlane.xlu1 %6974  ;;  %v7157_v39 = vsel %vm2126_vm11, %v16500_v38, 0 }
0x15e8   : > { %13916 = vrcp.f32 %v6975_v34  ;;  %7647 = vrot.lane.b32.xlu1 %v16327_v23, %s14461_s25 }
0x15ec   : > { %v13913_v9 = vpop.eup %13912  ;;  %7644 = vrot.lane.b32.xlu1 %v16356_v25, %s14461_s25 }
0x15ed   : > { %v6999_v49 = vmul.f32 %v13913_v9, %v16418_v41  ;;  %v7249_v9 = vsel %vm2126_vm11, %v16521_v5, 0 }
0x15ee   : > { %v6978_v15 = vpop.xlane.xlu0 %6977 }
0x15ef   : > { %v7007_v11 = vpack.c.bf16 %v6999_v49, %v6999_v49  ;;  %13918 = vrcp.f32 %v6978_v15  ;;  %v6521_v15 = vadd.f32 %v16391_v12, %v16342_v0 }
0x15f0   : > { %7751 = vrot.lane.b32.xlu1 %v16354_v29, %s14461_s25 }
0x15f1   : > { %12877 = vmatmul.mubr.msk.bf16.vlgmr.msra.gmra.mxu0 %vm2026_vm12, %v7007_v11 }
0x15f2   : > { %12887 = vmatpush3.bf16.msra.mxu0 %v7111_v20  ;;  %12888 = vmatprep.mubr.msk.bf16.mxu0 %vm14460_vm9, %v17622_v62  ;;  %v16537_v20 = vpack.c.bf16 %v6521_v15, %v6521_v15 }
0x15f3   : > { %12898 = vmatprep.subr.bf16.mxu0 %v17622_v62 }
0x15f4   : > { %v13915_v41 = vpop.eup %13914  ;;  %7748 = vrot.lane.b32.xlu1 %v16381_v44, %s14461_s25 }
0x15f5   : > { %v13917_v2 = vpop.eup %13916  ;;  %v7000_v32 = vmul.f32 %v13915_v41, %v16422_v24  ;;  %v7203_v24 = vsel %vm2126_vm11, %v16503_v26, 0  ;;  %v6524_v41 = vadd.f32 %v16396_v37, %v16342_v0 }
0x15f6   : > { %v7001_v35 = vmul.f32 %v13917_v2, %v16424_v56 }
0x15f7   : > { %v7008_v42 = vpack.c.bf16 %v7000_v32, %v7000_v32 }
0x15f8   : > { %v7009_v30 = vpack.c.bf16 %v7001_v35, %v7001_v35  ;;  %7896 = vrot.lane.b32.xlu1 %v16362_v19, %s14461_s25  ;;  %v7295_v35 = vsel %vm2126_vm11, %v16537_v20, 0 }
0x15f9   : > { %12883 = vmatmul.mubr.msk.bf16.vlgmr.msra.gmra.mxu1 %vm2026_vm12, %v7008_v42  ;;  %v16545_v42 = vpack.c.bf16 %v6524_v41, %v6524_v41 }
0x15fa   : > { %12889 = vmatmul.mubr.msk.bf16.vlgmr.msra.gmra.mxu0 %vm2026_vm12, %v7009_v30  ;;  %12893 = vmatpush3.bf16.msra.mxu1 %v7157_v39 }
0x15fb   : > { %12899 = vmatpush3.bf16.msra.mxu0 %v7203_v24  ;;  %12894 = vmatprep.mubr.msk.bf16.mxu1 %vm14460_vm9, %v17622_v62  ;;  %v7341_v0 = vsel %vm2126_vm11, %v16545_v42, 0 }
0x15fc   : > { %v13919_v56 = vpop.eup %13918  ;;  %7994 = vrot.lane.b32.xlu1 %v16483_v47, %s14461_s25  ;;  %12904 = vmatprep.subr.bf16.mxu1 %v17622_v62 }
0x15fd   : > { %v7002_v34 = vmul.f32 %v13919_v56, %v16430_v22  ;;  %12900 = vmatprep.mubr.msk.bf16.mxu0 %vm14460_vm9, %v17622_v62  ;;  %12910 = vmatprep.subr.bf16.mxu0 %v17622_v62 }
0x15ff   : > { %v7010_v27 = vpack.c.bf16 %v7002_v34, %v7002_v34 }
0x1600   : > { %8043 = vrot.lane.b32.xlu1 %v16500_v38, %s14461_s25 }
0x1601   : > { %12895 = vmatmul.mubr.msk.bf16.vlgmr.msra.gmra.mxu1 %vm2026_vm12, %v7010_v27 }
0x1602   : > { %12905 = vmatpush3.bf16.msra.mxu1 %v7249_v9  ;;  %12906 = vmatprep.mubr.msk.bf16.mxu1 %vm14460_vm9, %v17622_v62 }
0x1603   : > { %12916 = vmatprep.subr.bf16.mxu1 %v17622_v62 }
0x161b   : > { %v6981_v22 = vpop.xlane.xlu1 %6980 }
0x161c   : > { %13920 = vrcp.f32 %v6981_v22 }
0x161f   : > { %v6984_v49 = vpop.xlane.xlu0 %6983  ;;  %v7388_v24 = vpop.permute.xlu1 %7387 }
0x1620   : > { %13922 = vrcp.f32 %v6984_v49 }
0x1627   : > { %v6990_v11 = vpop.xlane.xlu0 %6989 }
0x1628   : > { %13924 = vrcp.f32 %v6990_v11 }
0x1629   : > { %v13921_v55 = vpop.eup %13920 }
0x162a   : > { %v7003_v54 = vmul.f32 %v13921_v55, %v16434_v59 }
0x162b   : > { %v7440_v30 = vpop.permute.xlu0 %7439 }
0x162c   : > { %v7011_v2 = vpack.c.bf16 %v7003_v54, %v7003_v54  ;;  %v7445_v39 = vsel %vm1657_vm10, %v7440_v30, 0 }
0x162d   : > { %v13923_v32 = vpop.eup %13922 }
0x162e   : > { %12901 = vmatmul.mubr.msk.bf16.vlgmr.msra.gmra.mxu0 %vm2026_vm12, %v7011_v2  ;;  %v7004_v12 = vmul.f32 %v13923_v32, %v16438_v57  ;;  %v7393_v32 = vsel %vm1657_vm10, %v7388_v24, 0 }
0x162f   : > { %12911 = vmatpush3.bf16.msra.mxu0 %v7295_v35  ;;  %12912 = vmatprep.mubr.msk.bf16.mxu0 %vm14460_vm9, %v17622_v62  ;;  %v7492_v56 = vpop.permute.xlu0 %7491 }
0x1630   : > { %12922 = vmatprep.subr.bf16.mxu0 %v17622_v62  ;;  %v7012_v59 = vpack.c.bf16 %v7004_v12, %v7004_v12 }
0x1632   : > { %12907 = vmatmul.mubr.msk.bf16.vlgmr.msra.gmra.mxu1 %vm2026_vm12, %v7012_v59 }
0x1633   : > { %12917 = vmatpush3.bf16.msra.mxu1 %v7341_v0  ;;  %12918 = vmatprep.mubr.msk.bf16.mxu1 %vm14460_vm9, %v17622_v62  ;;  %v7489_v27 = vpop.permute.xlu0 %7488  ;;  %v7497_v0 = vsel %vm1657_vm10, %v7492_v56, 0 }
0x1634   : > { %12928 = vmatprep.subr.bf16.mxu1 %v17622_v62 }
0x1635   : > { %v13925_v37 = vpop.eup %13924 }
0x1636   : > { %v7006_v57 = vmul.f32 %v13925_v37, %v16442_v50 }
0x1637   : > { %v7596_v50 = vpop.permute.xlu0 %7595 }
0x1638   : > { %v7014_v1 = vpack.c.bf16 %v7006_v57, %v7006_v57 }
0x163a   : > { %12919 = vmatmul.mubr.msk.bf16.vlgmr.msra.gmra.mxu1 %vm2026_vm12, %v7014_v1 }
0x163b   : > { %12929 = vmatpush3.bf16.xpose.msra.mxu1 %v7445_v39  ;;  %12930 = vmatprep.mubr.msk.bf16.mxu1 %vm14460_vm9, %v17622_v62  ;;  %v7593_v54 = vpop.permute.xlu0 %7592  ;;  %v7601_v39 = vsel %vm1657_vm10, %v7596_v50, 0 }
0x163c   : > { %12940 = vmatprep.subr.bf16.mxu1 %v17622_v62 }
0x1650   : > { %v6987_v34 = vpop.xlane.xlu1 %6986 }
0x1651   : > { %13926 = vrcp.f32 %v6987_v34 }
0x1654   : > { %v7385_v9 = vpop.permute.xlu1 %7384 }
0x1658   : > { %v7437_v22 = vpop.permute.xlu1 %7436 }
0x1659   : > { %12931 = vmatmul.mubr.msk.bf16.vlgmr.msra.gmra.mxu1 %vm1657_vm10, %v7437_v22 }
0x165a   : > { %12942 = vmatprep.mubr.msk.bf16.mxu1 %vm14460_vm9, %v17622_v62 }
0x165c   : > { %v7544_v49 = vpop.permute.xlu1 %7543 }
0x165d   : > { %v7549_v15 = vsel %vm1657_vm10, %v7544_v49, 0 }
0x165e   : > { %v13927_v11 = vpop.eup %13926  ;;  %12941 = vmatpush3.bf16.xpose.msra.mxu1 %v7549_v15 }
0x165f   : > { %v7005_v55 = vmul.f32 %v13927_v11, %v16457_v58  ;;  %12952 = vmatprep.subr.bf16.mxu1 %v17622_v62  ;;  %v7700_v58 = vpop.permute.xlu0 %7699 }
0x1660   : > { %v7541_v41 = vpop.permute.xlu1 %7540  ;;  %v7705_v34 = vsel %vm1657_vm10, %v7700_v58, 0 }
0x1661   : > { %v7013_v2 = vpack.c.bf16 %v7005_v55, %v7005_v55 }
0x1663   : > { %12913 = vmatmul.mubr.msk.bf16.vlgmr.msra.gmra.mxu0 %vm2026_vm12, %v7013_v2  ;;  %v7697_v37 = vpop.permute.xlu0 %7696 }
0x1664   : > { %12923 = vmatpush3.bf16.xpose.msra.mxu0 %v7393_v32  ;;  %v7648_v35 = vpop.permute.xlu1 %7647  ;;  %12924 = vmatprep.mubr.msk.bf16.mxu0 %vm14460_vm9, %v17622_v62 }
0x1665   : > { %v7653_v12 = vsel %vm1657_vm10, %v7648_v35, 0  ;;  %12943 = vmatmul.mubr.msk.bf16.vlgmr.msra.gmra.mxu1 %vm1657_vm10, %v7541_v41  ;;  %12934 = vmatprep.subr.bf16.mxu0 %v17622_v62 }
0x1666   : > { %12953 = vmatpush3.bf16.xpose.msra.mxu1 %v7653_v12  ;;  %12954 = vmatprep.mubr.msk.bf16.mxu1 %vm14460_vm9, %v17622_v62 }
0x1667   : > { %12964 = vmatprep.subr.bf16.mxu1 %v17622_v62  ;;  %v7946_v1 = vpop.permute.xlu0 %7945 }
0x1668   : > { %v7645_v59 = vpop.permute.xlu1 %7644  ;;  %v7951_v56 = vsel %vm2126_vm11, %v7946_v1, 0 }
0x166b   : > { %12925 = vmatmul.mubr.msk.bf16.vlgmr.msra.gmra.mxu0 %vm1657_vm10, %v7385_v9 }
0x166c   : > { %12935 = vmatpush3.bf16.xpose.msra.mxu0 %v7497_v0  ;;  %v7752_v57 = vpop.permute.xlu1 %7751  ;;  %12936 = vmatprep.mubr.msk.bf16.mxu0 %vm14460_vm9, %v17622_v62 }
0x166d   : > { %v7757_v30 = vsel %vm1657_vm10, %v7752_v57, 0  ;;  %12955 = vmatmul.mubr.msk.bf16.vlgmr.msra.gmra.mxu1 %vm1657_vm10, %v7645_v59  ;;  %12946 = vmatprep.subr.bf16.mxu0 %v17622_v62 }
0x166e   : > { %12965 = vmatpush3.bf16.xpose.msra.mxu1 %v7757_v30  ;;  %12966 = vmatprep.mubr.msk.bf16.mxu1 %vm14460_vm9, %v17622_v62 }
0x166f   : > { %12976 = vmatprep.subr.bf16.mxu1 %v17622_v62 }
0x1670   : > { %v7749_v24 = vpop.permute.xlu1 %7748 }
0x1673   : > { %12937 = vmatmul.mubr.msk.bf16.vlgmr.msra.gmra.mxu0 %vm1657_vm10, %v7489_v27 }
0x1674   : > { %12947 = vmatpush3.bf16.xpose.msra.mxu0 %v7601_v39  ;;  %12948 = vmatprep.mubr.msk.bf16.mxu0 %vm14460_vm9, %v17622_v62  ;;  %v7897_v27 = vpop.permute.xlu1 %7896 }
0x1675   : > { %12967 = vmatmul.mubr.msk.bf16.vlgmr.msra.gmra.mxu1 %vm1657_vm10, %v7749_v24  ;;  %12958 = vmatprep.subr.bf16.mxu0 %v17622_v62  ;;  %v7902_v9 = vsel %vm2126_vm11, %v7897_v27, 0 }
0x1676   : > { %12977 = vmatpush3.bf16.msra.mxu1 %v7951_v56  ;;  %12978 = vmatprep.mubr.msk.bf16.mxu1 %vm14460_vm9, %v17622_v62 }
0x1677   : > { %12988 = vmatprep.subr.bf16.mxu1 %v17622_v62 }
0x167b   : > { %12949 = vmatmul.mubr.msk.bf16.vlgmr.msra.gmra.mxu0 %vm1657_vm10, %v7593_v54 }
0x167c   : > { %12959 = vmatpush3.bf16.xpose.msra.mxu0 %v7705_v34  ;;  %12960 = vmatprep.mubr.msk.bf16.mxu0 %vm14460_vm9, %v17622_v62 }
0x167d   : > { %12970 = vmatprep.subr.bf16.mxu0 %v17622_v62 }
0x1683   : > { %12961 = vmatmul.mubr.msk.bf16.vlgmr.msra.gmra.mxu0 %vm1657_vm10, %v7697_v37 }
0x1684   : > { %12971 = vmatpush3.bf16.msra.mxu0 %v7902_v9  ;;  %12972 = vmatprep.mubr.msk.bf16.mxu0 %vm14460_vm9, %v17622_v62 }
0x1685   : > { %12982 = vmatprep.subr.bf16.mxu0 %v17622_v62 }
0x16b1   : > { %v16609_v22 = vpop.f32.mrf.mxu0 }
0x16b2   : > { %17670 = vst [vmem:[#allocation44_spill] sm:$0xff] %v16609_v22 }
0x16b3   : > { %v12878_v50 = vpop.f32.mrf.mxu0 }
0x16b5   : > { %v7058_v49 = vpop.f32.mrf.mxu0 }
0x16b7   : > { %v12879_v15 = vpop.f32.mrf.mxu0 }
0x16b9   : > { %v16611_v11 = vpop.f32.mrf.mxu1 }
0x16ba   : > { %17671 = vst [vmem:[#allocation46_spill] sm:$0xff] %v16611_v11  ;;  %v16613_v55 = vpop.f32.mrf.mxu0 }
0x16bb   : > { %17672 = vst [vmem:[#allocation47_spill] sm:$0xff] %v16613_v55  ;;  %v12884_v54 = vpop.f32.mrf.mxu1 }
0x16bc   : > { %v12890_v41 = vpop.f32.mrf.mxu0 }
0x16bd   : > { %v7104_v2 = vpop.f32.mrf.mxu1 }
0x16be   : > { %v7150_v32 = vpop.f32.mrf.mxu0 }
0x16bf   : > { %v12885_v35 = vpop.f32.mrf.mxu1 }
0x16c0   : > { %v12891_v12 = vpop.f32.mrf.mxu0 }
0x16c1   : > { %v16615_v58 = vpop.f32.mrf.mxu1 }
0x16c2   : > { %17673 = vst [vmem:[#allocation29_spill] sm:$0xff] %v16615_v58 }
0x16c3   : > { %v12896_v59 = vpop.f32.mrf.mxu1 }
0x16c5   : > { %v7196_v0 = vpop.f32.mrf.mxu1 }
0x16c7   : > { %v12897_v37 = vpop.f32.mrf.mxu1 }
0x16ee   : > { %v16617_v57 = vpop.f32.mrf.mxu0 }
0x16ef   : > { %17674 = vst [vmem:[#allocation31_spill] sm:$0xff] %v16617_v57 }
0x16f0   : > { %v12902_v30 = vpop.f32.mrf.mxu0 }
0x16f2   : > { %v7242_v1 = vpop.f32.mrf.mxu0  ;;  %v16619_v39 = vpop.f32.mrf.mxu1 }
0x16f3   : > { %17675 = vst [vmem:[#allocation30_spill] sm:$0xff] %v16619_v39 }
0x16f4   : > { %v12903_v24 = vpop.f32.mrf.mxu0  ;;  %v12908_v56 = vpop.f32.mrf.mxu1 }
0x16f6   : > { %v7288_v34 = vpop.f32.mrf.mxu1 }
0x16f8   : > { %v12909_v27 = vpop.f32.mrf.mxu1 }
0x16fa   : > { %v16621_v9 = vpop.f32.mrf.mxu1 }
0x16fb   : > { %17676 = vst [vmem:[#allocation32_spill] sm:$0xff] %v16621_v9 }
0x16fc   : > { %v12920_v50 = vpop.f32.mrf.mxu1 }
0x16fe   : > { %v7380_v49 = vpop.f32.mrf.mxu1 }
0x1700   : > { %v12921_v15 = vpop.f32.mrf.mxu1 }
0x1719   : > { %v7481_v54 = vpop.f32.mrf.mxu1 }
0x171a   : > { %v16624_v41 = vadd.f32 %v7481_v54, %v15082_v13 }
0x171b   : > { %v12932_v2 = vpop.f32.mrf.mxu1 }
0x171c   : > { %v7802_v32 = vsel %vm2026_vm12, %v16624_v41, -inf }
0x171d   : > { %7803 = vmax.xlane.f32.xlu1 %v7802_v32  ;;  %v7484_v35 = vpop.f32.mrf.mxu1 }
0x171f   : > { %v12933_v12 = vpop.f32.mrf.mxu1 }
0x1723   : > { %v16628_v59 = vpop.f32.mrf.mxu0 }
0x1724   : > { %17677 = vst [vmem:[#allocation33_spill] sm:$0xff] %v16628_v59 }
0x1725   : > { %v12914_v0 = vpop.f32.mrf.mxu0  ;;  %v7585_v37 = vpop.f32.mrf.mxu1 }
0x1727   : > { %v7334_v30 = vpop.f32.mrf.mxu0  ;;  %v12944_v1 = vpop.f32.mrf.mxu1 }
0x1729   : > { %v12915_v24 = vpop.f32.mrf.mxu0  ;;  %v7588_v56 = vpop.f32.mrf.mxu1 }
0x172a   : > { %v7586_v56 = vadd.f32 %v7585_v37, %v15100_v63 }
0x172b   : > { %v7429_v34 = vpop.f32.mrf.mxu0  ;;  %v12945_v27 = vpop.f32.mrf.mxu1 }
0x172c   : > { %v7430_v50 = vadd.f32 %v7429_v34, %v15073_v31 }
0x172d   : > { %v12926_v49 = vpop.f32.mrf.mxu0  ;;  %v7689_v15 = vpop.f32.mrf.mxu1 }
0x172e   : > { %v7799_v54 = vsel %vm2026_vm12, %v7430_v50, -inf }
0x172f   : > { %v12956_v2 = vpop.f32.mrf.mxu1  ;;  %7800 = vmax.xlane.f32.xlu0 %v7799_v54  ;;  %v7432_v32 = vpop.f32.mrf.mxu0  ;;  %v7690_v54 = vadd.f32 %v7689_v15, %v15113_v14 }
0x1730   : > { %v7808_v2 = vsel %vm2026_vm12, %v7586_v56, -inf }
0x1731   : > { %v12927_v35 = vpop.f32.mrf.mxu0  ;;  %v7692_v12 = vpop.f32.mrf.mxu1  ;;  %v7814_v37 = vsel %vm2026_vm12, %v7690_v54, -inf }
0x1733   : > { %v7533_v21 = vpop.f32.mrf.mxu0  ;;  %v12957_v0 = vpop.f32.mrf.mxu1 }
0x1734   : > { %v7534_v30 = vadd.f32 %v7533_v21, %v15091_v36 }
0x1735   : > { %v12938_v1 = vpop.f32.mrf.mxu0  ;;  %v7793_v24 = vpop.f32.mrf.mxu1 }
0x1736   : > { %v7805_v27 = vsel %vm2026_vm12, %v7534_v30, -inf  ;;  %v16639_v0 = vadd.f32 %v7793_v24, %v15125_v4 }
0x1737   : > { %v12968_v34 = vpop.f32.mrf.mxu1  ;;  %7806 = vmax.xlane.f32.xlu0 %v7805_v27  ;;  %v7536_v49 = vpop.f32.mrf.mxu0 }
0x1738   : > { %v7820_v15 = vsel %vm2026_vm12, %v16639_v0, -inf }
0x1739   : > { %v12939_v10 = vpop.f32.mrf.mxu0  ;;  %v7796_v8 = vpop.f32.mrf.mxu1 }
0x173b   : > { %v12969_v32 = vpop.f32.mrf.mxu1  ;;  %7809 = vmax.xlane.f32.xlu0 %v7808_v2  ;;  %v7637_v35 = vpop.f32.mrf.mxu0 }
0x173c   : > { %v7638_v21 = vadd.f32 %v7637_v35, %v15107_v40  ;;  %v16651_v35 = vpop.permute.xlu1 %7994 }
0x173d   : > { %v12950_v12 = vpop.f32.mrf.mxu0 }
0x173e   : > { %v7811_v1 = vsel %vm2026_vm12, %v7638_v21, -inf }
0x173f   : > { %7815 = vmax.xlane.f32.xlu0 %v7814_v37  ;;  %7812 = vmax.xlane.f32.xlu1 %v7811_v1  ;;  %v7640_v8 = vpop.f32.mrf.mxu0 }
0x1740   : > { %v16653_v12 = vpop.permute.xlu1 %8043 }
0x1741   : > { %v12951_v10 = vpop.f32.mrf.mxu0 }
0x1743   : > { %7821 = vmax.xlane.f32.xlu0 %v7820_v15  ;;  %v7741_v27 = vpop.f32.mrf.mxu0 }
0x1744   : > { %v7742_v34 = vadd.f32 %v7741_v27, %v15118_v3 }
0x1745   : > { %v12962_v49 = vpop.f32.mrf.mxu0 }
0x1746   : > { %v7817_v2 = vsel %vm2026_vm12, %v7742_v34, -inf }
0x1747   : > { %7818 = vmax.xlane.f32.xlu1 %v7817_v2  ;;  %v7744_v24 = vpop.f32.mrf.mxu0 }
0x1749   : > { %v12963_v32 = vpop.f32.mrf.mxu0 }
0x1758   : > { %8141 = vrot.lane.b32.xlu1 %v16521_v5, %s14461_s25 }
0x1759   : > { %8092 = vrot.lane.b32.xlu0 %v16503_v26, %s14461_s25 }
0x17a6   : > { %v7804_v37 = vpop.xlane.xlu1 %7803 }
0x17a7   : > { %v7824_v1 = vsub.f32 %v16624_v41, %v7804_v37 }
0x17a9   : > { %v7833_v8 = vmul.f32 1.442695, %v7824_v1 }
0x17ab   : > { %13928 = vpow2.f32 %v7833_v8 }
0x17b8   : > { %v16656_v10 = vpop.eup %13928  ;;  %v7801_v15 = vpop.xlane.xlu0 %7800 }
0x17b9   : > { %v7823_v27 = vsub.f32 %v7430_v50, %v7801_v15  ;;  %v7850_v49 = vsel %vm2026_vm12, %v16656_v10, 0.0 }
0x17ba   : > { %7851 = vadd.xlane.f32.xlu0 %v7850_v49 }
0x17bb   : > { %v7831_v2 = vmul.f32 1.442695, %v7823_v27 }
0x17bd   : > { %13930 = vpow2.f32 %v7831_v2 }
0x17c0   : > { %v7807_v24 = vpop.xlane.xlu0 %7806 }
0x17c1   : > { %v7825_v32 = vsub.f32 %v7534_v30, %v7807_v24 }
0x17c3   : > { %v7835_v48 = vmul.f32 1.442695, %v7825_v32 }
0x17c4   : > { %v7810_v53 = vpop.xlane.xlu0 %7809 }
0x17c5   : > { %13932 = vpow2.f32 %v7835_v48  ;;  %v7826_v59 = vsub.f32 %v7586_v56, %v7810_v53 }
0x17c7   : > { %v7837_v9 = vmul.f32 1.442695, %v7826_v59 }
0x17c8   : > { %v7816_v41 = vpop.xlane.xlu0 %7815  ;;  %v7813_v37 = vpop.xlane.xlu1 %7812 }
0x17c9   : > { %13934 = vpow2.f32 %v7837_v9  ;;  %v7828_v1 = vsub.f32 %v7690_v54, %v7816_v41  ;;  %v7827_v8 = vsub.f32 %v7638_v21, %v7813_v37 }
0x17ca   : > { %v16660_v57 = vpop.eup %13930 }
0x17cb   : > { %v7841_v50 = vmul.f32 1.442695, %v7828_v1  ;;  %v7839_v15 = vmul.f32 1.442695, %v7827_v8  ;;  %v7847_v27 = vsel %vm2026_vm12, %v16660_v57, 0.0 }
0x17cc   : > { %7848 = vadd.xlane.f32.xlu1 %v7847_v27  ;;  %v7822_v49 = vpop.xlane.xlu0 %7821 }
0x17cd   : > { %13936 = vpow2.f32 %v7841_v50  ;;  %v7830_v24 = vsub.f32 %v16639_v0, %v7822_v49  ;;  %v8049_v49 = vsel %vm2126_vm11, %v16653_v12, 0 }
0x17ce   : > { %13938 = vpow2.f32 %v7839_v15 }
0x17cf   : > { %v7845_v41 = vmul.f32 1.442695, %v7830_v24 }
0x17d0   : > { %v7819_v2 = vpop.xlane.xlu1 %7818  ;;  %v8093_v0 = vpop.permute.xlu0 %8092 }
0x17d1   : > { %v7829_v32 = vsub.f32 %v7742_v34, %v7819_v2  ;;  %13940 = vpow2.f32 %v7845_v41 }
0x17d2   : > { %v16664_v30 = vpop.eup %13932 }
0x17d3   : > { %v7853_v53 = vsel %vm2026_vm12, %v16664_v30, 0.0  ;;  %v7843_v37 = vmul.f32 1.442695, %v7829_v32 }
0x17d4   : > { %7854 = vadd.xlane.f32.xlu1 %v7853_v53  ;;  %v8142_v53 = vpop.permute.xlu1 %8141 }
0x17d5   : > { %13942 = vpow2.f32 %v7843_v37 }
0x17d6   : > { %v16668_v48 = vpop.eup %13934 }
0x17d7   : > { %v7856_v9 = vsel %vm2026_vm12, %v16668_v48, 0.0 }
0x17d8   : > { %7857 = vadd.xlane.f32.xlu0 %v7856_v9 }
0x17da   : > { %v16672_v59 = vpop.eup %13936 }
0x17db   : > { %v16674_v56 = vpop.eup %13938  ;;  %v7862_v54 = vsel %vm2026_vm12, %v16672_v59, 0.0 }
0x17dc   : > { %7863 = vadd.xlane.f32.xlu0 %v7862_v54  ;;  %v7859_v21 = vsel %vm2026_vm12, %v16674_v56, 0.0 }
0x17dd   : > { %7860 = vadd.xlane.f32.xlu1 %v7859_v21 }
0x17de   : > { %v16685_v1 = vpop.eup %13940 }
0x17df   : > { %v7868_v50 = vsel %vm2026_vm12, %v16685_v1, 0.0 }
0x17e2   : > { %v16687_v8 = vpop.eup %13942 }
0x17e3   : > { %v7865_v15 = vsel %vm2026_vm12, %v16687_v8, 0.0 }
0x17ee   : > { %8239 = vrot.lane.b32.xlu1 %v16545_v42, %s14461_s25 }
0x17f2   : > { %8190 = vrot.lane.b32.xlu0 %v16537_v20, %s14461_s25 }
0x1811   : > { %7869 = vadd.xlane.f32.xlu0 %v7868_v50  ;;  %v8000_v50 = vsel %vm2126_vm11, %v16651_v35, 0 }
0x1812   : > { %7866 = vadd.xlane.f32.xlu1 %v7865_v15 }
0x1823   : > { %8339 = vrot.lane.b32.xlu1 %v16274_v16, %s14462_s7 }
0x1827   : > { %8337 = vrot.lane.b32.xlu1 %v16296_v33, %s14462_s7  ;;  %8289 = vrot.lane.b32.xlu0 %v16267_v61, %s14462_s7 }
0x182b   : > { %8439 = vrot.lane.b32.xlu1 %v16294_v17, %s14462_s7  ;;  %8287 = vrot.lane.b32.xlu0 %v16277_v52, %s14462_s7 }
0x182f   : > { %8437 = vrot.lane.b32.xlu1 %v16312_v51, %s14462_s7  ;;  %8389 = vrot.lane.b32.xlu0 %v16279_v6, %s14462_s7 }
0x1833   : > { %8539 = vrot.lane.b32.xlu1 %v16327_v23, %s14462_s7  ;;  %8387 = vrot.lane.b32.xlu0 %v16298_v28, %s14462_s7 }
0x1837   : > { %8537 = vrot.lane.b32.xlu1 %v16356_v25, %s14462_s7  ;;  %8489 = vrot.lane.b32.xlu0 %v16321_v7, %s14462_s7 }
0x183b   : > { %8639 = vrot.lane.b32.xlu1 %v16354_v29, %s14462_s7  ;;  %8487 = vrot.lane.b32.xlu0 %v16335_v60, %s14462_s7 }
0x183f   : > { %8637 = vrot.lane.b32.xlu1 %v16381_v44, %s14462_s7  ;;  %8589 = vrot.lane.b32.xlu0 %v16337_v45, %s14462_s7 }
0x1843   : > { %8783 = vrot.lane.b32.xlu1 %v16362_v19, %s14462_s7  ;;  %8587 = vrot.lane.b32.xlu0 %v16369_v18, %s14462_s7  ;;  %v7852_v34 = vpop.xlane.xlu0 %7851 }
0x1844   : > { %13944 = vrcp.f32 %v7852_v34 }
0x1847   : > { %8879 = vrot.lane.b32.xlu1 %v16483_v47, %s14462_s7  ;;  %8831 = vrot.lane.b32.xlu0 %v16373_v43, %s14462_s7 }
0x184b   : > { %8927 = vrot.lane.b32.xlu1 %v16500_v38, %s14462_s7 }
0x1851   : > { %v13945_v27 = vpop.eup %13944 }
0x1852   : > { %v7880_v9 = vmul.f32 %v13945_v27, %v16656_v10 }
0x1854   : > { %v7888_v54 = vpack.c.bf16 %v7880_v9, %v7880_v9  ;;  %v8098_v9 = vsel %vm2126_vm11, %v8093_v0, 0 }
0x1855   : > { %v7849_v21 = vpop.xlane.xlu1 %7848 }
0x1856   : > { %13946 = vrcp.f32 %v7849_v21  ;;  %12979 = vmatmul.mubr.msk.bf16.vlgmr.msra.gmra.mxu1 %vm2026_vm12, %v7888_v54 }
0x1857   : > { %12989 = vmatpush3.bf16.msra.mxu1 %v8049_v49  ;;  %12990 = vmatprep.mubr.msk.bf16.mxu1 %vm14460_vm9, %v17622_v62 }
0x1858   : > { %13000 = vmatprep.subr.bf16.mxu1 %v17622_v62 }
0x185d   : > { %v7855_v2 = vpop.xlane.xlu1 %7854 }
0x185e   : > { %13948 = vrcp.f32 %v7855_v2  ;;  %v8147_v2 = vsel %vm2126_vm11, %v8142_v53, 0 }
0x1861   : > { %v7858_v24 = vpop.xlane.xlu0 %7857 }
0x1862   : > { %13950 = vrcp.f32 %v7858_v24 }
0x1863   : > { %v13947_v32 = vpop.eup %13946 }
0x1864   : > { %v7879_v10 = vmul.f32 %v13947_v32, %v16660_v57 }
0x1865   : > { %v7864_v41 = vpop.xlane.xlu0 %7863 }
0x1866   : > { %v7887_v37 = vpack.c.bf16 %v7879_v10, %v7879_v10  ;;  %13952 = vrcp.f32 %v7864_v41  ;;  %v7861_v12 = vpop.xlane.xlu1 %7860 }
0x1867   : > { %13954 = vrcp.f32 %v7861_v12 }
0x1868   : > { %12973 = vmatmul.mubr.msk.bf16.vlgmr.msra.gmra.mxu0 %vm2026_vm12, %v7887_v37 }
0x1869   : > { %12983 = vmatpush3.bf16.msra.mxu0 %v8000_v50  ;;  %12984 = vmatprep.mubr.msk.bf16.mxu0 %vm14460_vm9, %v17622_v62  ;;  %v8191_v0 = vpop.permute.xlu0 %8190 }
0x186a   : > { %12994 = vmatprep.subr.bf16.mxu0 %v17622_v62  ;;  %v8196_v32 = vsel %vm2126_vm11, %v8191_v0, 0  ;;  %v8240_v10 = vpop.permute.xlu1 %8239 }
0x186b   : > { %v13949_v15 = vpop.eup %13948 }
0x186c   : > { %v7881_v34 = vmul.f32 %v13949_v15, %v16664_v30 }
0x186e   : > { %v7889_v57 = vpack.c.bf16 %v7881_v34, %v7881_v34 }
0x186f   : > { %v13951_v27 = vpop.eup %13950 }
0x1870   : > { %v7882_v54 = vmul.f32 %v13951_v27, %v16668_v48  ;;  %12985 = vmatmul.mubr.msk.bf16.vlgmr.msra.gmra.mxu0 %vm2026_vm12, %v7889_v57 }
0x1871   : > { %12995 = vmatpush3.bf16.msra.mxu0 %v8098_v9  ;;  %12996 = vmatprep.mubr.msk.bf16.mxu0 %vm14460_vm9, %v17622_v62 }
0x1872   : > { %v7890_v35 = vpack.c.bf16 %v7882_v54, %v7882_v54  ;;  %13006 = vmatprep.subr.bf16.mxu0 %v17622_v62 }
0x1873   : > { %v13953_v21 = vpop.eup %13952 }
0x1874   : > { %v13955_v49 = vpop.eup %13954  ;;  %12991 = vmatmul.mubr.msk.bf16.vlgmr.msra.gmra.mxu1 %vm2026_vm12, %v7890_v35  ;;  %v7884_v48 = vmul.f32 %v13953_v21, %v16672_v59 }
0x1875   : > { %v7883_v30 = vmul.f32 %v13955_v49, %v16674_v56  ;;  %13001 = vmatpush3.bf16.msra.mxu1 %v8147_v2  ;;  %13002 = vmatprep.mubr.msk.bf16.mxu1 %vm14460_vm9, %v17622_v62  ;;  %v8245_v56 = vsel %vm2126_vm11, %v8240_v10, 0 }
0x1876   : > { %13012 = vmatprep.subr.bf16.mxu1 %v17622_v62  ;;  %v7892_v53 = vpack.c.bf16 %v7884_v48, %v7884_v48 }
0x1877   : > { %v7891_v24 = vpack.c.bf16 %v7883_v30, %v7883_v30 }
0x1879   : > { %12997 = vmatmul.mubr.msk.bf16.vlgmr.msra.gmra.mxu0 %vm2026_vm12, %v7891_v24 }
0x187a   : > { %13007 = vmatpush3.bf16.msra.mxu0 %v8196_v32  ;;  %13008 = vmatprep.mubr.msk.bf16.mxu0 %vm14460_vm9, %v17622_v62 }
0x187b   : > { %13018 = vmatprep.subr.bf16.mxu0 %v17622_v62 }
0x187c   : > { %13003 = vmatmul.mubr.msk.bf16.vlgmr.msra.gmra.mxu1 %vm2026_vm12, %v7892_v53 }
0x187d   : > { %13013 = vmatpush3.bf16.msra.mxu1 %v8245_v56  ;;  %13014 = vmatprep.mubr.msk.bf16.mxu1 %vm14460_vm9, %v17622_v62 }
0x187e   : > { %13024 = vmatprep.subr.bf16.mxu1 %v17622_v62 }
0x189a   : > { %v7870_v59 = vpop.xlane.xlu0 %7869 }
0x189b   : > { %13956 = vrcp.f32 %v7870_v59  ;;  %v7867_v41 = vpop.xlane.xlu1 %7866 }
0x189c   : > { %13958 = vrcp.f32 %v7867_v41 }
0x189e   : > { %v8290_v37 = vpop.permute.xlu0 %8289 }
0x189f   : > { %v8340_v12 = vpop.permute.xlu1 %8339  ;;  %v8295_v0 = vsel %vm1657_vm10, %v8290_v37, 0 }
0x18a0   : > { %v8345_v30 = vsel %vm1657_vm10, %v8340_v12, 0 }
0x18a2   : > { %v8288_v50 = vpop.permute.xlu0 %8287 }
0x18a3   : > { %v8338_v15 = vpop.permute.xlu1 %8337 }
0x18a6   : > { %v8390_v34 = vpop.permute.xlu0 %8389 }
0x18a7   : > { %v8440_v57 = vpop.permute.xlu1 %8439  ;;  %v8395_v32 = vsel %vm1657_vm10, %v8390_v34, 0 }
0x18a8   : > { %v13957_v27 = vpop.eup %13956  ;;  %v8445_v24 = vsel %vm1657_vm10, %v8440_v57, 0 }
0x18a9   : > { %v13959_v9 = vpop.eup %13958  ;;  %v7886_v54 = vmul.f32 %v13957_v27, %v16685_v1 }
0x18aa   : > { %v7885_v35 = vmul.f32 %v13959_v9, %v16687_v8  ;;  %v8388_v2 = vpop.permute.xlu0 %8387 }
0x18ab   : > { %v7894_v21 = vpack.c.bf16 %v7886_v54, %v7886_v54  ;;  %v8438_v48 = vpop.permute.xlu1 %8437 }
0x18ac   : > { %v7893_v49 = vpack.c.bf16 %v7885_v35, %v7885_v35 }
0x18ad   : > { %13015 = vmatmul.mubr.msk.bf16.vlgmr.msra.gmra.mxu1 %vm2026_vm12, %v7894_v21 }
0x18ae   : > { %13009 = vmatmul.mubr.msk.bf16.vlgmr.msra.gmra.mxu0 %vm2026_vm12, %v7893_v49  ;;  %13025 = vmatpush3.bf16.xpose.msra.mxu1 %v8345_v30  ;;  %v8490_v1 = vpop.permute.xlu0 %8489 }
0x18af   : > { %13019 = vmatpush3.bf16.xpose.msra.mxu0 %v8295_v0  ;;  %13020 = vmatprep.mubr.msk.bf16.mxu0 %vm14460_vm9, %v17622_v62  ;;  %v8540_v8 = vpop.permute.xlu1 %8539  ;;  %v8495_v59 = vsel %vm1657_vm10, %v8490_v1, 0 }
0x18b0   : > { %13026 = vmatprep.mubr.msk.bf16.mxu1 %vm14460_vm9, %v17622_v62  ;;  %13030 = vmatprep.subr.bf16.mxu0 %v17622_v62  ;;  %v8545_v56 = vsel %vm1657_vm10, %v8540_v8, 0 }
0x18b1   : > { %13036 = vmatprep.subr.bf16.mxu1 %v17622_v62 }
0x18b2   : > { %v8488_v10 = vpop.permute.xlu0 %8487 }
0x18b3   : > { %v8538_v53 = vpop.permute.xlu1 %8537 }
0x18b5   : > { %13027 = vmatmul.mubr.msk.bf16.vlgmr.msra.gmra.mxu1 %vm1657_vm10, %v8338_v15 }
0x18b6   : > { %13021 = vmatmul.mubr.msk.bf16.vlgmr.msra.gmra.mxu0 %vm1657_vm10, %v8288_v50  ;;  %13037 = vmatpush3.bf16.xpose.msra.mxu1 %v8445_v24  ;;  %v8590_v41 = vpop.permute.xlu0 %8589 }
0x18b7   : > { %13031 = vmatpush3.bf16.xpose.msra.mxu0 %v8395_v32  ;;  %13032 = vmatprep.mubr.msk.bf16.mxu0 %vm14460_vm9, %v17622_v62  ;;  %v8640_v37 = vpop.permute.xlu1 %8639  ;;  %v8595_v34 = vsel %vm1657_vm10, %v8590_v41, 0 }
0x18b8   : > { %13038 = vmatprep.mubr.msk.bf16.mxu1 %vm14460_vm9, %v17622_v62  ;;  %13042 = vmatprep.subr.bf16.mxu0 %v17622_v62  ;;  %v8645_v50 = vsel %vm1657_vm10, %v8640_v37, 0 }
0x18b9   : > { %13048 = vmatprep.subr.bf16.mxu1 %v17622_v62 }
0x18ba   : > { %v8588_v12 = vpop.permute.xlu0 %8587 }
0x18bb   : > { %v8638_v15 = vpop.permute.xlu1 %8637 }
0x18bd   : > { %13039 = vmatmul.mubr.msk.bf16.vlgmr.msra.gmra.mxu1 %vm1657_vm10, %v8438_v48 }
0x18be   : > { %13033 = vmatmul.mubr.msk.bf16.vlgmr.msra.gmra.mxu0 %vm1657_vm10, %v8388_v2  ;;  %13049 = vmatpush3.bf16.xpose.msra.mxu1 %v8545_v56  ;;  %v8832_v57 = vpop.permute.xlu0 %8831 }
0x18bf   : > { %13043 = vmatpush3.bf16.xpose.msra.mxu0 %v8495_v59  ;;  %13044 = vmatprep.mubr.msk.bf16.mxu0 %vm14460_vm9, %v17622_v62  ;;  %v8784_v27 = vpop.permute.xlu1 %8783  ;;  %v8837_v9 = vsel %vm2126_vm11, %v8832_v57, 0 }
0x18c0   : > { %13050 = vmatprep.mubr.msk.bf16.mxu1 %vm14460_vm9, %v17622_v62  ;;  %13054 = vmatprep.subr.bf16.mxu0 %v17622_v62  ;;  %v8789_v54 = vsel %vm2126_vm11, %v8784_v27, 0 }
0x18c1   : > { %13060 = vmatprep.subr.bf16.mxu1 %v17622_v62 }
0x18c5   : > { %13051 = vmatmul.mubr.msk.bf16.vlgmr.msra.gmra.mxu1 %vm1657_vm10, %v8538_v53 }
0x18c6   : > { %13045 = vmatmul.mubr.msk.bf16.vlgmr.msra.gmra.mxu0 %vm1657_vm10, %v8488_v10  ;;  %13061 = vmatpush3.bf16.xpose.msra.mxu1 %v8645_v50 }
0x18c7   : > { %13055 = vmatpush3.bf16.xpose.msra.mxu0 %v8595_v34  ;;  %13056 = vmatprep.mubr.msk.bf16.mxu0 %vm14460_vm9, %v17622_v62 }
0x18c8   : > { %13062 = vmatprep.mubr.msk.bf16.mxu1 %vm14460_vm9, %v17622_v62  ;;  %13066 = vmatprep.subr.bf16.mxu0 %v17622_v62 }
0x18c9   : > { %13072 = vmatprep.subr.bf16.mxu1 %v17622_v62 }
0x18cd   : > { %13063 = vmatmul.mubr.msk.bf16.vlgmr.msra.gmra.mxu1 %vm1657_vm10, %v8638_v15 }
0x18ce   : > { %13057 = vmatmul.mubr.msk.bf16.vlgmr.msra.gmra.mxu0 %vm1657_vm10, %v8588_v12  ;;  %13073 = vmatpush3.bf16.msra.mxu1 %v8837_v9 }
0x18cf   : > { %13067 = vmatpush3.bf16.msra.mxu0 %v8789_v54  ;;  %13068 = vmatprep.mubr.msk.bf16.mxu0 %vm14460_vm9, %v17622_v62 }
0x18d0   : > { %13074 = vmatprep.mubr.msk.bf16.mxu1 %vm14460_vm9, %v17622_v62  ;;  %13078 = vmatprep.subr.bf16.mxu0 %v17622_v62 }
0x18d1   : > { %13084 = vmatprep.subr.bf16.mxu1 %v17622_v62 }
0x1916   : > { %v16823_v35 = vpop.f32.mrf.mxu1 }
0x1918   : > { %v12980_v21 = vpop.f32.mrf.mxu1 }
0x191a   : > { %v7990_v49 = vpop.f32.mrf.mxu1 }
0x191c   : > { %v12981_v2 = vpop.f32.mrf.mxu1 }
0x1928   : > { %v16825_v30 = vpop.f32.mrf.mxu0 }
0x192a   : > { %v12974_v0 = vpop.f32.mrf.mxu0 }
0x192c   : > { %v7941_v1 = vpop.f32.mrf.mxu0 }
0x192e   : > { %v12975_v8 = vpop.f32.mrf.mxu0 }
0x1930   : > { %v16829_v24 = vpop.f32.mrf.mxu0 }
0x1932   : > { %v12986_v32 = vpop.f32.mrf.mxu0 }
0x1934   : > { %v8039_v10 = vpop.f32.mrf.mxu0  ;;  %v16831_v53 = vpop.f32.mrf.mxu1 }
0x1936   : > { %v12987_v59 = vpop.f32.mrf.mxu0  ;;  %v12992_v41 = vpop.f32.mrf.mxu1 }
0x1938   : > { %v8088_v37 = vpop.f32.mrf.mxu1 }
0x1939   : > { %v16835_v12 = vpop.f32.mrf.mxu0 }
0x193a   : > { %17678 = vst [vmem:[#allocation35_spill] sm:$0xff] %v16835_v12  ;;  %v12993_v50 = vpop.f32.mrf.mxu1 }
0x193b   : > { %v12998_v15 = vpop.f32.mrf.mxu0 }
0x193c   : > { %v16837_v34 = vpop.f32.mrf.mxu1 }
0x193d   : > { %17679 = vst [vmem:[#allocation34_spill] sm:$0xff] %v16837_v34  ;;  %v8137_v57 = vpop.f32.mrf.mxu0 }
0x193e   : > { %v13004_v9 = vpop.f32.mrf.mxu1 }
0x193f   : > { %v12999_v54 = vpop.f32.mrf.mxu0 }
0x1940   : > { %v8186_v21 = vpop.f32.mrf.mxu1 }
0x1942   : > { %v13005_v49 = vpop.f32.mrf.mxu1 }
0x196d   : > { %v16841_v2 = vpop.f32.mrf.mxu1 }
0x196e   : > { %17680 = vst [vmem:[#allocation36_spill] sm:$0xff] %v16841_v2  ;;  %v16843_v0 = vpop.f32.mrf.mxu0 }
0x196f   : > { %17681 = vst [vmem:[#allocation51_spill] sm:$0xff] %v16843_v0  ;;  %v13016_v8 = vpop.f32.mrf.mxu1 }
0x1970   : > { %v13010_v32 = vpop.f32.mrf.mxu0 }
0x1971   : > { %v8284_v10 = vpop.f32.mrf.mxu1 }
0x1972   : > { %v8235_v59 = vpop.f32.mrf.mxu0 }
0x1973   : > { %v13017_v41 = vpop.f32.mrf.mxu1 }
0x1974   : > { %v13011_v37 = vpop.f32.mrf.mxu0 }
0x1975   : > { %v8381_v50 = vpop.f32.mrf.mxu1 }
0x1976   : > { %v8331_v15 = vpop.f32.mrf.mxu0  ;;  %v8382_v57 = vadd.f32 %v8381_v50, %v15082_v13 }
0x1977   : > { %v8332_v9 = vadd.f32 %v8331_v15, %v15073_v31  ;;  %v13028_v54 = vpop.f32.mrf.mxu1 }
0x1978   : > { %v13022_v21 = vpop.f32.mrf.mxu0  ;;  %v8690_v49 = vsel %vm2026_vm12, %v8382_v57, -inf }
0x1979   : > { %8691 = vmax.xlane.f32.xlu1 %v8690_v49  ;;  %v8384_v27 = vpop.f32.mrf.mxu1  ;;  %v8687_v1 = vsel %vm2026_vm12, %v8332_v9, -inf }
0x197a   : > { %8688 = vmax.xlane.f32.xlu0 %v8687_v1  ;;  %v8334_v8 = vpop.f32.mrf.mxu0 }
0x197b   : > { %v13029_v32 = vpop.f32.mrf.mxu1 }
0x197c   : > { %v13023_v10 = vpop.f32.mrf.mxu0 }
0x197d   : > { %v8481_v59 = vpop.f32.mrf.mxu1 }
0x197e   : > { %v8431_v41 = vpop.f32.mrf.mxu0  ;;  %v8482_v15 = vadd.f32 %v8481_v59, %v15100_v63 }
0x197f   : > { %v8432_v37 = vadd.f32 %v8431_v41, %v15091_v36  ;;  %v13040_v48 = vpop.f32.mrf.mxu1 }
0x1980   : > { %v13034_v50 = vpop.f32.mrf.mxu0  ;;  %v8696_v1 = vsel %vm2026_vm12, %v8482_v15, -inf }
0x1981   : > { %v8484_v54 = vpop.f32.mrf.mxu1  ;;  %v8693_v21 = vsel %vm2026_vm12, %v8432_v37, -inf }
0x1982   : > { %8694 = vmax.xlane.f32.xlu0 %v8693_v21  ;;  %v8434_v49 = vpop.f32.mrf.mxu0 }
0x1983   : > { %v13041_v27 = vpop.f32.mrf.mxu1 }
0x1984   : > { %v13035_v56 = vpop.f32.mrf.mxu0 }
0x1985   : > { %v8581_v39 = vpop.f32.mrf.mxu1 }
0x1986   : > { %v8582_v8 = vadd.f32 %v8581_v39, %v15113_v14  ;;  %8697 = vmax.xlane.f32.xlu0 %v8696_v1  ;;  %v8531_v32 = vpop.f32.mrf.mxu0 }
0x1987   : > { %v8532_v10 = vadd.f32 %v8531_v32, %v15107_v40  ;;  %v13052_v48 = vpop.f32.mrf.mxu1 }
0x1988   : > { %v13046_v41 = vpop.f32.mrf.mxu0  ;;  %v8702_v59 = vsel %vm2026_vm12, %v8582_v8, -inf }
0x1989   : > { %v8584_v50 = vpop.f32.mrf.mxu1  ;;  %v8699_v54 = vsel %vm2026_vm12, %v8532_v10, -inf }
0x198a   : > { %8703 = vmax.xlane.f32.xlu0 %v8702_v59  ;;  %8700 = vmax.xlane.f32.xlu1 %v8699_v54  ;;  %v8534_v21 = vpop.f32.mrf.mxu0 }
0x198b   : > { %v13053_v56 = vpop.f32.mrf.mxu1 }
0x198c   : > { %v13047_v49 = vpop.f32.mrf.mxu0 }
0x198d   : > { %v8681_v27 = vpop.f32.mrf.mxu1 }
0x198e   : > { %v8631_v55 = vpop.f32.mrf.mxu0  ;;  %v16860_v39 = vadd.f32 %v8681_v27, %v15125_v4 }
0x198f   : > { %v16863_v1 = vadd.f32 %v8631_v55, %v15118_v3  ;;  %v13064_v32 = vpop.f32.mrf.mxu1  ;;  %v16873_v55 = vpop.permute.xlu1 %8879 }
0x1990   : > { %v13058_v48 = vpop.f32.mrf.mxu0  ;;  %v8708_v41 = vsel %vm2026_vm12, %v16860_v39, -inf }
0x1991   : > { %v8684_v50 = vpop.f32.mrf.mxu1  ;;  %8709 = vmax.xlane.f32.xlu0 %v8708_v41  ;;  %v8705_v59 = vsel %vm2026_vm12, %v16863_v1, -inf }
0x1992   : > { %8706 = vmax.xlane.f32.xlu1 %v8705_v59  ;;  %v8634_v54 = vpop.f32.mrf.mxu0 }
0x1993   : > { %v13065_v21 = vpop.f32.mrf.mxu1  ;;  %v16875_v49 = vpop.permute.xlu1 %8927 }
0x1994   : > { %v13059_v56 = vpop.f32.mrf.mxu0 }
0x19a3   : > { %9023 = vrot.lane.b32.xlu1 %v16521_v5, %s14462_s7 }
0x19a7   : > { %8975 = vrot.lane.b32.xlu0 %v16503_v26, %s14462_s7 }
0x1a02   : > { %v8692_v27 = vpop.xlane.xlu1 %8691 }
0x1a03   : > { %v8712_v32 = vsub.f32 %v8382_v57, %v8692_v27  ;;  %v8689_v48 = vpop.xlane.xlu0 %8688 }
0x1a04   : > { %v8711_v41 = vsub.f32 %v8332_v9, %v8689_v48 }
0x1a05   : > { %v8721_v50 = vmul.f32 1.442695, %v8712_v32 }
0x1a06   : > { %v8719_v58 = vmul.f32 1.442695, %v8711_v41 }
0x1a07   : > { %13960 = vpow2.f32 %v8721_v50 }
0x1a08   : > { %13962 = vpow2.f32 %v8719_v58 }
0x1a0b   : > { %v8695_v59 = vpop.xlane.xlu0 %8694 }
0x1a0c   : > { %v8713_v54 = vsub.f32 %v8432_v37, %v8695_v59 }
0x1a0e   : > { %v8723_v21 = vmul.f32 1.442695, %v8713_v54 }
0x1a0f   : > { %v8698_v56 = vpop.xlane.xlu0 %8697 }
0x1a10   : > { %13964 = vpow2.f32 %v8723_v21  ;;  %v8714_v22 = vsub.f32 %v8482_v15, %v8698_v56 }
0x1a12   : > { %v8725_v11 = vmul.f32 1.442695, %v8714_v22 }
0x1a13   : > { %v8704_v0 = vpop.xlane.xlu0 %8703  ;;  %v8701_v2 = vpop.xlane.xlu1 %8700 }
0x1a14   : > { %v16877_v12 = vpop.eup %13960  ;;  %13966 = vpow2.f32 %v8725_v11  ;;  %v8716_v34 = vsub.f32 %v8582_v8, %v8704_v0  ;;  %v8715_v57 = vsub.f32 %v8532_v10, %v8701_v2 }
0x1a15   : > { %v16879_v27 = vpop.eup %13962  ;;  %v8738_v9 = vsel %vm2026_vm12, %v16877_v12, 0.0 }
0x1a16   : > { %v8729_v58 = vmul.f32 1.442695, %v8716_v34  ;;  %v8727_v32 = vmul.f32 1.442695, %v8715_v57  ;;  %8739 = vadd.xlane.f32.xlu0 %v8738_v9  ;;  %v8735_v37 = vsel %vm2026_vm12, %v16879_v27, 0.0 }
0x1a17   : > { %8736 = vadd.xlane.f32.xlu1 %v8735_v37 }
0x1a18   : > { %13968 = vpow2.f32 %v8729_v58 }
0x1a19   : > { %13970 = vpow2.f32 %v8727_v32 }
0x1a1a   : > { %v8710_v48 = vpop.xlane.xlu0 %8709 }
0x1a1b   : > { %v8707_v41 = vpop.xlane.xlu1 %8706  ;;  %v8718_v50 = vsub.f32 %v16860_v39, %v8710_v48 }
0x1a1c   : > { %v8717_v59 = vsub.f32 %v16863_v1, %v8707_v41 }
0x1a1d   : > { %v16885_v22 = vpop.eup %13964  ;;  %v8733_v54 = vmul.f32 1.442695, %v8718_v50 }
0x1a1e   : > { %v8741_v11 = vsel %vm2026_vm12, %v16885_v22, 0.0  ;;  %v8731_v21 = vmul.f32 1.442695, %v8717_v59 }
0x1a1f   : > { %8742 = vadd.xlane.f32.xlu1 %v8741_v11  ;;  %13972 = vpow2.f32 %v8733_v54 }
0x1a20   : > { %13974 = vpow2.f32 %v8731_v21 }
0x1a21   : > { %v16889_v2 = vpop.eup %13966 }
0x1a22   : > { %v8744_v0 = vsel %vm2026_vm12, %v16889_v2, 0.0 }
0x1a23   : > { %8745 = vadd.xlane.f32.xlu0 %v8744_v0 }
0x1a25   : > { %v16893_v34 = vpop.eup %13968 }
0x1a26   : > { %v16895_v15 = vpop.eup %13970  ;;  %v8750_v8 = vsel %vm2026_vm12, %v16893_v34, 0.0 }
0x1a27   : > { %8751 = vadd.xlane.f32.xlu0 %v8750_v8  ;;  %v8747_v10 = vsel %vm2026_vm12, %v16895_v15, 0.0 }
0x1a28   : > { %8748 = vadd.xlane.f32.xlu1 %v8747_v10 }
0x1a2c   : > { %v16907_v56 = vpop.eup %13972 }
0x1a2d   : > { %v16909_v57 = vpop.eup %13974  ;;  %v8756_v9 = vsel %vm2026_vm12, %v16907_v56, 0.0 }
0x1a2e   : > { %v8753_v58 = vsel %vm2026_vm12, %v16909_v57, 0.0 }
0x1a39   : > { %9119 = vrot.lane.b32.xlu1 %v16545_v42, %s14462_s7 }
0x1a3d   : > { %9071 = vrot.lane.b32.xlu0 %v16537_v20, %s14462_s7 }
0x1a5c   : > { %8757 = vadd.xlane.f32.xlu0 %v8756_v9 }
0x1a5d   : > { %8754 = vadd.xlane.f32.xlu1 %v8753_v58 }
0x1a6e   : > { %9219 = vrot.lane.b32.xlu1 %v16274_v16, %s14463_s5  ;;  %v9024_v16 = vpop.permute.xlu1 %9023 }
0x1a6f   : > { %v9029_v11 = vsel %vm2126_vm11, %v9024_v16, 0 }
0x1a72   : > { %9217 = vrot.lane.b32.xlu1 %v16296_v33, %s14463_s5  ;;  %9169 = vrot.lane.b32.xlu0 %v16267_v61, %s14463_s5  ;;  %v8976_v61 = vpop.permute.xlu0 %8975 }
0x1a76   : > { %9319 = vrot.lane.b32.xlu1 %v16294_v17, %s14463_s5  ;;  %9167 = vrot.lane.b32.xlu0 %v16277_v52, %s14463_s5 }
0x1a7a   : > { %9317 = vrot.lane.b32.xlu1 %v16312_v51, %s14463_s5  ;;  %9269 = vrot.lane.b32.xlu0 %v16279_v6, %s14463_s5 }
0x1a7e   : > { %9419 = vrot.lane.b32.xlu1 %v16327_v23, %s14463_s5  ;;  %9267 = vrot.lane.b32.xlu0 %v16298_v28, %s14463_s5 }
0x1a82   : > { %9417 = vrot.lane.b32.xlu1 %v16356_v25, %s14463_s5  ;;  %9369 = vrot.lane.b32.xlu0 %v16321_v7, %s14463_s5 }
0x1a86   : > { %9519 = vrot.lane.b32.xlu1 %v16354_v29, %s14463_s5  ;;  %9367 = vrot.lane.b32.xlu0 %v16335_v60, %s14463_s5 }
0x1a8a   : > { %9517 = vrot.lane.b32.xlu1 %v16381_v44, %s14463_s5  ;;  %9469 = vrot.lane.b32.xlu0 %v16337_v45, %s14463_s5 }
0x1a8e   : > { %9663 = vrot.lane.b32.xlu1 %v16362_v19, %s14463_s5  ;;  %9467 = vrot.lane.b32.xlu0 %v16369_v18, %s14463_s5  ;;  %v8933_v19 = vsel %vm2126_vm11, %v16875_v49, 0  ;;  %v8885_v18 = vsel %vm2126_vm11, %v16873_v55, 0  ;;  %v8981_v55 = vsel %vm2126_vm11, %v8976_v61, 0 }
0x1a9f   : > { %v8740_v52 = vpop.xlane.xlu0 %8739 }
0x1aa0   : > { %13976 = vrcp.f32 %v8740_v52  ;;  %v8737_v6 = vpop.xlane.xlu1 %8736 }
0x1aa1   : > { %13978 = vrcp.f32 %v8737_v6 }
0x1aa8   : > { %v8743_v17 = vpop.xlane.xlu1 %8742 }
0x1aa9   : > { %13980 = vrcp.f32 %v8743_v17 }
0x1aac   : > { %v8746_v33 = vpop.xlane.xlu0 %8745 }
0x1aad   : > { %v13977_v28 = vpop.eup %13976  ;;  %13982 = vrcp.f32 %v8746_v33 }
0x1aae   : > { %v13979_v51 = vpop.eup %13978  ;;  %v8768_v7 = vmul.f32 %v13977_v28, %v16877_v12 }
0x1aaf   : > { %v8767_v23 = vmul.f32 %v13979_v51, %v16879_v27 }
0x1ab0   : > { %v8776_v60 = vpack.c.bf16 %v8768_v7, %v8768_v7  ;;  %v8752_v45 = vpop.xlane.xlu0 %8751 }
0x1ab1   : > { %v8775_v29 = vpack.c.bf16 %v8767_v23, %v8767_v23  ;;  %13984 = vrcp.f32 %v8752_v45  ;;  %v8749_v25 = vpop.xlane.xlu1 %8748 }
0x1ab2   : > { %13986 = vrcp.f32 %v8749_v25  ;;  %13075 = vmatmul.mubr.msk.bf16.vlgmr.msra.gmra.mxu1 %vm2026_vm12, %v8776_v60 }
0x1ab3   : > { %13069 = vmatmul.mubr.msk.bf16.vlgmr.msra.gmra.mxu0 %vm2026_vm12, %v8775_v29  ;;  %13085 = vmatpush3.bf16.msra.mxu1 %v8933_v19 }
0x1ab4   : > { %13079 = vmatpush3.bf16.msra.mxu0 %v8885_v18  ;;  %13080 = vmatprep.mubr.msk.bf16.mxu0 %vm14460_vm9, %v17622_v62  ;;  %v9072_v0 = vpop.permute.xlu0 %9071 }
0x1ab5   : > { %13090 = vmatprep.subr.bf16.mxu0 %v17622_v62  ;;  %13086 = vmatprep.mubr.msk.bf16.mxu1 %vm14460_vm9, %v17622_v62  ;;  %v9077_v10 = vsel %vm2126_vm11, %v9072_v0, 0  ;;  %v9120_v48 = vpop.permute.xlu1 %9119 }
0x1ab6   : > { %v13981_v44 = vpop.eup %13980  ;;  %13096 = vmatprep.subr.bf16.mxu1 %v17622_v62 }
0x1ab7   : > { %v8769_v12 = vmul.f32 %v13981_v44, %v16885_v22 }
0x1ab9   : > { %v8777_v39 = vpack.c.bf16 %v8769_v12, %v8769_v12 }
0x1aba   : > { %v13983_v1 = vpop.eup %13982 }
0x1abb   : > { %v8770_v49 = vmul.f32 %v13983_v1, %v16889_v2  ;;  %13081 = vmatmul.mubr.msk.bf16.vlgmr.msra.gmra.mxu0 %vm2026_vm12, %v8777_v39 }
0x1abc   : > { %13091 = vmatpush3.bf16.msra.mxu0 %v8981_v55  ;;  %13092 = vmatprep.mubr.msk.bf16.mxu0 %vm14460_vm9, %v17622_v62 }
0x1abd   : > { %v8778_v27 = vpack.c.bf16 %v8770_v49, %v8770_v49  ;;  %13102 = vmatprep.subr.bf16.mxu0 %v17622_v62 }
0x1abe   : > { %v13985_v32 = vpop.eup %13984 }
0x1abf   : > { %v13987_v37 = vpop.eup %13986  ;;  %13087 = vmatmul.mubr.msk.bf16.vlgmr.msra.gmra.mxu1 %vm2026_vm12, %v8778_v27  ;;  %v8772_v2 = vmul.f32 %v13985_v32, %v16893_v34 }
0x1ac0   : > { %v8771_v22 = vmul.f32 %v13987_v37, %v16895_v15  ;;  %13097 = vmatpush3.bf16.msra.mxu1 %v9029_v11  ;;  %13098 = vmatprep.mubr.msk.bf16.mxu1 %vm14460_vm9, %v17622_v62  ;;  %v9125_v15 = vsel %vm2126_vm11, %v9120_v48, 0 }
0x1ac1   : > { %13108 = vmatprep.subr.bf16.mxu1 %v17622_v62  ;;  %v8780_v41 = vpack.c.bf16 %v8772_v2, %v8772_v2 }
0x1ac2   : > { %v8779_v8 = vpack.c.bf16 %v8771_v22, %v8771_v22 }
0x1ac4   : > { %13093 = vmatmul.mubr.msk.bf16.vlgmr.msra.gmra.mxu0 %vm2026_vm12, %v8779_v8 }
0x1ac5   : > { %13103 = vmatpush3.bf16.msra.mxu0 %v9077_v10  ;;  %13104 = vmatprep.mubr.msk.bf16.mxu0 %vm14460_vm9, %v17622_v62 }
0x1ac6   : > { %13114 = vmatprep.subr.bf16.mxu0 %v17622_v62 }
0x1ac7   : > { %13099 = vmatmul.mubr.msk.bf16.vlgmr.msra.gmra.mxu1 %vm2026_vm12, %v8780_v41 }
0x1ac8   : > { %13109 = vmatpush3.bf16.msra.mxu1 %v9125_v15  ;;  %13110 = vmatprep.mubr.msk.bf16.mxu1 %vm14460_vm9, %v17622_v62 }
0x1ac9   : > { %13120 = vmatprep.subr.bf16.mxu1 %v17622_v62 }
0x1ae5   : > { %v8758_v34 = vpop.xlane.xlu0 %8757 }
0x1ae6   : > { %13988 = vrcp.f32 %v8758_v34  ;;  %v8755_v50 = vpop.xlane.xlu1 %8754 }
0x1ae7   : > { %13990 = vrcp.f32 %v8755_v50 }
0x1ae9   : > { %v9170_v59 = vpop.permute.xlu0 %9169 }
0x1aea   : > { %v9220_v54 = vpop.permute.xlu1 %9219  ;;  %v9175_v23 = vsel %vm1657_vm10, %v9170_v59, 0 }
0x1aeb   : > { %v9225_v51 = vsel %vm1657_vm10, %v9220_v54, 0 }
0x1aed   : > { %v9168_v9 = vpop.permute.xlu0 %9167 }
0x1aee   : > { %v9218_v21 = vpop.permute.xlu1 %9217 }
0x1af1   : > { %v9270_v33 = vpop.permute.xlu0 %9269 }
0x1af2   : > { %v9320_v58 = vpop.permute.xlu1 %9319  ;;  %v9275_v45 = vsel %vm1657_vm10, %v9270_v33, 0 }
0x1af3   : > { %v13989_v61 = vpop.eup %13988  ;;  %v9325_v60 = vsel %vm1657_vm10, %v9320_v58, 0 }
0x1af4   : > { %v13991_v16 = vpop.eup %13990  ;;  %v8774_v52 = vmul.f32 %v13989_v61, %v16907_v56 }
0x1af5   : > { %v8773_v6 = vmul.f32 %v13991_v16, %v16909_v57  ;;  %v9268_v56 = vpop.permute.xlu0 %9267 }
0x1af6   : > { %v8782_v17 = vpack.c.bf16 %v8774_v52, %v8774_v52  ;;  %v9318_v7 = vpop.permute.xlu1 %9317 }
0x1af7   : > { %v8781_v28 = vpack.c.bf16 %v8773_v6, %v8773_v6 }
0x1af8   : > { %13111 = vmatmul.mubr.msk.bf16.vlgmr.msra.gmra.mxu1 %vm2026_vm12, %v8782_v17 }
0x1af9   : > { %13105 = vmatmul.mubr.msk.bf16.vlgmr.msra.gmra.mxu0 %vm2026_vm12, %v8781_v28  ;;  %13121 = vmatpush3.bf16.xpose.msra.mxu1 %v9225_v51  ;;  %v9370_v29 = vpop.permute.xlu0 %9369 }
0x1afa   : > { %13115 = vmatpush3.bf16.xpose.msra.mxu0 %v9175_v23  ;;  %13116 = vmatprep.mubr.msk.bf16.mxu0 %vm14460_vm9, %v17622_v62  ;;  %v9420_v57 = vpop.permute.xlu1 %9419  ;;  %v9375_v44 = vsel %vm1657_vm10, %v9370_v29, 0 }
0x1afb   : > { %13122 = vmatprep.mubr.msk.bf16.mxu1 %vm14460_vm9, %v17622_v62  ;;  %13126 = vmatprep.subr.bf16.mxu0 %v17622_v62  ;;  %v9425_v19 = vsel %vm1657_vm10, %v9420_v57, 0 }
0x1afc   : > { %13132 = vmatprep.subr.bf16.mxu1 %v17622_v62 }
0x1afd   : > { %v9368_v18 = vpop.permute.xlu0 %9367 }
0x1afe   : > { %v9418_v25 = vpop.permute.xlu1 %9417 }
0x1b00   : > { %13123 = vmatmul.mubr.msk.bf16.vlgmr.msra.gmra.mxu1 %vm1657_vm10, %v9218_v21 }
0x1b01   : > { %13117 = vmatmul.mubr.msk.bf16.vlgmr.msra.gmra.mxu0 %vm1657_vm10, %v9168_v9  ;;  %13133 = vmatpush3.bf16.xpose.msra.mxu1 %v9325_v60  ;;  %v9470_v39 = vpop.permute.xlu0 %9469 }
0x1b02   : > { %13127 = vmatpush3.bf16.xpose.msra.mxu0 %v9275_v45  ;;  %13128 = vmatprep.mubr.msk.bf16.mxu0 %vm14460_vm9, %v17622_v62  ;;  %v9520_v12 = vpop.permute.xlu1 %9519  ;;  %v9475_v49 = vsel %vm1657_vm10, %v9470_v39, 0 }
0x1b03   : > { %13134 = vmatprep.mubr.msk.bf16.mxu1 %vm14460_vm9, %v17622_v62  ;;  %13138 = vmatprep.subr.bf16.mxu0 %v17622_v62  ;;  %v9525_v1 = vsel %vm1657_vm10, %v9520_v12, 0 }
0x1b04   : > { %13144 = vmatprep.subr.bf16.mxu1 %v17622_v62 }
0x1b05   : > { %v9468_v32 = vpop.permute.xlu0 %9467 }
0x1b06   : > { %v9518_v55 = vpop.permute.xlu1 %9517 }
0x1b08   : > { %13135 = vmatmul.mubr.msk.bf16.vlgmr.msra.gmra.mxu1 %vm1657_vm10, %v9318_v7 }
0x1b09   : > { %13129 = vmatmul.mubr.msk.bf16.vlgmr.msra.gmra.mxu0 %vm1657_vm10, %v9268_v56  ;;  %13145 = vmatpush3.bf16.xpose.msra.mxu1 %v9425_v19 }
0x1b0a   : > { %13139 = vmatpush3.bf16.xpose.msra.mxu0 %v9375_v44  ;;  %13140 = vmatprep.mubr.msk.bf16.mxu0 %vm14460_vm9, %v17622_v62  ;;  %v9664_v27 = vpop.permute.xlu1 %9663 }
0x1b0b   : > { %13146 = vmatprep.mubr.msk.bf16.mxu1 %vm14460_vm9, %v17622_v62  ;;  %13150 = vmatprep.subr.bf16.mxu0 %v17622_v62  ;;  %v9669_v37 = vsel %vm2126_vm11, %v9664_v27, 0 }
0x1b0c   : > { %13156 = vmatprep.subr.bf16.mxu1 %v17622_v62 }
0x1b10   : > { %13147 = vmatmul.mubr.msk.bf16.vlgmr.msra.gmra.mxu1 %vm1657_vm10, %v9418_v25 }
0x1b11   : > { %13141 = vmatmul.mubr.msk.bf16.vlgmr.msra.gmra.mxu0 %vm1657_vm10, %v9368_v18  ;;  %13157 = vmatpush3.bf16.xpose.msra.mxu1 %v9525_v1 }
0x1b12   : > { %13151 = vmatpush3.bf16.xpose.msra.mxu0 %v9475_v49  ;;  %13152 = vmatprep.mubr.msk.bf16.mxu0 %vm14460_vm9, %v17622_v62 }
0x1b13   : > { %13158 = vmatprep.mubr.msk.bf16.mxu1 %vm14460_vm9, %v17622_v62  ;;  %13162 = vmatprep.subr.bf16.mxu0 %v17622_v62 }
0x1b14   : > { %13168 = vmatprep.subr.bf16.mxu1 %v17622_v62 }
0x1b18   : > { %13159 = vmatmul.mubr.msk.bf16.vlgmr.msra.gmra.mxu1 %vm1657_vm10, %v9518_v55 }
0x1b19   : > { %13153 = vmatmul.mubr.msk.bf16.vlgmr.msra.gmra.mxu0 %vm1657_vm10, %v9468_v32  ;;  %13170 = vmatprep.mubr.msk.bf16.mxu1 %vm14460_vm9, %v17622_v62 }
0x1b1a   : > { %13163 = vmatpush3.bf16.msra.mxu0 %v9669_v37  ;;  %13164 = vmatprep.mubr.msk.bf16.mxu0 %vm14460_vm9, %v17622_v62 }
0x1b1b   : > { %13174 = vmatprep.subr.bf16.mxu0 %v17622_v62 }
0x1b72   : > { %v17037_v11 = vpop.f32.mrf.mxu1 }
0x1b73   : > { %v17039_v22 = vpop.f32.mrf.mxu0 }
0x1b74   : > { %v13470_v2 = vpack.i.bf16 %v17037_v11, %v17039_v22  ;;  %v13076_v0 = vpop.f32.mrf.mxu1 }
0x1b75   : > { %v13070_v8 = vpop.f32.mrf.mxu0 }
0x1b76   : > { %v8876_v10 = vpop.f32.mrf.mxu1 }
0x1b77   : > { %v8828_v48 = vpop.f32.mrf.mxu0 }
0x1b78   : > { %v13077_v41 = vpop.f32.mrf.mxu1 }
0x1b79   : > { %v13071_v15 = vpop.f32.mrf.mxu0 }
0x1b7b   : > { %v17043_v34 = vpop.f32.mrf.mxu0 }
0x1b7d   : > { %v13082_v50 = vpop.f32.mrf.mxu0 }
0x1b7f   : > { %v8924_v59 = vpop.f32.mrf.mxu0  ;;  %v17045_v54 = vpop.f32.mrf.mxu1 }
0x1b80   : > { %v13475_v21 = vpack.i.bf16 %v17045_v54, %v17043_v34 }
0x1b81   : > { %v13083_v9 = vpop.f32.mrf.mxu0  ;;  %v13088_v58 = vpop.f32.mrf.mxu1 }
0x1b83   : > { %v8972_v61 = vpop.f32.mrf.mxu1 }
0x1b84   : > { %v17049_v16 = vpop.f32.mrf.mxu0 }
0x1b85   : > { %v13089_v52 = vpop.f32.mrf.mxu1 }
0x1b86   : > { %v13094_v6 = vpop.f32.mrf.mxu0 }
0x1b87   : > { %v17051_v17 = vpop.f32.mrf.mxu1 }
0x1b88   : > { %v9020_v33 = vpop.f32.mrf.mxu0  ;;  %v13500_v28 = vpack.i.bf16 %v17051_v17, %v17049_v16 }
0x1b89   : > { %v13100_v51 = vpop.f32.mrf.mxu1 }
0x1b8a   : > { %v13095_v7 = vpop.f32.mrf.mxu0 }
0x1b8b   : > { %v9068_v23 = vpop.f32.mrf.mxu1 }
0x1b8d   : > { %v13101_v56 = vpop.f32.mrf.mxu1 }
0x1bb8   : > { %v17055_v57 = vpop.f32.mrf.mxu1 }
0x1bb9   : > { %v17057_v60 = vpop.f32.mrf.mxu0 }
0x1bba   : > { %v13505_v45 = vpack.i.bf16 %v17055_v57, %v17057_v60  ;;  %v13112_v29 = vpop.f32.mrf.mxu1 }
0x1bbb   : > { %v13106_v25 = vpop.f32.mrf.mxu0 }
0x1bbc   : > { %v9164_v19 = vpop.f32.mrf.mxu1 }
0x1bbd   : > { %v9116_v18 = vpop.f32.mrf.mxu0 }
0x1bbe   : > { %v13113_v44 = vpop.f32.mrf.mxu1 }
0x1bbf   : > { %v13107_v12 = vpop.f32.mrf.mxu0 }
0x1bc0   : > { %v9261_v39 = vpop.f32.mrf.mxu1 }
0x1bc1   : > { %v9211_v1 = vpop.f32.mrf.mxu0  ;;  %v9262_v55 = vadd.f32 %v9261_v39, %v15082_v13 }
0x1bc2   : > { %v9212_v49 = vadd.f32 %v9211_v1, %v15073_v31  ;;  %v13124_v27 = vpop.f32.mrf.mxu1 }
0x1bc3   : > { %v13118_v32 = vpop.f32.mrf.mxu0  ;;  %v9570_v37 = vsel %vm2026_vm12, %v9262_v55, -inf }
0x1bc4   : > { %9571 = vmax.xlane.f32.xlu1 %v9570_v37  ;;  %v9264_v0 = vpop.f32.mrf.mxu1  ;;  %v9567_v8 = vsel %vm2026_vm12, %v9212_v49, -inf }
0x1bc5   : > { %9568 = vmax.xlane.f32.xlu0 %v9567_v8  ;;  %v9214_v10 = vpop.f32.mrf.mxu0 }
0x1bc6   : > { %v13125_v48 = vpop.f32.mrf.mxu1 }
0x1bc7   : > { %v13119_v41 = vpop.f32.mrf.mxu0 }
0x1bc8   : > { %v9361_v15 = vpop.f32.mrf.mxu1 }
0x1bc9   : > { %v9311_v50 = vpop.f32.mrf.mxu0  ;;  %v9362_v31 = vadd.f32 %v9361_v15, %v15100_v63 }
0x1bca   : > { %v9312_v59 = vadd.f32 %v9311_v50, %v15091_v36  ;;  %v13136_v9 = vpop.f32.mrf.mxu1 }
0x1bcb   : > { %v13130_v13 = vpop.f32.mrf.mxu0  ;;  %v9576_v7 = vsel %vm2026_vm12, %v9362_v31, -inf }
0x1bcc   : > { %v9364_v58 = vpop.f32.mrf.mxu1  ;;  %v9573_v61 = vsel %vm2026_vm12, %v9312_v59, -inf }
0x1bcd   : > { %9574 = vmax.xlane.f32.xlu0 %v9573_v61  ;;  %v9314_v52 = vpop.f32.mrf.mxu0 }
0x1bce   : > { %v13137_v6 = vpop.f32.mrf.mxu1 }
0x1bcf   : > { %v13131_v33 = vpop.f32.mrf.mxu0 }
0x1bd0   : > { %v9461_v51 = vpop.f32.mrf.mxu1 }
0x1bd1   : > { %v17070_v23 = vadd.f32 %v9461_v51, %v15113_v14  ;;  %9577 = vmax.xlane.f32.xlu0 %v9576_v7  ;;  %v9411_v56 = vpop.f32.mrf.mxu0 }
0x1bd2   : > { %v17073_v36 = vadd.f32 %v9411_v56, %v15107_v40  ;;  %v13148_v29 = vpop.f32.mrf.mxu1 }
0x1bd3   : > { %v13142_v63 = vpop.f32.mrf.mxu0  ;;  %v9582_v25 = vsel %vm2026_vm12, %v17070_v23, -inf }
0x1bd4   : > { %v9464_v19 = vpop.f32.mrf.mxu1  ;;  %v9579_v18 = vsel %vm2026_vm12, %v17073_v36, -inf }
0x1bd5   : > { %9583 = vmax.xlane.f32.xlu0 %v9582_v25  ;;  %9580 = vmax.xlane.f32.xlu1 %v9579_v18  ;;  %v9414_v44 = vpop.f32.mrf.mxu0 }
0x1bd6   : > { %v13149_v12 = vpop.f32.mrf.mxu1 }
0x1bd7   : > { %v13143_v14 = vpop.f32.mrf.mxu0 }
0x1bd8   : > { %v9561_v39 = vpop.f32.mrf.mxu1 }
0x1bd9   : > { %v9511_v1 = vpop.f32.mrf.mxu0  ;;  %v9562_v27 = vadd.f32 %v9561_v39, %v15125_v4 }
0x1bda   : > { %v9512_v40 = vadd.f32 %v9511_v1, %v15118_v3  ;;  %v13160_v32 = vpop.f32.mrf.mxu1 }
0x1bdb   : > { %v13154_v37 = vpop.f32.mrf.mxu0  ;;  %v9588_v0 = vsel %vm2026_vm12, %v9562_v27, -inf }
0x1bdc   : > { %v9564_v8 = vpop.f32.mrf.mxu1  ;;  %9589 = vmax.xlane.f32.xlu0 %v9588_v0  ;;  %v9585_v10 = vsel %vm2026_vm12, %v9512_v40, -inf }
0x1bdd   : > { %9586 = vmax.xlane.f32.xlu1 %v9585_v10  ;;  %v9514_v48 = vpop.f32.mrf.mxu0 }
0x1bde   : > { %v13161_v41 = vpop.f32.mrf.mxu1 }
0x1bdf   : > { %v13155_v15 = vpop.f32.mrf.mxu0  ;;  %v17682_v41 = vpack.i.bf16 %v16831_v53, %v16829_v24 }
0x1be0   : > { %v17683_v15 = vpack.i.bf16 %v16823_v35, %v16825_v30 }
0x1bee   : > { %9759 = vrot.lane.b32.xlu1 %v16483_v47, %s14463_s5 }
0x1bf2   : > { %9807 = vrot.lane.b32.xlu1 %v16500_v38, %s14463_s5  ;;  %9711 = vrot.lane.b32.xlu0 %v16373_v43, %s14463_s5 }
0x1c4d   : > { %v9572_v3 = vpop.xlane.xlu1 %9571 }
0x1c4e   : > { %v9592_v4 = vsub.f32 %v9262_v55, %v9572_v3  ;;  %v9569_v50 = vpop.xlane.xlu0 %9568 }
0x1c4f   : > { %v9591_v9 = vsub.f32 %v9212_v49, %v9569_v50 }
0x1c50   : > { %v9601_v13 = vmul.f32 1.442695, %v9592_v4 }
0x1c51   : > { %v9599_v58 = vmul.f32 1.442695, %v9591_v9 }
0x1c52   : > { %13992 = vpow2.f32 %v9601_v13 }
0x1c53   : > { %13994 = vpow2.f32 %v9599_v58 }
0x1c56   : > { %v9575_v61 = vpop.xlane.xlu0 %9574 }
0x1c57   : > { %v9593_v52 = vsub.f32 %v9312_v59, %v9575_v61 }
0x1c59   : > { %v9603_v6 = vmul.f32 1.442695, %v9593_v52 }
0x1c5a   : > { %v9578_v33 = vpop.xlane.xlu0 %9577 }
0x1c5b   : > { %13996 = vpow2.f32 %v9603_v6  ;;  %v9594_v47 = vsub.f32 %v9362_v31, %v9578_v33 }
0x1c5d   : > { %v9605_v51 = vmul.f32 1.442695, %v9594_v47 }
0x1c5e   : > { %v9584_v55 = vpop.xlane.xlu0 %9583  ;;  %v9581_v18 = vpop.xlane.xlu1 %9580 }
0x1c5f   : > { %v17089_v7 = vpop.eup %13992  ;;  %13998 = vpow2.f32 %v9605_v51  ;;  %v9595_v44 = vsub.f32 %v17073_v36, %v9581_v18  ;;  %v9596_v14 = vsub.f32 %v17070_v23, %v9584_v55 }
0x1c60   : > { %v17091_v38 = vpop.eup %13994  ;;  %v9618_v43 = vsel %vm2026_vm12, %v17089_v7, 0.0 }
0x1c61   : > { %9619 = vadd.xlane.f32.xlu0 %v9618_v43  ;;  %v9615_v49 = vsel %vm2026_vm12, %v17091_v38, 0.0  ;;  %v9607_v39 = vmul.f32 1.442695, %v9595_v44  ;;  %v9609_v32 = vmul.f32 1.442695, %v9596_v14 }
0x1c62   : > { %9616 = vadd.xlane.f32.xlu1 %v9615_v49 }
0x1c63   : > { %14000 = vpow2.f32 %v9607_v39 }
0x1c64   : > { %14002 = vpow2.f32 %v9609_v32 }
0x1c65   : > { %v9590_v59 = vpop.xlane.xlu0 %9589 }
0x1c66   : > { %v9587_v12 = vpop.xlane.xlu1 %9586  ;;  %v9598_v37 = vsub.f32 %v9562_v27, %v9590_v59 }
0x1c67   : > { %v9597_v1 = vsub.f32 %v9512_v40, %v9587_v12 }
0x1c68   : > { %v17097_v56 = vpop.eup %13996  ;;  %v9613_v8 = vmul.f32 1.442695, %v9598_v37 }
0x1c69   : > { %v9712_v29 = vpop.permute.xlu0 %9711  ;;  %v9621_v31 = vsel %vm2026_vm12, %v17097_v56, 0.0  ;;  %v9611_v0 = vmul.f32 1.442695, %v9597_v1 }
0x1c6a   : > { %v9717_v63 = vsel %vm2126_vm11, %v9712_v29, 0  ;;  %9622 = vadd.xlane.f32.xlu1 %v9621_v31 }
0x1c6b   : > { %13169 = vmatpush3.bf16.msra.mxu1 %v9717_v63  ;;  %14004 = vpow2.f32 %v9611_v0  ;;  %v13632_v0 = vld [vmem:[%s17522_s9 + $0x78] sm:$0xff]  }
0x1c6c   : > { %v17102_v25 = vpop.eup %13998  ;;  %13180 = vmatprep.subr.bf16.mxu1 %v17622_v62  ;;  %14006 = vpow2.f32 %v9613_v8  ;;  %v13633_v8 = vld [vmem:[%s17522_s9 + $0x70] sm:$0xff]  }
0x1c6d   : > { %v9624_v19 = vsel %vm2026_vm12, %v17102_v25, 0.0 }
0x1c6e   : > { %9625 = vadd.xlane.f32.xlu0 %v9624_v19 }
0x1c7b   : > { %9903 = vrot.lane.b32.xlu1 %v16521_v5, %s14463_s5  ;;  %v17113_v5 = vpop.eup %14000 }
0x1c7c   : > { %v17115_v10 = vpop.eup %14002 }
0x1c7d   : > { %v17119_v36 = vpop.eup %14004  ;;  %v9630_v23 = vsel %vm2026_vm12, %v17115_v10, 0.0 }
0x1c7e   : > { %v9633_v27 = vsel %vm2026_vm12, %v17119_v36, 0.0  ;;  %v17125_v40 = vpop.eup %14006 }
0x1c7f   : > { %v9636_v48 = vsel %vm2026_vm12, %v17125_v40, 0.0 }
0x1c84   : > { %9855 = vrot.lane.b32.xlu0 %v16503_v26, %s14463_s5  ;;  %v9627_v26 = vsel %vm2026_vm12, %v17113_v5, 0.0 }
0x1c9f   : > { %9628 = vadd.xlane.f32.xlu1 %v9627_v26  ;;  %v13636_v26 = vld [vmem:[%s17522_s9 + $0x58] sm:$0xff]  }
0x1ca3   : > { %9631 = vadd.xlane.f32.xlu0 %v9630_v23  ;;  %9634 = vadd.xlane.f32.xlu1 %v9633_v27  ;;  %v13638_v23 = vld [vmem:[%s17522_s9 + $0x48] sm:$0xff]  }
0x1ca7   : > { %9637 = vadd.xlane.f32.xlu0 %v9636_v48 }
0x1cb4   : > { %9999 = vrot.lane.b32.xlu1 %v16545_v42, %s14463_s5  ;;  %v9760_v42 = vpop.permute.xlu1 %9759 }
0x1cb5   : > { %v9765_v22 = vsel %vm2126_vm11, %v9760_v42, 0  ;;  %v13639_v42 = vld [vmem:[%s17522_s9 + $0x40] sm:$0xff]  }
0x1cb8   : > { %13466 = vrot.lane.b32.xlu1 %v17682_v41, %s14463_s5  ;;  %v9808_v24 = vpop.permute.xlu1 %9807 }
0x1cb9   : > { %v9813_v11 = vsel %vm2126_vm11, %v9808_v24, 0 }
0x1cbc   : > { %13476 = vrot.lane.b32.xlu1 %v13475_v21, %s14462_s7 }
0x1cbd   : > { %9951 = vrot.lane.b32.xlu0 %v16537_v20, %s14463_s5 }
0x1cc1   : > { %13461 = vrot.lane.b32.xlu0 %v17683_v15, %s14463_s5 }
0x1cc5   : > { %13471 = vrot.lane.b32.xlu0 %v13470_v2, %s14462_s7 }
0x1cea   : > { %v9620_v53 = vpop.xlane.xlu0 %9619 }
0x1ceb   : > { %14008 = vrcp.f32 %v9620_v53  ;;  %v9617_v3 = vpop.xlane.xlu1 %9616 }
0x1cec   : > { %14010 = vrcp.f32 %v9617_v3 }
0x1cf3   : > { %v9623_v34 = vpop.xlane.xlu1 %9622 }
0x1cf4   : > { %14012 = vrcp.f32 %v9623_v34 }
0x1cf7   : > { %v9626_v54 = vpop.xlane.xlu0 %9625  ;;  %v9904_v33 = vpop.permute.xlu1 %9903 }
0x1cf8   : > { %v14009_v20 = vpop.eup %14008  ;;  %14014 = vrcp.f32 %v9626_v54  ;;  %v9909_v51 = vsel %vm2126_vm11, %v9904_v33, 0  ;;  %v17684_v54 = vld [vmem:[#allocation34_spill] sm:$0xff] }
0x1cf9   : > { %v14011_v21 = vpop.eup %14010  ;;  %v9648_v35 = vmul.f32 %v14009_v20, %v17089_v7  ;;  %v17685_v20 = vld [vmem:[#allocation35_spill] sm:$0xff] }
0x1cfa   : > { %v9647_v30 = vmul.f32 %v14011_v21, %v17091_v38  ;;  %v17686_v21 = vpack.i.bf16 %v17684_v54, %v17685_v20 }
0x1cfb   : > { %v9656_v4 = vpack.c.bf16 %v9648_v35, %v9648_v35  ;;  %v9856_v13 = vpop.permute.xlu0 %9855 }
0x1cfc   : > { %v9655_v50 = vpack.c.bf16 %v9647_v30, %v9647_v30  ;;  %v9861_v6 = vsel %vm2126_vm11, %v9856_v13, 0 }
0x1cfd   : > { %13171 = vmatmul.mubr.msk.bf16.vlgmr.msra.gmra.mxu1 %vm2026_vm12, %v9656_v4 }
0x1cfe   : > { %13165 = vmatmul.mubr.msk.bf16.vlgmr.msra.gmra.mxu0 %vm2026_vm12, %v9655_v50  ;;  %13181 = vmatpush3.bf16.msra.mxu1 %v9813_v11 }
0x1cff   : > { %13175 = vmatpush3.bf16.msra.mxu0 %v9765_v22  ;;  %13176 = vmatprep.mubr.msk.bf16.mxu0 %vm14460_vm9, %v17622_v62 }
0x1d00   : > { %13186 = vmatprep.subr.bf16.mxu0 %v17622_v62  ;;  %13182 = vmatprep.mubr.msk.bf16.mxu1 %vm14460_vm9, %v17622_v62 }
0x1d01   : > { %v14013_v2 = vpop.eup %14012  ;;  %13192 = vmatprep.subr.bf16.mxu1 %v17622_v62 }
0x1d02   : > { %v9649_v9 = vmul.f32 %v14013_v2, %v17097_v56 }
0x1d04   : > { %v9657_v58 = vpack.c.bf16 %v9649_v9, %v9649_v9 }
0x1d05   : > { %v14015_v61 = vpop.eup %14014 }
0x1d06   : > { %v9650_v52 = vmul.f32 %v14015_v61, %v17102_v25  ;;  %13177 = vmatmul.mubr.msk.bf16.vlgmr.msra.gmra.mxu0 %vm2026_vm12, %v9657_v58  ;;  %v17687_v58 = vld [vmem:[#allocation36_spill] sm:$0xff]  ;;  %v17688_v61 = vld [vmem:[#allocation51_spill] sm:$0xff] }
0x1d07   : > { %13187 = vmatpush3.bf16.msra.mxu0 %v9861_v6  ;;  %13188 = vmatprep.mubr.msk.bf16.mxu0 %vm14460_vm9, %v17622_v62 }
0x1d08   : > { %v9658_v47 = vpack.c.bf16 %v9650_v52, %v9650_v52  ;;  %13198 = vmatprep.subr.bf16.mxu0 %v17622_v62  ;;  %v17689_v52 = vpack.i.bf16 %v17687_v58, %v17688_v61 }
0x1d0a   : > { %13183 = vmatmul.mubr.msk.bf16.vlgmr.msra.gmra.mxu1 %vm2026_vm12, %v9658_v47 }
0x1d0b   : > { %13193 = vmatpush3.bf16.msra.mxu1 %v9909_v51  ;;  %13194 = vmatprep.mubr.msk.bf16.mxu1 %vm14460_vm9, %v17622_v62 }
0x1d0c   : > { %13204 = vmatprep.subr.bf16.mxu1 %v17622_v62 }
0x1d28   : > { %v9629_v7 = vpop.xlane.xlu1 %9628 }
0x1d29   : > { %14016 = vrcp.f32 %v9629_v7 }
0x1d2c   : > { %v9632_v38 = vpop.xlane.xlu0 %9631  ;;  %v9635_v43 = vpop.xlane.xlu1 %9634 }
0x1d2d   : > { %14018 = vrcp.f32 %v9632_v38 }
0x1d2e   : > { %14020 = vrcp.f32 %v9635_v43 }
0x1d30   : > { %v9638_v55 = vpop.xlane.xlu0 %9637  ;;  %v10000_v18 = vpop.permute.xlu1 %9999 }
0x1d31   : > { %14022 = vrcp.f32 %v9638_v55  ;;  %v10005_v39 = vsel %vm2126_vm11, %v10000_v18, 0 }
0x1d34   : > { %v9952_v56 = vpop.permute.xlu0 %9951 }
0x1d35   : > { %v9957_v19 = vsel %vm2126_vm11, %v9952_v56, 0 }
0x1d36   : > { %v14017_v49 = vpop.eup %14016 }
0x1d37   : > { %v9651_v59 = vmul.f32 %v14017_v49, %v17113_v5  ;;  %v13634_v5 = vld [vmem:[%s17522_s9 + $0x68] sm:$0xff]  }
0x1d39   : > { %v9659_v29 = vpack.c.bf16 %v9651_v59, %v9651_v59 }
0x1d3a   : > { %v14019_v31 = vpop.eup %14018 }
0x1d3b   : > { %v14021_v63 = vpop.eup %14020  ;;  %v9652_v25 = vmul.f32 %v14019_v31, %v17115_v10  ;;  %13189 = vmatmul.mubr.msk.bf16.vlgmr.msra.gmra.mxu0 %vm2026_vm12, %v9659_v29  ;;  %v13635_v10 = vld [vmem:[%s17522_s9 + $0x60] sm:$0xff]  }
0x1d3c   : > { %13199 = vmatpush3.bf16.msra.mxu0 %v9957_v19  ;;  %13200 = vmatprep.mubr.msk.bf16.mxu0 %vm14460_vm9, %v17622_v62  ;;  %v9653_v12 = vmul.f32 %v14021_v63, %v17119_v36  ;;  %v13637_v36 = vld [vmem:[%s17522_s9 + $0x50] sm:$0xff]  }
0x1d3d   : > { %v9660_v44 = vpack.c.bf16 %v9652_v25, %v9652_v25  ;;  %13210 = vmatprep.subr.bf16.mxu0 %v13632_v0 }
0x1d3e   : > { %v14023_v14 = vpop.eup %14022  ;;  %v9661_v1 = vpack.c.bf16 %v9653_v12, %v9653_v12 }
0x1d3f   : > { %13195 = vmatmul.mubr.msk.bf16.vlgmr.msra.gmra.mxu1 %vm2026_vm12, %v9660_v44  ;;  %v9654_v32 = vmul.f32 %v14023_v14, %v17125_v40  ;;  %v13467_v14 = vpop.permute.xlu1 %13466 }
0x1d40   : > { %13205 = vmatpush3.bf16.msra.mxu1 %v10005_v39  ;;  %13206 = vmatprep.mubr.msk.bf16.mxu1 %vm14460_vm9, %v17622_v62  ;;  %v17690_v39 = vld [vmem:[#allocation46_spill] sm:$0xff] }
0x1d41   : > { %v9662_v37 = vpack.c.bf16 %v9654_v32, %v9654_v32  ;;  %v17691_v32 = vld [vmem:[#allocation44_spill] sm:$0xff] }
0x1d43   : > { %13201 = vmatmul.mubr.msk.bf16.vlgmr.msra.gmra.mxu0 %vm2026_vm12, %v9661_v1 }
0x1d44   : > { %13211 = vmatpush3.bf16.msra.mxu0 %v13632_v0 }
0x1d45   : > { %13212 = vmatprep.subr.bf16.mxu0 %v13633_v8 }
0x1d47   : > { %13207 = vmatmul.mubr.msk.bf16.vlgmr.msra.gmra.mxu1 %vm2026_vm12, %v9662_v37 }
0x1d48   : > { %10583 = vmatprep.mubr.bf16.mxu1 %v17636_v46  ;;  %13213 = vmatpush3.bf16.msra.mxu0 %v13633_v8 }
0x1d49   : > { %13214 = vmatprep.subr.bf16.mxu0 %v13634_v5 }
0x1d4c   : > { %13215 = vmatpush3.bf16.msra.mxu0 %v13634_v5 }
0x1d4d   : > { %13216 = vmatprep.subr.bf16.mxu0 %v13635_v10 }
0x1d50   : > { %13217 = vmatpush3.bf16.msra.mxu0 %v13635_v10 }
0x1d51   : > { %13218 = vmatprep.subr.bf16.mxu0 %v13636_v26 }
0x1d54   : > { %13219 = vmatpush3.bf16.msra.mxu0 %v13636_v26 }
0x1d55   : > { %13220 = vmatprep.subr.bf16.mxu0 %v13637_v36 }
0x1d58   : > { %13221 = vmatpush3.bf16.msra.mxu0 %v13637_v36 }
0x1d59   : > { %13222 = vmatprep.subr.bf16.mxu0 %v13638_v23 }
0x1d5c   : > { %13223 = vmatpush3.bf16.msra.mxu0 %v13638_v23 }
0x1d5d   : > { %13224 = vmatprep.subr.bf16.mxu0 %v13639_v42 }
0x1d60   : > { %13225 = vmatpush3.bf16.msra.mxu0 %v13639_v42 }
0x1dbd   : > { %v9753_v27 = vpop.f32.mrf.mxu1 }
0x1dbe   : > { %v9705_v40 = vpop.f32.mrf.mxu0 }
0x1dbf   : > { %v13480_v48 = vpack.i.bf16 %v9753_v27, %v9705_v40  ;;  %v13172_v41 = vpop.f32.mrf.mxu1  ;;  %v13477_v27 = vpop.permute.xlu1 %13476  ;;  %v13469_v40 = vunpack.i.h.bf16 %v13467_v14 }
0x1dc0   : > { %v13166_v15 = vpop.f32.mrf.mxu0  ;;  %v13479_v41 = vunpack.i.h.bf16 %v13477_v27 }
0x1dc1   : > { %13481 = vrot.lane.b32.xlu0 %v13480_v48, %s14461_s25  ;;  %v9756_v24 = vpop.f32.mrf.mxu1  ;;  %v13468_v48 = vunpack.i.l.bf16 %v13467_v14  ;;  %v13478_v15 = vunpack.i.l.bf16 %v13477_v27 }
0x1dc2   : > { %v9708_v53 = vpop.f32.mrf.mxu0  ;;  %v17692_v24 = vld [vmem:[#allocation29_spill] sm:$0xff] }
0x1dc3   : > { %v13173_v3 = vpop.f32.mrf.mxu1  ;;  %v10146_v53 = vsel %vm1657_vm10, %v17692_v24, %v13469_v40  ;;  %v17699_v40 = vld [vmem:[#allocation50_spill] sm:$0xff]  ;;  %v17701_v24 = vld [vmem:[#allocation41_spill] sm:$0xff] }
0x1dc4   : > { %v13167_v34 = vpop.f32.mrf.mxu0  ;;  %v17693_v3 = vld [vmem:[#allocation47_spill] sm:$0xff] }
0x1dc5   : > { %13491 = vrot.lane.b32.xlu0 %v17686_v21, %s14463_s5  ;;  %v10145_v34 = vsel %vm1657_vm10, %v17693_v3, %v13468_v48 }
0x1dc6   : > { %v9801_v35 = vpop.f32.mrf.mxu0  ;;  %v10153_v21 = vsel %vm969_vm0, %v10145_v34, %v13478_v15  ;;  %v17700_v15 = vld [vmem:[#allocation49_spill] sm:$0xff] }
0x1dc8   : > { %v13178_v30 = vpop.f32.mrf.mxu0 }
0x1dc9   : > { %13501 = vrot.lane.b32.xlu0 %v13500_v28, %s14462_s7 }
0x1dca   : > { %v9804_v4 = vpop.f32.mrf.mxu0  ;;  %v9849_v50 = vpop.f32.mrf.mxu1 }
0x1dcb   : > { %v13485_v11 = vpack.i.bf16 %v9849_v50, %v9801_v35  ;;  %v10154_v35 = vsel %vm969_vm0, %v10146_v53, %v13479_v41 }
0x1dcc   : > { %v13179_v22 = vpop.f32.mrf.mxu0  ;;  %v13184_v2 = vpop.f32.mrf.mxu1 }
0x1dcd   : > { %13486 = vrot.lane.b32.xlu1 %v13485_v11, %s14461_s25 }
0x1dce   : > { %v9852_v9 = vpop.f32.mrf.mxu1 }
0x1dd0   : > { %v13185_v13 = vpop.f32.mrf.mxu1 }
0x1dd1   : > { %13496 = vrot.lane.b32.xlu1 %v17689_v52, %s14463_s5 }
0x1dd5   : > { %13506 = vrot.lane.b32.xlu1 %v13505_v45, %s14462_s7  ;;  %v13462_v45 = vpop.permute.xlu0 %13461 }
0x1dd6   : > { %v13464_v25 = vunpack.i.h.bf16 %v13462_v45  ;;  %v13463_v19 = vunpack.i.l.bf16 %v13462_v45 }
0x1dd8   : > { %v10144_v1 = vsel %vm1657_vm10, %v17690_v39, %v13464_v25  ;;  %v10143_v37 = vsel %vm1657_vm10, %v17691_v32, %v13463_v19 }
0x1dd9   : > { %v13472_v63 = vpop.permute.xlu0 %13471 }
0x1dda   : > { %v13474_v18 = vunpack.i.h.bf16 %v13472_v63  ;;  %v13473_v44 = vunpack.i.l.bf16 %v13472_v63  ;;  %v17697_v63 = vld [vmem:[#allocation33_spill] sm:$0xff] }
0x1ddc   : > { %v10151_v5 = vsel %vm969_vm0, %v10143_v37, %v13473_v44  ;;  %v10152_v10 = vsel %vm969_vm0, %v10144_v1, %v13474_v18  ;;  %v11873_v37 = vld [vmem:[%s17523_s10 + $0x1] ss:$0 sm:$0xff] }
0x1dfb   : > { %v9897_v16 = vpop.f32.mrf.mxu0 }
0x1dfd   : > { %v13190_v17 = vpop.f32.mrf.mxu0 }
0x1dff   : > { %v9900_v28 = vpop.f32.mrf.mxu0  ;;  %v9945_v6 = vpop.f32.mrf.mxu1 }
0x1e00   : > { %v13510_v33 = vpack.i.bf16 %v9945_v6, %v9897_v16  ;;  %v17694_v16 = vld [vmem:[#allocation30_spill] sm:$0xff]  ;;  %v17695_v28 = vld [vmem:[#allocation31_spill] sm:$0xff] }
0x1e01   : > { %v13191_v47 = vpop.f32.mrf.mxu0  ;;  %v13196_v51 = vpop.f32.mrf.mxu1 }
0x1e02   : > { %13511 = vrot.lane.b32.xlu0 %v13510_v33, %s14461_s25 }
0x1e03   : > { %v9948_v7 = vpop.f32.mrf.mxu1  ;;  %v9993_v38 = vpop.f32.mrf.mxu0 }
0x1e05   : > { %v13197_v43 = vpop.f32.mrf.mxu1  ;;  %v13202_v55 = vpop.f32.mrf.mxu0 }
0x1e07   : > { %v9996_v49 = vpop.f32.mrf.mxu0  ;;  %v10041_v59 = vpop.f32.mrf.mxu1 }
0x1e08   : > { %v13515_v56 = vpack.i.bf16 %v10041_v59, %v9993_v38 }
0x1e09   : > { %v13203_v29 = vpop.f32.mrf.mxu0  ;;  %v13208_v31 = vpop.f32.mrf.mxu1 }
0x1e0a   : > { %13516 = vrot.lane.b32.xlu1 %v13515_v56, %s14461_s25 }
0x1e0b   : > { %v10044_v57 = vpop.f32.mrf.mxu1 }
0x1e0d   : > { %v13209_v60 = vpop.f32.mrf.mxu1 }
0x1e0e   : > { %v17696_v60 = vld [vmem:[#allocation32_spill] sm:$0xff] }
0x1e33   : > { %v13482_v12 = vpop.permute.xlu0 %13481 }
0x1e34   : > { %v13484_v0 = vunpack.i.h.bf16 %v13482_v12  ;;  %v13483_v8 = vunpack.i.l.bf16 %v13482_v12 }
0x1e36   : > { %v10159_v26 = vsel %vm5268_vm13, %v10151_v5, %v13483_v8  ;;  %v10160_v36 = vsel %vm5268_vm13, %v10152_v10, %v13484_v0 }
0x1e37   : > { %v10184_v23 = vpack.c.bf16 %v10160_v36, %v10159_v26  ;;  %v13492_v11 = vpop.permute.xlu0 %13491  ;;  %v17698_v26 = vld [vmem:[#allocation48_spill] sm:$0xff] }
0x1e38   : > { %v13494_v2 = vunpack.i.h.bf16 %v13492_v11  ;;  %v13493_v9 = vunpack.i.l.bf16 %v13492_v11  ;;  %v17703_v11 = vld [vmem:[#allocation42_spill] sm:$0xff] }
0x1e39   : > { %13226 = vmatprep.mubr.bf16.mxu0 %v10184_v23 }
0x1e3a   : > { %v10148_v17 = vsel %vm1657_vm10, %v17694_v16, %v13494_v2  ;;  %v10147_v6 = vsel %vm1657_vm10, %v17695_v28, %v13493_v9  ;;  %v17704_v9 = vld [vmem:[#allocation43_spill] sm:$0xff] }
0x1e3b   : > { %v13502_v22 = vpop.permute.xlu0 %13501  ;;  %v13642_v16 = vld [vmem:[#allocation10 + $0xf4] ss:$8 sps:$4 sm:$0xff]  }
0x1e3c   : > { %v13504_v58 = vunpack.i.h.bf16 %v13502_v22  ;;  %v13503_v61 = vunpack.i.l.bf16 %v13502_v22  ;;  %10551 = vmatprep.subr.bf16.mxu1 %v13642_v16 }
0x1e3e   : > { %v10155_v51 = vsel %vm969_vm0, %v10147_v6, %v13503_v61  ;;  %v10156_v7 = vsel %vm969_vm0, %v10148_v17, %v13504_v58  ;;  %v17705_v58 = vld [vmem:[#allocation45_spill] sm:$0xff] }
0x1e3f   : > { %v13487_v42 = vpop.permute.xlu1 %13486 }
0x1e40   : > { %v13489_v54 = vunpack.i.h.bf16 %v13487_v42  ;;  %v13488_v20 = vunpack.i.l.bf16 %v13487_v42 }
0x1e42   : > { %v10162_v30 = vsel %vm5268_vm13, %v10154_v35, %v13489_v54  ;;  %v10161_v4 = vsel %vm5268_vm13, %v10153_v21, %v13488_v20  ;;  %v17702_v35 = vld [vmem:[#allocation40_spill] sm:$0xff] }
0x1e43   : > { %v10185_v50 = vpack.c.bf16 %v10162_v30, %v10161_v4  ;;  %v13497_v13 = vpop.permute.xlu1 %13496 }
0x1e44   : > { %v13499_v59 = vunpack.i.h.bf16 %v13497_v13  ;;  %v13498_v56 = vunpack.i.l.bf16 %v13497_v13 }
0x1e45   : > { %13227 = vmatmul.mubr.bf16.vlgmr.msra.gmra.mxu0 %v10185_v50 }
0x1e46   : > { %v10150_v45 = vsel %vm1657_vm10, %v17696_v60, %v13499_v59  ;;  %v10149_v25 = vsel %vm1657_vm10, %v17697_v63, %v13498_v56  ;;  %v13645_v60 = vld [vmem:[#allocation10 + $0xe4] ss:$8 sps:$4 sm:$0xff]   ;;  %v13648_v63 = vld [vmem:[#allocation10 + $0xd4] ss:$8 sps:$4 sm:$0xff]  }
0x1e47   : > { %v13507_v38 = vpop.permute.xlu1 %13506 }
0x1e48   : > { %v13509_v29 = vunpack.i.h.bf16 %v13507_v38  ;;  %v13508_v31 = vunpack.i.l.bf16 %v13507_v38 }
0x1e4a   : > { %v10157_v44 = vsel %vm969_vm0, %v10149_v25, %v13508_v31  ;;  %v10158_v12 = vsel %vm969_vm0, %v10150_v45, %v13509_v29  ;;  %v13643_v45 = vld [vmem:[#allocation10 + $0xe0] ss:$8 sps:$4 sm:$0xff]   ;;  %v13646_v25 = vld [vmem:[#allocation10 + $0xd0] ss:$8 sps:$4 sm:$0xff]   ;;  %vm11160_vm0 = vcmask 1043459  }
0x1e74   : > { %v13512_v52 = vpop.permute.xlu0 %13511 }
0x1e75   : > { %v13514_v33 = vunpack.i.h.bf16 %v13512_v52  ;;  %v13513_v47 = vunpack.i.l.bf16 %v13512_v52  ;;  %v13640_v52 = vld [vmem:[#allocation10 + $0xf0] ss:$8 sps:$4 sm:$0xff]  }
0x1e76   : > { %10552 = vmatpush1.bf16.msra.mxu1 %v13640_v52  ;;  %v11882_v52 = vld [vmem:[#allocation7 + $0x1] ss:$0 sm:$0xff] }
0x1e77   : > { %v10163_v43 = vsel %vm5268_vm13, %v10155_v51, %v13513_v47  ;;  %v10164_v55 = vsel %vm5268_vm13, %v10156_v7, %v13514_v33  ;;  %10553 = vmatprep.subr.bf16.mxu1 %v13645_v60 }
0x1e78   : > { %v10186_v49 = vpack.c.bf16 %v10164_v55, %v10163_v43 }
0x1e7a   : > { %13230 = vmatprep.mubr.bf16.mxu0 %v10186_v49  ;;  %10554 = vmatpush1.bf16.msra.mxu1 %v13643_v45 }
0x1e7b   : > { %10555 = vmatprep.subr.bf16.mxu1 %v13648_v63 }
0x1e7c   : > { %v13517_v57 = vpop.permute.xlu1 %13516 }
0x1e7d   : > { %v13519_v19 = vunpack.i.h.bf16 %v13517_v57  ;;  %v13518_v18 = vunpack.i.l.bf16 %v13517_v57 }
0x1e7e   : > { %10556 = vmatpush1.bf16.msra.mxu1 %v13646_v25 }
0x1e7f   : > { %v10166_v14 = vsel %vm5268_vm13, %v10158_v12, %v13519_v19  ;;  %v10165_v39 = vsel %vm5268_vm13, %v10157_v44, %v13518_v18  ;;  %v13651_v19 = vld [vmem:[#allocation10 + $0xc4] ss:$8 sps:$4 sm:$0xff]   ;;  %v13649_v18 = vld [vmem:[#allocation10 + $0xc0] ss:$8 sps:$4 sm:$0xff]   ;;  %v13654_v44 = vld [vmem:[#allocation10 + $0xb4] ss:$8 sps:$4 sm:$0xff]  }
0x1e80   : > { %v10187_v1 = vpack.c.bf16 %v10166_v14, %v10165_v39  ;;  %10557 = vmatprep.subr.bf16.mxu1 %v13651_v19  ;;  %v13652_v12 = vld [vmem:[#allocation10 + $0xb0] ss:$8 sps:$4 sm:$0xff]   ;;  %v13657_v14 = vld [vmem:[#allocation10 + $0xa4] ss:$8 sps:$4 sm:$0xff]   ;;  %v13655_v39 = vld [vmem:[#allocation10 + $0xa0] ss:$8 sps:$4 sm:$0xff]  }
0x1e82   : > { %13231 = vmatmul.mubr.bf16.gmra.mxu0 %v10187_v1  ;;  %10558 = vmatpush1.bf16.msra.mxu1 %v13649_v18  ;;  %v13660_v1 = vld [vmem:[#allocation10 + $0x94] ss:$8 sps:$4 sm:$0xff]  }
0x1e83   : > { %10559 = vmatprep.subr.bf16.mxu1 %v13654_v44 }
0x1e86   : > { %10560 = vmatpush1.bf16.msra.mxu1 %v13652_v12 }
0x1e87   : > { %10561 = vmatprep.subr.bf16.mxu1 %v13657_v14 }
0x1e8a   : > { %10562 = vmatpush1.bf16.msra.mxu1 %v13655_v39 }
0x1e8b   : > { %10563 = vmatprep.subr.bf16.mxu1 %v13660_v1 }
0x1f05   : > { %v13228_v32 = vpop.f32.mrf.mxu0 }
0x1f06   : > { %v10287_v10 = vadd.f32 %v13228_v32, %v11873_v37  ;;  %v13658_v32 = vld [vmem:[#allocation10 + $0x90] ss:$8 sps:$4 sm:$0xff]  }
0x1f07   : > { %v10278_v0 = vpop.f32.mrf.mxu0  ;;  %10564 = vmatpush1.bf16.msra.mxu1 %v13658_v32 }
0x1f08   : > { %v10279_v8 = vadd.f32 %v11873_v37, %v10278_v0  ;;  %v10311_v48 = vadd.f32 %v10287_v10, %v17699_v40  ;;  %v13661_v0 = vld [vmem:[#allocation10 + $0x80] ss:$8 sps:$4 sm:$0xff]  }
0x1f09   : > { %v13229_v5 = vpop.f32.mrf.mxu0 }
0x1f0a   : > { %v10309_v36 = vadd.f32 %v10279_v8, %v17698_v26  ;;  %v10290_v41 = vadd.f32 %v13229_v5, %v11873_v37 }
0x1f0b   : > { %v10281_v23 = vpop.f32.mrf.mxu0 }
0x1f0c   : > { %v10282_v27 = vadd.f32 %v11873_v37, %v10281_v23  ;;  %10321 = vadd.xlane.f32.xlu0 %v10309_v36  ;;  %v10312_v53 = vadd.f32 %v10290_v41, %v17701_v24 }
0x1f0e   : > { %v10310_v42 = vadd.f32 %v10282_v27, %v17700_v15 }
0x1f10   : > { %10323 = vadd.xlane.f32.xlu1 %v10310_v42  ;;  %10325 = vadd.xlane.f32.xlu0 %v10311_v48 }
0x1f14   : > { %10327 = vadd.xlane.f32.xlu0 %v10312_v53 }
0x1f42   : > { %v13232_v3 = vpop.f32.mrf.mxu0 }
0x1f43   : > { %v10303_v21 = vadd.f32 %v13232_v3, %v11873_v37 }
0x1f44   : > { %v10294_v34 = vpop.f32.mrf.mxu0 }
0x1f45   : > { %v10295_v54 = vadd.f32 %v11873_v37, %v10294_v34  ;;  %v17276_v22 = vadd.f32 %v10303_v21, %v17703_v11 }
0x1f46   : > { %v13233_v20 = vpop.f32.mrf.mxu0 }
0x1f47   : > { %v17272_v30 = vadd.f32 %v10295_v54, %v17702_v35  ;;  %v10306_v2 = vadd.f32 %v13233_v20, %v11873_v37 }
0x1f48   : > { %v10297_v4 = vpop.f32.mrf.mxu0 }
0x1f49   : > { %v10298_v50 = vadd.f32 %v11873_v37, %v10297_v4  ;;  %10329 = vadd.xlane.f32.xlu1 %v17272_v30  ;;  %v17284_v61 = vadd.f32 %v10306_v2, %v17705_v58  ;;  %v13663_v37 = vld [vmem:[#allocation10 + $0x84] ss:$8 sps:$4 sm:$0xff]  }
0x1f4a   : > { %10565 = vmatprep.subr.bf16.mxu1 %v13663_v37 }
0x1f4b   : > { %v17279_v13 = vadd.f32 %v10298_v50, %v17704_v9  ;;  %10566 = vmatpush1.bf16.msra.mxu1 %v13661_v0 }
0x1f4c   : > { %13234 = vmatprep.subr.bf16.mxu1 %v17622_v62 }
0x1f4d   : > { %10333 = vadd.xlane.f32.xlu1 %v17276_v22  ;;  %10331 = vadd.xlane.f32.xlu0 %v17279_v13 }
0x1f51   : > { %10335 = vadd.xlane.f32.xlu0 %v17284_v61 }
0x1f95   : > { %v10322_v17 = vpop.xlane.xlu0 %10321 }
0x1f96   : > { %v10337_v28 = vmul.f32 0.0078125, %v10322_v17 }
0x1f98   : > { %v17287_v6 = vsub.f32 %v10309_v36, %v10337_v28 }
0x1f99   : > { %v10324_v33 = vpop.xlane.xlu1 %10323  ;;  %v10326_v47 = vpop.xlane.xlu0 %10325 }
0x1f9a   : > { %v10338_v51 = vmul.f32 0.0078125, %v10324_v33  ;;  %v10339_v7 = vmul.f32 0.0078125, %v10326_v47  ;;  %v10353_v38 = vmul.f32 %v17287_v6, %v17287_v6  ;;  %v11883_v47 = vld [vmem:[#allocation8 + $0x1] ss:$0 sm:$0xff] }
0x1f9c   : > { %v17291_v43 = vsub.f32 %v10310_v42, %v10338_v51  ;;  %v17293_v55 = vsub.f32 %v10311_v48, %v10339_v7  ;;  %10361 = vadd.xlane.f32.xlu1 %v10353_v38 }
0x1f9d   : > { %v10328_v49 = vpop.xlane.xlu0 %10327 }
0x1f9e   : > { %v10340_v59 = vmul.f32 0.0078125, %v10328_v49  ;;  %v10354_v56 = vmul.f32 %v17291_v43, %v17291_v43  ;;  %v10355_v29 = vmul.f32 %v17293_v55, %v17293_v55 }
0x1fa0   : > { %v17299_v31 = vsub.f32 %v10312_v53, %v10340_v59  ;;  %10363 = vadd.xlane.f32.xlu0 %v10354_v56  ;;  %10365 = vadd.xlane.f32.xlu1 %v10355_v29 }
0x1fa2   : > { %v10356_v57 = vmul.f32 %v17299_v31, %v17299_v31 }
0x1fa4   : > { %10367 = vadd.xlane.f32.xlu0 %v10356_v57 }
0x1fd2   : > { %v10330_v8 = vpop.xlane.xlu1 %10329 }
0x1fd3   : > { %v10341_v5 = vmul.f32 0.0078125, %v10330_v8 }
0x1fd5   : > { %v17305_v10 = vsub.f32 %v17272_v30, %v10341_v5 }
0x1fd6   : > { %v10334_v26 = vpop.xlane.xlu1 %10333  ;;  %v10332_v36 = vpop.xlane.xlu0 %10331 }
0x1fd7   : > { %v10343_v23 = vmul.f32 0.0078125, %v10334_v26  ;;  %v10342_v27 = vmul.f32 0.0078125, %v10332_v36  ;;  %v10357_v40 = vmul.f32 %v17305_v10, %v17305_v10 }
0x1fd9   : > { %v17310_v48 = vsub.f32 %v17276_v22, %v10343_v23  ;;  %v17313_v41 = vsub.f32 %v17279_v13, %v10342_v27  ;;  %10369 = vadd.xlane.f32.xlu1 %v10357_v40 }
0x1fda   : > { %v10336_v15 = vpop.xlane.xlu0 %10335 }
0x1fdb   : > { %v10344_v42 = vmul.f32 0.0078125, %v10336_v15  ;;  %v10359_v24 = vmul.f32 %v17310_v48, %v17310_v48  ;;  %v10358_v53 = vmul.f32 %v17313_v41, %v17313_v41 }
0x1fdd   : > { %v17320_v3 = vsub.f32 %v17284_v61, %v10344_v42  ;;  %10373 = vadd.xlane.f32.xlu1 %v10359_v24  ;;  %10371 = vadd.xlane.f32.xlu0 %v10358_v53 }
0x1fdf   : > { %v10360_v34 = vmul.f32 %v17320_v3, %v17320_v3 }
0x1fe1   : > { %10375 = vadd.xlane.f32.xlu0 %v10360_v34 }
0x2025   : > { %v10362_v54 = vpop.xlane.xlu1 %10361 }
0x2026   : > { %v10377_v20 = vmul.f32 0.0078125, %v10362_v54 }
0x2028   : > { %v10385_v21 = vadd.f32 1e-12, %v10377_v20  ;;  %v13665_v20 = vld [vmem:[#allocation11 + $0xb8] sm:$0xff]  }
0x2029   : > { %v10366_v35 = vpop.xlane.xlu1 %10365  ;;  %v10364_v30 = vpop.xlane.xlu0 %10363 }
0x202a   : > { %14024 = vrsqrt.f32 %v10385_v21  ;;  %v10379_v4 = vmul.f32 0.0078125, %v10366_v35  ;;  %v10378_v50 = vmul.f32 0.0078125, %v10364_v30  ;;  %v13666_v21 = vld [vmem:[#allocation11 + $0xf0] sm:$0xff]   ;;  %v13669_v30 = vld [vmem:[#allocation11 + $0xa8] sm:$0xff]  }
0x202b   : > { %v13667_v35 = vld [vmem:[#allocation11 + $0xb0] sm:$0xff]  }
0x202c   : > { %v10386_v11 = vadd.f32 1e-12, %v10378_v50  ;;  %v10387_v22 = vadd.f32 1e-12, %v10379_v4  ;;  %v13670_v4 = vld [vmem:[#allocation11 + $0xe0] sm:$0xff]  }
0x202d   : > { %v10368_v2 = vpop.xlane.xlu0 %10367  ;;  %v13671_v50 = vld [vmem:[#allocation11 + $0xa0] sm:$0xff]  }
0x202e   : > { %v10380_v9 = vmul.f32 0.0078125, %v10368_v2  ;;  %14026 = vrsqrt.f32 %v10386_v11  ;;  %v13672_v11 = vld [vmem:[#allocation11 + $0xd8] sm:$0xff]   ;;  %v13674_v2 = vld [vmem:[#allocation11 + $0xd0] sm:$0xff]  }
0x202f   : > { %14028 = vrsqrt.f32 %v10387_v22  ;;  %v13673_v22 = vld [vmem:[#allocation11 + $0x98] sm:$0xff]  }
0x2030   : > { %v10388_v13 = vadd.f32 1e-12, %v10380_v9  ;;  %v13675_v9 = vld [vmem:[#allocation11 + $0x90] sm:$0xff]  }
0x2032   : > { %14030 = vrsqrt.f32 %v10388_v13  ;;  %v13676_v13 = vld [vmem:[#allocation11 + $0xc8] sm:$0xff]  }
0x2037   : > { %v14025_v58 = vpop.eup %14024 }
0x2038   : > { %v10401_v61 = vmul.f32 %v14025_v58, %v17287_v6  ;;  %v13677_v58 = vld [vmem:[#allocation11 + $0x88] sm:$0xff]  }
0x203a   : > { %v10415_v28 = vmul.f32 %v11882_v52, %v10401_v61  ;;  %v13678_v61 = vld [vmem:[#allocation11 + $0xc0] sm:$0xff]  }
0x203b   : > { %v14027_v16 = vpop.eup %14026 }
0x203c   : > { %v10402_v17 = vmul.f32 %v14027_v16, %v17291_v43  ;;  %v14029_v33 = vpop.eup %14028  ;;  %v17327_v49 = vadd.f32 %v11883_v47, %v10415_v28  ;;  %v11884_v16 = vld [vmem:[%s17527_s14 + $0x2] sm:$0x3] }
0x203d   : > { %v10403_v56 = vmul.f32 %v14029_v33, %v17293_v55  ;;  %v17707_v33 = vld [vmem:[#allocation38_spill] sm:$0xff] }
0x203e   : > { %v10416_v7 = vmul.f32 %v11882_v52, %v10402_v17  ;;  %v17706_v17 = vld [vmem:[#allocation39_spill] sm:$0xff] }
0x203f   : > { %v14031_v51 = vpop.eup %14030  ;;  %v10417_v57 = vmul.f32 %v11882_v52, %v10403_v56  ;;  %v17365_v28 = vrot.slane %v11884_v16, %v17706_v17 }
0x2040   : > { %v10404_v38 = vmul.f32 %v14031_v51, %v17299_v31  ;;  %v17329_v59 = vadd.f32 %v11883_v47, %v10416_v7 }
0x2041   : > { %v17337_v60 = vadd.f32 %v11883_v47, %v10417_v57 }
0x2042   : > { %v10454_v6 = vpack.c.bf16 %v17329_v59, %v17327_v49  ;;  %v10418_v29 = vmul.f32 %v11882_v52, %v10404_v38 }
0x2044   : > { %10584 = vmatmul.mubr.bf16.vlgmr.msra.gmra.mxu1 %v10454_v6  ;;  %v17335_v43 = vadd.f32 %v11883_v47, %v10418_v29 }
0x2045   : > { %10593 = vmatprep.mubr.bf16.mxu1 %v17636_v46 }
0x2046   : > { %v10455_v31 = vpack.c.bf16 %v17335_v43, %v17337_v60 }
0x204c   : > { %10594 = vmatmul.mubr.bf16.gmra.mxu1 %v10455_v31 }
0x204d   : > { %10603 = vmatprep.mubr.bf16.mxu1 %v17636_v46 }
0x2062   : > { %v10370_v45 = vpop.xlane.xlu1 %10369 }
0x2063   : > { %v10381_v55 = vmul.f32 0.0078125, %v10370_v45 }
0x2065   : > { %v10389_v63 = vadd.f32 1e-12, %v10381_v55 }
0x2066   : > { %v10374_v25 = vpop.xlane.xlu1 %10373  ;;  %v10372_v19 = vpop.xlane.xlu0 %10371 }
0x2067   : > { %14032 = vrsqrt.f32 %v10389_v63  ;;  %v10383_v18 = vmul.f32 0.0078125, %v10374_v25  ;;  %v10382_v44 = vmul.f32 0.0078125, %v10372_v19 }
0x2069   : > { %v10390_v12 = vadd.f32 1e-12, %v10382_v44  ;;  %v10391_v14 = vadd.f32 1e-12, %v10383_v18 }
0x206a   : > { %v10376_v39 = vpop.xlane.xlu0 %10375 }
0x206b   : > { %v10384_v1 = vmul.f32 0.0078125, %v10376_v39  ;;  %14034 = vrsqrt.f32 %v10390_v12 }
0x206c   : > { %14036 = vrsqrt.f32 %v10391_v14 }
0x206d   : > { %v10392_v32 = vadd.f32 1e-12, %v10384_v1 }
0x206f   : > { %14038 = vrsqrt.f32 %v10392_v32 }
0x2074   : > { %v14033_v37 = vpop.eup %14032 }
0x2075   : > { %v10405_v0 = vmul.f32 %v14033_v37, %v17305_v10 }
0x2077   : > { %v10419_v26 = vmul.f32 %v11882_v52, %v10405_v0 }
0x2078   : > { %v14035_v8 = vpop.eup %14034 }
0x2079   : > { %v10406_v5 = vmul.f32 %v14035_v8, %v17313_v41  ;;  %v14037_v36 = vpop.eup %14036  ;;  %v17345_v15 = vadd.f32 %v11883_v47, %v10419_v26 }
0x207a   : > { %v10407_v24 = vmul.f32 %v14037_v36, %v17310_v48  ;;  %v13664_v48 = vld [vmem:[#allocation11 + $0xf8] sm:$0xff]  }
0x207b   : > { %v10420_v27 = vmul.f32 %v11882_v52, %v10406_v5  ;;  %12293 = vmatprep.subr.bf16.mxu0 %v13664_v48 }
0x207c   : > { %v14039_v23 = vpop.eup %14038  ;;  %v10421_v10 = vmul.f32 %v11882_v52, %v10407_v24  ;;  %12294 = vmatpush3.bf16.msra.mxu0 %v13665_v20 }
0x207d   : > { %v10408_v40 = vmul.f32 %v14039_v23, %v17320_v3  ;;  %v17347_v42 = vadd.f32 %v11883_v47, %v10420_v27  ;;  %12295 = vmatprep.subr.bf16.mxu0 %v13666_v21 }
0x207e   : > { %v17355_v54 = vadd.f32 %v11883_v47, %v10421_v10 }
0x207f   : > { %v10456_v53 = vpack.c.bf16 %v17347_v42, %v17345_v15  ;;  %v10422_v34 = vmul.f32 %v11882_v52, %v10408_v40  ;;  %v13679_v52 = vld [vmem:[#allocation11 + $0x80] sm:$0xff]  }
0x2080   : > { %12296 = vmatpush3.bf16.msra.mxu0 %v13667_v35 }
0x2081   : > { %10604 = vmatmul.mubr.bf16.gmra.mxu1 %v10456_v53  ;;  %v17353_v41 = vadd.f32 %v11883_v47, %v10422_v34  ;;  %v17368_v47 = vrot.slane %v11884_v16, %v17707_v33 }
0x2082   : > { %10613 = vmatprep.mubr.bf16.mxu1 %v17636_v46  ;;  %v13668_v46 = vld [vmem:[#allocation11 + $0xe8] sm:$0xff]  }
0x2083   : > { %v10457_v3 = vpack.c.bf16 %v17353_v41, %v17355_v54  ;;  %12297 = vmatprep.subr.bf16.mxu0 %v13668_v46 }
0x2084   : > { %12298 = vmatpush3.bf16.msra.mxu0 %v13669_v30 }
0x2085   : > { %12299 = vmatprep.subr.bf16.mxu0 %v13670_v4 }
0x2088   : > { %12300 = vmatpush3.bf16.msra.mxu0 %v13671_v50 }
0x2089   : > { %10614 = vmatmul.mubr.bf16.gmra.mxu1 %v10457_v3  ;;  %12301 = vmatprep.subr.bf16.mxu0 %v13672_v11 }
0x208a   : > { %13250 = vmatprep.mubr.msk.bf16.mxu1 %vm14460_vm9, %v17622_v62 }
0x208c   : > { %12302 = vmatpush3.bf16.msra.mxu0 %v13673_v22 }
0x208d   : > { %12303 = vmatprep.subr.bf16.mxu0 %v13674_v2 }
0x2090   : > { %12304 = vmatpush3.bf16.msra.mxu0 %v13675_v9 }
0x2091   : > { %12305 = vmatprep.subr.bf16.mxu0 %v13676_v13 }
0x2094   : > { %12306 = vmatpush3.bf16.msra.mxu0 %v13677_v58 }
0x2095   : > { %12307 = vmatprep.subr.bf16.mxu0 %v13678_v61 }
0x2098   : > { %12308 = vmatpush3.bf16.msra.mxu0 %v13679_v52 }
0x2104   : > { %v10585_v51 = vpop.f32.mrf.mxu1 }
0x2105   : > { %v17371_v7 = vadd.f32 %v10585_v51, %v17365_v28 }
0x2106   : > { %v10587_v38 = vpop.f32.mrf.mxu1 }
0x2107   : > { %v10640_v56 = vmul.f32 0.044715, %v17371_v7  ;;  %v17375_v6 = vadd.f32 %v10587_v38, %v17368_v47 }
0x2108   : > { %v10589_v29 = vpop.f32.mrf.mxu1 }
0x2109   : > { %v10656_v57 = vmul.f32 %v10640_v56, %v17371_v7  ;;  %v10641_v31 = vmul.f32 0.044715, %v17375_v6  ;;  %v10590_v45 = vadd.f32 %v10589_v29, %v17365_v28 }
0x210a   : > { %v10591_v55 = vpop.f32.mrf.mxu1 }
0x210b   : > { %v10672_v63 = vmul.f32 %v10656_v57, %v17371_v7  ;;  %v10657_v25 = vmul.f32 %v10641_v31, %v17375_v6  ;;  %v10642_v19 = vmul.f32 0.044715, %v10590_v45  ;;  %v10592_v18 = vadd.f32 %v10591_v55, %v17368_v47 }
0x210c   : > { %v10595_v44 = vpop.f32.mrf.mxu1 }
0x210d   : > { %v10688_v12 = vadd.f32 %v10672_v63, %v17371_v7  ;;  %v10673_v14 = vmul.f32 %v10657_v25, %v17375_v6  ;;  %v10658_v39 = vmul.f32 %v10642_v19, %v10590_v45  ;;  %v17386_v1 = vadd.f32 %v10595_v44, %v17365_v28 }
0x210e   : > { %v10643_v32 = vmul.f32 0.044715, %v10592_v18  ;;  %v10597_v37 = vpop.f32.mrf.mxu1 }
0x210f   : > { %v10704_v0 = vmul.f32 0.7978846, %v10688_v12  ;;  %v10674_v8 = vmul.f32 %v10658_v39, %v10590_v45  ;;  %v10644_v5 = vmul.f32 0.044715, %v17386_v1  ;;  %v17390_v26 = vadd.f32 %v10597_v37, %v17368_v47 }
0x2110   : > { %v10659_v36 = vmul.f32 %v10643_v32, %v10592_v18  ;;  %v10599_v23 = vpop.f32.mrf.mxu1  ;;  %v10689_v27 = vadd.f32 %v10673_v14, %v17375_v6  ;;  %v10626_v12 = vmul.f32 0.5, %v10590_v45  ;;  %v10625_v14 = vmul.f32 0.5, %v17375_v6 }
0x2111   : > { %v10690_v40 = vadd.f32 %v10674_v8, %v10590_v45  ;;  %v10660_v24 = vmul.f32 %v10644_v5, %v17386_v1  ;;  %v10645_v53 = vmul.f32 0.044715, %v17390_v26  ;;  %14040 = vtanh.f32 %v10704_v0 }
0x2112   : > { %v10675_v34 = vmul.f32 %v10659_v36, %v10592_v18  ;;  %v10600_v10 = vadd.f32 %v10599_v23, %v17365_v28  ;;  %v10601_v3 = vpop.f32.mrf.mxu1  ;;  %v10705_v48 = vmul.f32 0.7978846, %v10689_v27  ;;  %v10627_v39 = vmul.f32 0.5, %v10592_v18 }
0x2113   : > { %v10706_v20 = vmul.f32 0.7978846, %v10690_v40  ;;  %v10676_v21 = vmul.f32 %v10660_v24, %v17386_v1  ;;  %v10661_v35 = vmul.f32 %v10645_v53, %v17390_v26  ;;  %v10602_v46 = vadd.f32 %v10601_v3, %v17368_v47 }
0x2114   : > { %v10646_v30 = vmul.f32 0.044715, %v10600_v10  ;;  %v10691_v4 = vadd.f32 %v10675_v34, %v10592_v18  ;;  %14042 = vtanh.f32 %v10705_v48  ;;  %v10624_v37 = vmul.f32 0.5, %v17371_v7 }
0x2115   : > { %14044 = vtanh.f32 %v10706_v20  ;;  %v10692_v50 = vadd.f32 %v10676_v21, %v17386_v1  ;;  %v10677_v11 = vmul.f32 %v10661_v35, %v17390_v26  ;;  %v10647_v22 = vmul.f32 0.044715, %v10602_v46 }
0x2116   : > { %v10662_v2 = vmul.f32 %v10646_v30, %v10600_v10  ;;  %v10707_v9 = vmul.f32 0.7978846, %v10691_v4  ;;  %v10629_v45 = vmul.f32 0.5, %v17390_v26  ;;  %v10631_v6 = vmul.f32 0.5, %v10602_v46 }
0x2117   : > { %v10663_v13 = vmul.f32 %v10647_v22, %v10602_v46  ;;  %v10693_v58 = vadd.f32 %v10677_v11, %v17390_v26  ;;  %v10708_v52 = vmul.f32 0.7978846, %v10692_v50  ;;  %v10630_v20 = vmul.f32 0.5, %v10600_v10 }
0x2118   : > { %v10678_v61 = vmul.f32 %v10662_v2, %v10600_v10  ;;  %14046 = vtanh.f32 %v10707_v9  ;;  %v10628_v30 = vmul.f32 0.5, %v17386_v1 }
0x2119   : > { %v10679_v16 = vmul.f32 %v10663_v13, %v10602_v46  ;;  %v10709_v33 = vmul.f32 0.7978846, %v10693_v58 }
0x211a   : > { %v10694_v51 = vadd.f32 %v10678_v61, %v10600_v10 }
0x211b   : > { %v10695_v38 = vadd.f32 %v10679_v16, %v10602_v46  ;;  %14048 = vtanh.f32 %v10709_v33 }
0x211c   : > { %v10710_v56 = vmul.f32 0.7978846, %v10694_v51  ;;  %14050 = vtanh.f32 %v10708_v52 }
0x211d   : > { %v10711_v29 = vmul.f32 0.7978846, %v10695_v38 }
0x211e   : > { %14052 = vtanh.f32 %v10710_v56  ;;  %v14041_v57 = vpop.eup %14040 }
0x211f   : > { %14054 = vtanh.f32 %v10711_v29  ;;  %v10736_v44 = vadd.f32 1.0, %v14041_v57 }
0x2121   : > { %v14043_v31 = vpop.eup %14042  ;;  %v10752_v23 = vmul.f32 %v10736_v44, %v10624_v37 }
0x2122   : > { %v14045_v55 = vpop.eup %14044  ;;  %v10737_v25 = vadd.f32 1.0, %v14043_v31 }
0x2123   : > { %v10738_v63 = vadd.f32 1.0, %v14045_v55 }
0x2124   : > { %v10753_v5 = vmul.f32 %v10737_v25, %v10625_v14 }
0x2125   : > { %v14047_v19 = vpop.eup %14046  ;;  %v10754_v0 = vmul.f32 %v10738_v63, %v10626_v12 }
0x2126   : > { %v10739_v32 = vadd.f32 1.0, %v14047_v19 }
0x2127   : > { %v10801_v53 = vpack.c.bf16 %v10754_v0, %v10752_v23 }
0x2128   : > { %v14049_v8 = vpop.eup %14048  ;;  %v10755_v36 = vmul.f32 %v10739_v32, %v10627_v39 }
0x2129   : > { %v14051_v27 = vpop.eup %14050  ;;  %v10741_v34 = vadd.f32 1.0, %v14049_v8 }
0x212a   : > { %v10802_v40 = vpack.c.bf16 %v10755_v36, %v10753_v5  ;;  %v10740_v7 = vadd.f32 1.0, %v14051_v27 }
0x212b   : > { %v14053_v24 = vpop.eup %14052  ;;  %v10757_v21 = vmul.f32 %v10741_v34, %v10629_v45 }
0x212c   : > { %v14055_v3 = vpop.eup %14054  ;;  %10945 = vmatprep.mubr.bf16.mxu0 %v10802_v40  ;;  %v10742_v48 = vadd.f32 1.0, %v14053_v24  ;;  %v10756_v11 = vmul.f32 %v10740_v7, %v10628_v30 }
0x212d   : > { %10946 = vmatmul.mubr.bf16.vlgmr.msra.gmra.mxu0 %v10801_v53  ;;  %v10743_v18 = vadd.f32 1.0, %v14055_v3 }
0x212e   : > { %v10758_v4 = vmul.f32 %v10742_v48, %v10630_v20 }
0x212f   : > { %v10759_v35 = vmul.f32 %v10743_v18, %v10631_v6 }
0x2130   : > { %v10803_v22 = vpack.c.bf16 %v10758_v4, %v10756_v11 }
0x2131   : > { %v10804_v50 = vpack.c.bf16 %v10759_v35, %v10757_v21 }
0x2133   : > { %10953 = vmatprep.mubr.bf16.mxu0 %v10804_v50 }
0x2135   : > { %10954 = vmatmul.mubr.bf16.gmra.mxu0 %v10803_v22 }
0x2141   : > { %v10605_v2 = vpop.f32.mrf.mxu1 }
0x2142   : > { %v17407_v9 = vadd.f32 %v10605_v2, %v17365_v28 }
0x2143   : > { %v10607_v26 = vpop.f32.mrf.mxu1 }
0x2144   : > { %v10648_v46 = vmul.f32 0.044715, %v17407_v9  ;;  %v17411_v10 = vadd.f32 %v10607_v26, %v17368_v47 }
0x2145   : > { %v10609_v13 = vpop.f32.mrf.mxu1 }
0x2146   : > { %v10664_v58 = vmul.f32 %v10648_v46, %v17407_v9  ;;  %v10649_v1 = vmul.f32 0.044715, %v17411_v10  ;;  %v10610_v61 = vadd.f32 %v10609_v13, %v17365_v28 }
0x2147   : > { %v10611_v52 = vpop.f32.mrf.mxu1 }
0x2148   : > { %v10680_v16 = vmul.f32 %v10664_v58, %v17407_v9  ;;  %v10665_v33 = vmul.f32 %v10649_v1, %v17411_v10  ;;  %v10650_v51 = vmul.f32 0.044715, %v10610_v61  ;;  %v10612_v38 = vadd.f32 %v10611_v52, %v17368_v47 }
0x2149   : > { %v10615_v56 = vpop.f32.mrf.mxu1 }
0x214a   : > { %v10696_v29 = vadd.f32 %v10680_v16, %v17407_v9  ;;  %v10681_v57 = vmul.f32 %v10665_v33, %v17411_v10  ;;  %v10666_v31 = vmul.f32 %v10650_v51, %v10610_v61  ;;  %v10651_v55 = vmul.f32 0.044715, %v10612_v38 }
0x214b   : > { %v17422_v63 = vadd.f32 %v10615_v56, %v17365_v28  ;;  %v10617_v25 = vpop.f32.mrf.mxu1  ;;  %v10634_v33 = vmul.f32 0.5, %v10610_v61  ;;  %v10633_v56 = vmul.f32 0.5, %v17411_v10 }
0x214c   : > { %v10712_v19 = vmul.f32 0.7978846, %v10696_v29  ;;  %v10682_v44 = vmul.f32 %v10666_v31, %v10610_v61  ;;  %v10667_v12 = vmul.f32 %v10651_v55, %v10612_v38  ;;  %v17425_v14 = vadd.f32 %v10617_v25, %v17368_v47 }
0x214d   : > { %v10652_v39 = vmul.f32 0.044715, %v17422_v63  ;;  %v10619_v32 = vpop.f32.mrf.mxu1  ;;  %v10697_v37 = vadd.f32 %v10681_v57, %v17411_v10  ;;  %v10635_v29 = vmul.f32 0.5, %v10612_v38  ;;  %v10632_v31 = vmul.f32 0.5, %v17407_v9 }
0x214e   : > { %v10698_v0 = vadd.f32 %v10682_v44, %v10610_v61  ;;  %v10683_v8 = vmul.f32 %v10667_v12, %v10612_v38  ;;  %v10653_v5 = vmul.f32 0.044715, %v17425_v14  ;;  %14056 = vtanh.f32 %v10712_v19 }
0x214f   : > { %v10668_v36 = vmul.f32 %v10652_v39, %v17422_v63  ;;  %v10620_v23 = vadd.f32 %v10619_v32, %v17365_v28  ;;  %v10621_v27 = vpop.f32.mrf.mxu1  ;;  %v10713_v40 = vmul.f32 0.7978846, %v10697_v37 }
0x2150   : > { %v10714_v24 = vmul.f32 0.7978846, %v10698_v0  ;;  %v10669_v53 = vmul.f32 %v10653_v5, %v17425_v14  ;;  %v10622_v34 = vadd.f32 %v10621_v27, %v17368_v47  ;;  %v10699_v3 = vadd.f32 %v10683_v8, %v10612_v38 }
0x2151   : > { %v10684_v45 = vmul.f32 %v10668_v36, %v17422_v63  ;;  %v10654_v48 = vmul.f32 0.044715, %v10620_v23  ;;  %14058 = vtanh.f32 %v10713_v40  ;;  %v10638_v61 = vmul.f32 0.5, %v10620_v23 }
0x2152   : > { %14060 = vtanh.f32 %v10714_v24  ;;  %v10685_v6 = vmul.f32 %v10669_v53, %v17425_v14  ;;  %v10655_v18 = vmul.f32 0.044715, %v10622_v34  ;;  %v10715_v20 = vmul.f32 0.7978846, %v10699_v3 }
0x2153   : > { %v10700_v7 = vadd.f32 %v10684_v45, %v17422_v63  ;;  %v10670_v28 = vmul.f32 %v10654_v48, %v10620_v23  ;;  %v10637_v38 = vmul.f32 0.5, %v17425_v14  ;;  %v10639_v27 = vmul.f32 0.5, %v10622_v34 }
0x2154   : > { %v10671_v21 = vmul.f32 %v10655_v18, %v10622_v34  ;;  %14062 = vtanh.f32 %v10715_v20  ;;  %v10701_v35 = vadd.f32 %v10685_v6, %v17425_v14  ;;  %v10636_v40 = vmul.f32 0.5, %v17422_v63  ;;  %v11901_v20 = vld [vmem:[#allocation13 + $0x1] ss:$0 sm:$0xff] }
0x2155   : > { %v10716_v30 = vmul.f32 0.7978846, %v10700_v7  ;;  %v10686_v4 = vmul.f32 %v10670_v28, %v10620_v23 }
0x2156   : > { %v10687_v47 = vmul.f32 %v10671_v21, %v10622_v34  ;;  %v10717_v50 = vmul.f32 0.7978846, %v10701_v35 }
0x2157   : > { %v10702_v11 = vadd.f32 %v10686_v4, %v10620_v23 }
0x2158   : > { %v10703_v22 = vadd.f32 %v10687_v47, %v10622_v34  ;;  %14064 = vtanh.f32 %v10717_v50 }
0x2159   : > { %14066 = vtanh.f32 %v10716_v30  ;;  %v10718_v2 = vmul.f32 0.7978846, %v10702_v11 }
0x215a   : > { %v10719_v26 = vmul.f32 0.7978846, %v10703_v22 }
0x215b   : > { %14068 = vtanh.f32 %v10718_v2  ;;  %v14057_v46 = vpop.eup %14056 }
0x215c   : > { %14070 = vtanh.f32 %v10719_v26  ;;  %v10744_v51 = vadd.f32 1.0, %v14057_v46 }
0x215e   : > { %v14059_v13 = vpop.eup %14058  ;;  %v10760_v12 = vmul.f32 %v10744_v51, %v10632_v31 }
0x215f   : > { %v14061_v58 = vpop.eup %14060  ;;  %v10745_v1 = vadd.f32 1.0, %v14059_v13 }
0x2160   : > { %v10746_v52 = vadd.f32 1.0, %v14061_v58 }
0x2161   : > { %v14063_v16 = vpop.eup %14062  ;;  %v10761_v25 = vmul.f32 %v10745_v1, %v10633_v56 }
0x2162   : > { %v10747_v57 = vadd.f32 1.0, %v14063_v16  ;;  %v10762_v55 = vmul.f32 %v10746_v52, %v10634_v33 }
0x2164   : > { %v10763_v19 = vmul.f32 %v10747_v57, %v10635_v29  ;;  %v10805_v37 = vpack.c.bf16 %v10762_v55, %v10760_v12 }
0x2165   : > { %v14065_v44 = vpop.eup %14064 }
0x2166   : > { %v14067_v39 = vpop.eup %14066  ;;  %v10806_v32 = vpack.c.bf16 %v10763_v19, %v10761_v25  ;;  %v10749_v8 = vadd.f32 1.0, %v14065_v44 }
0x2167   : > { %v10748_v36 = vadd.f32 1.0, %v14067_v39 }
0x2168   : > { %v14069_v0 = vpop.eup %14068  ;;  %10961 = vmatprep.mubr.bf16.mxu0 %v10806_v32  ;;  %v10765_v53 = vmul.f32 %v10749_v8, %v10637_v38 }
0x2169   : > { %v14071_v5 = vpop.eup %14070  ;;  %10962 = vmatmul.mubr.bf16.gmra.mxu0 %v10805_v37  ;;  %v10750_v10 = vadd.f32 1.0, %v14069_v0  ;;  %v10764_v45 = vmul.f32 %v10748_v36, %v10636_v40 }
0x216a   : > { %v10751_v9 = vadd.f32 1.0, %v14071_v5 }
0x216b   : > { %v10766_v24 = vmul.f32 %v10750_v10, %v10638_v61 }
0x216c   : > { %v10767_v3 = vmul.f32 %v10751_v9, %v10639_v27 }
0x216d   : > { %v10807_v6 = vpack.c.bf16 %v10766_v24, %v10764_v45 }
0x216e   : > { %v10808_v48 = vpack.c.bf16 %v10767_v3, %v10765_v53 }
0x2170   : > { %10969 = vmatprep.mubr.bf16.mxu0 %v10808_v48 }
0x2171   : > { %10970 = vmatmul.mubr.bf16.gmra.mxu0 %v10807_v6 }
0x21ed   : > { %v12309_v18 = vpop.f32.mrf.mxu0 }
0x21ef   : > { %v12310_v7 = vpop.f32.mrf.mxu0 }
0x21f0   : > { %v12311_v23 = vadd.f32 %v12310_v7, %v12309_v18 }
0x21f1   : > { %v12312_v28 = vpop.f32.mrf.mxu0 }
0x21f2   : > { %v10948_v21 = vadd.f32 %v12311_v23, %v11901_v20 }
0x21f3   : > { %v12313_v35 = vpop.f32.mrf.mxu0 }
0x21f4   : > { %v12314_v14 = vadd.f32 %v12313_v35, %v12312_v28  ;;  %v10978_v34 = vadd.f32 %v10948_v21, %v17327_v49 }
0x21f5   : > { %v12315_v30 = vpop.f32.mrf.mxu0 }
0x21f6   : > { %v10951_v63 = vadd.f32 %v12314_v14, %v11901_v20  ;;  %10990 = vadd.xlane.f32.xlu1 %v10978_v34 }
0x21f7   : > { %v12316_v4 = vpop.f32.mrf.mxu0 }
0x21f8   : > { %v12317_v47 = vadd.f32 %v12316_v4, %v12315_v30  ;;  %v10979_v50 = vadd.f32 %v10951_v63, %v17329_v59  ;;  %v13680_v4 = vld [vmem:[#allocation17 + $0x38] sm:$0xff]  }
0x21f9   : > { %v12318_v11 = vpop.f32.mrf.mxu0  ;;  %13235 = vmatpush3.bf16.msra.mxu1 %v13680_v4 }
0x21fa   : > { %v10956_v22 = vadd.f32 %v12317_v47, %v11901_v20  ;;  %10992 = vadd.xlane.f32.xlu1 %v10979_v50  ;;  %13236 = vmatprep.subr.bf16.mxu1 %v17622_v62  ;;  %v13681_v47 = vld [vmem:[#allocation17 + $0x30] sm:$0xff]  }
0x21fb   : > { %v12319_v2 = vpop.f32.mrf.mxu0 }
0x21fc   : > { %v12320_v26 = vadd.f32 %v12319_v2, %v12318_v11  ;;  %v10980_v46 = vadd.f32 %v10956_v22, %v17337_v60  ;;  %v13683_v11 = vld [vmem:[#allocation17 + $0x20] sm:$0xff]   ;;  %v13684_v22 = vld [vmem:[#allocation17 + $0x18] sm:$0xff]   ;;  %v13685_v2 = vld [vmem:[#allocation17 + $0x10] sm:$0xff]  }
0x21fd   : > { %13237 = vmatpush3.bf16.msra.mxu1 %v13681_v47 }
0x21fe   : > { %v10959_v13 = vadd.f32 %v12320_v26, %v11901_v20  ;;  %10994 = vadd.xlane.f32.xlu0 %v10980_v46  ;;  %13238 = vmatprep.subr.bf16.mxu1 %v17622_v62  ;;  %v13686_v26 = vld [vmem:[#allocation17 + $0x8] sm:$0xff]  }
0x2200   : > { %v10981_v58 = vadd.f32 %v10959_v13, %v17335_v43 }
0x2202   : > { %10996 = vadd.xlane.f32.xlu0 %v10981_v58 }
0x2229   : > { %v12321_v49 = vpop.f32.mrf.mxu0 }
0x222b   : > { %v12322_v1 = vpop.f32.mrf.mxu0 }
0x222c   : > { %v12323_v52 = vadd.f32 %v12322_v1, %v12321_v49 }
0x222d   : > { %v12324_v16 = vpop.f32.mrf.mxu0 }
0x222e   : > { %v10964_v33 = vadd.f32 %v12323_v52, %v11901_v20 }
0x222f   : > { %v12325_v51 = vpop.f32.mrf.mxu0 }
0x2230   : > { %v12326_v56 = vadd.f32 %v12325_v51, %v12324_v16  ;;  %v10982_v59 = vadd.f32 %v10964_v33, %v17345_v15 }
0x2231   : > { %v12327_v29 = vpop.f32.mrf.mxu0 }
0x2232   : > { %v10967_v57 = vadd.f32 %v12326_v56, %v11901_v20  ;;  %10998 = vadd.xlane.f32.xlu1 %v10982_v59 }
0x2233   : > { %v12328_v31 = vpop.f32.mrf.mxu0 }
0x2234   : > { %v12329_v55 = vadd.f32 %v12328_v31, %v12327_v29  ;;  %v10983_v60 = vadd.f32 %v10967_v57, %v17347_v42 }
0x2235   : > { %v12330_v25 = vpop.f32.mrf.mxu0 }
0x2236   : > { %v10972_v19 = vadd.f32 %v12329_v55, %v11901_v20  ;;  %11000 = vadd.xlane.f32.xlu0 %v10983_v60 }
0x2237   : > { %v12331_v43 = vpop.f32.mrf.mxu0 }
0x2238   : > { %v12332_v44 = vadd.f32 %v12331_v43, %v12330_v25  ;;  %v10984_v12 = vadd.f32 %v10972_v19, %v17355_v54 }
0x223a   : > { %v10975_v39 = vadd.f32 %v12332_v44, %v11901_v20  ;;  %11002 = vadd.xlane.f32.xlu1 %v10984_v12 }
0x223c   : > { %v10985_v32 = vadd.f32 %v10975_v39, %v17353_v41 }
0x223e   : > { %11004 = vadd.xlane.f32.xlu0 %v10985_v32 }
0x227f   : > { %v10991_v15 = vpop.xlane.xlu1 %10990 }
0x2280   : > { %v11006_v37 = vmul.f32 0.0078125, %v10991_v15 }
0x2282   : > { %v17450_v0 = vsub.f32 %v10978_v34, %v11006_v37 }
0x2283   : > { %v10993_v8 = vpop.xlane.xlu1 %10992 }
0x2284   : > { %v11007_v5 = vmul.f32 0.0078125, %v10993_v8  ;;  %v11022_v42 = vmul.f32 %v17450_v0, %v17450_v0 }
0x2286   : > { %v17454_v61 = vsub.f32 %v10979_v50, %v11007_v5  ;;  %11030 = vadd.xlane.f32.xlu1 %v11022_v42  ;;  %v13682_v50 = vld [vmem:[#allocation17 + $0x28] sm:$0xff]  }
0x2287   : > { %v10995_v36 = vpop.xlane.xlu0 %10994  ;;  %13239 = vmatpush3.bf16.msra.mxu1 %v13682_v50 }
0x2288   : > { %v11008_v10 = vmul.f32 0.0078125, %v10995_v36  ;;  %v11023_v54 = vmul.f32 %v17454_v61, %v17454_v61  ;;  %13240 = vmatprep.subr.bf16.mxu1 %v17622_v62 }
0x228a   : > { %v17458_v38 = vsub.f32 %v10980_v46, %v11008_v10  ;;  %11032 = vadd.xlane.f32.xlu1 %v11023_v54  ;;  %v13687_v46 = vld [vmem:[#allocation17] sm:$0xff]  }
0x228b   : > { %v10997_v41 = vpop.xlane.xlu0 %10996  ;;  %13241 = vmatpush3.bf16.msra.mxu1 %v13683_v11 }
0x228c   : > { %v11009_v27 = vmul.f32 0.0078125, %v10997_v41  ;;  %v11024_v9 = vmul.f32 %v17458_v38, %v17458_v38  ;;  %13242 = vmatprep.subr.bf16.mxu1 %v17622_v62  ;;  %v11918_v41 = vld [vmem:[#allocation14 + $0x1] ss:$0 sm:$0xff] }
0x228e   : > { %v17462_v40 = vsub.f32 %v10981_v58, %v11009_v27  ;;  %11034 = vadd.xlane.f32.xlu0 %v11024_v9 }
0x228f   : > { %13243 = vmatpush3.bf16.msra.mxu1 %v13684_v22 }
0x2290   : > { %v11025_v24 = vmul.f32 %v17462_v40, %v17462_v40  ;;  %13244 = vmatprep.subr.bf16.mxu1 %v17622_v62 }
0x2292   : > { %11036 = vadd.xlane.f32.xlu0 %v11025_v24 }
0x2293   : > { %13245 = vmatpush3.bf16.msra.mxu1 %v13685_v2 }
0x2294   : > { %13246 = vmatprep.subr.bf16.mxu1 %v17622_v62 }
0x2297   : > { %13247 = vmatpush3.bf16.msra.mxu1 %v13686_v26 }
0x2298   : > { %13248 = vmatprep.subr.bf16.mxu1 %v17622_v62 }
0x229b   : > { %13249 = vmatpush3.bf16.msra.mxu1 %v13687_v46 }
0x22bb   : > { %v10999_v53 = vpop.xlane.xlu1 %10998 }
0x22bc   : > { %v11010_v3 = vmul.f32 0.0078125, %v10999_v53 }
0x22be   : > { %v17466_v45 = vsub.f32 %v10982_v59, %v11010_v3 }
0x22bf   : > { %v11001_v48 = vpop.xlane.xlu0 %11000 }
0x22c0   : > { %v11011_v6 = vmul.f32 0.0078125, %v11001_v48  ;;  %v11026_v18 = vmul.f32 %v17466_v45, %v17466_v45 }
0x22c2   : > { %v17470_v20 = vsub.f32 %v10983_v60, %v11011_v6  ;;  %11038 = vadd.xlane.f32.xlu1 %v11026_v18  ;;  %v11919_v6 = vld [vmem:[#allocation16 + $0x1] ss:$0 sm:$0xff] }
0x22c3   : > { %v11003_v7 = vpop.xlane.xlu1 %11002 }
0x22c4   : > { %v11012_v23 = vmul.f32 0.0078125, %v11003_v7  ;;  %v11027_v28 = vmul.f32 %v17470_v20, %v17470_v20 }
0x22c6   : > { %v17474_v21 = vsub.f32 %v10984_v12, %v11012_v23  ;;  %11040 = vadd.xlane.f32.xlu0 %v11027_v28 }
0x22c7   : > { %v11005_v35 = vpop.xlane.xlu0 %11004 }
0x22c8   : > { %v11013_v14 = vmul.f32 0.0078125, %v11005_v35  ;;  %v11028_v34 = vmul.f32 %v17474_v21, %v17474_v21 }
0x22ca   : > { %v17478_v30 = vsub.f32 %v10985_v32, %v11013_v14  ;;  %11042 = vadd.xlane.f32.xlu1 %v11028_v34 }
0x22cc   : > { %v11029_v63 = vmul.f32 %v17478_v30, %v17478_v30 }
0x22ce   : > { %11044 = vadd.xlane.f32.xlu0 %v11029_v63 }
0x230f   : > { %v11031_v13 = vpop.xlane.xlu1 %11030 }
0x2310   : > { %v11046_v59 = vmul.f32 0.0078125, %v11031_v13 }
0x2312   : > { %v11054_v57 = vadd.f32 1e-12, %v11046_v59 }
0x2313   : > { %v11033_v49 = vpop.xlane.xlu1 %11032 }
0x2314   : > { %v11047_v52 = vmul.f32 0.0078125, %v11033_v49 }
0x2316   : > { %v11055_v51 = vadd.f32 1e-12, %v11047_v52 }
0x2317   : > { %v11035_v58 = vpop.xlane.xlu0 %11034 }
0x2318   : > { %v11048_v16 = vmul.f32 0.0078125, %v11035_v58  ;;  %14072 = vrsqrt.f32 %v11055_v51 }
0x231a   : > { %v11056_v56 = vadd.f32 1e-12, %v11048_v16 }
0x231b   : > { %v11037_v1 = vpop.xlane.xlu0 %11036 }
0x231c   : > { %v11049_v33 = vmul.f32 0.0078125, %v11037_v1  ;;  %14074 = vrsqrt.f32 %v11056_v56 }
0x231e   : > { %v11057_v29 = vadd.f32 1e-12, %v11049_v33 }
0x2320   : > { %14076 = vrsqrt.f32 %v11057_v29 }
0x2321   : > { %14078 = vrsqrt.f32 %v11054_v57 }
0x2325   : > { %v14073_v12 = vpop.eup %14072 }
0x2326   : > { %v11071_v8 = vmul.f32 %v14073_v12, %v17454_v61 }
0x2328   : > { %v11085_v27 = vmul.f32 %v11918_v41, %v11071_v8 }
0x2329   : > { %v14075_v39 = vpop.eup %14074 }
0x232a   : > { %v11072_v42 = vmul.f32 %v14075_v39, %v17458_v38  ;;  %v11099_v61 = vadd.f32 %v11919_v6, %v11085_v27  ;;  %v11929_v27 = vld [vmem:[#allocation20] ss:$0 sm:$0xff] }
0x232c   : > { %v11086_v24 = vmul.f32 %v11918_v41, %v11072_v42  ;;  %v11123_v14 = vpack.c.bf16 %v11099_v61, %v11099_v61  ;;  %v17708_v61 = vld [vmem:[#allocation37_spill] sm:$0xff] }
0x232d   : > { %v14077_v15 = vpop.eup %14076 }
0x232e   : > { %v11073_v36 = vmul.f32 %v14077_v15, %v17462_v40  ;;  %v14079_v54 = vpop.eup %14078  ;;  %v11100_v23 = vadd.f32 %v11919_v6, %v11086_v24  ;;  %v11146_v22 = vunpack.c.l.b16 %v11123_v14 }
0x232f   : > { %v11070_v53 = vmul.f32 %v14079_v54, %v17450_v0 }
0x2330   : > { %v11087_v3 = vmul.f32 %v11918_v41, %v11073_v36  ;;  %v11124_v4 = vpack.c.bf16 %v11100_v23, %v11100_v23  ;;  %v11153_v16 = vrot.slane %v11146_v22, 7 }
0x2331   : > { %v11084_v38 = vmul.f32 %v11918_v41, %v11070_v53  ;;  %v14464_v53 = vmov 1966171168  }
0x2332   : > { %v11101_v28 = vadd.f32 %v11919_v6, %v11087_v3  ;;  %v11147_v13 = vunpack.c.l.b16 %v11124_v4  ;;  %v11286_v3 = vunpack.c.l.s4 %v14464_v53 }
0x2333   : > { %v11098_v47 = vadd.f32 %v11919_v6, %v11084_v38 }
0x2334   : > { %v11125_v50 = vpack.c.bf16 %v11101_v28, %v11101_v28  ;;  %v11156_v59 = vrot.slane %v11147_v13, 6 }
0x2335   : > { %v11122_v58 = vpack.c.bf16 %v11098_v47, %v11098_v47 }
0x2336   : > { %v11148_v49 = vunpack.c.l.b16 %v11125_v50 }
0x2338   : > { %v11159_v29 = vrot.slane %v11148_v49, 5 }
0x234b   : > { %v11039_v31 = vpop.xlane.xlu1 %11038 }
0x234c   : > { %v11050_v55 = vmul.f32 0.0078125, %v11039_v31 }
0x234e   : > { %v11058_v62 = vadd.f32 1e-12, %v11050_v55 }
0x234f   : > { %v11041_v60 = vpop.xlane.xlu0 %11040 }
0x2350   : > { %14080 = vrsqrt.f32 %v11058_v62  ;;  %v11051_v25 = vmul.f32 0.0078125, %v11041_v60 }
0x2352   : > { %v11059_v19 = vadd.f32 1e-12, %v11051_v25 }
0x2353   : > { %v11043_v43 = vpop.xlane.xlu1 %11042 }
0x2354   : > { %14082 = vrsqrt.f32 %v11059_v19  ;;  %v11052_v44 = vmul.f32 0.0078125, %v11043_v43 }
0x2356   : > { %v11060_v32 = vadd.f32 1e-12, %v11052_v44 }
0x2357   : > { %v11045_v37 = vpop.xlane.xlu0 %11044 }
0x2358   : > { %14084 = vrsqrt.f32 %v11060_v32  ;;  %v11053_v5 = vmul.f32 0.0078125, %v11045_v37 }
0x235a   : > { %v11061_v10 = vadd.f32 1e-12, %v11053_v5  ;;  %v11920_v5 = vld [vmem:[#allocation19] ss:$0 sm:$0xff] }
0x235c   : > { %14086 = vrsqrt.f32 %v11061_v10 }
0x235d   : > { %v14081_v9 = vpop.eup %14080 }
0x235e   : > { %v11074_v48 = vmul.f32 %v14081_v9, %v17466_v45 }
0x2360   : > { %v11088_v18 = vmul.f32 %v11918_v41, %v11074_v48  ;;  %v11287_v48 = vunpack.c.0.s8 %v11286_v3 }
0x2361   : > { %v14083_v7 = vpop.eup %14082 }
0x2362   : > { %v11075_v40 = vmul.f32 %v14083_v7, %v17470_v20  ;;  %v11102_v35 = vadd.f32 %v11919_v6, %v11088_v18  ;;  %v11290_v18 = vsub.s32 %v11287_v48, %v17708_v61 }
0x2364   : > { %v11089_v34 = vmul.f32 %v11918_v41, %v11075_v40  ;;  %v11126_v45 = vpack.c.bf16 %v11102_v35, %v11102_v35 }
0x2365   : > { %v14085_v63 = vpop.eup %14084 }
0x2366   : > { %v11103_v0 = vadd.f32 %v11919_v6, %v11089_v34  ;;  %v11076_v11 = vmul.f32 %v14085_v63, %v17474_v21  ;;  %v11149_v52 = vunpack.c.l.b16 %v11126_v45  ;;  %v11145_v21 = vunpack.c.l.b16 %v11122_v58 }
0x2368   : > { %v11127_v2 = vpack.c.bf16 %v11103_v0, %v11103_v0  ;;  %v11090_v26 = vmul.f32 %v11918_v41, %v11076_v11  ;;  %v11162_v55 = vrot.slane %v11149_v52, 4  ;;  %v11155_v62 = vsel %vm11154_vm14, %v11153_v16, %v11145_v21 }
0x2369   : > { %v14087_v46 = vpop.eup %14086  ;;  %v11158_v19 = vsel %vm11157_vm15, %v11156_v59, %v11155_v62 }
0x236a   : > { %v11104_v1 = vadd.f32 %v11919_v6, %v11090_v26  ;;  %v11077_v20 = vmul.f32 %v14087_v46, %v17478_v30  ;;  %v11150_v33 = vunpack.c.l.b16 %v11127_v2  ;;  %v11161_v43 = vsel %vm11160_vm0, %v11159_v29, %v11158_v19 }
0x236b   : > { %v11164_v12 = vsel %vm11163_vm1, %v11162_v55, %v11161_v43 }
0x236c   : > { %v11128_v51 = vpack.c.bf16 %v11104_v1, %v11104_v1  ;;  %v11091_v56 = vmul.f32 %v11918_v41, %v11077_v20  ;;  %v11165_v60 = vrot.slane %v11150_v33, 3 }
0x236e   : > { %v11151_v57 = vunpack.c.l.b16 %v11128_v51  ;;  %v11105_v31 = vadd.f32 %v11919_v6, %v11091_v56  ;;  %v11167_v32 = vsel %vm11166_vm2, %v11165_v60, %v11164_v12  ;;  %v11930_v6 = vld [vmem:[#allocation2] ss:$0 sm:$0xff] }
0x2370   : > { %v11129_v25 = vpack.c.bf16 %v11105_v31, %v11105_v31  ;;  %v11168_v30 = vrot.slane %v11151_v57, 2 }
0x2372   : > { %v11152_v44 = vunpack.c.l.b16 %v11129_v25  ;;  %v11170_v15 = vsel %vm11169_vm3, %v11168_v30, %v11167_v32 }
0x2374   : > { %v11171_v39 = vrot.slane %v11152_v44, 1 }
0x2376   : > { %v11173_v37 = vsel %vm11172_vm4, %v11171_v39, %v11170_v15 }
0x2377   : > { %v11174_v8 = vpack.c.b16 %v11173_v37, %v11173_v37 }
0x2379   : > { %13251 = vmatmul.mubr.bf16.vlgmr.msra.gmra.mxu1 %v11174_v8 }
0x2439   : > { %v11258_v42 = vpop.f32.mrf.mxu1 }
0x243a   : > { %v11259_v36 = vadd.f32 %v11920_v5, %v11258_v42 }
0x243b   : > { %v13252_v10 = vpop.f32.mrf.mxu1 }
0x243c   : > { %14088 = vtanh.f32 %v11259_v36 }
0x243d   : > { %v11261_v54 = vpop.f32.mrf.mxu1 }
0x243f   : > { %v13253_v41 = vpop.f32.mrf.mxu1 }
0x2449   : > { %v14089_v9 = vpop.eup %14088 }
0x244a   : > { %v11272_v24 = vmul.f32 %v14089_v9, %v11929_v27 }
0x244c   : > { %11273 = vadd.xlane.f32.xlu1 %v11272_v24 }
0x24d5   : > { %v11274_v7 = vpop.xlane.xlu1 %11273 }
0x24d6   : > { %v11282_v23 = vadd.f32 %v11930_v6, %v11274_v7 }
0x24d8   : > { %v11284_v38 = vcombine.high %v11282_v23, %v11282_v23  ;;  %v11291_v28 = vrot.slane %v11282_v23, %v11290_v18 }
0x24da   : > { %v11298_v40 = vrot.slane %v11284_v38, %v11290_v18  ;;  %v11299_v35 = vcombine.high %v11291_v28, %v11291_v28  ;;  %v11307_v14 = vrot.slane %v11291_v28, %v11290_v18 }
0x24dc   : > { %v11321_v34 = vrot.slane %v11299_v35, %v11290_v18  ;;  %11334 = vperm.xlu0 %13398, %v11307_v14   ;;  %v11300_v63 = vcombine.high %v11298_v40, %v11298_v40  ;;  %v11329_v47 = vcombine.high %v11307_v14, %v11307_v14  ;;  %v11314_v0 = vrot.slane %v11298_v40, %v11290_v18 }
0x24de   : > { %11342 = vperm.xlu1 %13399, %v11321_v34   ;;  %v11331_v4 = vcombine.high %v11321_v34, %v11321_v34  ;;  %v11328_v50 = vrot.slane %v11300_v63, %v11290_v18  ;;  %v11330_v45 = vcombine.high %v11314_v0, %v11314_v0 }
0x24e0   : > { %11358 = vperm.xlu0 %13398, %v11331_v4   ;;  %v11332_v11 = vcombine.high %v11328_v50, %v11328_v50 }
0x24e2   : > { %11350 = vperm.xlu1 %13399, %v11329_v47  }
0x24e4   : > { %11374 = vperm.xlu0 %13398, %v11328_v50  }
0x24e6   : > { %11366 = vperm.xlu1 %13399, %v11314_v0  }
0x24e8   : > { %11390 = vperm.xlu0 %13398, %v11332_v11  }
0x24ea   : > { %11382 = vperm.xlu1 %13399, %v11330_v45  }
0x2557   : > { %v11335_v22 = vpop.permute.xlu0 %11334 }
0x2558   : > { %v11340_v2 = vrot.slane %v11335_v22, %v17706_v17 }
0x2559   : > { %v11343_v26 = vpop.permute.xlu1 %11342 }
0x255a   : > { %11397 = vst [vmem:[%s900_s26] sm:$0x1] %v11340_v2  ;;  %v11348_v46 = vrot.slane %v11343_v26, %v17706_v17 }
0x255b   : > { %v11359_v13 = vpop.permute.xlu0 %11358 }
0x255c   : > { %11398 = vst [vmem:[%s900_s26 + $0x1] sm:$0x1] %v11348_v46  ;;  %v11364_v58 = vrot.slane %v11359_v13, %v17706_v17 }
0x255d   : > { %v11351_v49 = vpop.permute.xlu1 %11350 }
0x255e   : > { %11400 = vst [vmem:[%s900_s26 + $0x3] sm:$0x1] %v11364_v58  ;;  %v11356_v1 = vrot.slane %v11351_v49, %v17706_v17 }
0x255f   : > { %v11375_v20 = vpop.permute.xlu0 %11374 }
0x2560   : > { %11399 = vst [vmem:[%s900_s26 + $0x2] sm:$0x1] %v11356_v1  ;;  %v11380_v52 = vrot.slane %v11375_v20, %v17706_v17 }
0x2561   : > { %v11367_v16 = vpop.permute.xlu1 %11366 }
0x2562   : > { %11402 = vst [vmem:[%s900_s26 + $0x5] sm:$0x1] %v11380_v52  ;;  %v11372_v33 = vrot.slane %v11367_v16, %v17706_v17 }
0x2563   : > { %v11391_v51 = vpop.permute.xlu0 %11390 }
0x2564   : > { %11401 = vst [vmem:[%s900_s26 + $0x4] sm:$0x1] %v11372_v33  ;;  %v11396_v56 = vrot.slane %v11391_v51, %v17706_v17 }
0x2565   : > { %v11383_v59 = vpop.permute.xlu1 %11382 }
0x2566   : > { %11404 = vst [vmem:[%s900_s26 + $0x7] sm:$0x1] %v11396_v56  ;;  %v11388_v21 = vrot.slane %v11383_v59, %v17706_v17 }
0x2568   : > { %11403 = vst [vmem:[%s900_s26 + $0x6] sm:$0x1] %v11388_v21 }
0x2569 PF: > { %s42_s24 = sadd.s32 1, %s14436_s24  }
0x256a   : > { %p39_p6 = scmp.ge.s32.totalorder %s42_s24, 4  }
0x256c   :  { %41 = sbr.rel (!%p39_p6) target bundleno = 18 (0x12), region = 206 }
0x2571   :  { %11425 = vsyncpa [#allocation4], 1 }
0x2572   :  { %11427 = vsyncpa [#allocation4 + $0x1], 1 }
0x2573   :  { %11428 = vsyncpa [#allocation6], 1 }
0x2574   :  { %11429 = vsyncpa [#allocation9], 1 }
0x2575   :  { %11430 = vsyncpa [#allocation12], 1 }
0x2576   :  { %11431 = vsyncpa [#allocation15], 1 }
0x2577   :  { %11432 = vsyncpa [#allocation18], 1 }
0x2578   :  { %11433 = vsyncpa [#allocation21], 1 }

</bundles_post_ra>
